<compile_context>
chip_gen: v7x
topology: tpu7x:2x2x1
jax: 0.10.0
libtpu: 0.0.40
codegen_flags: <defaults>
</compile_context>

<pallas_src>
import functools

import jax
import jax.numpy as jnp
from jax.experimental import pallas as pl
from jax.experimental.pallas import tpu as pltpu

# ---------------- ModelArgs analog (deterministic, in-script) ----------------
DIM = 128                 # args.dim
MOE_INTER_DIM = 128       # args.moe_inter_dim (must equal DIM, see note above)
N_ROUTED_EXPERTS = 8      # args.n_routed_experts
N_ACTIVATED_EXPERTS = 2   # args.n_activated_experts
WORLD_SIZE = 1
NUM_LOCAL_EXPERTS = N_ROUTED_EXPERTS // WORLD_SIZE
TOP_K = min(N_ACTIVATED_EXPERTS, NUM_LOCAL_EXPERTS)

E_PAD = 128               # router-logit lane block (keeps the fused matmul lane-dense)
OUT_ROWS = 8              # only expert rows 0..7 can be nonzero -> compact (8, D) slab
TOKEN_TILE = 512          # token tile (raised per perf review; sweepable)
NUM_SLABS = 2             # leading "parallel" axis so v7x's 2 TensorCores both accumulate
NEG_INF = -1e30

assert MOE_INTER_DIM == DIM, "reference module requires dim == moe_inter_dim"
assert N_ROUTED_EXPERTS <= OUT_ROWS <= E_PAD and TOP_K <= N_ROUTED_EXPERTS


# ------------------------------ Pallas kernel --------------------------------
def _moe_fused_kernel(x_ref, wrw1_ref, w3_ref, w2_ref, acc_ref):
    # Zero this slab's (1, 8, D) VMEM-resident accumulator on its first tile.
    @pl.when(pl.program_id(1) == 0)
    def _():
        acc_ref[...] = jnp.zeros_like(acc_ref)

    x = x_ref[...]                                               # (tm, D) bf16

    # Router + w1 fused into one lane-dense 256-wide MXU matmul (f32 acc).
    fused = jnp.dot(x, wrw1_ref[...], preferred_element_type=jnp.float32)
    logits = fused[:, :E_PAD]           # real experts in lanes 0..E-1, rest 0
    h1 = fused[:, E_PAD:]                                        # (tm, inter)

    # ---- top-k routing on LOGITS (softmax denominator cancels) --------------
    # Only a (tm, 1) column exp is needed; selection uses the same
    # first-match min-index tie-break as lax.top_k.
    lane = jax.lax.broadcasted_iota(jnp.int32, logits.shape, 1)
    valid = lane < N_ROUTED_EXPERTS
    work = jnp.where(valid, logits, NEG_INF)                     # (tm, E_PAD)

    sels, rel_gates = [], []
    m1 = None
    for k in range(TOP_K):
        mk = jnp.max(work, axis=-1, keepdims=True)               # (tm, 1)
        idxk = jnp.min(jnp.where(work == mk, lane, E_PAD), axis=-1,
                       keepdims=True)                            # first-match tie-break
        selk = lane == idxk
        sels.append(selk)
        if k == 0:
            m1 = mk
            rel_gates.append(jnp.ones_like(mk))                  # exp(m1 - m1) = 1
        else:
            rel_gates.append(jnp.exp(mk - m1))                   # 1-column exp only
        if k + 1 < TOP_K:
            work = jnp.where(selk, NEG_INF, work)

    gsum = rel_gates[0]
    for g in rel_gates[1:]:
        gsum = gsum + g
    inv = 1.0 / gsum
    # w_comb[i, r] = sum_k [route_k(i) == r] * gate_norm_k(i)  (lanes >= E stay 0)
    w_comb = jnp.zeros_like(logits)
    for selk, g in zip(sels, rel_gates):
        w_comb = w_comb + jnp.where(selk, g * inv, 0.0)

    # ---- shared-expert FFN: w2(silu(w3(silu(w1 x)))) ------------------------
    # Elementwise math stays f32 (v5e has no bf16 VPU/EUP); MXU inputs bf16.
    h1 = h1 * jax.nn.sigmoid(h1)
    h2 = jnp.dot(h1.astype(jnp.bfloat16), w3_ref[...],
                 preferred_element_type=jnp.float32)
    h2 = h2 * jax.nn.sigmoid(h2)
    h = jnp.dot(h2.astype(jnp.bfloat16), w2_ref[...],
                preferred_element_type=jnp.float32)              # (tm, D)

    # ---- scatter_add_(dim=0, index=expert_id) as a transpose-free matmul ----
    # partial[r, :] = sum_i w_comb[i, r] * h[i, :]; contract dim 0 directly so
    # no (tm,128)->(128,tm) XLU transpose is materialized before the MXU.
    partial = jax.lax.dot_general(
        w_comb.astype(jnp.bfloat16), h.astype(jnp.bfloat16),
        dimension_numbers=(((0,), (0,)), ((), ())),
        preferred_element_type=jnp.float32)                      # (E_PAD, D)
    # Rows >= N_ROUTED_EXPERTS are exactly 0; keep only the aligned (8, D) slab.
    acc_ref[0, :, :] += partial[:OUT_ROWS, :]


# ------------------------ Weight packing (done once) -------------------------
def pack_weights(router_w, w1, w2, w3):
    """Pre-pack parameters ONCE (hoisted out of the per-call path).

    Inputs are PyTorch nn.Linear weights of shape (out_features, in_features);
    returns ([router|w1] packed, w3^T, w2^T), all bf16 and lane-dense.
    """
    wr_pad = (jnp.zeros((DIM, E_PAD), jnp.float32)
              .at[:, :N_ROUTED_EXPERTS].set(router_w.T.astype(jnp.float32)))
    wrw1_bf = jnp.concatenate([wr_pad, w1.T.astype(jnp.float32)],
                              axis=1).astype(jnp.bfloat16)       # (D, E_PAD+inter)
    w3_bf = w3.T.astype(jnp.bfloat16)                            # (inter, inter)
    w2_bf = w2.T.astype(jnp.bfloat16)                            # (inter, D)
    return wrw1_bf, w3_bf, w2_bf


# ---------------------------------- Wrapper ----------------------------------
@functools.partial(jax.jit, static_argnames=("tm",))
def moe_forward(x, wrw1_bf, w3_bf, w2_bf, *, tm=TOKEN_TILE):
    b, s, d = x.shape
    assert d == DIM
    n = b * s
    xf = x.reshape(n, d)

    # Pad the token axis to a multiple of NUM_SLABS * tm.  Zero tokens produce
    # h == 0, so they contribute nothing to the expert combine.
    chunk = NUM_SLABS * tm
    n_pad = pl.cdiv(n, chunk) * chunk
    if n_pad != n:
        xf = jnp.pad(xf, ((0, n_pad - n), (0, 0)))
    tiles_per_slab = n_pad // chunk
    xf_bf = xf.astype(jnp.bfloat16)

    # Grid: (slab, token-tile).  The slab axis is "parallel" (v7x: one slab per
    # TensorCore); the token axis is "arbitrary" and accumulates into a
    # VMEM-resident (1, 8, D) output block (constant block index per slab), so
    # there is no per-tile HBM partial writeback.  Weight blocks use constant
    # index_maps and stay resident in VMEM across grid steps.
    slabs = pl.pallas_call(
        _moe_fused_kernel,
        out_shape=jax.ShapeDtypeStruct((NUM_SLABS, OUT_ROWS, d), jnp.float32),
        grid=(NUM_SLABS, tiles_per_slab),
        in_specs=[
            pl.BlockSpec((tm, d), lambda c, i: (c * tiles_per_slab + i, 0)),
            pl.BlockSpec((d, E_PAD + MOE_INTER_DIM), lambda c, i: (0, 0)),
            pl.BlockSpec((MOE_INTER_DIM, MOE_INTER_DIM), lambda c, i: (0, 0)),
            pl.BlockSpec((MOE_INTER_DIM, d), lambda c, i: (0, 0)),
        ],
        out_specs=pl.BlockSpec((1, OUT_ROWS, d), lambda c, i: (c, 0, 0)),
        compiler_params=pltpu.CompilerParams(
            dimension_semantics=("parallel", "arbitrary")),
    )(xf_bf, wrw1_bf, w3_bf, w2_bf)

    combined = jnp.sum(slabs, axis=0)                            # (OUT_ROWS, D)

    # Reference semantics: the expert id is the ROW index of the (N, D) output,
    # so only rows 0..E-1 are non-zero; everything else is zeros.
    # TODO(synk): if downstream can consume the compact (E, D) `combined`
    # tensor directly, return it instead of materializing the mostly-zero
    # (N, D) slab (which becomes the HBM-bound step at large N).
    rows = min(n, N_ROUTED_EXPERTS)
    out = jnp.zeros((n, d), x.dtype).at[:rows].set(combined[:rows].astype(x.dtype))
    return out.reshape(b, s, d)


# --------------------------- Pure-JAX reference ------------------------------
def reference_forward(x, wr_t, w1_t, w3_t, w2_t):
    """Reference of the module semantics.  Matmul inputs are cast to bf16 with
    f32 accumulation to match the kernel's MXU precision (so the top-k routing
    decisions agree deterministically); everything else is f32."""
    b, s, d = x.shape
    xf = x.reshape(-1, d)

    def dot(a, w):
        return jnp.dot(a.astype(jnp.bfloat16), w.astype(jnp.bfloat16),
                       preferred_element_type=jnp.float32)

    probs = jax.nn.softmax(dot(xf, wr_t), axis=-1)
    routes_k, indices_k = jax.lax.top_k(probs, TOP_K)
    routes_k_norm = routes_k / jnp.sum(routes_k, axis=-1, keepdims=True)

    h = jax.nn.silu(dot(xf, w1_t))
    h = jax.nn.silu(dot(h, w3_t))
    h = dot(h, w2_t)

    out = jnp.zeros_like(xf)
    for k in range(TOP_K):
        out = out.at[indices_k[:, k]].add(routes_k_norm[:, k:k + 1] * h)
    return out.reshape(b, s, d)


# ------------------------------------ Main ------------------------------------
if __name__ == "__main__":
    key = jax.random.PRNGKey(0)
    kx, kr, k1, k2, k3 = jax.random.split(key, 5)

    batch, seq = 2, 1100     # N = 2200 tokens -> padded to 3072 (3 tiles per slab)
    x = jax.random.normal(kx, (batch, seq, DIM), dtype=jnp.float32)

    # Deterministic synthetic parameters (PyTorch Linear weight shapes).
    router_w = 0.05 * jax.random.normal(kr, (N_ROUTED_EXPERTS, DIM), jnp.float32)
    w1 = 0.05 * jax.random.normal(k1, (MOE_INTER_DIM, DIM), jnp.float32)
    w2 = 0.05 * jax.random.normal(k2, (DIM, MOE_INTER_DIM), jnp.float32)
    w3 = 0.05 * jax.random.normal(k3, (MOE_INTER_DIM, DIM), jnp.float32)

    # Pack once at "load time" (not per forward call).
    wrw1_bf, w3_bf, w2_bf = pack_weights(router_w, w1, w2, w3)

    out = moe_forward(x, wrw1_bf, w3_bf, w2_bf)
    out = jax.block_until_ready(out)

    ref = reference_forward(x, router_w.T, w1.T, w3.T, w2.T)
    assert out.shape == (batch, seq, DIM)
    # bf16-in / f32-accumulate kernel vs precision-matched reference.
    assert jnp.allclose(out, ref, rtol=3e-2, atol=3e-2), "mismatch vs reference"

    print("KERNEL_OK")
</pallas_src>

<mosaic_0001>
module attributes {stable_mosaic.version = 11 : i64} {
  func.func @_moe_fused_kernel(%arg0: i32, %arg1: i32, %arg2: memref<512x128xbf16, #tpu.memory_space<vmem>>, %arg3: memref<128x256xbf16, #tpu.memory_space<vmem>>, %arg4: memref<128x128xbf16, #tpu.memory_space<vmem>>, %arg5: memref<128x128xbf16, #tpu.memory_space<vmem>>, %arg6: memref<1x8x128xf32, #tpu.memory_space<vmem>>) attributes {dimension_semantics = [#tpu.dimension_semantics<parallel>, #tpu.dimension_semantics<arbitrary>], iteration_bounds = array<i64: 2, 3>, scalar_prefetch = 0 : i64, scratch_operands = 0 : i64, tpu.core_type = #tpu.core_type<tc>, window_params = [{transform_indices = @transform_0, window_bounds = array<i64: 512, 128>}, {pipeline_mode = #tpu.pipeline_mode<synchronous>, transform_indices = @transform_1, window_bounds = array<i64: 128, 256>}, {pipeline_mode = #tpu.pipeline_mode<synchronous>, transform_indices = @transform_2, window_bounds = array<i64: 128, 128>}, {pipeline_mode = #tpu.pipeline_mode<synchronous>, transform_indices = @transform_3, window_bounds = array<i64: 128, 128>}, {transform_indices = @transform_4, window_bounds = array<i64: 1, 8, 128>}]} {
    %c0_i32 = arith.constant 0 : i32
    %0 = arith.cmpi eq, %arg1, %c0_i32 : i32
    %1 = arith.extui %0 : i1 to i32
    %c0_i32_0 = arith.constant 0 : i32
    %2 = arith.cmpi ne, %1, %c0_i32_0 : i32
    scf.if %2 {
      %cst_31 = arith.constant 0.000000e+00 : f32
      %82 = vector.broadcast %cst_31 : f32 to vector<1x8x128xf32>
      %c0_32 = arith.constant 0 : index
      %c0_33 = arith.constant 0 : index
      %c0_34 = arith.constant 0 : index
      %83 = vector.load %arg6[%c0_32, %c0_33, %c0_34] : memref<1x8x128xf32, #tpu.memory_space<vmem>>, vector<1x8x128xf32>
      tpu.vector_store %arg6[%c0_32, %c0_33, %c0_34], %82 {strides = array<i32>} : memref<1x8x128xf32, #tpu.memory_space<vmem>>, vector<1x8x128xf32>,
    } else {
    }
    %c0 = arith.constant 0 : index
    %c0_1 = arith.constant 0 : index
    %3 = vector.load %arg2[%c0, %c0_1] : memref<512x128xbf16, #tpu.memory_space<vmem>>, vector<512x128xbf16>
    %c0_2 = arith.constant 0 : index
    %c0_3 = arith.constant 0 : index
    %4 = vector.load %arg3[%c0_2, %c0_3] : memref<128x256xbf16, #tpu.memory_space<vmem>>, vector<128x256xbf16>
    %cst = arith.constant dense<0.000000e+00> : vector<512x256xf32>
    %5 = tpu.matmul %3, %4, %cst {dimension_numbers = #tpu.dot_dimension_numbers<[1], [0], [0], [1], [0, 0, 1, 1], [], []>} : vector<512x128xbf16>, vector<128x256xbf16>, vector<512x256xf32> -> vector<512x256xf32>
    %6 = vector.extract_strided_slice %5 {offsets = [0, 0], sizes = [512, 128], strides = [1, 1]} : vector<512x256xf32> to vector<512x128xf32>
    %7 = vector.extract_strided_slice %5 {offsets = [0, 128], sizes = [512, 128], strides = [1, 1]} : vector<512x256xf32> to vector<512x128xf32>
    %8 = tpu.iota {dimensions = array<i32: 1>} : vector<512x128xi32>
    %c8_i32 = arith.constant 8 : i32
    %9 = vector.broadcast %c8_i32 : i32 to vector<512x128xi32>
    %10 = arith.cmpi slt, %8, %9 : vector<512x128xi32>
    %cst_4 = arith.constant -1.000000e+30 : f32
    %11 = vector.broadcast %cst_4 : f32 to vector<512x128xf32>
    %12 = arith.select %10, %6, %11 : vector<512x128xi1>, vector<512x128xf32>
    %cst_5 = arith.constant dense<0xFF800000> : vector<512xf32>
    %13 = vector.multi_reduction <maximumf>, %12, %cst_5 [1] : vector<512x128xf32> to vector<512xf32>
    %14 = vector.shape_cast %13 : vector<512xf32> to vector<512x1xf32>
    %15 = vector.broadcast %14 : vector<512x1xf32> to vector<512x128xf32>
    %16 = arith.cmpf oeq, %12, %15 : vector<512x128xf32>
    %c128_i32 = arith.constant 128 : i32
    %17 = vector.broadcast %c128_i32 : i32 to vector<512x128xi32>
    %18 = arith.select %16, %8, %17 : vector<512x128xi1>, vector<512x128xi32>
    %cst_6 = arith.constant dense<2147483647> : vector<512xi32>
    %19 = vector.multi_reduction <minsi>, %18, %cst_6 [1] : vector<512x128xi32> to vector<512xi32>
    %20 = vector.shape_cast %19 : vector<512xi32> to vector<512x1xi32>
    %21 = vector.broadcast %20 : vector<512x1xi32> to vector<512x128xi32>
    %22 = arith.cmpi eq, %8, %21 : vector<512x128xi32>
    %cst_7 = arith.constant 1.000000e+00 : f32
    %23 = vector.broadcast %cst_7 : f32 to vector<512x1xf32>
    %cst_8 = arith.constant -1.000000e+30 : f32
    %24 = vector.broadcast %cst_8 : f32 to vector<512x128xf32>
    %25 = arith.select %22, %24, %12 : vector<512x128xi1>, vector<512x128xf32>
    %cst_9 = arith.constant dense<0xFF800000> : vector<512xf32>
    %26 = vector.multi_reduction <maximumf>, %25, %cst_9 [1] : vector<512x128xf32> to vector<512xf32>
    %27 = vector.shape_cast %26 : vector<512xf32> to vector<512x1xf32>
    %28 = vector.broadcast %27 : vector<512x1xf32> to vector<512x128xf32>
    %29 = arith.cmpf oeq, %25, %28 : vector<512x128xf32>
    %c128_i32_10 = arith.constant 128 : i32
    %30 = vector.broadcast %c128_i32_10 : i32 to vector<512x128xi32>
    %31 = arith.select %29, %8, %30 : vector<512x128xi1>, vector<512x128xi32>
    %cst_11 = arith.constant dense<2147483647> : vector<512xi32>
    %32 = vector.multi_reduction <minsi>, %31, %cst_11 [1] : vector<512x128xi32> to vector<512xi32>
    %33 = vector.shape_cast %32 : vector<512xi32> to vector<512x1xi32>
    %34 = vector.broadcast %33 : vector<512x1xi32> to vector<512x128xi32>
    %35 = arith.cmpi eq, %8, %34 : vector<512x128xi32>
    %36 = arith.subf %27, %14 : vector<512x1xf32>
    %37 = math.exp %36 : vector<512x1xf32>
    %38 = arith.addf %23, %37 : vector<512x1xf32>
    %cst_12 = arith.constant 1.000000e+00 : f32
    %39 = vector.broadcast %cst_12 : f32 to vector<512x1xf32>
    %40 = arith.divf %39, %38 : vector<512x1xf32>
    %cst_13 = arith.constant 0.000000e+00 : f32
    %41 = vector.broadcast %cst_13 : f32 to vector<512x128xf32>
    %42 = arith.mulf %23, %40 : vector<512x1xf32>
    %cst_14 = arith.constant 0.000000e+00 : f32
    %43 = vector.shape_cast %42 : vector<512x1xf32> to vector<512x1xf32>
    %44 = vector.broadcast %43 : vector<512x1xf32> to vector<512x128xf32>
    %45 = vector.broadcast %cst_14 : f32 to vector<512x128xf32>
    %46 = arith.select %22, %44, %45 : vector<512x128xi1>, vector<512x128xf32>
    %47 = arith.addf %41, %46 : vector<512x128xf32>
    %48 = arith.mulf %37, %40 : vector<512x1xf32>
    %cst_15 = arith.constant 0.000000e+00 : f32
    %49 = vector.shape_cast %48 : vector<512x1xf32> to vector<512x1xf32>
    %50 = vector.broadcast %49 : vector<512x1xf32> to vector<512x128xf32>
    %51 = vector.broadcast %cst_15 : f32 to vector<512x128xf32>
    %52 = arith.select %35, %50, %51 : vector<512x128xi1>, vector<512x128xf32>
    %53 = arith.addf %47, %52 : vector<512x128xf32>
    %54 = arith.negf %7 : vector<512x128xf32>
    %55 = math.exp %54 : vector<512x128xf32>
    %cst_16 = arith.constant 1.000000e+00 : f32
    %56 = vector.broadcast %cst_16 : f32 to vector<512x128xf32>
    %57 = arith.addf %56, %55 : vector<512x128xf32>
    %58 = arith.divf %56, %57 : vector<512x128xf32>
    %59 = arith.mulf %7, %58 : vector<512x128xf32>
    %60 = arith.truncf %59 : vector<512x128xf32> to vector<512x128xbf16>
    %c0_17 = arith.constant 0 : index
    %c0_18 = arith.constant 0 : index
    %61 = vector.load %arg4[%c0_17, %c0_18] : memref<128x128xbf16, #tpu.memory_space<vmem>>, vector<128x128xbf16>
    %cst_19 = arith.constant dense<0.000000e+00> : vector<512x128xf32>
    %62 = tpu.matmul %60, %61, %cst_19 {dimension_numbers = #tpu.dot_dimension_numbers<[1], [0], [0], [1], [0, 0, 1, 1], [], []>} : vector<512x128xbf16>, vector<128x128xbf16>, vector<512x128xf32> -> vector<512x128xf32>
    %63 = arith.negf %62 : vector<512x128xf32>
    %64 = math.exp %63 : vector<512x128xf32>
    %cst_20 = arith.constant 1.000000e+00 : f32
    %65 = vector.broadcast %cst_20 : f32 to vector<512x128xf32>
    %66 = arith.addf %65, %64 : vector<512x128xf32>
    %67 = arith.divf %65, %66 : vector<512x128xf32>
    %68 = arith.mulf %62, %67 : vector<512x128xf32>
    %69 = arith.truncf %68 : vector<512x128xf32> to vector<512x128xbf16>
    %c0_21 = arith.constant 0 : index
    %c0_22 = arith.constant 0 : index
    %70 = vector.load %arg5[%c0_21, %c0_22] : memref<128x128xbf16, #tpu.memory_space<vmem>>, vector<128x128xbf16>
    %cst_23 = arith.constant dense<0.000000e+00> : vector<512x128xf32>
    %71 = tpu.matmul %69, %70, %cst_23 {dimension_numbers = #tpu.dot_dimension_numbers<[1], [0], [0], [1], [0, 0, 1, 1], [], []>} : vector<512x128xbf16>, vector<128x128xbf16>, vector<512x128xf32> -> vector<512x128xf32>
    %72 = arith.truncf %53 : vector<512x128xf32> to vector<512x128xbf16>
    %73 = arith.truncf %71 : vector<512x128xf32> to vector<512x128xbf16>
    %cst_24 = arith.constant dense<0.000000e+00> : vector<128x128xf32>
    %74 = tpu.matmul %72, %73, %cst_24 {dimension_numbers = #tpu.dot_dimension_numbers<[0], [0], [1], [1], [0, 1, 1, 1], [], []>} : vector<512x128xbf16>, vector<512x128xbf16>, vector<128x128xf32> -> vector<128x128xf32>
    %c0_25 = arith.constant 0 : index
    %c0_26 = arith.constant 0 : index
    %c0_27 = arith.constant 0 : index
    %75 = vector.load %arg6[%c0_25, %c0_26, %c0_27] : memref<1x8x128xf32, #tpu.memory_space<vmem>>, vector<1x8x128xf32>
    %76 = vector.shape_cast %75 : vector<1x8x128xf32> to vector<8x128xf32>
    %77 = vector.extract_strided_slice %74 {offsets = [0, 0], sizes = [8, 128], strides = [1, 1]} : vector<128x128xf32> to vector<8x128xf32>
    %78 = arith.addf %76, %77 : vector<8x128xf32>
    %c0_28 = arith.constant 0 : index
    %c0_29 = arith.constant 0 : index
    %c0_30 = arith.constant 0 : index
    %79 = vector.load %arg6[%c0_28, %c0_29, %c0_30] : memref<1x8x128xf32, #tpu.memory_space<vmem>>, vector<1x8x128xf32>
    %80 = vector.shape_cast %79 : vector<1x8x128xf32> to vector<8x128xf32>
    %81 = vector.shape_cast %78 : vector<8x128xf32> to vector<1x8x128xf32>
    tpu.vector_store %arg6[%c0_28, %c0_29, %c0_30], %81 {strides = array<i32>} : memref<1x8x128xf32, #tpu.memory_space<vmem>>, vector<1x8x128xf32>,
    return
  }
  func.func @transform_0(%arg0: i32, %arg1: i32) -> (i32, i32) {
    %c3_i32 = arith.constant 3 : i32
    %0 = arith.muli %arg0, %c3_i32 : i32
    %1 = arith.addi %0, %arg1 : i32
    %c0_i32 = arith.constant 0 : i32
    %c0_i32_0 = arith.constant 0 : i32
    return %1, %c0_i32 : i32, i32
  }
  func.func @transform_1(%arg0: i32, %arg1: i32) -> (i32, i32) {
    %c0_i32 = arith.constant 0 : i32
    %c0_i32_0 = arith.constant 0 : i32
    %c0_i32_1 = arith.constant 0 : i32
    return %c0_i32, %c0_i32_0 : i32, i32
  }
  func.func @transform_2(%arg0: i32, %arg1: i32) -> (i32, i32) {
    %c0_i32 = arith.constant 0 : i32
    %c0_i32_0 = arith.constant 0 : i32
    %c0_i32_1 = arith.constant 0 : i32
    return %c0_i32, %c0_i32_0 : i32, i32
  }
  func.func @transform_3(%arg0: i32, %arg1: i32) -> (i32, i32) {
    %c0_i32 = arith.constant 0 : i32
    %c0_i32_0 = arith.constant 0 : i32
    %c0_i32_1 = arith.constant 0 : i32
    return %c0_i32, %c0_i32_0 : i32, i32
  }
  func.func @transform_4(%arg0: i32, %arg1: i32) -> (i32, i32, i32) {
    %c0_i32 = arith.constant 0 : i32
    %c0_i32_0 = arith.constant 0 : i32
    %c0_i32_1 = arith.constant 0 : i32
    return %arg0, %c0_i32, %c0_i32_0 : i32, i32, i32
  }
}

</mosaic_0001>

<bundles_post_ra>
// kernel: moe_forward.1
= control target key start
LH: loop header
LB: loop body
LE: loop exit
PB: predicated region body
PF: predicated region fallthrough
CT: control target
= control target key end

     0   :  { %s7747_s15 = smov 0   ;;  %s7749_s16 = smov 0   ;;  %s13045_s0 = inlined_call_operand.vmem [shape: bf16[3072,128], index: 0, kind: input, shape index: {}]   ;;  %s13046_s1 = inlined_call_operand.vmem [shape: bf16[128,256], index: 1, kind: input, shape index: {}]   ;;  %s13047_s2 = inlined_call_operand.vmem [shape: bf16[128,128], index: 2, kind: input, shape index: {}]   ;;  %s13048_s3 = inlined_call_operand.vmem [shape: bf16[128,128], index: 3, kind: input, shape index: {}]   ;;  %s13049_s4 = inlined_call_operand.vmem [shape: f32[2,8,128], index: 4, kind: output, shape index: {}]  }
   0x1   :  { %s7751_s17 = smov 0   ;;  %s7753_s18 = smov 0  }
   0x2   :  { %s7755_s19 = smov 0  }
   0x3 LB: > { %s23_s20 = sadd.s32 1, %s7710_s17  ;;  %s26_s21 = sadd.s32 1, %s7714_s18  ;;  %s7718_s19 = sphi %s7755_s19, %s14_s19   ;;  %s7714_s18 = sphi %s7753_s18, %s14977_s18   ;;  %s7710_s17 = sphi %s7751_s17, %s14976_s17   ;;  %s7706_s16 = sphi %s7749_s16, %s14975_s16   ;;  %s7702_s15 = sphi %s7747_s15, %s14974_s15  }
   0x4   : > { %p24_p0 = scmp.ge.s32.totalorder %s23_s20, 3  ;;  %p6231_p1 = scmp.ge.s32.totalorder %s7718_s19, 1 }
   0x5   : > { %p183_p2 = scmp.lt.s32.totalorder %s7718_s19, 7 }
   0x6   : > { %s14979_s20 = smov (%p24_p0, %s23_s20), 0  ;;  %s14981_s21 = smov (!%p24_p0, %s26_s21), %s7714_s18 }
   0x7   : > { %p184_p3 = pnand %p6231_p1, %p183_p2  ;;  %p28_p4 = scmp.ge.s32.totalorder %s14981_s21, 2 }
   0x9   : > { %s14983_s21 = smov (%p28_p4, %s14981_s21), 0  ;;  %187 = sbr.rel (%p184_p3) target bundleno = 1803 (0x70b), region = 36 }
  0x10   : > { %s210_s22 = smul.u32 3, %s7706_s16  ;;  %p220_p5 = scmp.lt.s32.totalorder %s7706_s16, 1 }
  0x11   : > { %p6235_p7 = scmp.ne.s32.totalorder %s7702_s15, 0 }
  0x12   : > { %s211_s23 = sadd.s32 %s7702_s15, %s210_s22  ;;  %s14985_s16 = smov (!%p220_p5, %s7706_s16), 1  ;;  %v7720_v0 = vmov (!%p6235_p7), 0.0  }
  0x13   : > { %s6232_s24 = sshll.u32 %s211_s23, 6  ;;  %s6234_s25 = sshll.u32 %s14985_s16, 3 }
  0x14   : > { %p213_p6 = scmp.lt.s32.totalorder %s6232_s24, 383  ;;  %s7780_s29 = scalar_lea.vmem %s13049_s4, %s6234_s25 }
  0x15   : > { %228 = sbr.rel (%p6235_p7) target bundleno = 28 (0x1c), region = 40  ;;  %229 = vst [vmem:[%s7780_s29] sm:$0xff] (!%p6235_p7), %v7720_v0 }
  0x16   : > { %s14987_s24 = smov (!%p213_p6, %s6232_s24), 383 }
  0x17   : > { %s6233_s26 = sshll.u32 %s14987_s24, 2 }
  0x18   : > { %s7785_s6 = scalar_lea.vmem %s13045_s0, %s6233_s26 }
  0x1c PF: > { %v6840_v1 = vld [vmem:[%s13046_s1 + $0x4] ss:$8 sps:$4 sm:$0xff]   ;;  %v6842_v2 = vld [vmem:[%s13046_s1] ss:$8 sps:$4 sm:$0xff]   ;;  %v7721_v3 = vmov 0   ;;  %v6866_v20 = vld [vmem:[%s7785_s6 + $0x10] sm:$0xff]   ;;  %v935_v52 = vlaneseq }
  0x1d   : > { %614 = vmatprep.mubr.bf16.mxu0 %v7721_v3  ;;  %582 = vmatprep.subr.bf16.mxu0 %v6840_v1  ;;  %v6843_v4 = vld [vmem:[%s13046_s1 + $0x14] ss:$8 sps:$4 sm:$0xff]   ;;  %v6845_v5 = vld [vmem:[%s13046_s1 + $0x10] ss:$8 sps:$4 sm:$0xff]   ;;  %v6846_v6 = vld [vmem:[%s13046_s1 + $0x24] ss:$8 sps:$4 sm:$0xff]  }
  0x1e   : > { %583 = vmatpush1.bf16.msra.mxu0 %v6842_v2  ;;  %v6848_v7 = vld [vmem:[%s13046_s1 + $0x20] ss:$8 sps:$4 sm:$0xff]   ;;  %v6849_v8 = vld [vmem:[%s13046_s1 + $0x34] ss:$8 sps:$4 sm:$0xff]   ;;  %v6851_v9 = vld [vmem:[%s13046_s1 + $0x30] ss:$8 sps:$4 sm:$0xff]  }
  0x1f   : > { %584 = vmatprep.subr.bf16.mxu0 %v6843_v4  ;;  %v6852_v10 = vld [vmem:[%s13046_s1 + $0x44] ss:$8 sps:$4 sm:$0xff]   ;;  %v6854_v11 = vld [vmem:[%s13046_s1 + $0x40] ss:$8 sps:$4 sm:$0xff]   ;;  %v6855_v12 = vld [vmem:[%s13046_s1 + $0x54] ss:$8 sps:$4 sm:$0xff]  }
  0x20   : > { %v6857_v13 = vld [vmem:[%s13046_s1 + $0x50] ss:$8 sps:$4 sm:$0xff]   ;;  %v6858_v14 = vld [vmem:[%s13046_s1 + $0x64] ss:$8 sps:$4 sm:$0xff]   ;;  %v6860_v15 = vld [vmem:[%s13046_s1 + $0x60] ss:$8 sps:$4 sm:$0xff]  }
  0x21   : > { %v6861_v16 = vld [vmem:[%s13046_s1 + $0x74] ss:$8 sps:$4 sm:$0xff]   ;;  %v6863_v17 = vld [vmem:[%s13046_s1 + $0x70] ss:$8 sps:$4 sm:$0xff]   ;;  %v6864_v18 = vld [vmem:[%s7785_s6] sm:$0xff]   ;;  %v7914_v54 = vand.u32 127, %v935_v52 }
  0x22   : > { %585 = vmatpush1.bf16.msra.mxu0 %v6845_v5  ;;  %v6865_v19 = vld [vmem:[%s7785_s6 + $0x8] sm:$0xff]   ;;  %v6867_v21 = vld [vmem:[%s7785_s6 + $0x18] sm:$0xff]   ;;  %v6868_v22 = vld [vmem:[%s7785_s6 + $0x20] sm:$0xff]  }
  0x23   : > { %586 = vmatprep.subr.bf16.mxu0 %v6846_v6  ;;  %v6869_v23 = vld [vmem:[%s7785_s6 + $0x28] sm:$0xff]   ;;  %v6870_v24 = vld [vmem:[%s7785_s6 + $0x30] sm:$0xff]   ;;  %v6871_v25 = vld [vmem:[%s7785_s6 + $0x38] sm:$0xff]   ;;  %vm937_vm0 = vcmp.lt.s32.totalorder %v7914_v54, 8 }
  0x24   : > { %v6872_v26 = vld [vmem:[%s7785_s6 + $0x40] sm:$0xff]   ;;  %v6873_v27 = vld [vmem:[%s7785_s6 + $0x48] sm:$0xff]   ;;  %v6874_v28 = vld [vmem:[%s7785_s6 + $0x50] sm:$0xff]  }
  0x25   : > { %v6875_v29 = vld [vmem:[%s7785_s6 + $0x58] sm:$0xff]   ;;  %v6892_v30 = vld [vmem:[%s13047_s2] sm:$0xff]   ;;  %v6894_v32 = vld [vmem:[%s13047_s2 + $0x8] sm:$0xff]  }
  0x26   : > { %587 = vmatpush1.bf16.msra.mxu0 %v6848_v7  ;;  %v6876_v31 = vld [vmem:[%s7785_s6 + $0x60] sm:$0xff]   ;;  %6638 = vmatprep.subr.bf16.mxu1 %v6892_v30  ;;  %v6895_v33 = vld [vmem:[%s13047_s2 + $0x10] sm:$0xff]   ;;  %v6877_v34 = vld [vmem:[%s7785_s6 + $0x68] sm:$0xff]  }
  0x27   : > { %588 = vmatprep.subr.bf16.mxu0 %v6849_v8  ;;  %6639 = vmatpush3.bf16.msra.mxu1 %v6892_v30  ;;  %v6897_v35 = vld [vmem:[%s13047_s2 + $0x18] sm:$0xff]   ;;  %v6898_v36 = vld [vmem:[%s13047_s2 + $0x20] sm:$0xff]   ;;  %v6878_v37 = vld [vmem:[%s7785_s6 + $0x70] sm:$0xff]  }
  0x28   : > { %6640 = vmatprep.subr.bf16.mxu1 %v6894_v32  ;;  %v6900_v38 = vld [vmem:[%s13047_s2 + $0x28] sm:$0xff]   ;;  %v6901_v39 = vld [vmem:[%s13047_s2 + $0x30] sm:$0xff]   ;;  %v6879_v40 = vld [vmem:[%s7785_s6 + $0x78] sm:$0xff]  }
  0x29   : > { %v6903_v41 = vld [vmem:[%s13047_s2 + $0x38] sm:$0xff]   ;;  %v6880_v42 = vld [vmem:[%s7785_s6 + $0x80] sm:$0xff]   ;;  %v6881_v43 = vld [vmem:[%s7785_s6 + $0x88] sm:$0xff]  }
  0x2a   : > { %589 = vmatpush1.bf16.msra.mxu0 %v6851_v9  ;;  %v6882_v44 = vld [vmem:[%s7785_s6 + $0x90] sm:$0xff]   ;;  %v6883_v45 = vld [vmem:[%s7785_s6 + $0x98] sm:$0xff]   ;;  %v6884_v46 = vld [vmem:[%s7785_s6 + $0xa0] sm:$0xff]  }
  0x2b   : > { %590 = vmatprep.subr.bf16.mxu0 %v6852_v10  ;;  %6641 = vmatpush3.bf16.msra.mxu1 %v6894_v32  ;;  %v6885_v47 = vld [vmem:[%s7785_s6 + $0xa8] sm:$0xff]   ;;  %v6886_v48 = vld [vmem:[%s7785_s6 + $0xb0] sm:$0xff]   ;;  %v6887_v49 = vld [vmem:[%s7785_s6 + $0xb8] sm:$0xff]  }
  0x2c   : > { %6642 = vmatprep.subr.bf16.mxu1 %v6895_v33  ;;  %v6888_v50 = vld [vmem:[%s7785_s6 + $0xc0] sm:$0xff]   ;;  %v6889_v51 = vld [vmem:[%s7785_s6 + $0xc8] sm:$0xff]   ;;  %v6890_v53 = vld [vmem:[%s7785_s6 + $0xd0] sm:$0xff]  }
  0x2d   : > { %v6891_v58 = vld [vmem:[%s7785_s6 + $0xd8] sm:$0xff]   ;;  %v6893_v4 = vld [vmem:[%s7785_s6 + $0xe0] sm:$0xff]   ;;  %v6899_v30 = vld [vmem:[%s7785_s6 + $0xf0] sm:$0xff]  }
  0x2e   : > { %591 = vmatpush1.bf16.msra.mxu0 %v6854_v11 }
  0x2f   : > { %592 = vmatprep.subr.bf16.mxu0 %v6855_v12  ;;  %6643 = vmatpush3.bf16.msra.mxu1 %v6895_v33 }
  0x30   : > { %6644 = vmatprep.subr.bf16.mxu1 %v6897_v35 }
  0x32   : > { %593 = vmatpush1.bf16.msra.mxu0 %v6857_v13 }
  0x33   : > { %594 = vmatprep.subr.bf16.mxu0 %v6858_v14  ;;  %6645 = vmatpush3.bf16.msra.mxu1 %v6897_v35 }
  0x34   : > { %6646 = vmatprep.subr.bf16.mxu1 %v6898_v36 }
  0x36   : > { %595 = vmatpush1.bf16.msra.mxu0 %v6860_v15 }
  0x37   : > { %596 = vmatprep.subr.bf16.mxu0 %v6861_v16  ;;  %6647 = vmatpush3.bf16.msra.mxu1 %v6898_v36 }
  0x38   : > { %6648 = vmatprep.subr.bf16.mxu1 %v6900_v38 }
  0x3a   : > { %597 = vmatpush1.bf16.msra.mxu0 %v6863_v17  ;;  %v6896_v17 = vld [vmem:[%s7785_s6 + $0xe8] sm:$0xff]  }
  0x3b   : > { %6649 = vmatpush3.bf16.msra.mxu1 %v6900_v38 }
  0x3c   : > { %6650 = vmatprep.subr.bf16.mxu1 %v6901_v39 }
  0x3d   : > { %615 = vmatmul.mubr.bf16.vlgmr.msra.gmra.mrb[0].mxu0 %v6864_v18 }
  0x3e   : > { %624 = vmatprep.mubr.bf16.mxu0 %v7721_v3 }
  0x3f   : > { %6651 = vmatpush3.bf16.msra.mxu1 %v6901_v39 }
  0x40   : > { %6652 = vmatprep.subr.bf16.mxu1 %v6903_v41 }
  0x43   : > { %6653 = vmatpush3.bf16.msra.mxu1 %v6903_v41 }
  0x45   : > { %625 = vmatmul.mubr.bf16.gmra.mrb[4].mxu0 %v6865_v19 }
  0x46   : > { %634 = vmatprep.mubr.bf16.mxu0 %v7721_v3 }
  0x4d   : > { %635 = vmatmul.mubr.bf16.gmra.mrb[8].mxu0 %v6866_v20 }
  0x4e   : > { %644 = vmatprep.mubr.bf16.mxu0 %v7721_v3 }
  0x55   : > { %645 = vmatmul.mubr.bf16.gmra.mrb[12].mxu0 %v6867_v21 }
  0x56   : > { %654 = vmatprep.mubr.bf16.mxu0 %v7721_v3 }
  0x5d   : > { %655 = vmatmul.mubr.bf16.gmra.mrb[16].mxu0 %v6868_v22 }
  0x5e   : > { %664 = vmatprep.mubr.bf16.mxu0 %v7721_v3 }
  0x65   : > { %665 = vmatmul.mubr.bf16.gmra.mrb[20].mxu0 %v6869_v23 }
  0x66   : > { %674 = vmatprep.mubr.bf16.mxu0 %v7721_v3 }
  0x6d   : > { %675 = vmatmul.mubr.bf16.gmra.mrb[24].mxu0 %v6870_v24 }
  0x6e   : > { %684 = vmatprep.mubr.bf16.mxu0 %v7721_v3 }
  0x75   : > { %685 = vmatmul.mubr.bf16.gmra.mrb[28].mxu0 %v6871_v25 }
  0x76   : > { %694 = vmatprep.mubr.bf16.mxu0 %v7721_v3 }
  0x7d   : > { %695 = vmatmul.mubr.bf16.gmra.mrb[32].mxu0 %v6872_v26 }
  0x7e   : > { %704 = vmatprep.mubr.bf16.mxu0 %v7721_v3 }
  0x85   : > { %705 = vmatmul.mubr.bf16.gmra.mrb[36].mxu0 %v6873_v27 }
  0x86   : > { %714 = vmatprep.mubr.bf16.mxu0 %v7721_v3 }
  0x8d   : > { %715 = vmatmul.mubr.bf16.gmra.mrb[40].mxu0 %v6874_v28 }
  0x8e   : > { %724 = vmatprep.mubr.bf16.mxu0 %v7721_v3 }
  0x95   : > { %725 = vmatmul.mubr.bf16.gmra.mrb[44].mxu0 %v6875_v29 }
  0x96   : > { %734 = vmatprep.mubr.bf16.mxu0 %v7721_v3 }
  0x9d   : > { %735 = vmatmul.mubr.bf16.gmra.mrb[48].mxu0 %v6876_v31 }
  0x9e   : > { %744 = vmatprep.mubr.bf16.mxu0 %v7721_v3 }
  0xa5   : > { %745 = vmatmul.mubr.bf16.gmra.mrb[52].mxu0 %v6877_v34 }
  0xa6   : > { %754 = vmatprep.mubr.bf16.mxu0 %v7721_v3 }
  0xad   : > { %755 = vmatmul.mubr.bf16.gmra.mrb[56].mxu0 %v6878_v37 }
  0xae   : > { %764 = vmatprep.mubr.bf16.mxu0 %v7721_v3 }
  0xb5   : > { %765 = vmatmul.mubr.bf16.gmra.mrb[60].mxu0 %v6879_v40 }
  0xb6   : > { %774 = vmatprep.mubr.bf16.mxu0 %v7721_v3 }
  0xbd   : > { %775 = vmatmul.mubr.bf16.gmra.mrb[64].mxu0 %v6880_v42 }
  0xbe   : > { %784 = vmatprep.mubr.bf16.mxu0 %v7721_v3 }
  0xc5   : > { %785 = vmatmul.mubr.bf16.gmra.mrb[68].mxu0 %v6881_v43 }
  0xc6   : > { %794 = vmatprep.mubr.bf16.mxu0 %v7721_v3 }
  0xcd   : > { %795 = vmatmul.mubr.bf16.gmra.mrb[72].mxu0 %v6882_v44 }
  0xce   : > { %804 = vmatprep.mubr.bf16.mxu0 %v7721_v3 }
  0xd5   : > { %805 = vmatmul.mubr.bf16.gmra.mrb[76].mxu0 %v6883_v45 }
  0xd6   : > { %814 = vmatprep.mubr.bf16.mxu0 %v7721_v3 }
  0xdd   : > { %815 = vmatmul.mubr.bf16.gmra.mrb[80].mxu0 %v6884_v46 }
  0xde   : > { %824 = vmatprep.mubr.bf16.mxu0 %v7721_v3 }
  0xe5   : > { %825 = vmatmul.mubr.bf16.gmra.mrb[84].mxu0 %v6885_v47 }
  0xe6   : > { %834 = vmatprep.mubr.bf16.mxu0 %v7721_v3 }
  0xed   : > { %835 = vmatmul.mubr.bf16.gmra.mrb[88].mxu0 %v6886_v48  ;;  %v6902_v48 = vld [vmem:[%s7785_s6 + $0xf8] sm:$0xff]  }
  0xee   : > { %844 = vmatprep.mubr.bf16.mxu0 %v7721_v3 }
  0xf5   : > { %845 = vmatmul.mubr.bf16.gmra.mrb[92].mxu0 %v6887_v49 }
  0xf6   : > { %854 = vmatprep.mubr.bf16.mxu0 %v7721_v3 }
  0xfd   : > { %855 = vmatmul.mubr.bf16.gmra.mrb[96].mxu0 %v6888_v50 }
  0xfe   : > { %864 = vmatprep.mubr.bf16.mxu0 %v7721_v3 }
 0x105   : > { %865 = vmatmul.mubr.bf16.gmra.mrb[100].mxu0 %v6889_v51 }
 0x106   : > { %874 = vmatprep.mubr.bf16.mxu0 %v7721_v3 }
 0x10d   : > { %875 = vmatmul.mubr.bf16.gmra.mrb[104].mxu0 %v6890_v53 }
 0x10e   : > { %884 = vmatprep.mubr.bf16.mxu0 %v7721_v3 }
 0x110   : > { %v616_v55 = vpop.f32.mrb[0].mxu0 }
 0x111   : > { %v7920_v56 = vsel %vm937_vm0, %v616_v55, -1e+30  ;;  %v7922_v57 = vpop.f32.mrb[1].mxu0 }
 0x112   : > { %13708 = vst [vmem:[#allocation2_spill] sm:$0xff] %v7920_v56  ;;  %v6284_v59 = vmul.f32 -1.442695, %v7922_v57  ;;  %1002 = vmax.xlane.f32.xlu0 %v7920_v56  ;;  %v620_v60 = vpop.f32.mrb[2].mxu0 }
 0x113   : > { %v7927_v61 = vpop.f32.mrb[3].mxu0  ;;  %v7932_v63 = vsel %vm937_vm0, %v620_v60, -1e+30 }
 0x114   : > { %6912 = vpow2.f32 %v6284_v59  ;;  %v6285_v62 = vmul.f32 -1.442695, %v7927_v61  ;;  %13709 = vst [vmem:[#allocation3_spill] sm:$0xff] %v7932_v63 }
 0x115   : > { %885 = vmatmul.mubr.bf16.gmra.mrb[108].mxu0 %v6891_v58 }
 0x116   : > { %6914 = vpow2.f32 %v6285_v62  ;;  %1004 = vmax.xlane.f32.xlu0 %v7932_v63  ;;  %894 = vmatprep.mubr.bf16.mxu0 %v7721_v3 }
 0x118   : > { %v626_v0 = vpop.f32.mrb[4].mxu0 }
 0x119   : > { %v7938_v1 = vsel %vm937_vm0, %v626_v0, -1e+30  ;;  %v7940_v2 = vpop.f32.mrb[5].mxu0 }
 0x11a   : > { %13710 = vst [vmem:[#allocation4_spill] sm:$0xff] %v7938_v1  ;;  %v6286_v5 = vmul.f32 -1.442695, %v7940_v2  ;;  %1006 = vmax.xlane.f32.xlu1 %v7938_v1  ;;  %v630_v6 = vpop.f32.mrb[6].mxu0 }
 0x11b   : > { %v7945_v7 = vpop.f32.mrb[7].mxu0  ;;  %v7950_v9 = vsel %vm937_vm0, %v630_v6, -1e+30 }
 0x11c   : > { %6916 = vpow2.f32 %v6286_v5  ;;  %v6287_v8 = vmul.f32 -1.442695, %v7945_v7  ;;  %13711 = vst [vmem:[#allocation5_spill] sm:$0xff] %v7950_v9 }
 0x11d   : > { %895 = vmatmul.mubr.bf16.gmra.mrb[112].mxu0 %v6893_v4 }
 0x11e   : > { %v6913_v10 = vpop.eup %6912  ;;  %6918 = vpow2.f32 %v6287_v8  ;;  %1008 = vmax.xlane.f32.xlu1 %v7950_v9  ;;  %904 = vmatprep.mubr.bf16.mxu0 %v7721_v3 }
 0x11f   : > { %v4394_v11 = vadd.f32 1.0, %v6913_v10 }
 0x120   : > { %v6915_v12 = vpop.eup %6914  ;;  %v636_v13 = vpop.f32.mrb[8].mxu0 }
 0x121   : > { %6920 = vrcp.f32 %v4394_v11  ;;  %v4395_v14 = vadd.f32 1.0, %v6915_v12  ;;  %v7956_v15 = vsel %vm937_vm0, %v636_v13, -1e+30  ;;  %v7958_v16 = vpop.f32.mrb[9].mxu0 }
 0x122   : > { %13712 = vst [vmem:[#allocation6_spill] sm:$0xff] %v7956_v15  ;;  %v6288_v18 = vmul.f32 -1.442695, %v7958_v16  ;;  %1010 = vmax.xlane.f32.xlu0 %v7956_v15  ;;  %v640_v19 = vpop.f32.mrb[10].mxu0 }
 0x123   : > { %6922 = vrcp.f32 %v4395_v14  ;;  %v7965_v20 = vsel %vm937_vm0, %v640_v19, -1e+30  ;;  %v7967_v21 = vpop.f32.mrb[11].mxu0 }
 0x124   : > { %13713 = vst [vmem:[#allocation7_spill] sm:$0xff] %v7965_v20  ;;  %6924 = vpow2.f32 %v6288_v18  ;;  %v6289_v22 = vmul.f32 -1.442695, %v7967_v21  ;;  %1012 = vmax.xlane.f32.xlu1 %v7965_v20 }
 0x125   : > { %905 = vmatmul.mubr.bf16.gmra.mrb[116].mxu0 %v6896_v17 }
 0x126   : > { %v6917_v23 = vpop.eup %6916  ;;  %6926 = vpow2.f32 %v6289_v22  ;;  %914 = vmatprep.mubr.bf16.mxu0 %v7721_v3 }
 0x127   : > { %v4396_v24 = vadd.f32 1.0, %v6917_v23 }
 0x128   : > { %v6919_v25 = vpop.eup %6918  ;;  %v646_v26 = vpop.f32.mrb[12].mxu0 }
 0x129   : > { %6928 = vrcp.f32 %v4396_v24  ;;  %v4397_v27 = vadd.f32 1.0, %v6919_v25  ;;  %v7974_v28 = vsel %vm937_vm0, %v646_v26, -1e+30  ;;  %v7976_v29 = vpop.f32.mrb[13].mxu0 }
 0x12a   : > { %13714 = vst [vmem:[#allocation8_spill] sm:$0xff] %v7974_v28  ;;  %v6290_v31 = vmul.f32 -1.442695, %v7976_v29  ;;  %1014 = vmax.xlane.f32.xlu0 %v7974_v28  ;;  %v650_v32 = vpop.f32.mrb[14].mxu0 }
 0x12b   : > { %v6921_v33 = vpop.eup %6920  ;;  %6930 = vrcp.f32 %v4397_v27  ;;  %v7983_v34 = vsel %vm937_vm0, %v650_v32, -1e+30  ;;  %v7985_v35 = vpop.f32.mrb[15].mxu0 }
 0x12c   : > { %13715 = vst [vmem:[#allocation9_spill] sm:$0xff] %v7983_v34  ;;  %6932 = vpow2.f32 %v6290_v31  ;;  %v6291_v36 = vmul.f32 -1.442695, %v7985_v35  ;;  %1016 = vmax.xlane.f32.xlu1 %v7983_v34  ;;  %v4586_v39 = vmul.f32 %v6921_v33, %v7922_v57 }
 0x12d   : > { %v6923_v37 = vpop.eup %6922  ;;  %915 = vmatmul.mubr.bf16.gmra.mrb[120].mxu0 %v6899_v30 }
 0x12e   : > { %v6925_v38 = vpop.eup %6924  ;;  %v4587_v40 = vmul.f32 %v6923_v37, %v7927_v61  ;;  %6934 = vpow2.f32 %v6291_v36  ;;  %924 = vmatprep.mubr.bf16.mxu0 %v7721_v3 }
 0x12f   : > { %v4398_v41 = vadd.f32 1.0, %v6925_v38 }
 0x130   : > { %v6927_v42 = vpop.eup %6926  ;;  %v656_v43 = vpop.f32.mrb[16].mxu0  ;;  %v4650_v44 = vpack.c.bf16 %v4587_v40, %v4586_v39 }
 0x131   : > { %6936 = vrcp.f32 %v4398_v41  ;;  %v4399_v45 = vadd.f32 1.0, %v6927_v42  ;;  %v7994_v46 = vsel %vm937_vm0, %v656_v43, -1e+30  ;;  %v7996_v47 = vpop.f32.mrb[17].mxu0 }
 0x132   : > { %13716 = vst [vmem:[#allocation10_spill] sm:$0xff] %v7994_v46  ;;  %v6292_v49 = vmul.f32 -1.442695, %v7996_v47  ;;  %6654 = vmatprep.mubr.bf16.mxu1 %v4650_v44  ;;  %1018 = vmax.xlane.f32.xlu0 %v7994_v46  ;;  %v660_v50 = vpop.f32.mrb[18].mxu0 }
 0x133   : > { %v6929_v3 = vpop.eup %6928  ;;  %6938 = vrcp.f32 %v4399_v45  ;;  %v8003_v51 = vsel %vm937_vm0, %v660_v50, -1e+30  ;;  %v8005_v52 = vpop.f32.mrb[19].mxu0 }
 0x134   : > { %13717 = vst [vmem:[#allocation11_spill] sm:$0xff] %v8003_v51  ;;  %6940 = vpow2.f32 %v6292_v49  ;;  %v6293_v53 = vmul.f32 -1.442695, %v8005_v52  ;;  %1020 = vmax.xlane.f32.xlu1 %v8003_v51  ;;  %v4588_v58 = vmul.f32 %v6929_v3, %v7940_v2 }
 0x135   : > { %v6931_v55 = vpop.eup %6930  ;;  %925 = vmatmul.mubr.bf16.gmra.mrb[124].mxu0 %v6902_v48 }
 0x136   : > { %v6933_v57 = vpop.eup %6932  ;;  %v4589_v59 = vmul.f32 %v6931_v55, %v7945_v7  ;;  %6942 = vpow2.f32 %v6293_v53 }
 0x137   : > { %v4400_v60 = vadd.f32 1.0, %v6933_v57 }
 0x138   : > { %v6935_v61 = vpop.eup %6934  ;;  %v4651_v62 = vpack.c.bf16 %v4589_v59, %v4588_v58  ;;  %v666_v0 = vpop.f32.mrb[20].mxu0 }
 0x139   : > { %6944 = vrcp.f32 %v4400_v60  ;;  %v4401_v4 = vadd.f32 1.0, %v6935_v61  ;;  %v8013_v5 = vsel %vm937_vm0, %v666_v0, -1e+30  ;;  %v8015_v6 = vpop.f32.mrb[21].mxu0 }
 0x13a   : > { %13718 = vst [vmem:[#allocation12_spill] sm:$0xff] %v8013_v5  ;;  %v6294_v8 = vmul.f32 -1.442695, %v8015_v6  ;;  %6655 = vmatmul.mubr.bf16.vlgmr.msra.gmra.mrb[0].mxu1 %v4651_v62  ;;  %1022 = vmax.xlane.f32.xlu0 %v8013_v5  ;;  %v670_v2 = vpop.f32.mrb[22].mxu0 }
 0x13b   : > { %v6937_v7 = vpop.eup %6936  ;;  %6946 = vrcp.f32 %v4401_v4  ;;  %v8021_v10 = vsel %vm937_vm0, %v670_v2, -1e+30  ;;  %v8023_v11 = vpop.f32.mrb[23].mxu0 }
 0x13c   : > { %13719 = vst [vmem:[#allocation13_spill] sm:$0xff] %v8021_v10  ;;  %6948 = vpow2.f32 %v6294_v8  ;;  %v6295_v12 = vmul.f32 -1.442695, %v8023_v11  ;;  %1024 = vmax.xlane.f32.xlu1 %v8021_v10  ;;  %v4590_v17 = vmul.f32 %v6937_v7, %v7958_v16 }
 0x13d   : > { %v6939_v13 = vpop.eup %6938 }
 0x13e   : > { %v6941_v14 = vpop.eup %6940  ;;  %v4591_v18 = vmul.f32 %v6939_v13, %v7967_v21  ;;  %6950 = vpow2.f32 %v6295_v12 }
 0x13f   : > { %v4402_v19 = vadd.f32 1.0, %v6941_v14 }
 0x140   : > { %v6943_v22 = vpop.eup %6942  ;;  %v4652_v23 = vpack.c.bf16 %v4591_v18, %v4590_v17  ;;  %v676_v24 = vpop.f32.mrb[24].mxu0 }
 0x141   : > { %6952 = vrcp.f32 %v4402_v19  ;;  %v4403_v25 = vadd.f32 1.0, %v6943_v22  ;;  %v8031_v26 = vsel %vm937_vm0, %v676_v24, -1e+30  ;;  %v8033_v27 = vpop.f32.mrb[25].mxu0 }
 0x142   : > { %13720 = vst [vmem:[#allocation14_spill] sm:$0xff] %v8031_v26  ;;  %v6296_v30 = vmul.f32 -1.442695, %v8033_v27  ;;  %6658 = vmatprep.mubr.bf16.mxu1 %v4652_v23  ;;  %1026 = vmax.xlane.f32.xlu0 %v8031_v26  ;;  %v680_v16 = vpop.f32.mrb[26].mxu0 }
 0x143   : > { %v6945_v21 = vpop.eup %6944  ;;  %6954 = vrcp.f32 %v4403_v25  ;;  %v8039_v31 = vsel %vm937_vm0, %v680_v16, -1e+30  ;;  %v8041_v32 = vpop.f32.mrb[27].mxu0 }
 0x144   : > { %13721 = vst [vmem:[#allocation15_spill] sm:$0xff] %v8039_v31  ;;  %6956 = vpow2.f32 %v6296_v30  ;;  %v6297_v33 = vmul.f32 -1.442695, %v8041_v32  ;;  %1028 = vmax.xlane.f32.xlu1 %v8039_v31  ;;  %v4592_v38 = vmul.f32 %v6945_v21, %v7976_v29 }
 0x145   : > { %v6947_v36 = vpop.eup %6946 }
 0x146   : > { %v6949_v37 = vpop.eup %6948  ;;  %v4593_v39 = vmul.f32 %v6947_v36, %v7985_v35  ;;  %6958 = vpow2.f32 %v6297_v33 }
 0x147   : > { %v4404_v40 = vadd.f32 1.0, %v6949_v37 }
 0x148   : > { %v6951_v41 = vpop.eup %6950  ;;  %v4653_v42 = vpack.c.bf16 %v4593_v39, %v4592_v38  ;;  %v686_v43 = vpop.f32.mrb[28].mxu0 }
 0x149   : > { %6960 = vrcp.f32 %v4404_v40  ;;  %v4405_v44 = vadd.f32 1.0, %v6951_v41  ;;  %v8049_v45 = vsel %vm937_vm0, %v686_v43, -1e+30  ;;  %v8051_v48 = vpop.f32.mrb[29].mxu0 }
 0x14a   : > { %13722 = vst [vmem:[#allocation16_spill] sm:$0xff] %v8049_v45  ;;  %v6298_v49 = vmul.f32 -1.442695, %v8051_v48  ;;  %6659 = vmatmul.mubr.bf16.gmra.mrb[4].mxu1 %v4653_v42  ;;  %1030 = vmax.xlane.f32.xlu0 %v8049_v45  ;;  %v690_v29 = vpop.f32.mrb[30].mxu0 }
 0x14b   : > { %v6953_v35 = vpop.eup %6952  ;;  %6962 = vrcp.f32 %v4405_v44  ;;  %v8057_v50 = vsel %vm937_vm0, %v690_v29, -1e+30  ;;  %v8059_v3 = vpop.f32.mrb[31].mxu0 }
 0x14c   : > { %13723 = vst [vmem:[#allocation17_spill] sm:$0xff] %v8057_v50  ;;  %6964 = vpow2.f32 %v6298_v49  ;;  %v6299_v53 = vmul.f32 -1.442695, %v8059_v3  ;;  %1032 = vmax.xlane.f32.xlu1 %v8057_v50  ;;  %v4594_v58 = vmul.f32 %v6953_v35, %v7996_v47 }
 0x14d   : > { %v6955_v55 = vpop.eup %6954 }
 0x14e   : > { %v6957_v57 = vpop.eup %6956  ;;  %v4595_v59 = vmul.f32 %v6955_v55, %v8005_v52  ;;  %6966 = vpow2.f32 %v6299_v53 }
 0x14f   : > { %v4406_v60 = vadd.f32 1.0, %v6957_v57 }
 0x150   : > { %v6959_v61 = vpop.eup %6958  ;;  %v4654_v62 = vpack.c.bf16 %v4595_v59, %v4594_v58  ;;  %v696_v0 = vpop.f32.mrb[32].mxu0 }
 0x151   : > { %6968 = vrcp.f32 %v4406_v60  ;;  %v4407_v4 = vadd.f32 1.0, %v6959_v61  ;;  %v8067_v8 = vsel %vm937_vm0, %v696_v0, -1e+30  ;;  %v8069_v2 = vpop.f32.mrb[33].mxu0 }
 0x152   : > { %13724 = vst [vmem:[#allocation18_spill] sm:$0xff] %v8067_v8  ;;  %v6300_v7 = vmul.f32 -1.442695, %v8069_v2  ;;  %6662 = vmatprep.mubr.bf16.mxu1 %v4654_v62  ;;  %1034 = vmax.xlane.f32.xlu0 %v8067_v8  ;;  %v700_v47 = vpop.f32.mrb[34].mxu0 }
 0x153   : > { %v6961_v52 = vpop.eup %6960  ;;  %6970 = vrcp.f32 %v4407_v4  ;;  %v8075_v12 = vsel %vm937_vm0, %v700_v47, -1e+30  ;;  %v8077_v13 = vpop.f32.mrb[35].mxu0 }
 0x154   : > { %13725 = vst [vmem:[#allocation19_spill] sm:$0xff] %v8075_v12  ;;  %6972 = vpow2.f32 %v6300_v7  ;;  %v6301_v14 = vmul.f32 -1.442695, %v8077_v13  ;;  %1036 = vmax.xlane.f32.xlu1 %v8075_v12  ;;  %v4596_v19 = vmul.f32 %v6961_v52, %v8015_v6 }
 0x155   : > { %v6963_v17 = vpop.eup %6962 }
 0x156   : > { %v6965_v18 = vpop.eup %6964  ;;  %v4597_v22 = vmul.f32 %v6963_v17, %v8023_v11  ;;  %6974 = vpow2.f32 %v6301_v14 }
 0x157   : > { %v4408_v23 = vadd.f32 1.0, %v6965_v18 }
 0x158   : > { %v6967_v24 = vpop.eup %6966  ;;  %v4655_v25 = vpack.c.bf16 %v4597_v22, %v4596_v19  ;;  %v706_v30 = vpop.f32.mrb[36].mxu0 }
 0x159   : > { %6976 = vrcp.f32 %v4408_v23  ;;  %v4409_v16 = vadd.f32 1.0, %v6967_v24  ;;  %v8085_v21 = vsel %vm937_vm0, %v706_v30, -1e+30  ;;  %v8087_v33 = vpop.f32.mrb[37].mxu0 }
 0x15a   : > { %13726 = vst [vmem:[#allocation20_spill] sm:$0xff] %v8085_v21  ;;  %v6302_v36 = vmul.f32 -1.442695, %v8087_v33  ;;  %6663 = vmatmul.mubr.bf16.gmra.mrb[8].mxu1 %v4655_v25  ;;  %1038 = vmax.xlane.f32.xlu0 %v8085_v21  ;;  %v710_v6 = vpop.f32.mrb[38].mxu0 }
 0x15b   : > { %v6969_v11 = vpop.eup %6968  ;;  %6978 = vrcp.f32 %v4409_v16  ;;  %v8093_v37 = vsel %vm937_vm0, %v710_v6, -1e+30  ;;  %v8095_v38 = vpop.f32.mrb[39].mxu0 }
 0x15c   : > { %13727 = vst [vmem:[#allocation21_spill] sm:$0xff] %v8093_v37  ;;  %6980 = vpow2.f32 %v6302_v36  ;;  %v6303_v39 = vmul.f32 -1.442695, %v8095_v38  ;;  %1040 = vmax.xlane.f32.xlu1 %v8093_v37  ;;  %v4598_v42 = vmul.f32 %v6969_v11, %v8033_v27 }
 0x15d   : > { %v6971_v40 = vpop.eup %6970 }
 0x15e   : > { %v6973_v41 = vpop.eup %6972  ;;  %v4599_v43 = vmul.f32 %v6971_v40, %v8041_v32  ;;  %6982 = vpow2.f32 %v6303_v39 }
 0x15f   : > { %v4410_v44 = vadd.f32 1.0, %v6973_v41 }
 0x160   : > { %v6975_v49 = vpop.eup %6974  ;;  %v4656_v29 = vpack.c.bf16 %v4599_v43, %v4598_v42  ;;  %v716_v35 = vpop.f32.mrb[40].mxu0 }
 0x161   : > { %6984 = vrcp.f32 %v4410_v44  ;;  %v4411_v53 = vadd.f32 1.0, %v6975_v49  ;;  %v8103_v55 = vsel %vm937_vm0, %v716_v35, -1e+30  ;;  %v8105_v57 = vpop.f32.mrb[41].mxu0 }
 0x162   : > { %13728 = vst [vmem:[#allocation22_spill] sm:$0xff] %v8103_v55  ;;  %v6304_v58 = vmul.f32 -1.442695, %v8105_v57  ;;  %6666 = vmatprep.mubr.bf16.mxu1 %v4656_v29  ;;  %1042 = vmax.xlane.f32.xlu0 %v8103_v55  ;;  %v720_v27 = vpop.f32.mrb[42].mxu0 }
 0x163   : > { %v6977_v32 = vpop.eup %6976  ;;  %6986 = vrcp.f32 %v4411_v53  ;;  %v8111_v59 = vsel %vm937_vm0, %v720_v27, -1e+30  ;;  %v8113_v60 = vpop.f32.mrb[43].mxu0 }
 0x164   : > { %13729 = vst [vmem:[#allocation23_spill] sm:$0xff] %v8111_v59  ;;  %6988 = vpow2.f32 %v6304_v58  ;;  %v6305_v61 = vmul.f32 -1.442695, %v8113_v60  ;;  %1044 = vmax.xlane.f32.xlu1 %v8111_v59  ;;  %v4600_v4 = vmul.f32 %v6977_v32, %v8051_v48 }
 0x165   : > { %v6979_v62 = vpop.eup %6978 }
 0x166   : > { %v6981_v0 = vpop.eup %6980  ;;  %v4601_v7 = vmul.f32 %v6979_v62, %v8059_v3  ;;  %6990 = vpow2.f32 %v6305_v61 }
 0x167   : > { %v4412_v47 = vadd.f32 1.0, %v6981_v0 }
 0x168   : > { %v6983_v52 = vpop.eup %6982  ;;  %v4657_v14 = vpack.c.bf16 %v4601_v7, %v4600_v4  ;;  %v726_v17 = vpop.f32.mrb[44].mxu0 }
 0x169   : > { %6992 = vrcp.f32 %v4412_v47  ;;  %v4413_v18 = vadd.f32 1.0, %v6983_v52  ;;  %v8121_v19 = vsel %vm937_vm0, %v726_v17, -1e+30  ;;  %v8123_v22 = vpop.f32.mrb[45].mxu0 }
 0x16a   : > { %13730 = vst [vmem:[#allocation24_spill] sm:$0xff] %v8121_v19  ;;  %v6306_v23 = vmul.f32 -1.442695, %v8123_v22  ;;  %6667 = vmatmul.mubr.bf16.gmra.mrb[12].mxu1 %v4657_v14  ;;  %1046 = vmax.xlane.f32.xlu0 %v8121_v19  ;;  %v730_v48 = vpop.f32.mrb[46].mxu0 }
 0x16b   : > { %v6985_v3 = vpop.eup %6984  ;;  %6994 = vrcp.f32 %v4413_v18  ;;  %v8129_v24 = vsel %vm937_vm0, %v730_v48, -1e+30  ;;  %v8131_v25 = vpop.f32.mrb[47].mxu0 }
 0x16c   : > { %13731 = vst [vmem:[#allocation25_spill] sm:$0xff] %v8129_v24  ;;  %6996 = vpow2.f32 %v6306_v23  ;;  %v6307_v30 = vmul.f32 -1.442695, %v8131_v25  ;;  %1048 = vmax.xlane.f32.xlu1 %v8129_v24  ;;  %v4602_v6 = vmul.f32 %v6985_v3, %v8069_v2 }
 0x16d   : > { %v6987_v16 = vpop.eup %6986 }
 0x16e   : > { %v6989_v36 = vpop.eup %6988  ;;  %v4603_v11 = vmul.f32 %v6987_v16, %v8077_v13  ;;  %6998 = vpow2.f32 %v6307_v30 }
 0x16f   : > { %v4414_v39 = vadd.f32 1.0, %v6989_v36 }
 0x170   : > { %v6991_v40 = vpop.eup %6990  ;;  %v4658_v41 = vpack.c.bf16 %v4603_v11, %v4602_v6  ;;  %v736_v42 = vpop.f32.mrb[48].mxu0 }
 0x171   : > { %7000 = vrcp.f32 %v4414_v39  ;;  %v4415_v43 = vadd.f32 1.0, %v6991_v40  ;;  %v8139_v44 = vsel %vm937_vm0, %v736_v42, -1e+30  ;;  %v8141_v49 = vpop.f32.mrb[49].mxu0 }
 0x172   : > { %13732 = vst [vmem:[#allocation26_spill] sm:$0xff] %v8139_v44  ;;  %v6308_v29 = vmul.f32 -1.442695, %v8141_v49  ;;  %6670 = vmatprep.mubr.bf16.mxu1 %v4658_v41  ;;  %1050 = vmax.xlane.f32.xlu0 %v8139_v44  ;;  %v740_v2 = vpop.f32.mrb[50].mxu0 }
 0x173   : > { %v6993_v13 = vpop.eup %6992  ;;  %7002 = vrcp.f32 %v4415_v43  ;;  %v8147_v35 = vsel %vm937_vm0, %v740_v2, -1e+30  ;;  %v8149_v53 = vpop.f32.mrb[51].mxu0 }
 0x174   : > { %13733 = vst [vmem:[#allocation27_spill] sm:$0xff] %v8147_v35  ;;  %7004 = vpow2.f32 %v6308_v29  ;;  %v6309_v58 = vmul.f32 -1.442695, %v8149_v53  ;;  %1052 = vmax.xlane.f32.xlu1 %v8147_v35  ;;  %v4604_v61 = vmul.f32 %v6993_v13, %v8087_v33 }
 0x175   : > { %v6995_v27 = vpop.eup %6994 }
 0x176   : > { %v6997_v32 = vpop.eup %6996  ;;  %v4605_v62 = vmul.f32 %v6995_v27, %v8095_v38  ;;  %7006 = vpow2.f32 %v6309_v58 }
 0x177   : > { %v4416_v0 = vadd.f32 1.0, %v6997_v32 }
 0x178   : > { %v6999_v4 = vpop.eup %6998  ;;  %v4659_v7 = vpack.c.bf16 %v4605_v62, %v4604_v61  ;;  %v746_v47 = vpop.f32.mrb[52].mxu0 }
 0x179   : > { %7008 = vrcp.f32 %v4416_v0  ;;  %v4417_v52 = vadd.f32 1.0, %v6999_v4  ;;  %v8157_v14 = vsel %vm937_vm0, %v746_v47, -1e+30  ;;  %v8159_v17 = vpop.f32.mrb[53].mxu0 }
 0x17a   : > { %13734 = vst [vmem:[#allocation28_spill] sm:$0xff] %v8157_v14  ;;  %v6310_v18 = vmul.f32 -1.442695, %v8159_v17  ;;  %6671 = vmatmul.mubr.bf16.gmra.mrb[16].mxu1 %v4659_v7  ;;  %1054 = vmax.xlane.f32.xlu0 %v8157_v14  ;;  %v750_v33 = vpop.f32.mrb[54].mxu0 }
 0x17b   : > { %v7001_v38 = vpop.eup %7000  ;;  %7010 = vrcp.f32 %v4417_v52  ;;  %v8165_v23 = vsel %vm937_vm0, %v750_v33, -1e+30  ;;  %v8167_v48 = vpop.f32.mrb[55].mxu0 }
 0x17c   : > { %13735 = vst [vmem:[#allocation29_spill] sm:$0xff] %v8165_v23  ;;  %7012 = vpow2.f32 %v6310_v18  ;;  %v6311_v3 = vmul.f32 -1.442695, %v8167_v48  ;;  %1056 = vmax.xlane.f32.xlu1 %v8165_v23  ;;  %v4606_v36 = vmul.f32 %v7001_v38, %v8105_v57 }
 0x17d   : > { %v7003_v30 = vpop.eup %7002 }
 0x17e   : > { %v7005_v16 = vpop.eup %7004  ;;  %v4607_v6 = vmul.f32 %v7003_v30, %v8113_v60  ;;  %7014 = vpow2.f32 %v6311_v3 }
 0x17f   : > { %v4418_v11 = vadd.f32 1.0, %v7005_v16 }
 0x180   : > { %v7007_v39 = vpop.eup %7006  ;;  %v4660_v40 = vpack.c.bf16 %v4607_v6, %v4606_v36  ;;  %v756_v41 = vpop.f32.mrb[56].mxu0 }
 0x181   : > { %7016 = vrcp.f32 %v4418_v11  ;;  %v4419_v42 = vadd.f32 1.0, %v7007_v39  ;;  %v8175_v43 = vsel %vm937_vm0, %v756_v41, -1e+30  ;;  %v8177_v29 = vpop.f32.mrb[57].mxu0 }
 0x182   : > { %13736 = vst [vmem:[#allocation30_spill] sm:$0xff] %v8175_v43  ;;  %v6312_v2 = vmul.f32 -1.442695, %v8177_v29  ;;  %6674 = vmatprep.mubr.bf16.mxu1 %v4660_v40  ;;  %1058 = vmax.xlane.f32.xlu0 %v8175_v43  ;;  %v760_v57 = vpop.f32.mrb[58].mxu0 }
 0x183   : > { %v7009_v60 = vpop.eup %7008  ;;  %7018 = vrcp.f32 %v4419_v42  ;;  %v8183_v13 = vsel %vm937_vm0, %v760_v57, -1e+30  ;;  %v8185_v58 = vpop.f32.mrb[59].mxu0 }
 0x184   : > { %13737 = vst [vmem:[#allocation31_spill] sm:$0xff] %v8183_v13  ;;  %7020 = vpow2.f32 %v6312_v2  ;;  %v6313_v27 = vmul.f32 -1.442695, %v8185_v58  ;;  %1060 = vmax.xlane.f32.xlu1 %v8183_v13  ;;  %v4608_v62 = vmul.f32 %v7009_v60, %v8123_v22 }
 0x185   : > { %v7011_v32 = vpop.eup %7010 }
 0x186   : > { %v7013_v61 = vpop.eup %7012  ;;  %v4609_v0 = vmul.f32 %v7011_v32, %v8131_v25  ;;  %7022 = vpow2.f32 %v6313_v27 }
 0x187   : > { %v4420_v4 = vadd.f32 1.0, %v7013_v61 }
 0x188   : > { %v7015_v7 = vpop.eup %7014  ;;  %v4661_v47 = vpack.c.bf16 %v4609_v0, %v4608_v62  ;;  %v766_v52 = vpop.f32.mrb[60].mxu0 }
 0x189   : > { %7024 = vrcp.f32 %v4420_v4  ;;  %v4421_v18 = vadd.f32 1.0, %v7015_v7  ;;  %v8193_v33 = vsel %vm937_vm0, %v766_v52, -1e+30  ;;  %v8195_v38 = vpop.f32.mrb[61].mxu0 }
 0x18a   : > { %13738 = vst [vmem:[#allocation32_spill] sm:$0xff] %v8193_v33  ;;  %v6314_v3 = vmul.f32 -1.442695, %v8195_v38  ;;  %6675 = vmatmul.mubr.bf16.gmra.mrb[20].mxu1 %v4661_v47  ;;  %1062 = vmax.xlane.f32.xlu0 %v8193_v33  ;;  %v770_v22 = vpop.f32.mrb[62].mxu0 }
 0x18b   : > { %v7017_v25 = vpop.eup %7016  ;;  %7026 = vrcp.f32 %v4421_v18  ;;  %v8201_v30 = vsel %vm937_vm0, %v770_v22, -1e+30  ;;  %v8203_v16 = vpop.f32.mrb[63].mxu0  ;;  %v6905_v22 = vld [vmem:[%s13048_s3 + $0x8] sm:$0xff]  }
 0x18c   : > { %13739 = vst [vmem:[#allocation33_spill] sm:$0xff] %v8201_v30  ;;  %7028 = vpow2.f32 %v6314_v3  ;;  %v6315_v36 = vmul.f32 -1.442695, %v8203_v16  ;;  %1064 = vmax.xlane.f32.xlu1 %v8201_v30  ;;  %v4610_v39 = vmul.f32 %v7017_v25, %v8141_v49 }
 0x18d   : > { %v7019_v6 = vpop.eup %7018 }
 0x18e   : > { %v7021_v11 = vpop.eup %7020  ;;  %v4611_v40 = vmul.f32 %v7019_v6, %v8149_v53  ;;  %7030 = vpow2.f32 %v6315_v36  ;;  %v6904_v53 = vld [vmem:[%s13048_s3] sm:$0xff]  }
 0x18f   : > { %v4422_v41 = vadd.f32 1.0, %v7021_v11  ;;  %6718 = vmatprep.subr.bf16.mxu1 %v6904_v53 }
 0x190   : > { %v7023_v42 = vpop.eup %7022  ;;  %v4662_v2 = vpack.c.bf16 %v4611_v40, %v4610_v39  ;;  %v776_v57 = vpop.f32.mrb[64].mxu0  ;;  %6719 = vmatpush3.bf16.msra.mxu1 %v6904_v53 }
 0x191   : > { %7032 = vrcp.f32 %v4422_v41  ;;  %v4423_v60 = vadd.f32 1.0, %v7023_v42  ;;  %v8211_v27 = vsel %vm937_vm0, %v776_v57, -1e+30  ;;  %v8213_v32 = vpop.f32.mrb[65].mxu0  ;;  %6720 = vmatprep.subr.bf16.mxu1 %v6905_v22  ;;  %v6906_v42 = vld [vmem:[%s13048_s3 + $0x10] sm:$0xff]  }
 0x192   : > { %13740 = vst [vmem:[#allocation34_spill] sm:$0xff] %v8211_v27  ;;  %v6316_v61 = vmul.f32 -1.442695, %v8213_v32  ;;  %6678 = vmatprep.mubr.bf16.mxu1 %v4662_v2  ;;  %1066 = vmax.xlane.f32.xlu0 %v8211_v27  ;;  %v780_v49 = vpop.f32.mrb[66].mxu0 }
 0x193   : > { %v7025_v62 = vpop.eup %7024  ;;  %7034 = vrcp.f32 %v4423_v60  ;;  %v8222_v0 = vsel %vm937_vm0, %v780_v49, -1e+30  ;;  %v8224_v4 = vpop.f32.mrb[67].mxu0 }
 0x194   : > { %13741 = vst [vmem:[#allocation35_spill] sm:$0xff] %v8222_v0  ;;  %7036 = vpow2.f32 %v6316_v61  ;;  %v6317_v7 = vmul.f32 -1.442695, %v8224_v4  ;;  %1068 = vmax.xlane.f32.xlu1 %v8222_v0  ;;  %v4612_v18 = vmul.f32 %v7025_v62, %v8159_v17  ;;  %6721 = vmatpush3.bf16.msra.mxu1 %v6905_v22 }
 0x195   : > { %v7027_v47 = vpop.eup %7026  ;;  %6722 = vmatprep.subr.bf16.mxu1 %v6906_v42 }
 0x196   : > { %v7029_v52 = vpop.eup %7028  ;;  %v4613_v3 = vmul.f32 %v7027_v47, %v8167_v48  ;;  %7038 = vpow2.f32 %v6317_v7  ;;  %v6907_v47 = vld [vmem:[%s13048_s3 + $0x18] sm:$0xff]  }
 0x197   : > { %v4424_v25 = vadd.f32 1.0, %v7029_v52 }
 0x198   : > { %v7031_v36 = vpop.eup %7030  ;;  %v4663_v6 = vpack.c.bf16 %v4613_v3, %v4612_v18  ;;  %v786_v11 = vpop.f32.mrb[68].mxu0  ;;  %6723 = vmatpush3.bf16.msra.mxu1 %v6906_v42 }
 0x199   : > { %7040 = vrcp.f32 %v4424_v25  ;;  %v4425_v39 = vadd.f32 1.0, %v7031_v36  ;;  %v8235_v40 = vsel %vm937_vm0, %v786_v11, -1e+30  ;;  %v8237_v41 = vpop.f32.mrb[69].mxu0  ;;  %6724 = vmatprep.subr.bf16.mxu1 %v6907_v47 }
 0x19a   : > { %13742 = vst [vmem:[#allocation36_spill] sm:$0xff] %v8235_v40  ;;  %v6318_v17 = vmul.f32 -1.442695, %v8237_v41  ;;  %6679 = vmatmul.mubr.bf16.gmra.mrb[24].mxu1 %v4663_v6  ;;  %1070 = vmax.xlane.f32.xlu0 %v8235_v40  ;;  %v790_v48 = vpop.f32.mrb[70].mxu0 }
 0x19b   : > { %v7033_v2 = vpop.eup %7032  ;;  %7042 = vrcp.f32 %v4425_v39  ;;  %v8246_v57 = vsel %vm937_vm0, %v790_v48, -1e+30  ;;  %v8248_v60 = vpop.f32.mrb[71].mxu0  ;;  %v6908_v48 = vld [vmem:[%s13048_s3 + $0x20] sm:$0xff]  }
 0x19c   : > { %13743 = vst [vmem:[#allocation37_spill] sm:$0xff] %v8246_v57  ;;  %7044 = vpow2.f32 %v6318_v17  ;;  %v6319_v61 = vmul.f32 -1.442695, %v8248_v60  ;;  %1072 = vmax.xlane.f32.xlu1 %v8246_v57  ;;  %v4614_v62 = vmul.f32 %v7033_v2, %v8177_v29  ;;  %6725 = vmatpush3.bf16.msra.mxu1 %v6907_v47 }
 0x19d   : > { %v7035_v49 = vpop.eup %7034  ;;  %6726 = vmatprep.subr.bf16.mxu1 %v6908_v48 }
 0x19e   : > { %v7037_v53 = vpop.eup %7036  ;;  %v4615_v7 = vmul.f32 %v7035_v49, %v8185_v58  ;;  %7046 = vpow2.f32 %v6319_v61 }
 0x19f   : > { %v4426_v52 = vadd.f32 1.0, %v7037_v53  ;;  %v8257_v18 = vpop.xlane.xlu0 %1002 }
 0x1a0   : > { %13744 = vst [vmem:[#allocation38_spill] sm:$0xff] %v8257_v18  ;;  %v7039_v3 = vpop.eup %7038  ;;  %v4664_v22 = vpack.c.bf16 %v4615_v7, %v4614_v62  ;;  %vm1130_vm1 = vcmp.eq.f32.partialorder %v7920_v56, %v8257_v18  ;;  %v796_v25 = vpop.f32.mrb[72].mxu0  ;;  %6727 = vmatpush3.bf16.msra.mxu1 %v6908_v48 }
 0x1a1   : > { %7048 = vrcp.f32 %v4426_v52  ;;  %v4427_v36 = vadd.f32 1.0, %v7039_v3  ;;  %v8263_v29 = vsel %vm937_vm0, %v796_v25, -1e+30  ;;  %v8265_v58 = vpop.f32.mrb[73].mxu0  ;;  %v8268_v6 = vsel %vm1130_vm1, %v7914_v54, 128 }
 0x1a2   : > { %13745 = vst [vmem:[#allocation39_spill] sm:$0xff] %v8263_v29  ;;  %v6320_v11 = vmul.f32 -1.442695, %v8265_v58  ;;  %6682 = vmatprep.mubr.bf16.mxu1 %v4664_v22  ;;  %1074 = vmax.xlane.f32.xlu0 %v8263_v29  ;;  %v800_v39 = vpop.f32.mrb[74].mxu0  ;;  %v1259_v17 = vshra.s32 %v8268_v6, 16 }
 0x1a3   : > { %v7041_v42 = vpop.eup %7040  ;;  %7050 = vrcp.f32 %v4427_v36  ;;  %v8278_v2 = vsel %vm937_vm0, %v800_v39, -1e+30  ;;  %v8280_v61 = vpop.xlane.xlu0 %1004  ;;  %v6909_v36 = vld [vmem:[%s13048_s3 + $0x28] sm:$0xff]  }
 0x1a4   : > { %13746 = vst [vmem:[#allocation40_spill] sm:$0xff] %v8278_v2  ;;  %13747 = vst [vmem:[#allocation41_spill] sm:$0xff] %v8280_v61  ;;  %v8282_v49 = vpop.f32.mrb[75].mxu0  ;;  %7052 = vpow2.f32 %v6320_v11  ;;  %vm1131_vm2 = vcmp.eq.f32.partialorder %v7932_v63, %v8280_v61  ;;  %1076 = vmax.xlane.f32.xlu1 %v8278_v2  ;;  %v8288_v7 = vcvt.s32.f32 %v1259_v17  ;;  %v4616_v3 = vmul.f32 %v7041_v42, %v8195_v38 }
 0x1a5   : > { %v6321_v53 = vmul.f32 -1.442695, %v8282_v49  ;;  %v7043_v62 = vpop.eup %7042  ;;  %v8291_v47 = vsel %vm1131_vm2, %v7914_v54, 128  ;;  %6728 = vmatprep.subr.bf16.mxu1 %v6909_v36 }
 0x1a6   : > { %v7045_v52 = vpop.eup %7044  ;;  %v4617_v22 = vmul.f32 %v7043_v62, %v8203_v16  ;;  %v1273_v25 = vshra.s32 %v8291_v47, 16  ;;  %1262 = vmin.xlane.f32.xlu0 %v8288_v7  ;;  %6729 = vmatpush3.bf16.msra.mxu1 %v6909_v36 }
 0x1a7   : > { %7054 = vpow2.f32 %v6321_v53  ;;  %v4428_v11 = vadd.f32 1.0, %v7045_v52  ;;  %v8300_v39 = vpop.xlane.xlu1 %1006 }
 0x1a8   : > { %13748 = vst [vmem:[#allocation42_spill] sm:$0xff] %v8300_v39  ;;  %v7047_v17 = vpop.eup %7046  ;;  %v4665_v61 = vpack.c.bf16 %v4617_v22, %v4616_v3  ;;  %vm1132_vm3 = vcmp.eq.f32.partialorder %v7938_v1, %v8300_v39  ;;  %v806_v38 = vpop.f32.mrb[76].mxu0  ;;  %v8304_v48 = vcvt.s32.f32 %v1273_v25  ;;  %v6910_v3 = vld [vmem:[%s13048_s3 + $0x30] sm:$0xff]  }
 0x1a9   : > { %7056 = vrcp.f32 %v4428_v11  ;;  %v4429_v16 = vadd.f32 1.0, %v7047_v17  ;;  %v8306_v42 = vpop.f32.mrb[77].mxu0  ;;  %v8310_v52 = vsel %vm1132_vm3, %v7914_v54, 128  ;;  %6730 = vmatprep.subr.bf16.mxu1 %v6910_v3 }
 0x1aa   : > { %v6322_v53 = vmul.f32 -1.442695, %v8306_v42  ;;  %6683 = vmatmul.mubr.bf16.gmra.mrb[28].mxu1 %v4665_v61  ;;  %v810_v62 = vpop.f32.mrb[78].mxu0  ;;  %1276 = vmin.xlane.f32.xlu0 %v8304_v48  ;;  %v8326_v61 = vsel %vm937_vm0, %v806_v38, -1e+30 }
 0x1ab   : > { %v7049_v22 = vpop.eup %7048  ;;  %7058 = vrcp.f32 %v4429_v16  ;;  %v8318_v25 = vsel %vm937_vm0, %v810_v62, -1e+30  ;;  %v8320_v36 = vpop.xlane.xlu1 %1008  ;;  %13751 = vst [vmem:[#allocation45_spill] sm:$0xff] %v8326_v61  ;;  %v1287_v62 = vshra.s32 %v8310_v52, 16  ;;  %6731 = vmatpush3.bf16.msra.mxu1 %v6910_v3 }
 0x1ac   : > { %13749 = vst [vmem:[#allocation43_spill] sm:$0xff] %v8318_v25  ;;  %13750 = vst [vmem:[#allocation44_spill] sm:$0xff] %v8320_v36  ;;  %v8322_v11 = vpop.f32.mrb[79].mxu0  ;;  %7060 = vpow2.f32 %v6322_v53  ;;  %vm1133_vm4 = vcmp.eq.f32.partialorder %v7950_v9, %v8320_v36  ;;  %1080 = vmax.xlane.f32.xlu1 %v8318_v25  ;;  %v4618_v18 = vmul.f32 %v7049_v22, %v8213_v32  ;;  %v6911_v36 = vld [vmem:[%s13048_s3 + $0x38] sm:$0xff]  }
 0x1ad   : > { %v6323_v17 = vmul.f32 -1.442695, %v8322_v11  ;;  %v7051_v16 = vpop.eup %7050  ;;  %v8336_v38 = vsel %vm1133_vm4, %v7914_v54, 128  ;;  %6732 = vmatprep.subr.bf16.mxu1 %v6911_v36 }
 0x1ae   : > { %v7053_v39 = vpop.eup %7052  ;;  %v4619_v1 = vmul.f32 %v7051_v16, %v8224_v4  ;;  %13752 = vst [vmem:[#allocation46_spill] sm:$0xff] %v8336_v38  ;;  %1078 = vmax.xlane.f32.xlu0 %v8326_v61 }
 0x1af   : > { %7062 = vpow2.f32 %v6323_v17  ;;  %v4430_v53 = vadd.f32 1.0, %v7053_v39  ;;  %v8342_v56 = vpop.xlane.xlu0 %1010  ;;  %v8348_v17 = vcvt.s32.f32 %v1287_v62  ;;  %v1301_v39 = vshra.s32 %v8336_v38, 16  ;;  %6733 = vmatpush3.bf16.msra.mxu1 %v6911_v36 }
 0x1b0   : > { %v4666_v63 = vpack.c.bf16 %v4619_v1, %v4618_v18  ;;  %13753 = vst [vmem:[#allocation47_spill] sm:$0xff] %v8342_v56  ;;  %v816_v3 = vpop.f32.mrb[80].mxu0  ;;  %vm1134_vm6 = vcmp.eq.f32.partialorder %v7956_v15, %v8342_v56 }
 0x1b1   : > { %v7055_v9 = vpop.eup %7054  ;;  %7064 = vrcp.f32 %v4430_v53  ;;  %v8344_v22 = vpop.xlane.xlu1 %1012  ;;  %13755 = vst [vmem:[#allocation49_spill] sm:$0xff] %v8348_v17  ;;  %v8374_v15 = vsel %vm1134_vm6, %v7914_v54, 128 }
 0x1b2   : > { %v4431_v32 = vadd.f32 1.0, %v7055_v9  ;;  %13754 = vst [vmem:[#allocation48_spill] sm:$0xff] %v8344_v22  ;;  %v8346_v4 = vpop.f32.mrb[81].mxu0  ;;  %vm1135_vm5 = vcmp.eq.f32.partialorder %v7965_v20, %v8344_v22  ;;  %6686 = vmatprep.mubr.bf16.mxu1 %v4666_v63  ;;  %1290 = vmin.xlane.f32.xlu0 %v8348_v17 }
 0x1b3   : > { %v6324_v16 = vmul.f32 -1.442695, %v8346_v4  ;;  %v820_v1 = vpop.f32.mrb[82].mxu0  ;;  %v7057_v18 = vpop.eup %7056  ;;  %v8364_v53 = vsel %vm1135_vm5, %v7914_v54, 128 }
 0x1b4   : > { %7066 = vrcp.f32 %v4431_v32  ;;  %v8359_v9 = vsel %vm937_vm0, %v820_v1, -1e+30  ;;  %v8361_v62 = vpop.f32.mrb[83].mxu0  ;;  %13757 = vst [vmem:[#allocation51_spill] sm:$0xff] %v8364_v53  ;;  %v8368_v32 = vcvt.s32.f32 %v1301_v39  ;;  %v1329_v22 = vshra.s32 %v8364_v53, 16 }
 0x1b5   : > { %13756 = vst [vmem:[#allocation50_spill] sm:$0xff] %v8359_v9  ;;  %7068 = vpow2.f32 %v6324_v16  ;;  %v6325_v63 = vmul.f32 -1.442695, %v8361_v62  ;;  %1084 = vmax.xlane.f32.xlu1 %v8359_v9  ;;  %v7059_v36 = vpop.eup %7058  ;;  %v4620_v20 = vmul.f32 %v7057_v18, %v8237_v41  ;;  %v1315_v18 = vshra.s32 %v8374_v15, 16 }
 0x1b6   : > { %v7061_v56 = vpop.eup %7060  ;;  %v4621_v1 = vmul.f32 %v7059_v36, %v8248_v60  ;;  %1304 = vmin.xlane.f32.xlu0 %v8368_v32  ;;  %v8377_v16 = vcvt.s32.f32 %v1329_v22 }
 0x1b7   : > { %7070 = vpow2.f32 %v6325_v63  ;;  %v4432_v17 = vadd.f32 1.0, %v7061_v56  ;;  %v8379_v39 = vpop.xlane.xlu0 %1014  ;;  %v8389_v56 = vsel %vm937_vm0, %v816_v3, -1e+30 }
 0x1b8   : > { %13758 = vst [vmem:[#allocation52_spill] sm:$0xff] %v8377_v16  ;;  %v4667_v25 = vpack.c.bf16 %v4621_v1, %v4620_v20  ;;  %13759 = vst [vmem:[#allocation53_spill] sm:$0xff] %v8379_v39  ;;  %v826_v38 = vpop.f32.mrb[84].mxu0  ;;  %vm1136_vm8 = vcmp.eq.f32.partialorder %v7974_v28, %v8379_v39 }
 0x1b9   : > { %v7063_v9 = vpop.eup %7062  ;;  %7072 = vrcp.f32 %v4432_v17  ;;  %1332 = vmin.xlane.f32.xlu1 %v8377_v16  ;;  %v8382_v41 = vpop.xlane.xlu1 %1016  ;;  %13761 = vst [vmem:[#allocation55_spill] sm:$0xff] %v8389_v56 }
 0x1ba   : > { %v4433_v53 = vadd.f32 1.0, %v7063_v9  ;;  %13760 = vst [vmem:[#allocation54_spill] sm:$0xff] %v8382_v41  ;;  %v8384_v60 = vpop.f32.mrb[85].mxu0  ;;  %vm1137_vm7 = vcmp.eq.f32.partialorder %v7983_v34, %v8382_v41  ;;  %6687 = vmatmul.mubr.bf16.gmra.mrb[32].mxu1 %v4667_v25  ;;  %1082 = vmax.xlane.f32.xlu0 %v8389_v56  ;;  %v8414_v34 = vsel %vm1136_vm8, %v7914_v54, 128 }
 0x1bb   : > { %v6326_v20 = vmul.f32 -1.442695, %v8384_v60  ;;  %v830_v22 = vpop.f32.mrb[86].mxu0  ;;  %v7065_v17 = vpop.eup %7064  ;;  %v8404_v63 = vsel %vm1137_vm7, %v7914_v54, 128  ;;  %13764 = vst [vmem:[#allocation58_spill] sm:$0xff] %v8414_v34 }
 0x1bc   : > { %7074 = vrcp.f32 %v4433_v53  ;;  %v8399_v9 = vsel %vm937_vm0, %v830_v22, -1e+30  ;;  %v8401_v3 = vpop.f32.mrb[87].mxu0  ;;  %13763 = vst [vmem:[#allocation57_spill] sm:$0xff] %v8404_v63  ;;  %v8408_v53 = vcvt.s32.f32 %v1315_v18  ;;  %v1357_v1 = vshra.s32 %v8404_v63, 16 }
 0x1bd   : > { %13762 = vst [vmem:[#allocation56_spill] sm:$0xff] %v8399_v9  ;;  %7076 = vpow2.f32 %v6326_v20  ;;  %v6327_v25 = vmul.f32 -1.442695, %v8401_v3  ;;  %1088 = vmax.xlane.f32.xlu1 %v8399_v9  ;;  %v4622_v39 = vmul.f32 %v7065_v17, %v8265_v58  ;;  %v1343_v17 = vshra.s32 %v8414_v34, 16 }
 0x1be   : > { %v7067_v36 = vpop.eup %7066  ;;  %1318 = vmin.xlane.f32.xlu0 %v8408_v53  ;;  %v8417_v20 = vcvt.s32.f32 %v1357_v1 }
 0x1bf   : > { %v7069_v41 = vpop.eup %7068  ;;  %v4623_v22 = vmul.f32 %v7067_v36, %v8282_v49  ;;  %7078 = vpow2.f32 %v6327_v25  ;;  %v8419_v18 = vpop.xlane.xlu0 %1018 }
 0x1c0   : > { %v4434_v28 = vadd.f32 1.0, %v7069_v41  ;;  %13765 = vst [vmem:[#allocation59_spill] sm:$0xff] %v8417_v20  ;;  %13766 = vst [vmem:[#allocation60_spill] sm:$0xff] %v8419_v18  ;;  %v836_v56 = vpop.f32.mrb[88].mxu0  ;;  %v8429_v41 = vsel %vm937_vm0, %v826_v38, -1e+30  ;;  %vm1138_vm10 = vcmp.eq.f32.partialorder %v7994_v46, %v8419_v18 }
 0x1c1   : > { %v7071_v16 = vpop.eup %7070  ;;  %v4668_v9 = vpack.c.bf16 %v4623_v22, %v4622_v39  ;;  %1360 = vmin.xlane.f32.xlu1 %v8417_v20  ;;  %v8422_v58 = vpop.xlane.xlu1 %1020  ;;  %13768 = vst [vmem:[#allocation62_spill] sm:$0xff] %v8429_v41 }
 0x1c2   : > { %7080 = vrcp.f32 %v4434_v28  ;;  %v4435_v63 = vadd.f32 1.0, %v7071_v16  ;;  %13767 = vst [vmem:[#allocation61_spill] sm:$0xff] %v8422_v58  ;;  %v8424_v49 = vpop.f32.mrb[89].mxu0  ;;  %vm1139_vm9 = vcmp.eq.f32.partialorder %v8003_v51, %v8422_v58  ;;  %1086 = vmax.xlane.f32.xlu0 %v8429_v41  ;;  %v8454_v51 = vsel %vm1138_vm10, %v7914_v54, 128 }
 0x1c3   : > { %v6328_v39 = vmul.f32 -1.442695, %v8424_v49  ;;  %6690 = vmatprep.mubr.bf16.mxu1 %v4668_v9  ;;  %v840_v28 = vpop.f32.mrb[90].mxu0  ;;  %v7073_v16 = vpop.eup %7072  ;;  %v8444_v36 = vsel %vm1139_vm9, %v7914_v54, 128 }
 0x1c4   : > { %7082 = vrcp.f32 %v4435_v63  ;;  %v8439_v25 = vsel %vm937_vm0, %v840_v28, -1e+30  ;;  %v8441_v38 = vpop.f32.mrb[91].mxu0  ;;  %13770 = vst [vmem:[#allocation64_spill] sm:$0xff] %v8444_v36  ;;  %v8448_v63 = vcvt.s32.f32 %v1343_v17  ;;  %v1385_v22 = vshra.s32 %v8444_v36, 16 }
 0x1c5   : > { %13769 = vst [vmem:[#allocation63_spill] sm:$0xff] %v8439_v25  ;;  %7084 = vpow2.f32 %v6328_v39  ;;  %v6329_v9 = vmul.f32 -1.442695, %v8441_v38  ;;  %1092 = vmax.xlane.f32.xlu1 %v8439_v25  ;;  %v4624_v18 = vmul.f32 %v7073_v16, %v8306_v42  ;;  %v1371_v16 = vshra.s32 %v8454_v51, 16 }
 0x1c6   : > { %v7075_v1 = vpop.eup %7074  ;;  %1346 = vmin.xlane.f32.xlu0 %v8448_v63  ;;  %v8457_v39 = vcvt.s32.f32 %v1385_v22 }
 0x1c7   : > { %v7077_v58 = vpop.eup %7076  ;;  %v4625_v28 = vmul.f32 %v7075_v1, %v8322_v11  ;;  %7086 = vpow2.f32 %v6329_v9  ;;  %v8459_v17 = vpop.xlane.xlu0 %1022 }
 0x1c8   : > { %v4436_v46 = vadd.f32 1.0, %v7077_v58  ;;  %13771 = vst [vmem:[#allocation65_spill] sm:$0xff] %v8457_v39  ;;  %13772 = vst [vmem:[#allocation66_spill] sm:$0xff] %v8459_v17  ;;  %v846_v25 = vpop.f32.mrb[92].mxu0  ;;  %v8469_v58 = vsel %vm937_vm0, %v836_v56, -1e+30  ;;  %vm1140_vm12 = vcmp.eq.f32.partialorder %v8013_v5, %v8459_v17 }
 0x1c9   : > { %v7079_v20 = vpop.eup %7078  ;;  %v4669_v34 = vpack.c.bf16 %v4625_v28, %v4624_v18  ;;  %1388 = vmin.xlane.f32.xlu1 %v8457_v39  ;;  %v8462_v42 = vpop.xlane.xlu1 %1024  ;;  %13774 = vst [vmem:[#allocation68_spill] sm:$0xff] %v8469_v58 }
 0x1ca   : > { %7088 = vrcp.f32 %v4436_v46  ;;  %v4437_v36 = vadd.f32 1.0, %v7079_v20  ;;  %13773 = vst [vmem:[#allocation67_spill] sm:$0xff] %v8462_v42  ;;  %v8464_v11 = vpop.f32.mrb[93].mxu0  ;;  %vm1141_vm11 = vcmp.eq.f32.partialorder %v8021_v10, %v8462_v42  ;;  %1090 = vmax.xlane.f32.xlu0 %v8469_v58  ;;  %v8494_v10 = vsel %vm1140_vm12, %v7914_v54, 128 }
 0x1cb   : > { %v6330_v18 = vmul.f32 -1.442695, %v8464_v11  ;;  %6691 = vmatmul.mubr.bf16.gmra.mrb[36].mxu1 %v4669_v34  ;;  %v850_v46 = vpop.f32.mrb[94].mxu0  ;;  %v8484_v1 = vsel %vm1141_vm11, %v7914_v54, 128  ;;  %13777 = vst [vmem:[#allocation71_spill] sm:$0xff] %v8494_v10 }
 0x1cc   : > { %v7081_v20 = vpop.eup %7080  ;;  %7090 = vrcp.f32 %v4437_v36  ;;  %v8479_v9 = vsel %vm937_vm0, %v850_v46, -1e+30  ;;  %v8481_v56 = vpop.f32.mrb[95].mxu0  ;;  %13776 = vst [vmem:[#allocation70_spill] sm:$0xff] %v8484_v1  ;;  %v8488_v36 = vcvt.s32.f32 %v1371_v16  ;;  %v1413_v28 = vshra.s32 %v8484_v1, 16 }
 0x1cd   : > { %13775 = vst [vmem:[#allocation69_spill] sm:$0xff] %v8479_v9  ;;  %7092 = vpow2.f32 %v6330_v18  ;;  %v6331_v34 = vmul.f32 -1.442695, %v8481_v56  ;;  %1096 = vmax.xlane.f32.xlu1 %v8479_v9  ;;  %v4626_v17 = vmul.f32 %v7081_v20, %v8346_v4  ;;  %v8503_v4 = vsel %vm937_vm0, %v846_v25, -1e+30 }
 0x1ce   : > { %v7083_v22 = vpop.eup %7082  ;;  %1374 = vmin.xlane.f32.xlu0 %v8488_v36  ;;  %v8497_v18 = vcvt.s32.f32 %v1413_v28  ;;  %13780 = vst [vmem:[#allocation74_spill] sm:$0xff] %v8503_v4  ;;  %v1399_v20 = vshra.s32 %v8494_v10, 16 }
 0x1cf   : > { %v7085_v42 = vpop.eup %7084  ;;  %v4627_v46 = vmul.f32 %v7083_v22, %v8361_v62  ;;  %7094 = vpow2.f32 %v6331_v34  ;;  %v8499_v16 = vpop.xlane.xlu0 %1026 }
 0x1d0   : > { %v4438_v5 = vadd.f32 1.0, %v7085_v42  ;;  %13778 = vst [vmem:[#allocation72_spill] sm:$0xff] %v8497_v18  ;;  %13779 = vst [vmem:[#allocation73_spill] sm:$0xff] %v8499_v16  ;;  %v856_v58 = vpop.f32.mrb[96].mxu0  ;;  %vm1142_vm14 = vcmp.eq.f32.partialorder %v8031_v26, %v8499_v16 }
 0x1d1   : > { %v7087_v39 = vpop.eup %7086  ;;  %v4670_v9 = vpack.c.bf16 %v4627_v46, %v4626_v17  ;;  %1416 = vmin.xlane.f32.xlu1 %v8497_v18  ;;  %v8506_v62 = vpop.xlane.xlu1 %1028  ;;  %v8513_v17 = vsel %vm937_vm0, %v856_v58, -1e+30 }
 0x1d2   : > { %7096 = vrcp.f32 %v4438_v5  ;;  %v4439_v1 = vadd.f32 1.0, %v7087_v39  ;;  %13781 = vst [vmem:[#allocation75_spill] sm:$0xff] %v8506_v62  ;;  %v8508_v42 = vpop.f32.mrb[97].mxu0  ;;  %13782 = vst [vmem:[#allocation76_spill] sm:$0xff] %v8513_v17  ;;  %vm1143_vm13 = vcmp.eq.f32.partialorder %v8039_v31, %v8506_v62  ;;  %1094 = vmax.xlane.f32.xlu0 %v8503_v4  ;;  %v8534_v31 = vsel %vm1142_vm14, %v7914_v54, 128 }
 0x1d3   : > { %v6332_v5 = vmul.f32 -1.442695, %v8508_v42  ;;  %6694 = vmatprep.mubr.bf16.mxu1 %v4670_v9  ;;  %v860_v25 = vpop.f32.mrb[98].mxu0  ;;  %v8524_v22 = vsel %vm1143_vm13, %v7914_v54, 128  ;;  %v8528_v9 = vcvt.s32.f32 %v1399_v20 }
 0x1d4   : > { %v7089_v39 = vpop.eup %7088  ;;  %7098 = vrcp.f32 %v4439_v1  ;;  %v8521_v34 = vpop.f32.mrb[99].mxu0  ;;  %13783 = vst [vmem:[#allocation77_spill] sm:$0xff] %v8524_v22  ;;  %v1441_v1 = vshra.s32 %v8524_v22, 16 }
 0x1d5   : > { %7100 = vpow2.f32 %v6332_v5  ;;  %v6333_v58 = vmul.f32 -1.442695, %v8521_v34  ;;  %1098 = vmax.xlane.f32.xlu1 %v8513_v17  ;;  %v4628_v62 = vmul.f32 %v7089_v39, %v8384_v60  ;;  %v1427_v39 = vshra.s32 %v8534_v31, 16 }
 0x1d6   : > { %v7091_v28 = vpop.eup %7090  ;;  %1402 = vmin.xlane.f32.xlu0 %v8528_v9  ;;  %v8537_v5 = vcvt.s32.f32 %v1441_v1 }
 0x1d7   : > { %v7093_v46 = vpop.eup %7092  ;;  %v4629_v16 = vmul.f32 %v7091_v28, %v8401_v3  ;;  %7102 = vpow2.f32 %v6333_v58  ;;  %v8539_v20 = vpop.xlane.xlu0 %1030  ;;  %v8549_v58 = vsel %vm937_vm0, %v860_v25, -1e+30 }
 0x1d8   : > { %v4440_v26 = vadd.f32 1.0, %v7093_v46  ;;  %13784 = vst [vmem:[#allocation78_spill] sm:$0xff] %v8537_v5  ;;  %13785 = vst [vmem:[#allocation79_spill] sm:$0xff] %v8539_v20  ;;  %v866_v17 = vpop.f32.mrb[100].mxu0  ;;  %vm1144_vm1 = vcmp.eq.f32.partialorder %v8049_v45, %v8539_v20 }
 0x1d9   : > { %v7095_v18 = vpop.eup %7094  ;;  %v4671_v10 = vpack.c.bf16 %v4629_v16, %v4628_v62  ;;  %1444 = vmin.xlane.f32.xlu1 %v8537_v5  ;;  %v8542_v60 = vpop.xlane.xlu1 %1032  ;;  %13787 = vst [vmem:[#allocation81_spill] sm:$0xff] %v8549_v58 }
 0x1da   : > { %7104 = vrcp.f32 %v4440_v26  ;;  %v4441_v22 = vadd.f32 1.0, %v7095_v18  ;;  %13786 = vst [vmem:[#allocation80_spill] sm:$0xff] %v8542_v60  ;;  %v8544_v3 = vpop.f32.mrb[101].mxu0  ;;  %vm1145_vm15 = vcmp.eq.f32.partialorder %v8057_v50, %v8542_v60  ;;  %1100 = vmax.xlane.f32.xlu0 %v8549_v58  ;;  %v8574_v50 = vsel %vm1144_vm1, %v7914_v54, 128 }
 0x1db   : > { %v6334_v16 = vmul.f32 -1.442695, %v8544_v3  ;;  %6695 = vmatmul.mubr.bf16.gmra.mrb[40].mxu1 %v4671_v10  ;;  %v870_v26 = vpop.f32.mrb[102].mxu0  ;;  %v8564_v28 = vsel %vm1145_vm15, %v7914_v54, 128  ;;  %13790 = vst [vmem:[#allocation84_spill] sm:$0xff] %v8574_v50 }
 0x1dc   : > { %v7097_v18 = vpop.eup %7096  ;;  %7106 = vrcp.f32 %v4441_v22  ;;  %v8559_v62 = vsel %vm937_vm0, %v870_v26, -1e+30  ;;  %v8561_v25 = vpop.f32.mrb[103].mxu0  ;;  %13789 = vst [vmem:[#allocation83_spill] sm:$0xff] %v8564_v28  ;;  %v8568_v22 = vcvt.s32.f32 %v1427_v39  ;;  %v1469_v46 = vshra.s32 %v8564_v28, 16 }
 0x1dd   : > { %13788 = vst [vmem:[#allocation82_spill] sm:$0xff] %v8559_v62  ;;  %7108 = vpow2.f32 %v6334_v16  ;;  %v6335_v10 = vmul.f32 -1.442695, %v8561_v25  ;;  %1104 = vmax.xlane.f32.xlu1 %v8559_v62  ;;  %v4630_v20 = vmul.f32 %v7097_v18, %v8424_v49  ;;  %v1455_v18 = vshra.s32 %v8574_v50, 16 }
 0x1de   : > { %v7099_v1 = vpop.eup %7098  ;;  %1430 = vmin.xlane.f32.xlu0 %v8568_v22  ;;  %v8577_v16 = vcvt.s32.f32 %v1469_v46 }
 0x1df   : > { %v7101_v60 = vpop.eup %7100  ;;  %v4631_v26 = vmul.f32 %v7099_v1, %v8441_v38  ;;  %7110 = vpow2.f32 %v6335_v10  ;;  %v8579_v39 = vpop.xlane.xlu0 %1034 }
 0x1e0   : > { %v4442_v45 = vadd.f32 1.0, %v7101_v60  ;;  %13791 = vst [vmem:[#allocation85_spill] sm:$0xff] %v8577_v16  ;;  %13792 = vst [vmem:[#allocation86_spill] sm:$0xff] %v8579_v39  ;;  %v876_v58 = vpop.f32.mrb[104].mxu0  ;;  %v8589_v60 = vsel %vm937_vm0, %v866_v17, -1e+30  ;;  %vm1146_vm3 = vcmp.eq.f32.partialorder %v8067_v8, %v8579_v39 }
 0x1e1   : > { %v7103_v5 = vpop.eup %7102  ;;  %v4672_v62 = vpack.c.bf16 %v4631_v26, %v4630_v20  ;;  %1472 = vmin.xlane.f32.xlu1 %v8577_v16  ;;  %v8582_v49 = vpop.xlane.xlu1 %1036  ;;  %13794 = vst [vmem:[#allocation88_spill] sm:$0xff] %v8589_v60 }
 0x1e2   : > { %7112 = vrcp.f32 %v4442_v45  ;;  %v4443_v28 = vadd.f32 1.0, %v7103_v5  ;;  %13793 = vst [vmem:[#allocation87_spill] sm:$0xff] %v8582_v49  ;;  %v8584_v38 = vpop.f32.mrb[105].mxu0  ;;  %vm1147_vm2 = vcmp.eq.f32.partialorder %v8075_v12, %v8582_v49  ;;  %1102 = vmax.xlane.f32.xlu0 %v8589_v60  ;;  %v8614_v12 = vsel %vm1146_vm3, %v7914_v54, 128 }
 0x1e3   : > { %v6336_v20 = vmul.f32 -1.442695, %v8584_v38  ;;  %6698 = vmatprep.mubr.bf16.mxu1 %v4672_v62  ;;  %v880_v45 = vpop.f32.mrb[106].mxu0  ;;  %v8604_v1 = vsel %vm1147_vm2, %v7914_v54, 128 }
 0x1e4   : > { %v7105_v5 = vpop.eup %7104  ;;  %7114 = vrcp.f32 %v4443_v28  ;;  %v8599_v10 = vsel %vm937_vm0, %v880_v45, -1e+30  ;;  %v8601_v17 = vpop.f32.mrb[107].mxu0  ;;  %13796 = vst [vmem:[#allocation90_spill] sm:$0xff] %v8604_v1  ;;  %v8608_v28 = vcvt.s32.f32 %v1455_v18  ;;  %v1497_v26 = vshra.s32 %v8604_v1, 16 }
 0x1e5   : > { %13795 = vst [vmem:[#allocation89_spill] sm:$0xff] %v8599_v10  ;;  %7116 = vpow2.f32 %v6336_v20  ;;  %v6337_v62 = vmul.f32 -1.442695, %v8601_v17  ;;  %1108 = vmax.xlane.f32.xlu1 %v8599_v10  ;;  %v4632_v39 = vmul.f32 %v7105_v5, %v8464_v11  ;;  %v1483_v5 = vshra.s32 %v8614_v12, 16 }
 0x1e6   : > { %v7107_v46 = vpop.eup %7106  ;;  %1458 = vmin.xlane.f32.xlu0 %v8608_v28  ;;  %v8617_v20 = vcvt.s32.f32 %v1497_v26 }
 0x1e7   : > { %v7109_v49 = vpop.eup %7108  ;;  %v4633_v45 = vmul.f32 %v7107_v46, %v8481_v56  ;;  %7118 = vpow2.f32 %v6337_v62  ;;  %v8619_v18 = vpop.xlane.xlu0 %1038 }
 0x1e8   : > { %v4444_v8 = vadd.f32 1.0, %v7109_v49  ;;  %13797 = vst [vmem:[#allocation91_spill] sm:$0xff] %v8617_v20  ;;  %13798 = vst [vmem:[#allocation92_spill] sm:$0xff] %v8619_v18  ;;  %v886_v10 = vpop.f32.mrb[108].mxu0  ;;  %v8629_v49 = vsel %vm937_vm0, %v876_v58, -1e+30  ;;  %vm1148_vm5 = vcmp.eq.f32.partialorder %v8085_v21, %v8619_v18 }
 0x1e9   : > { %v7111_v16 = vpop.eup %7110  ;;  %v4673_v50 = vpack.c.bf16 %v4633_v45, %v4632_v39  ;;  %1500 = vmin.xlane.f32.xlu1 %v8617_v20  ;;  %v8622_v11 = vpop.xlane.xlu1 %1040  ;;  %13800 = vst [vmem:[#allocation94_spill] sm:$0xff] %v8629_v49 }
 0x1ea   : > { %7120 = vrcp.f32 %v4444_v8  ;;  %v4445_v1 = vadd.f32 1.0, %v7111_v16  ;;  %13799 = vst [vmem:[#allocation93_spill] sm:$0xff] %v8622_v11  ;;  %v8624_v56 = vpop.f32.mrb[109].mxu0  ;;  %vm1149_vm4 = vcmp.eq.f32.partialorder %v8093_v37, %v8622_v11  ;;  %1106 = vmax.xlane.f32.xlu0 %v8629_v49  ;;  %v8654_v37 = vsel %vm1148_vm5, %v7914_v54, 128 }
 0x1eb   : > { %v6338_v39 = vmul.f32 -1.442695, %v8624_v56  ;;  %6699 = vmatmul.mubr.bf16.gmra.mrb[44].mxu1 %v4673_v50  ;;  %v890_v8 = vpop.f32.mrb[110].mxu0  ;;  %v8644_v46 = vsel %vm1149_vm4, %v7914_v54, 128  ;;  %13803 = vst [vmem:[#allocation97_spill] sm:$0xff] %v8654_v37 }
 0x1ec   : > { %v7113_v16 = vpop.eup %7112  ;;  %7122 = vrcp.f32 %v4445_v1  ;;  %v8639_v62 = vsel %vm937_vm0, %v890_v8, -1e+30  ;;  %v8641_v58 = vpop.f32.mrb[111].mxu0  ;;  %13802 = vst [vmem:[#allocation96_spill] sm:$0xff] %v8644_v46  ;;  %v8648_v1 = vcvt.s32.f32 %v1483_v5  ;;  %v1525_v45 = vshra.s32 %v8644_v46, 16 }
 0x1ed   : > { %13801 = vst [vmem:[#allocation95_spill] sm:$0xff] %v8639_v62  ;;  %7124 = vpow2.f32 %v6338_v39  ;;  %v6339_v50 = vmul.f32 -1.442695, %v8641_v58  ;;  %1112 = vmax.xlane.f32.xlu1 %v8639_v62  ;;  %v4634_v18 = vmul.f32 %v7113_v16, %v8508_v42  ;;  %v1511_v16 = vshra.s32 %v8654_v37, 16 }
 0x1ee   : > { %v7115_v26 = vpop.eup %7114  ;;  %1486 = vmin.xlane.f32.xlu0 %v8648_v1  ;;  %v8657_v39 = vcvt.s32.f32 %v1525_v45 }
 0x1ef   : > { %v7117_v11 = vpop.eup %7116  ;;  %v4635_v8 = vmul.f32 %v7115_v26, %v8521_v34  ;;  %7126 = vpow2.f32 %v6339_v50  ;;  %v8659_v5 = vpop.xlane.xlu0 %1042 }
 0x1f0   : > { %v4446_v21 = vadd.f32 1.0, %v7117_v11  ;;  %13804 = vst [vmem:[#allocation98_spill] sm:$0xff] %v8657_v39  ;;  %13805 = vst [vmem:[#allocation99_spill] sm:$0xff] %v8659_v5  ;;  %v896_v49 = vpop.f32.mrb[112].mxu0  ;;  %v8669_v11 = vsel %vm937_vm0, %v886_v10, -1e+30  ;;  %vm1150_vm7 = vcmp.eq.f32.partialorder %v8103_v55, %v8659_v5 }
 0x1f1   : > { %v7119_v20 = vpop.eup %7118  ;;  %v4674_v62 = vpack.c.bf16 %v4635_v8, %v4634_v18  ;;  %1528 = vmin.xlane.f32.xlu1 %v8657_v39  ;;  %v8662_v42 = vpop.xlane.xlu1 %1044  ;;  %13807 = vst [vmem:[#allocation101_spill] sm:$0xff] %v8669_v11 }
 0x1f2   : > { %7128 = vrcp.f32 %v4446_v21  ;;  %v4447_v46 = vadd.f32 1.0, %v7119_v20  ;;  %13806 = vst [vmem:[#allocation100_spill] sm:$0xff] %v8662_v42  ;;  %v8664_v34 = vpop.f32.mrb[113].mxu0  ;;  %vm1151_vm6 = vcmp.eq.f32.partialorder %v8111_v59, %v8662_v42  ;;  %1110 = vmax.xlane.f32.xlu0 %v8669_v11  ;;  %v8694_v59 = vsel %vm1150_vm7, %v7914_v54, 128 }
 0x1f3   : > { %v6340_v18 = vmul.f32 -1.442695, %v8664_v34  ;;  %6702 = vmatprep.mubr.bf16.mxu1 %v4674_v62  ;;  %v900_v21 = vpop.f32.mrb[114].mxu0  ;;  %v8684_v26 = vsel %vm1151_vm6, %v7914_v54, 128 }
 0x1f4   : > { %v7121_v20 = vpop.eup %7120  ;;  %7130 = vrcp.f32 %v4447_v46  ;;  %v8679_v50 = vsel %vm937_vm0, %v900_v21, -1e+30  ;;  %v8681_v10 = vpop.f32.mrb[115].mxu0  ;;  %13809 = vst [vmem:[#allocation103_spill] sm:$0xff] %v8684_v26  ;;  %v8688_v46 = vcvt.s32.f32 %v1511_v16  ;;  %v1553_v8 = vshra.s32 %v8684_v26, 16 }
 0x1f5   : > { %13808 = vst [vmem:[#allocation102_spill] sm:$0xff] %v8679_v50  ;;  %7132 = vpow2.f32 %v6340_v18  ;;  %v6341_v62 = vmul.f32 -1.442695, %v8681_v10  ;;  %1116 = vmax.xlane.f32.xlu1 %v8679_v50  ;;  %v4636_v5 = vmul.f32 %v7121_v20, %v8544_v3  ;;  %v1539_v20 = vshra.s32 %v8694_v59, 16 }
 0x1f6   : > { %v7123_v45 = vpop.eup %7122  ;;  %1514 = vmin.xlane.f32.xlu0 %v8688_v46  ;;  %v8697_v18 = vcvt.s32.f32 %v1553_v8 }
 0x1f7   : > { %v7125_v42 = vpop.eup %7124  ;;  %v4637_v21 = vmul.f32 %v7123_v45, %v8561_v25  ;;  %7134 = vpow2.f32 %v6341_v62  ;;  %v8699_v16 = vpop.xlane.xlu0 %1046 }
 0x1f8   : > { %v4448_v55 = vadd.f32 1.0, %v7125_v42  ;;  %13810 = vst [vmem:[#allocation104_spill] sm:$0xff] %v8697_v18  ;;  %13811 = vst [vmem:[#allocation105_spill] sm:$0xff] %v8699_v16  ;;  %v906_v50 = vpop.f32.mrb[116].mxu0  ;;  %v8709_v42 = vsel %vm937_vm0, %v896_v49, -1e+30  ;;  %vm1152_vm9 = vcmp.eq.f32.partialorder %v8121_v19, %v8699_v16 }
 0x1f9   : > { %v7127_v39 = vpop.eup %7126  ;;  %v4675_v37 = vpack.c.bf16 %v4637_v21, %v4636_v5  ;;  %1556 = vmin.xlane.f32.xlu1 %v8697_v18  ;;  %v8702_v3 = vpop.xlane.xlu1 %1048  ;;  %13813 = vst [vmem:[#allocation107_spill] sm:$0xff] %v8709_v42 }
 0x1fa   : > { %7136 = vrcp.f32 %v4448_v55  ;;  %v4449_v26 = vadd.f32 1.0, %v7127_v39  ;;  %13812 = vst [vmem:[#allocation106_spill] sm:$0xff] %v8702_v3  ;;  %v8704_v25 = vpop.f32.mrb[117].mxu0  ;;  %vm1153_vm8 = vcmp.eq.f32.partialorder %v8129_v24, %v8702_v3  ;;  %1114 = vmax.xlane.f32.xlu0 %v8709_v42  ;;  %v8734_v24 = vsel %vm1152_vm9, %v7914_v54, 128 }
 0x1fb   : > { %v6342_v5 = vmul.f32 -1.442695, %v8704_v25  ;;  %6703 = vmatmul.mubr.bf16.gmra.mrb[48].mxu1 %v4675_v37  ;;  %v910_v55 = vpop.f32.mrb[118].mxu0  ;;  %v8724_v45 = vsel %vm1153_vm8, %v7914_v54, 128  ;;  %13816 = vst [vmem:[#allocation110_spill] sm:$0xff] %v8734_v24 }
 0x1fc   : > { %v7129_v39 = vpop.eup %7128  ;;  %7138 = vrcp.f32 %v4449_v26  ;;  %v8719_v62 = vsel %vm937_vm0, %v910_v55, -1e+30  ;;  %v8721_v49 = vpop.f32.mrb[119].mxu0  ;;  %13815 = vst [vmem:[#allocation109_spill] sm:$0xff] %v8724_v45  ;;  %v8728_v26 = vcvt.s32.f32 %v1539_v20  ;;  %v1581_v21 = vshra.s32 %v8724_v45, 16 }
 0x1fd   : > { %13814 = vst [vmem:[#allocation108_spill] sm:$0xff] %v8719_v62  ;;  %7140 = vpow2.f32 %v6342_v5  ;;  %v6343_v37 = vmul.f32 -1.442695, %v8721_v49  ;;  %1120 = vmax.xlane.f32.xlu1 %v8719_v62  ;;  %v4638_v16 = vmul.f32 %v7129_v39, %v8584_v38  ;;  %v1567_v39 = vshra.s32 %v8734_v24, 16 }
 0x1fe   : > { %v7131_v8 = vpop.eup %7130  ;;  %1542 = vmin.xlane.f32.xlu0 %v8728_v26  ;;  %v8737_v5 = vcvt.s32.f32 %v1581_v21 }
 0x1ff   : > { %v7133_v3 = vpop.eup %7132  ;;  %v4639_v55 = vmul.f32 %v7131_v8, %v8601_v17  ;;  %7142 = vpow2.f32 %v6343_v37  ;;  %v8739_v20 = vpop.xlane.xlu0 %1050 }
 0x200   : > { %v4450_v19 = vadd.f32 1.0, %v7133_v3  ;;  %13817 = vst [vmem:[#allocation111_spill] sm:$0xff] %v8737_v5  ;;  %13818 = vst [vmem:[#allocation112_spill] sm:$0xff] %v8739_v20  ;;  %v916_v42 = vpop.f32.mrb[120].mxu0  ;;  %v8749_v3 = vsel %vm937_vm0, %v906_v50, -1e+30  ;;  %vm1154_vm11 = vcmp.eq.f32.partialorder %v8139_v44, %v8739_v20 }
 0x201   : > { %v7135_v18 = vpop.eup %7134  ;;  %v4676_v62 = vpack.c.bf16 %v4639_v55, %v4638_v16  ;;  %1584 = vmin.xlane.f32.xlu1 %v8737_v5  ;;  %v8742_v38 = vpop.xlane.xlu1 %1052  ;;  %13820 = vst [vmem:[#allocation114_spill] sm:$0xff] %v8749_v3 }
 0x202   : > { %7144 = vrcp.f32 %v4450_v19  ;;  %v4451_v45 = vadd.f32 1.0, %v7135_v18  ;;  %13819 = vst [vmem:[#allocation113_spill] sm:$0xff] %v8742_v38  ;;  %v8744_v17 = vpop.f32.mrb[121].mxu0  ;;  %vm1155_vm10 = vcmp.eq.f32.partialorder %v8147_v35, %v8742_v38  ;;  %1118 = vmax.xlane.f32.xlu0 %v8749_v3  ;;  %v8774_v35 = vsel %vm1154_vm11, %v7914_v54, 128 }
 0x203   : > { %v6344_v16 = vmul.f32 -1.442695, %v8744_v17  ;;  %6706 = vmatprep.mubr.bf16.mxu1 %v4676_v62  ;;  %v920_v19 = vpop.f32.mrb[122].mxu0  ;;  %v8764_v8 = vsel %vm1155_vm10, %v7914_v54, 128 }
 0x204   : > { %v7137_v18 = vpop.eup %7136  ;;  %7146 = vrcp.f32 %v4451_v45  ;;  %v8759_v37 = vsel %vm937_vm0, %v920_v19, -1e+30  ;;  %v8761_v50 = vpop.f32.mrb[123].mxu0  ;;  %13822 = vst [vmem:[#allocation116_spill] sm:$0xff] %v8764_v8  ;;  %v8768_v45 = vcvt.s32.f32 %v1567_v39  ;;  %v1609_v55 = vshra.s32 %v8764_v8, 16 }
 0x205   : > { %13821 = vst [vmem:[#allocation115_spill] sm:$0xff] %v8759_v37  ;;  %7148 = vpow2.f32 %v6344_v16  ;;  %v6345_v62 = vmul.f32 -1.442695, %v8761_v50  ;;  %1124 = vmax.xlane.f32.xlu1 %v8759_v37  ;;  %v4640_v20 = vmul.f32 %v7137_v18, %v8624_v56  ;;  %v1595_v18 = vshra.s32 %v8774_v35, 16 }
 0x206   : > { %v7139_v21 = vpop.eup %7138  ;;  %13823 = vst [vmem:[#allocation117_spill] sm:$0xff] %v8768_v45  ;;  %1570 = vmin.xlane.f32.xlu0 %v8768_v45  ;;  %v8779_v5 = vcvt.s32.f32 %v1609_v55 }
 0x207   : > { %v7141_v38 = vpop.eup %7140  ;;  %v4641_v19 = vmul.f32 %v7139_v21, %v8641_v58  ;;  %7150 = vpow2.f32 %v6345_v62  ;;  %v8777_v16 = vpop.xlane.xlu0 %1054 }
 0x208   : > { %v4452_v44 = vadd.f32 1.0, %v7141_v38  ;;  %13824 = vst [vmem:[#allocation118_spill] sm:$0xff] %v8777_v16  ;;  %13825 = vst [vmem:[#allocation119_spill] sm:$0xff] %v8779_v5  ;;  %v926_v24 = vpop.f32.mrb[124].mxu0  ;;  %v8789_v38 = vsel %vm937_vm0, %v916_v42, -1e+30  ;;  %vm1156_vm12 = vcmp.eq.f32.partialorder %v8157_v14, %v8777_v16 }
 0x209   : > { %v7143_v39 = vpop.eup %7142  ;;  %v4677_v37 = vpack.c.bf16 %v4641_v19, %v4640_v20  ;;  %1612 = vmin.xlane.f32.xlu1 %v8779_v5  ;;  %v8782_v56 = vpop.xlane.xlu1 %1056  ;;  %13827 = vst [vmem:[#allocation121_spill] sm:$0xff] %v8789_v38 }
 0x20a   : > { %7152 = vrcp.f32 %v4452_v44  ;;  %v4453_v8 = vadd.f32 1.0, %v7143_v39  ;;  %13826 = vst [vmem:[#allocation120_spill] sm:$0xff] %v8782_v56  ;;  %v8784_v58 = vpop.f32.mrb[125].mxu0  ;;  %vm1157_vm13 = vcmp.eq.f32.partialorder %v8165_v23, %v8782_v56  ;;  %1122 = vmax.xlane.f32.xlu0 %v8789_v38 }
 0x20b   : > { %v6346_v44 = vmul.f32 -1.442695, %v8784_v58  ;;  %6707 = vmatmul.mubr.bf16.gmra.mrb[52].mxu1 %v4677_v37  ;;  %v930_v20 = vpop.f32.mrb[126].mxu0  ;;  %v8804_v55 = vsel %vm1157_vm13, %v7914_v54, 128 }
 0x20c   : > { %v7145_v62 = vpop.eup %7144  ;;  %7154 = vrcp.f32 %v4453_v8  ;;  %v8799_v21 = vsel %vm937_vm0, %v930_v20, -1e+30  ;;  %v8801_v42 = vpop.f32.mrb[127].mxu0  ;;  %13829 = vst [vmem:[#allocation123_spill] sm:$0xff] %v8804_v55  ;;  %v8810_v8 = vcvt.s32.f32 %v1595_v18  ;;  %v1637_v56 = vshra.s32 %v8804_v55, 16 }
 0x20d   : > { %13828 = vst [vmem:[#allocation122_spill] sm:$0xff] %v8799_v21  ;;  %7156 = vpow2.f32 %v6346_v44  ;;  %v6347_v19 = vmul.f32 -1.442695, %v8801_v42  ;;  %1128 = vmax.xlane.f32.xlu1 %v8799_v21  ;;  %v8808_v37 = vpop.f32.mrb[0].mxu1  ;;  %v8817_v20 = vsel %vm1156_vm12, %v7914_v54, 128  ;;  %v4642_v44 = vmul.f32 %v7145_v62, %v8664_v34 }
 0x20e   : > { %v7147_v39 = vpop.eup %7146  ;;  %13830 = vst [vmem:[#allocation124_spill] sm:$0xff] %v8810_v8  ;;  %v6358_v21 = vmul.f32 -1.442695, %v8808_v37  ;;  %v8822_v38 = vpop.f32.mrb[1].mxu1  ;;  %v8826_v55 = vsel %vm937_vm0, %v926_v24, -1e+30  ;;  %1598 = vmin.xlane.f32.xlu0 %v8810_v8  ;;  %v8834_v34 = vcvt.s32.f32 %v1637_v56 }
 0x20f   : > { %v7149_v23 = vpop.eup %7148  ;;  %v4643_v5 = vmul.f32 %v7147_v39, %v8681_v10  ;;  %7158 = vpow2.f32 %v6347_v19  ;;  %13831 = vst [vmem:[#allocation125_spill] sm:$0xff] %v8826_v55  ;;  %v6356_v45 = vmul.f32 -1.442695, %v8822_v38  ;;  %v8830_v16 = vpop.f32.mrb[2].mxu1  ;;  %v1623_v56 = vshra.s32 %v8817_v20, 16 }
 0x210   : > { %v4454_v18 = vadd.f32 1.0, %v7149_v23  ;;  %v8832_v14 = vpop.xlane.xlu0 %1058  ;;  %13833 = vst [vmem:[#allocation127_spill] sm:$0xff] %v8834_v34  ;;  %7160 = vpow2.f32 %v6358_v21  ;;  %v6359_v19 = vmul.f32 -1.442695, %v8830_v16  ;;  %v8839_v24 = vpop.f32.mrb[3].mxu1 }
 0x211   : > { %13832 = vst [vmem:[#allocation126_spill] sm:$0xff] %v8832_v14  ;;  %v7151_v10 = vpop.eup %7150  ;;  %v4678_v62 = vpack.c.bf16 %v4643_v5, %v4642_v44  ;;  %vm1158_vm14 = vcmp.eq.f32.partialorder %v8175_v43, %v8832_v14  ;;  %v6357_v39 = vmul.f32 -1.442695, %v8839_v24  ;;  %1640 = vmin.xlane.f32.xlu1 %v8834_v34  ;;  %v8843_v8 = vpop.xlane.xlu1 %1060 }
 0x212   : > { %7162 = vrcp.f32 %v4454_v18  ;;  %v4455_v23 = vadd.f32 1.0, %v7151_v10  ;;  %13834 = vst [vmem:[#allocation128_spill] sm:$0xff] %v8843_v8  ;;  %vm1159_vm0 = vcmp.eq.f32.partialorder %v8183_v13, %v8843_v8  ;;  %v8849_v5 = vsel %vm1158_vm14, %v7914_v54, 128  ;;  %1126 = vmax.xlane.f32.xlu0 %v8826_v55 }
 0x213   : > { %7164 = vpow2.f32 %v6356_v45  ;;  %6710 = vmatprep.mubr.bf16.mxu1 %v4678_v62  ;;  %v8853_v44 = vsel %vm1159_vm0, %v7914_v54, 128  ;;  %v8856_v45 = vcvt.s32.f32 %v1623_v56  ;;  %v1651_v8 = vshra.s32 %v8849_v5, 16 }
 0x214   : > { %v7153_v21 = vpop.eup %7152  ;;  %7166 = vrcp.f32 %v4455_v23  ;;  %13835 = vst [vmem:[#allocation129_spill] sm:$0xff] %v8853_v44  ;;  %v1665_v18 = vshra.s32 %v8853_v44, 16 }
 0x215   : > { %7168 = vpow2.f32 %v6359_v19  ;;  %v4644_v14 = vmul.f32 %v7153_v21, %v8704_v25  ;;  %v8874_v56 = vcvt.s32.f32 %v1651_v8 }
 0x216   : > { %v7155_v10 = vpop.eup %7154  ;;  %7170 = vpow2.f32 %v6357_v39  ;;  %v8861_v23 = vcvt.s32.f32 %v1665_v18  ;;  %1626 = vmin.xlane.f32.xlu0 %v8856_v45 }
 0x217   : > { %v7157_v62 = vpop.eup %7156  ;;  %v4645_v13 = vmul.f32 %v7155_v10, %v8721_v49  ;;  %v8864_v34 = vpop.xlane.xlu0 %1062  ;;  %13840 = vst [vmem:[#allocation134_spill] sm:$0xff] %v8874_v56 }
 0x218   : > { %13836 = vst [vmem:[#allocation130_spill] sm:$0xff] %v8861_v23  ;;  %v4456_v43 = vadd.f32 1.0, %v7157_v62  ;;  %13837 = vst [vmem:[#allocation131_spill] sm:$0xff] %v8864_v34  ;;  %vm1160_vm15 = vcmp.eq.f32.partialorder %v8193_v33, %v8864_v34  ;;  %1668 = vmin.xlane.f32.xlu1 %v8861_v23 }
 0x219   : > { %v7159_v19 = vpop.eup %7158  ;;  %v4679_v44 = vpack.c.bf16 %v4645_v13, %v4644_v14  ;;  %v8870_v25 = vsel %vm1160_vm15, %v7914_v54, 128  ;;  %v8872_v49 = vpop.xlane.xlu1 %1064 }
 0x21a   : > { %7172 = vrcp.f32 %v4456_v43  ;;  %v4457_v39 = vadd.f32 1.0, %v7159_v19  ;;  %13838 = vst [vmem:[#allocation132_spill] sm:$0xff] %v8870_v25  ;;  %13839 = vst [vmem:[#allocation133_spill] sm:$0xff] %v8872_v49  ;;  %v7161_v21 = vpop.eup %7160  ;;  %vm1161_vm1 = vcmp.eq.f32.partialorder %v8201_v30, %v8872_v49  ;;  %v1679_v14 = vshra.s32 %v8870_v25, 16  ;;  %1654 = vmin.xlane.f32.xlu0 %v8874_v56 }
 0x21b   : > { %6711 = vmatmul.mubr.bf16.gmra.mrb[56].mxu1 %v4679_v44  ;;  %v5229_v18 = vadd.f32 1.0, %v7161_v21  ;;  %v8881_v43 = vsel %vm1161_vm1, %v7914_v54, 128 }
 0x21c   : > { %v7163_v13 = vpop.eup %7162  ;;  %7174 = vrcp.f32 %v4457_v39  ;;  %v8883_v62 = vcvt.s32.f32 %v1679_v14  ;;  %v1693_v8 = vshra.s32 %v8881_v43, 16 }
 0x21d   : > { %v7165_v10 = vpop.eup %7164  ;;  %v4646_v34 = vmul.f32 %v7163_v13, %v8744_v17  ;;  %v8887_v44 = vpop.f32.mrb[4].mxu1  ;;  %7176 = vrcp.f32 %v5229_v18 }
 0x21e   : > { %v7167_v19 = vpop.eup %7166  ;;  %v5227_v49 = vadd.f32 1.0, %v7165_v10  ;;  %v6362_v21 = vmul.f32 -1.442695, %v8887_v44  ;;  %v8891_v33 = vpop.f32.mrb[5].mxu1  ;;  %v8893_v23 = vcvt.s32.f32 %v1693_v8  ;;  %1682 = vmin.xlane.f32.xlu0 %v8883_v62 }
 0x21f   : > { %v7169_v30 = vpop.eup %7168  ;;  %v4647_v39 = vmul.f32 %v7167_v19, %v8761_v50  ;;  %v6360_v25 = vmul.f32 -1.442695, %v8891_v33  ;;  %v8897_v17 = vpop.f32.mrb[6].mxu1 }
 0x220   : > { %13841 = vst [vmem:[#allocation135_spill] sm:$0xff] %v8893_v23  ;;  %v7171_v14 = vpop.eup %7170  ;;  %7178 = vrcp.f32 %v5227_v49  ;;  %v5230_v56 = vadd.f32 1.0, %v7169_v30  ;;  %v8899_v13 = vpop.xlane.xlu0 %1066  ;;  %v6363_v18 = vmul.f32 -1.442695, %v8897_v17  ;;  %1696 = vmin.xlane.f32.xlu1 %v8893_v23 }
 0x221   : > { %13842 = vst [vmem:[#allocation136_spill] sm:$0xff] %v8899_v13  ;;  %v4680_v10 = vpack.c.bf16 %v4647_v39, %v4646_v34  ;;  %v5228_v50 = vadd.f32 1.0, %v7171_v14  ;;  %7180 = vpow2.f32 %v6362_v21  ;;  %v8902_v19 = vpop.f32.mrb[7].mxu1  ;;  %vm1162_vm2 = vcmp.eq.f32.partialorder %v8211_v27, %v8899_v13  ;;  %v8908_v49 = vpop.xlane.xlu1 %1068 }
 0x222   : > { %7182 = vrcp.f32 %v5230_v56  ;;  %v6361_v30 = vmul.f32 -1.442695, %v8902_v19  ;;  %13843 = vst [vmem:[#allocation137_spill] sm:$0xff] %v8908_v49  ;;  %v8911_v8 = vsel %vm1162_vm2, %v7914_v54, 128  ;;  %vm1163_vm3 = vcmp.eq.f32.partialorder %v8222_v0, %v8908_v49 }
 0x223   : > { %7184 = vrcp.f32 %v5228_v50  ;;  %6714 = vmatprep.mubr.bf16.mxu1 %v4680_v10  ;;  %v1707_v39 = vshra.s32 %v8911_v8, 16  ;;  %v8917_v56 = vsel %vm1163_vm3, %v7914_v54, 128 }
 0x224   : > { %v7173_v34 = vpop.eup %7172  ;;  %7186 = vpow2.f32 %v6360_v25  ;;  %13844 = vst [vmem:[#allocation138_spill] sm:$0xff] %v8917_v56  ;;  %v1721_v21 = vshra.s32 %v8917_v56, 16 }
 0x225   : > { %7188 = vpow2.f32 %v6363_v18  ;;  %v8920_v50 = vcvt.s32.f32 %v1707_v39  ;;  %v4648_v13 = vmul.f32 %v7173_v34, %v8784_v58 }
 0x226   : > { %v7175_v14 = vpop.eup %7174  ;;  %7190 = vpow2.f32 %v6361_v30  ;;  %v8924_v49 = vcvt.s32.f32 %v1721_v21 }
 0x227   : > { %13845 = vst [vmem:[#allocation139_spill] sm:$0xff] %v8920_v50  ;;  %v4649_v27 = vmul.f32 %v7175_v14, %v8801_v42  ;;  %1710 = vmin.xlane.f32.xlu0 %v8920_v50  ;;  %v8927_v25 = vpop.xlane.xlu0 %1070  ;;  %v7177_v10 = vpop.eup %7176 }
 0x228   : > { %13846 = vst [vmem:[#allocation140_spill] sm:$0xff] %v8924_v49  ;;  %13847 = vst [vmem:[#allocation141_spill] sm:$0xff] %v8927_v25  ;;  %vm1164_vm4 = vcmp.eq.f32.partialorder %v8235_v40, %v8927_v25  ;;  %1724 = vmin.xlane.f32.xlu1 %v8924_v49  ;;  %v5421_v14 = vmul.f32 %v7177_v10, %v8808_v37 }
 0x229   : > { %v4681_v0 = vpack.c.bf16 %v4649_v27, %v4648_v13  ;;  %v8933_v30 = vsel %vm1164_vm4, %v7914_v54, 128  ;;  %v8935_v58 = vpop.xlane.xlu1 %1072 }
 0x22a   : > { %v7179_v18 = vpop.eup %7178  ;;  %13848 = vst [vmem:[#allocation142_spill] sm:$0xff] %v8933_v30  ;;  %13849 = vst [vmem:[#allocation143_spill] sm:$0xff] %v8935_v58  ;;  %vm1165_vm5 = vcmp.eq.f32.partialorder %v8246_v57, %v8935_v58  ;;  %v1735_v34 = vshra.s32 %v8933_v30, 16 }
 0x22b   : > { %v7181_v42 = vpop.eup %7180  ;;  %6715 = vmatmul.mubr.bf16.gmra.mrb[60].mxu1 %v4681_v0  ;;  %v8941_v13 = vsel %vm1165_vm5, %v7914_v54, 128  ;;  %v5419_v58 = vmul.f32 %v7179_v18, %v8822_v38 }
 0x22c   : > { %v7183_v39 = vpop.eup %7182  ;;  %v5233_v27 = vadd.f32 1.0, %v7181_v42  ;;  %v8945_v40 = vcvt.s32.f32 %v1735_v34  ;;  %v1749_v49 = vshra.s32 %v8941_v13, 16 }
 0x22d   : > { %v7185_v21 = vpop.eup %7184  ;;  %v5422_v25 = vmul.f32 %v7183_v39, %v8830_v16  ;;  %v8950_v57 = vpop.f32.mrb[8].mxu1  ;;  %v1258_v16 = vand.u32 65535, %v8268_v6 }
 0x22e   : > { %v7187_v50 = vpop.eup %7186  ;;  %v5420_v0 = vmul.f32 %v7185_v21, %v8839_v24  ;;  %v8952_v56 = vpop.f32.mrb[9].mxu1  ;;  %1738 = vmin.xlane.f32.xlu0 %v8945_v40  ;;  %v8955_v37 = vcvt.s32.f32 %v1749_v49  ;;  %7192 = vrcp.f32 %v5233_v27  ;;  %v6366_v38 = vmul.f32 -1.442695, %v8950_v57 }
 0x22f   : > { %v7189_v42 = vpop.eup %7188  ;;  %v5484_v30 = vpack.c.bf16 %v5422_v25, %v5421_v14  ;;  %v5231_v23 = vadd.f32 1.0, %v7187_v50  ;;  %v8959_v24 = vpop.f32.mrb[10].mxu1  ;;  %v6364_v25 = vmul.f32 -1.442695, %v8952_v56  ;;  %v1272_v14 = vand.u32 65535, %v8291_v47 }
 0x230   : > { %v7191_v10 = vpop.eup %7190  ;;  %v5483_v34 = vpack.c.bf16 %v5420_v0, %v5419_v58  ;;  %v5234_v39 = vadd.f32 1.0, %v7189_v42  ;;  %v8961_v18 = vpop.xlane.xlu0 %1074  ;;  %1752 = vmin.xlane.f32.xlu1 %v8955_v37  ;;  %v6367_v6 = vmul.f32 -1.442695, %v8959_v24 }
 0x231   : > { %13850 = vst [vmem:[#allocation144_spill] sm:$0xff] %v8961_v18  ;;  %7194 = vrcp.f32 %v5231_v23  ;;  %v5232_v50 = vadd.f32 1.0, %v7191_v10  ;;  %vm1166_vm6 = vcmp.eq.f32.partialorder %v8263_v29, %v8961_v18  ;;  %v8966_v49 = vpop.f32.mrb[11].mxu1  ;;  %v8973_v27 = vpop.xlane.xlu1 %1076  ;;  %v1260_v10 = vcvt.s32.f32 %v1258_v16 }
 0x232   : > { %7196 = vrcp.f32 %v5234_v39  ;;  %v8971_v58 = vsel %vm1166_vm6, %v7914_v54, 128  ;;  %6734 = vmatprep.mubr.bf16.mxu1 %v5483_v34  ;;  %13851 = vst [vmem:[#allocation145_spill] sm:$0xff] %v8973_v27  ;;  %v6365_v23 = vmul.f32 -1.442695, %v8966_v49  ;;  %vm1167_vm7 = vcmp.eq.f32.partialorder %v8278_v2, %v8973_v27 }
 0x233   : > { %7198 = vrcp.f32 %v5232_v50  ;;  %6735 = vmatmul.mubr.bf16.vlgmr.msra.gmra.mrb[64].mxu1 %v5484_v30  ;;  %v1763_v21 = vshra.s32 %v8971_v58, 16  ;;  %v8987_v30 = vsel %vm1167_vm7, %v7914_v54, 128  ;;  %v1274_v47 = vcvt.s32.f32 %v1272_v14 }
 0x234   : > { %7200 = vpow2.f32 %v6366_v38  ;;  %v8980_v0 = vpop.xlane.xlu0 %1262  ;;  %13852 = vst [vmem:[#allocation146_spill] sm:$0xff] %v8987_v30  ;;  %v1777_v16 = vshra.s32 %v8987_v30, 16 }
 0x235   : > { %7202 = vpow2.f32 %v6364_v25  ;;  %v8982_v42 = vcvt.s32.f32 %v1763_v21  ;;  %vm1264_vm8 = vcmp.eq.f32.partialorder %v8288_v7, %v8980_v0  ;;  %v1286_v7 = vand.u32 65535, %v8310_v52 }
 0x236   : > { %7204 = vpow2.f32 %v6367_v6  ;;  %v1265_v34 = vsel %vm1264_vm8, %v1260_v10, inf }
 0x237   : > { %7206 = vpow2.f32 %v6365_v23  ;;  %1766 = vmin.xlane.f32.xlu0 %v8982_v42  ;;  %1266 = vmin.xlane.f32.xlu1 %v1265_v34 }
 0x238   : > { %v8990_v39 = vpop.xlane.xlu0 %1276  ;;  %v7193_v38 = vpop.eup %7192 }
 0x239   : > { %13853 = vst [vmem:[#allocation147_spill] sm:$0xff] %v8990_v39  ;;  %vm1278_vm9 = vcmp.eq.f32.partialorder %v8304_v48, %v8990_v39  ;;  %v5425_v21 = vmul.f32 %v7193_v38, %v8887_v44  ;;  %v9002_v18 = vpop.xlane.xlu1 %1080 }
 0x23a   : > { %v1279_v25 = vsel %vm1278_vm9, %v1274_v47, inf  ;;  %13855 = vst [vmem:[#allocation149_spill] sm:$0xff] %v9002_v18  ;;  %v9008_v47 = vcvt.s32.f32 %v1777_v16 }
 0x23b   : > { %v7195_v50 = vpop.eup %7194  ;;  %1280 = vmin.xlane.f32.xlu1 %v1279_v25 }
 0x23c   : > { %v7197_v6 = vpop.eup %7196  ;;  %v8998_v34 = vpop.xlane.xlu0 %1078  ;;  %v5423_v27 = vmul.f32 %v7195_v50, %v8891_v33  ;;  %13856 = vst [vmem:[#allocation150_spill] sm:$0xff] %v9008_v47  ;;  %v1288_v33 = vcvt.s32.f32 %v1286_v7 }
 0x23d   : > { %v7199_v23 = vpop.eup %7198  ;;  %v5426_v10 = vmul.f32 %v7197_v6, %v8897_v17  ;;  %13854 = vst [vmem:[#allocation148_spill] sm:$0xff] %v8998_v34  ;;  %vm1168_vm10 = vcmp.eq.f32.partialorder %v8326_v61, %v8998_v34  ;;  %v9006_v52 = vpop.f32.mrb[12].mxu1 }
 0x23e   : > { %v7201_v14 = vpop.eup %7200  ;;  %v5424_v48 = vmul.f32 %v7199_v23, %v8902_v19  ;;  %v9011_v17 = vsel %vm1168_vm10, %v7914_v54, 128  ;;  %v9013_v6 = vpop.f32.mrb[13].mxu1  ;;  %v13858_v19 = vld [vmem:[#allocation46_spill] sm:$0xff] }
 0x23f   : > { %v7203_v25 = vpop.eup %7202  ;;  %v5486_v44 = vpack.c.bf16 %v5426_v10, %v5425_v21  ;;  %v5237_v38 = vadd.f32 1.0, %v7201_v14  ;;  %13857 = vst [vmem:[#allocation151_spill] sm:$0xff] %v9011_v17  ;;  %v1300_v23 = vand.u32 65535, %v13858_v19  ;;  %1780 = vmin.xlane.f32.xlu1 %v9008_v47  ;;  %v9017_v34 = vpop.f32.mrb[14].mxu1  ;;  %v1791_v16 = vshra.s32 %v9011_v17, 16  ;;  %v13859_v10 = vld [vmem:[#allocation43_spill] sm:$0xff] }
 0x240   : > { %v7205_v50 = vpop.eup %7204  ;;  %v5485_v2 = vpack.c.bf16 %v5424_v48, %v5423_v27  ;;  %v5235_v29 = vadd.f32 1.0, %v7203_v25  ;;  %vm1169_vm11 = vcmp.eq.f32.partialorder %v13859_v10, %v9002_v18  ;;  %v6370_v14 = vmul.f32 -1.442695, %v9006_v52  ;;  %v9023_v7 = vpop.xlane.xlu0 %1290  ;;  %v13864_v47 = vld [vmem:[#allocation49_spill] sm:$0xff]  ;;  %v13870_v18 = vld [vmem:[#allocation55_spill] sm:$0xff] }
 0x241   : > { %v7207_v61 = vpop.eup %7206  ;;  %7208 = vrcp.f32 %v5237_v38  ;;  %v5238_v21 = vadd.f32 1.0, %v7205_v50  ;;  %13860 = vst [vmem:[#allocation46_spill] sm:$0xff] %v9023_v7  ;;  %v9025_v30 = vpop.f32.mrb[15].mxu1  ;;  %v6368_v48 = vmul.f32 -1.442695, %v9013_v6  ;;  %v13862_v38 = vld [vmem:[#allocation50_spill] sm:$0xff]  ;;  %v9033_v50 = vcvt.s32.f32 %v1791_v16 }
 0x242   : > { %7210 = vrcp.f32 %v5235_v29  ;;  %v5236_v27 = vadd.f32 1.0, %v7207_v61  ;;  %v6371_v25 = vmul.f32 -1.442695, %v9017_v34  ;;  %6738 = vmatprep.mubr.bf16.mxu1 %v5485_v2  ;;  %v9029_v19 = vpop.xlane.xlu1 %1084  ;;  %vm1292_vm13 = vcmp.eq.f32.partialorder %v13864_v47, %v9023_v7 }
 0x243   : > { %13861 = vst [vmem:[#allocation152_spill] sm:$0xff] %v9029_v19  ;;  %7212 = vrcp.f32 %v5238_v21  ;;  %6739 = vmatmul.mubr.bf16.gmra.mrb[68].mxu1 %v5486_v44  ;;  %vm1171_vm12 = vcmp.eq.f32.partialorder %v13862_v38, %v9029_v19  ;;  %13863 = vst [vmem:[#allocation153_spill] sm:$0xff] %v9033_v50  ;;  %v9041_v29 = vsel %vm1169_vm11, %v7914_v54, 128  ;;  %v6369_v2 = vmul.f32 -1.442695, %v9025_v30  ;;  %1794 = vmin.xlane.f32.xlu0 %v9033_v50 }
 0x244   : > { %7214 = vrcp.f32 %v5236_v27  ;;  %13865 = vst [vmem:[#allocation49_spill] sm:$0xff] %v9041_v29  ;;  %v1293_v61 = vsel %vm1292_vm13, %v1288_v33, inf  ;;  %v9045_v44 = vpop.xlane.xlu0 %1304  ;;  %v1302_v16 = vcvt.s32.f32 %v1300_v23  ;;  %v9048_v47 = vsel %vm1171_vm12, %v7914_v54, 128 }
 0x245   : > { %7216 = vpow2.f32 %v6370_v14  ;;  %1294 = vmin.xlane.f32.xlu1 %v1293_v61  ;;  %13866 = vst [vmem:[#allocation154_spill] sm:$0xff] %v9045_v44  ;;  %13867 = vst [vmem:[#allocation155_spill] sm:$0xff] %v9048_v47  ;;  %vm1306_vm14 = vcmp.eq.f32.partialorder %v8368_v32, %v9045_v44  ;;  %v1805_v33 = vshra.s32 %v9041_v29, 16  ;;  %v13868_v14 = vld [vmem:[#allocation51_spill] sm:$0xff]  ;;  %v1314_v61 = vand.u32 65535, %v8374_v15  ;;  %v13876_v29 = vld [vmem:[#allocation52_spill] sm:$0xff] }
 0x246   : > { %7218 = vpow2.f32 %v6368_v48  ;;  %v9052_v21 = vpop.xlane.xlu1 %1332  ;;  %v1307_v27 = vsel %vm1306_vm14, %v1302_v16, inf  ;;  %v1328_v19 = vand.u32 65535, %v13868_v14  ;;  %v1833_v48 = vshra.s32 %v9048_v47, 16  ;;  %v13874_v14 = vld [vmem:[#allocation56_spill] sm:$0xff] }
 0x247   : > { %7220 = vpow2.f32 %v6371_v25  ;;  %v9067_v38 = vcvt.s32.f32 %v1805_v33  ;;  %vm1334_vm1 = vcmp.eq.f32.partialorder %v13876_v29, %v9052_v21 }
 0x248   : > { %7222 = vpow2.f32 %v6369_v2  ;;  %v9057_v23 = vpop.xlane.xlu0 %1082  ;;  %v1330_v47 = vcvt.s32.f32 %v1328_v19 }
 0x249   : > { %1308 = vmin.xlane.f32.xlu1 %v1307_v27  ;;  %13869 = vst [vmem:[#allocation51_spill] sm:$0xff] %v9057_v23  ;;  %vm1170_vm0 = vcmp.eq.f32.partialorder %v13870_v18, %v9057_v23  ;;  %13873 = vst [vmem:[#allocation158_spill] sm:$0xff] %v9067_v38  ;;  %v9075_v23 = vcvt.s32.f32 %v1833_v48  ;;  %v1316_v18 = vcvt.s32.f32 %v1314_v61 }
 0x24a   : > { %v9063_v25 = vsel %vm1170_vm0, %v7914_v54, 128  ;;  %v9065_v16 = vpop.xlane.xlu1 %1088 }
 0x24b   : > { %v7209_v32 = vpop.eup %7208  ;;  %13871 = vst [vmem:[#allocation156_spill] sm:$0xff] %v9063_v25  ;;  %13872 = vst [vmem:[#allocation157_spill] sm:$0xff] %v9065_v16  ;;  %vm1173_vm15 = vcmp.eq.f32.partialorder %v13874_v14, %v9065_v16  ;;  %v1819_v15 = vshra.s32 %v9063_v25, 16 }
 0x24c   : > { %v7211_v2 = vpop.eup %7210  ;;  %v9073_v10 = vpop.xlane.xlu0 %1318  ;;  %13875 = vst [vmem:[#allocation159_spill] sm:$0xff] %v9075_v23  ;;  %v5429_v50 = vmul.f32 %v7209_v32, %v8950_v57  ;;  %v9093_v61 = vsel %vm1173_vm15, %v7914_v54, 128 }
 0x24d   : > { %v7213_v27 = vpop.eup %7212  ;;  %1808 = vmin.xlane.f32.xlu1 %v9067_v38  ;;  %v9081_v17 = vpop.f32.mrb[16].mxu1  ;;  %v9083_v25 = vcvt.s32.f32 %v1819_v15  ;;  %vm1320_vm2 = vcmp.eq.f32.partialorder %v8408_v53, %v9073_v10  ;;  %v5427_v48 = vmul.f32 %v7211_v2, %v8952_v56  ;;  %13878 = vst [vmem:[#allocation160_spill] sm:$0xff] %v9093_v61 }
 0x24e   : > { %v7215_v33 = vpop.eup %7214  ;;  %v5430_v44 = vmul.f32 %v7213_v27, %v8959_v24  ;;  %v6374_v57 = vmul.f32 -1.442695, %v9081_v17  ;;  %v9096_v24 = vpop.xlane.xlu1 %1360 }
 0x24f   : > { %13877 = vst [vmem:[#allocation52_spill] sm:$0xff] %v9083_v25  ;;  %v7217_v38 = vpop.eup %7216  ;;  %v5428_v19 = vmul.f32 %v7215_v33, %v8966_v49  ;;  %13879 = vst [vmem:[#allocation161_spill] sm:$0xff] %v9096_v24  ;;  %v9098_v32 = vpop.f32.mrb[17].mxu1  ;;  %1822 = vmin.xlane.f32.xlu0 %v9083_v25  ;;  %v1335_v49 = vsel %vm1334_vm1, %v1330_v47, inf  ;;  %v1861_v47 = vshra.s32 %v9093_v61, 16 }
 0x250   : > { %v7219_v15 = vpop.eup %7218  ;;  %v5488_v27 = vpack.c.bf16 %v5430_v44, %v5429_v50  ;;  %v5241_v7 = vadd.f32 1.0, %v7217_v38  ;;  %v9101_v56 = vpop.f32.mrb[18].mxu1  ;;  %7224 = vpow2.f32 %v6374_v57  ;;  %v1321_v38 = vsel %vm1320_vm2, %v1316_v18, inf }
 0x251   : > { %v7221_v2 = vpop.eup %7220  ;;  %v5487_v33 = vpack.c.bf16 %v5428_v19, %v5427_v48  ;;  %v5239_v16 = vadd.f32 1.0, %v7219_v15  ;;  %1836 = vmin.xlane.f32.xlu1 %v9075_v23  ;;  %v9107_v14 = vpop.xlane.xlu0 %1086  ;;  %v6372_v29 = vmul.f32 -1.442695, %v9098_v32  ;;  %v6375_v19 = vmul.f32 -1.442695, %v9101_v56 }
 0x252   : > { %13880 = vst [vmem:[#allocation162_spill] sm:$0xff] %v9107_v14  ;;  %v9109_v39 = vpop.f32.mrb[19].mxu1  ;;  %v7223_v50 = vpop.eup %7222  ;;  %7226 = vrcp.f32 %v5241_v7  ;;  %v5242_v44 = vadd.f32 1.0, %v7221_v2  ;;  %vm1172_vm3 = vcmp.eq.f32.partialorder %v8429_v41, %v9107_v14  ;;  %v13883_v7 = vld [vmem:[#allocation63_spill] sm:$0xff] }
 0x253   : > { %7228 = vrcp.f32 %v5239_v16  ;;  %v5240_v48 = vadd.f32 1.0, %v7223_v50  ;;  %6742 = vmatprep.mubr.bf16.mxu1 %v5487_v33  ;;  %v9119_v57 = vpop.xlane.xlu1 %1092  ;;  %v9122_v53 = vsel %vm1172_vm3, %v7914_v54, 128  ;;  %v6373_v18 = vmul.f32 -1.442695, %v9109_v39  ;;  %1322 = vmin.xlane.f32.xlu0 %v1321_v38  ;;  %v13884_v16 = vld [vmem:[#allocation57_spill] sm:$0xff]  ;;  %v13886_v50 = vld [vmem:[#allocation58_spill] sm:$0xff] }
 0x254   : > { %13881 = vst [vmem:[#allocation163_spill] sm:$0xff] %v9119_v57  ;;  %7230 = vrcp.f32 %v5242_v44  ;;  %13882 = vst [vmem:[#allocation164_spill] sm:$0xff] %v9122_v53  ;;  %6743 = vmatmul.mubr.bf16.gmra.mrb[72].mxu1 %v5488_v27  ;;  %vm1175_vm4 = vcmp.eq.f32.partialorder %v13883_v7, %v9119_v57  ;;  %v1356_v15 = vand.u32 65535, %v13884_v16  ;;  %v1847_v33 = vshra.s32 %v9122_v53, 16 }
 0x255   : > { %7232 = vrcp.f32 %v5240_v48  ;;  %1336 = vmin.xlane.f32.xlu1 %v1335_v49  ;;  %v9128_v2 = vpop.xlane.xlu0 %1346  ;;  %v1342_v44 = vand.u32 65535, %v13886_v50  ;;  %v9133_v14 = vsel %vm1175_vm4, %v7914_v54, 128  ;;  %v9139_v38 = vcvt.s32.f32 %v1861_v47  ;;  %v13890_v49 = vld [vmem:[#allocation59_spill] sm:$0xff]  ;;  %v13891_v48 = vld [vmem:[#allocation64_spill] sm:$0xff] }
 0x256   : > { %13885 = vst [vmem:[#allocation57_spill] sm:$0xff] %v9128_v2  ;;  %7234 = vpow2.f32 %v6372_v29  ;;  %13887 = vst [vmem:[#allocation58_spill] sm:$0xff] %v9133_v14  ;;  %v9137_v41 = vcvt.s32.f32 %v1847_v33  ;;  %vm1362_vm5 = vcmp.eq.f32.partialorder %v13890_v49, %v9096_v24  ;;  %v1384_v16 = vand.u32 65535, %v13891_v48  ;;  %v13893_v47 = vld [vmem:[#allocation68_spill] sm:$0xff] }
 0x257   : > { %7236 = vpow2.f32 %v6375_v19  ;;  %v9135_v27 = vpop.xlane.xlu1 %1388  ;;  %13889 = vst [vmem:[#allocation166_spill] sm:$0xff] %v9139_v38  ;;  %v1370_v57 = vand.u32 65535, %v8454_v51  ;;  %vm1348_vm6 = vcmp.eq.f32.partialorder %v8448_v63, %v9128_v2  ;;  %v1358_v19 = vcvt.s32.f32 %v1356_v15 }
 0x258   : > { %13888 = vst [vmem:[#allocation165_spill] sm:$0xff] %v9137_v41  ;;  %7238 = vpow2.f32 %v6373_v18  ;;  %1850 = vmin.xlane.f32.xlu0 %v9137_v41  ;;  %v1344_v18 = vcvt.s32.f32 %v1342_v44  ;;  %v1889_v33 = vshra.s32 %v9133_v14, 16  ;;  %v13896_v41 = vld [vmem:[#allocation69_spill] sm:$0xff] }
 0x259   : > { %1864 = vmin.xlane.f32.xlu1 %v9139_v38  ;;  %v9147_v29 = vpop.xlane.xlu0 %1090  ;;  %v1363_v48 = vsel %vm1362_vm5, %v1358_v19, inf }
 0x25a   : > { %13892 = vst [vmem:[#allocation59_spill] sm:$0xff] %v9147_v29  ;;  %vm1174_vm7 = vcmp.eq.f32.partialorder %v13893_v47, %v9147_v29  ;;  %v7225_v50 = vpop.eup %7224  ;;  %v1349_v63 = vsel %vm1348_vm6, %v1344_v18, inf  ;;  %v1372_v29 = vcvt.s32.f32 %v1370_v57  ;;  %v1386_v47 = vcvt.s32.f32 %v1384_v16  ;;  %v13899_v18 = vld [vmem:[#allocation65_spill] sm:$0xff] }
 0x25b   : > { %v9155_v49 = vsel %vm1174_vm7, %v7914_v54, 128  ;;  %v9157_v51 = vpop.xlane.xlu1 %1096  ;;  %v5245_v38 = vadd.f32 1.0, %v7225_v50  ;;  %v9171_v2 = vcvt.s32.f32 %v1889_v33  ;;  %vm1390_vm9 = vcmp.eq.f32.partialorder %v13899_v18, %v9135_v27 }
 0x25c   : > { %13894 = vst [vmem:[#allocation64_spill] sm:$0xff] %v9155_v49  ;;  %13895 = vst [vmem:[#allocation167_spill] sm:$0xff] %v9157_v51  ;;  %v7227_v7 = vpop.eup %7226  ;;  %vm1177_vm8 = vcmp.eq.f32.partialorder %v13896_v41, %v9157_v51  ;;  %v1875_v15 = vshra.s32 %v9155_v49, 16  ;;  %1350 = vmin.xlane.f32.xlu0 %v1349_v63 }
 0x25d   : > { %v7229_v24 = vpop.eup %7228  ;;  %1364 = vmin.xlane.f32.xlu1 %v1363_v48  ;;  %v9162_v44 = vpop.xlane.xlu0 %1374  ;;  %v9165_v61 = vsel %vm1177_vm8, %v7914_v54, 128  ;;  %13898 = vst [vmem:[#allocation169_spill] sm:$0xff] %v9171_v2  ;;  %v5433_v48 = vmul.f32 %v7227_v7, %v9006_v52  ;;  %7240 = vrcp.f32 %v5245_v38 }
 0x25e   : > { %v7231_v14 = vpop.eup %7230  ;;  %13897 = vst [vmem:[#allocation168_spill] sm:$0xff] %v9165_v61  ;;  %v9167_v19 = vpop.f32.mrb[20].mxu1  ;;  %v9169_v50 = vcvt.s32.f32 %v1875_v15  ;;  %v5431_v63 = vmul.f32 %v7229_v24, %v9013_v6  ;;  %vm1376_vm10 = vcmp.eq.f32.partialorder %v8488_v36, %v9162_v44 }
 0x25f   : > { %v7233_v51 = vpop.eup %7232  ;;  %v5434_v57 = vmul.f32 %v7231_v14, %v9017_v34  ;;  %v6378_v16 = vmul.f32 -1.442695, %v9167_v19  ;;  %v9179_v41 = vpop.xlane.xlu1 %1416 }
 0x260   : > { %v9181_v49 = vpop.f32.mrb[21].mxu1  ;;  %v7235_v15 = vpop.eup %7234  ;;  %v5432_v33 = vmul.f32 %v7233_v51, %v9025_v30  ;;  %1878 = vmin.xlane.f32.xlu0 %v9169_v50  ;;  %v1917_v30 = vshra.s32 %v9165_v61, 16 }
 0x261   : > { %v6376_v53 = vmul.f32 -1.442695, %v9181_v49  ;;  %v9185_v23 = vpop.f32.mrb[22].mxu1  ;;  %v7237_v52 = vpop.eup %7236  ;;  %v5490_v6 = vpack.c.bf16 %v5434_v57, %v5433_v48  ;;  %v5243_v34 = vadd.f32 1.0, %v7235_v15  ;;  %7242 = vpow2.f32 %v6378_v16  ;;  %1892 = vmin.xlane.f32.xlu1 %v9171_v2 }
 0x262   : > { %v9191_v14 = vpop.xlane.xlu0 %1094  ;;  %v9193_v24 = vpop.f32.mrb[23].mxu1  ;;  %v5489_v38 = vpack.c.bf16 %v5432_v33, %v5431_v63  ;;  %v5246_v51 = vadd.f32 1.0, %v7237_v52  ;;  %v6379_v25 = vmul.f32 -1.442695, %v9185_v23  ;;  %v13903_v63 = vld [vmem:[#allocation76_spill] sm:$0xff]  ;;  %v1391_v33 = vsel %vm1390_vm9, %v1386_v47, inf }
 0x263   : > { %13900 = vst [vmem:[#allocation65_spill] sm:$0xff] %v9191_v14  ;;  %v7239_v7 = vpop.eup %7238  ;;  %7244 = vpow2.f32 %v6376_v53  ;;  %vm1176_vm11 = vcmp.eq.f32.partialorder %v8503_v4, %v9191_v14  ;;  %v6377_v57 = vmul.f32 -1.442695, %v9193_v24  ;;  %v9200_v16 = vpop.xlane.xlu1 %1098  ;;  %v1377_v53 = vsel %vm1376_vm10, %v1372_v29, inf  ;;  %v13909_v47 = vld [vmem:[#allocation77_spill] sm:$0xff]  ;;  %v13915_v4 = vld [vmem:[#allocation82_spill] sm:$0xff] }
 0x264   : > { %7246 = vrcp.f32 %v5243_v34  ;;  %v5244_v48 = vadd.f32 1.0, %v7239_v7  ;;  %13901 = vst [vmem:[#allocation170_spill] sm:$0xff] %v9200_v16  ;;  %v9203_v15 = vsel %vm1176_vm11, %v7914_v54, 128  ;;  %6746 = vmatprep.mubr.bf16.mxu1 %v5489_v38  ;;  %vm1178_vm12 = vcmp.eq.f32.partialorder %v13903_v63, %v9200_v16  ;;  %1378 = vmin.xlane.f32.xlu0 %v1377_v53  ;;  %v13904_v7 = vld [vmem:[#allocation71_spill] sm:$0xff] }
 0x265   : > { %7248 = vrcp.f32 %v5246_v51  ;;  %13902 = vst [vmem:[#allocation171_spill] sm:$0xff] %v9203_v15  ;;  %6747 = vmatmul.mubr.bf16.gmra.mrb[76].mxu1 %v5490_v6  ;;  %v1903_v34 = vshra.s32 %v9203_v15, 16  ;;  %v1398_v38 = vand.u32 65535, %v13904_v7  ;;  %1392 = vmin.xlane.f32.xlu1 %v1391_v33  ;;  %v13905_v51 = vld [vmem:[#allocation70_spill] sm:$0xff]  ;;  %v9219_v36 = vsel %vm1178_vm12, %v7914_v54, 128  ;;  %v13911_v33 = vld [vmem:[#allocation81_spill] sm:$0xff] }
 0x266   : > { %7250 = vrcp.f32 %v5244_v48  ;;  %v9213_v52 = vpop.xlane.xlu0 %1402  ;;  %v1412_v16 = vand.u32 65535, %v13905_v51  ;;  %13906 = vst [vmem:[#allocation71_spill] sm:$0xff] %v9219_v36  ;;  %v9225_v18 = vcvt.s32.f32 %v1917_v30  ;;  %v1440_v48 = vand.u32 65535, %v13909_v47  ;;  %v13912_v30 = vld [vmem:[#allocation72_spill] sm:$0xff] }
 0x267   : > { %7252 = vpow2.f32 %v6379_v25  ;;  %v9221_v29 = vpop.xlane.xlu1 %1444  ;;  %v9223_v6 = vcvt.s32.f32 %v1903_v34  ;;  %v1426_v53 = vand.u32 65535, %v8534_v31  ;;  %vm1404_vm13 = vcmp.eq.f32.partialorder %v8528_v9, %v9213_v52 }
 0x268   : > { %7254 = vpow2.f32 %v6377_v57  ;;  %13908 = vst [vmem:[#allocation172_spill] sm:$0xff] %v9225_v18  ;;  %v7241_v57 = vpop.eup %7240  ;;  %v1400_v34 = vcvt.s32.f32 %v1398_v38  ;;  %vm1418_vm0 = vcmp.eq.f32.partialorder %v13912_v30, %v9179_v41  ;;  %v1931_v7 = vshra.s32 %v9219_v36, 16 }
 0x269   : > { %13907 = vst [vmem:[#allocation70_spill] sm:$0xff] %v9223_v6  ;;  %1906 = vmin.xlane.f32.xlu0 %v9223_v6  ;;  %1920 = vmin.xlane.f32.xlu1 %v9225_v18  ;;  %v1414_v14 = vcvt.s32.f32 %v1412_v16  ;;  %v1428_v6 = vcvt.s32.f32 %v1426_v53  ;;  %v1442_v61 = vcvt.s32.f32 %v1440_v48  ;;  %v5437_v2 = vmul.f32 %v7241_v57, %v9081_v17 }
 0x26a   : > { %v9230_v25 = vpop.xlane.xlu0 %1100  ;;  %v1405_v18 = vsel %vm1404_vm13, %v1400_v34, inf  ;;  %v9256_v34 = vcvt.s32.f32 %v1931_v7 }
 0x26b   : > { %13910 = vst [vmem:[#allocation77_spill] sm:$0xff] %v9230_v25  ;;  %vm1179_vm14 = vcmp.eq.f32.partialorder %v13911_v33, %v9230_v25  ;;  %v7243_v31 = vpop.eup %7242  ;;  %v9243_v47 = vpop.xlane.xlu1 %1104  ;;  %v1419_v30 = vsel %vm1418_vm0, %v1414_v14, inf }
 0x26c   : > { %v9241_v51 = vsel %vm1179_vm14, %v7914_v54, 128  ;;  %13914 = vst [vmem:[#allocation173_spill] sm:$0xff] %v9243_v47  ;;  %v5249_v63 = vadd.f32 1.0, %v7243_v31  ;;  %vm1181_vm15 = vcmp.eq.f32.partialorder %v13915_v4, %v9243_v47  ;;  %13917 = vst [vmem:[#allocation175_spill] sm:$0xff] %v9256_v34 }
 0x26d   : > { %13913 = vst [vmem:[#allocation72_spill] sm:$0xff] %v9241_v51  ;;  %v7245_v9 = vpop.eup %7244  ;;  %v1945_v38 = vshra.s32 %v9241_v51, 16  ;;  %1406 = vmin.xlane.f32.xlu0 %v1405_v18  ;;  %v9252_v16 = vsel %vm1181_vm15, %v7914_v54, 128  ;;  %1420 = vmin.xlane.f32.xlu1 %v1419_v30  ;;  %v9254_v31 = vpop.f32.mrb[24].mxu1 }
 0x26e   : > { %v7247_v25 = vpop.eup %7246  ;;  %v5247_v33 = vadd.f32 1.0, %v7245_v9  ;;  %v9248_v36 = vpop.xlane.xlu0 %1430  ;;  %13916 = vst [vmem:[#allocation174_spill] sm:$0xff] %v9252_v16  ;;  %7256 = vrcp.f32 %v5249_v63  ;;  %v6382_v48 = vmul.f32 -1.442695, %v9254_v31 }
 0x26f   : > { %v7249_v15 = vpop.eup %7248  ;;  %v9258_v47 = vcvt.s32.f32 %v1945_v38  ;;  %v5435_v14 = vmul.f32 %v7247_v25, %v9098_v32  ;;  %v9263_v53 = vpop.xlane.xlu1 %1472  ;;  %vm1432_vm1 = vcmp.eq.f32.partialorder %v8568_v22, %v9248_v36  ;;  %v13925_v22 = vld [vmem:[#allocation84_spill] sm:$0xff] }
 0x270   : > { %v7251_v9 = vpop.eup %7250  ;;  %v5438_v18 = vmul.f32 %v7249_v15, %v9101_v56  ;;  %v9265_v17 = vpop.f32.mrb[25].mxu1  ;;  %7258 = vrcp.f32 %v5247_v33 }
 0x271   : > { %13918 = vst [vmem:[#allocation176_spill] sm:$0xff] %v9258_v47  ;;  %v7253_v57 = vpop.eup %7252  ;;  %v5436_v30 = vmul.f32 %v7251_v9, %v9109_v39  ;;  %v6380_v7 = vmul.f32 -1.442695, %v9265_v17  ;;  %v9269_v38 = vpop.f32.mrb[26].mxu1  ;;  %7260 = vpow2.f32 %v6382_v48  ;;  %1934 = vmin.xlane.f32.xlu0 %v9256_v34  ;;  %1948 = vmin.xlane.f32.xlu1 %v9258_v47  ;;  %v13920_v9 = vld [vmem:[#allocation78_spill] sm:$0xff]  ;;  %v1433_v48 = vsel %vm1432_vm1, %v1428_v6, inf }
 0x272   : > { %v7255_v32 = vpop.eup %7254  ;;  %v5492_v56 = vpack.c.bf16 %v5438_v18, %v5437_v2  ;;  %v5250_v15 = vadd.f32 1.0, %v7253_v57  ;;  %v6383_v63 = vmul.f32 -1.442695, %v9269_v38  ;;  %v9275_v25 = vpop.xlane.xlu0 %1102  ;;  %vm1446_vm2 = vcmp.eq.f32.partialorder %v13920_v9, %v9221_v29  ;;  %v13923_v57 = vld [vmem:[#allocation89_spill] sm:$0xff] }
 0x273   : > { %13919 = vst [vmem:[#allocation177_spill] sm:$0xff] %v9275_v25  ;;  %v9277_v4 = vpop.f32.mrb[27].mxu1  ;;  %v5491_v39 = vpack.c.bf16 %v5436_v30, %v5435_v14  ;;  %v5248_v33 = vadd.f32 1.0, %v7255_v32  ;;  %7262 = vpow2.f32 %v6380_v7  ;;  %vm1180_vm3 = vcmp.eq.f32.partialorder %v8589_v60, %v9275_v25  ;;  %v9285_v18 = vpop.xlane.xlu1 %1108 }
 0x274   : > { %7264 = vrcp.f32 %v5250_v15  ;;  %v6381_v2 = vmul.f32 -1.442695, %v9277_v4  ;;  %13921 = vst [vmem:[#allocation78_spill] sm:$0xff] %v9285_v18  ;;  %v9291_v14 = vsel %vm1180_vm3, %v7914_v54, 128  ;;  %vm1183_vm4 = vcmp.eq.f32.partialorder %v13923_v57, %v9285_v18 }
 0x275   : > { %7266 = vrcp.f32 %v5248_v33  ;;  %13922 = vst [vmem:[#allocation178_spill] sm:$0xff] %v9291_v14  ;;  %6750 = vmatprep.mubr.bf16.mxu1 %v5491_v39  ;;  %v1973_v30 = vshra.s32 %v9252_v16, 16  ;;  %1434 = vmin.xlane.f32.xlu0 %v1433_v48  ;;  %v1447_v7 = vsel %vm1446_vm2, %v1442_v61, inf  ;;  %v1959_v15 = vshra.s32 %v9291_v14, 16  ;;  %v13926_v33 = vld [vmem:[#allocation83_spill] sm:$0xff] }
 0x276   : > { %7268 = vpow2.f32 %v6383_v63  ;;  %6751 = vmatmul.mubr.bf16.gmra.mrb[80].mxu1 %v5492_v56  ;;  %v9296_v32 = vpop.xlane.xlu0 %1458  ;;  %v1454_v6 = vand.u32 65535, %v13925_v22  ;;  %1448 = vmin.xlane.f32.xlu1 %v1447_v7  ;;  %v1468_v9 = vand.u32 65535, %v13926_v33  ;;  %v9302_v39 = vsel %vm1183_vm4, %v7914_v54, 128  ;;  %v13931_v7 = vld [vmem:[#allocation94_spill] sm:$0xff]  ;;  %v13936_v14 = vld [vmem:[#allocation95_spill] sm:$0xff] }
 0x277   : > { %13924 = vst [vmem:[#allocation179_spill] sm:$0xff] %v9296_v32  ;;  %7270 = vpow2.f32 %v6381_v2  ;;  %13927 = vst [vmem:[#allocation84_spill] sm:$0xff] %v9302_v39  ;;  %v9304_v18 = vpop.xlane.xlu1 %1500  ;;  %v9306_v25 = vcvt.s32.f32 %v1959_v15  ;;  %v9308_v56 = vcvt.s32.f32 %v1973_v30  ;;  %v1482_v63 = vand.u32 65535, %v8614_v12  ;;  %v13932_v30 = vld [vmem:[#allocation85_spill] sm:$0xff]  ;;  %v13933_v33 = vld [vmem:[#allocation90_spill] sm:$0xff] }
 0x278   : > { %v7257_v61 = vpop.eup %7256  ;;  %vm1460_vm5 = vcmp.eq.f32.partialorder %v8608_v28, %v9296_v32  ;;  %v1456_v15 = vcvt.s32.f32 %v1454_v6  ;;  %vm1474_vm7 = vcmp.eq.f32.partialorder %v13932_v30, %v9263_v53  ;;  %v2001_v22 = vshra.s32 %v9302_v39, 16 }
 0x279   : > { %13928 = vst [vmem:[#allocation83_spill] sm:$0xff] %v9306_v25  ;;  %13929 = vst [vmem:[#allocation180_spill] sm:$0xff] %v9308_v56  ;;  %1962 = vmin.xlane.f32.xlu0 %v9306_v25  ;;  %v1496_v57 = vand.u32 65535, %v13933_v33  ;;  %v1470_v28 = vcvt.s32.f32 %v1468_v9  ;;  %v5441_v39 = vmul.f32 %v7257_v61, %v9167_v19  ;;  %v1484_v9 = vcvt.s32.f32 %v1482_v63 }
 0x27a   : > { %v9312_v48 = vpop.xlane.xlu0 %1106  ;;  %v7259_v2 = vpop.eup %7258  ;;  %1976 = vmin.xlane.f32.xlu1 %v9308_v56  ;;  %v1461_v6 = vsel %vm1460_vm5, %v1456_v15, inf  ;;  %v9343_v19 = vcvt.s32.f32 %v2001_v22 }
 0x27b   : > { %13930 = vst [vmem:[#allocation181_spill] sm:$0xff] %v9312_v48  ;;  %vm1182_vm6 = vcmp.eq.f32.partialorder %v13931_v7, %v9312_v48  ;;  %v7261_v12 = vpop.eup %7260  ;;  %v9326_v25 = vpop.xlane.xlu1 %1112  ;;  %v1475_v33 = vsel %vm1474_vm7, %v1470_v28, inf }
 0x27c   : > { %v9324_v60 = vsel %vm1182_vm6, %v7914_v54, 128  ;;  %13935 = vst [vmem:[#allocation90_spill] sm:$0xff] %v9326_v25  ;;  %v5253_v56 = vadd.f32 1.0, %v7261_v12  ;;  %vm1185_vm8 = vcmp.eq.f32.partialorder %v13936_v14, %v9326_v25  ;;  %v5439_v12 = vmul.f32 %v7259_v2, %v9181_v49 }
 0x27d   : > { %13934 = vst [vmem:[#allocation85_spill] sm:$0xff] %v9324_v60  ;;  %v7263_v16 = vpop.eup %7262  ;;  %v1987_v48 = vshra.s32 %v9324_v60, 16  ;;  %1462 = vmin.xlane.f32.xlu0 %v1461_v6  ;;  %v9339_v15 = vpop.f32.mrb[28].mxu1  ;;  %v9350_v63 = vsel %vm1185_vm8, %v7914_v54, 128 }
 0x27e   : > { %v7265_v7 = vpop.eup %7264  ;;  %v5251_v32 = vadd.f32 1.0, %v7263_v16  ;;  %v9335_v47 = vpop.xlane.xlu0 %1486  ;;  %1476 = vmin.xlane.f32.xlu1 %v1475_v33  ;;  %7272 = vrcp.f32 %v5253_v56  ;;  %13937 = vst [vmem:[#allocation182_spill] sm:$0xff] %v9350_v63  ;;  %v6386_v49 = vmul.f32 -1.442695, %v9339_v15 }
 0x27f   : > { %v7267_v34 = vpop.eup %7266  ;;  %v5442_v51 = vmul.f32 %v7265_v7, %v9185_v23  ;;  %v9341_v60 = vcvt.s32.f32 %v1987_v48  ;;  %v9353_v23 = vpop.xlane.xlu1 %1528  ;;  %vm1488_vm9 = vcmp.eq.f32.partialorder %v8648_v1, %v9335_v47  ;;  %v13946_v1 = vld [vmem:[#allocation96_spill] sm:$0xff] }
 0x280   : > { %v7269_v16 = vpop.eup %7268  ;;  %v5440_v61 = vmul.f32 %v7267_v34, %v9193_v24  ;;  %v9355_v2 = vpop.f32.mrb[29].mxu1  ;;  %7274 = vrcp.f32 %v5251_v32  ;;  %v13939_v32 = vld [vmem:[#allocation91_spill] sm:$0xff] }
 0x281   : > { %v7271_v48 = vpop.eup %7270  ;;  %v5494_v7 = vpack.c.bf16 %v5442_v51, %v5441_v39  ;;  %v5254_v30 = vadd.f32 1.0, %v7269_v16  ;;  %v9357_v22 = vpop.f32.mrb[30].mxu1  ;;  %7276 = vpow2.f32 %v6386_v49  ;;  %v6384_v56 = vmul.f32 -1.442695, %v9355_v2  ;;  %1990 = vmin.xlane.f32.xlu0 %v9341_v60 }
 0x282   : > { %v5493_v24 = vpack.c.bf16 %v5440_v61, %v5439_v12  ;;  %v5252_v34 = vadd.f32 1.0, %v7271_v48  ;;  %v9363_v28 = vpop.xlane.xlu0 %1110  ;;  %v9365_v6 = vpop.f32.mrb[31].mxu1  ;;  %2004 = vmin.xlane.f32.xlu1 %v9343_v19  ;;  %v6387_v51 = vmul.f32 -1.442695, %v9357_v22  ;;  %vm1502_vm11 = vcmp.eq.f32.partialorder %v13939_v32, %v9304_v18  ;;  %v13944_v32 = vld [vmem:[#allocation97_spill] sm:$0xff] }
 0x283   : > { %13938 = vst [vmem:[#allocation183_spill] sm:$0xff] %v9363_v28  ;;  %7278 = vrcp.f32 %v5254_v30  ;;  %vm1184_vm10 = vcmp.eq.f32.partialorder %v8669_v11, %v9363_v28  ;;  %v6385_v33 = vmul.f32 -1.442695, %v9365_v6  ;;  %v9377_v12 = vpop.xlane.xlu1 %1116  ;;  %v1498_v16 = vcvt.s32.f32 %v1496_v57  ;;  %v13942_v30 = vld [vmem:[#allocation102_spill] sm:$0xff]  ;;  %v13954_v11 = vld [vmem:[#allocation108_spill] sm:$0xff] }
 0x284   : > { %7280 = vrcp.f32 %v5252_v34  ;;  %v9374_v39 = vsel %vm1184_vm10, %v7914_v54, 128  ;;  %6754 = vmatprep.mubr.bf16.mxu1 %v5493_v24  ;;  %13941 = vst [vmem:[#allocation184_spill] sm:$0xff] %v9377_v12  ;;  %v1489_v61 = vsel %vm1488_vm9, %v1484_v9, inf  ;;  %v2029_v48 = vshra.s32 %v9350_v63, 16 }
 0x285   : > { %13940 = vst [vmem:[#allocation91_spill] sm:$0xff] %v9374_v39  ;;  %7282 = vpow2.f32 %v6384_v56  ;;  %6755 = vmatmul.mubr.bf16.gmra.mrb[84].mxu1 %v5494_v7  ;;  %v2015_v49 = vshra.s32 %v9374_v39, 16  ;;  %vm1187_vm12 = vcmp.eq.f32.partialorder %v13942_v30, %v9377_v12  ;;  %1490 = vmin.xlane.f32.xlu0 %v1489_v61  ;;  %v1503_v24 = vsel %vm1502_vm11, %v1498_v16, inf }
 0x286   : > { %7284 = vpow2.f32 %v6387_v51  ;;  %v9386_v34 = vpop.xlane.xlu0 %1514  ;;  %v1510_v57 = vand.u32 65535, %v13944_v32  ;;  %1504 = vmin.xlane.f32.xlu1 %v1503_v24  ;;  %v1524_v9 = vand.u32 65535, %v13946_v1  ;;  %v9395_v25 = vsel %vm1187_vm12, %v7914_v54, 128 }
 0x287   : > { %13943 = vst [vmem:[#allocation185_spill] sm:$0xff] %v9386_v34  ;;  %7286 = vpow2.f32 %v6385_v33  ;;  %v9389_v7 = vcvt.s32.f32 %v2015_v49  ;;  %v9392_v56 = vpop.xlane.xlu1 %1556  ;;  %13947 = vst [vmem:[#allocation96_spill] sm:$0xff] %v9395_v25  ;;  %v9397_v51 = vcvt.s32.f32 %v2029_v48  ;;  %vm1516_vm13 = vcmp.eq.f32.partialorder %v8688_v46, %v9386_v34  ;;  %v13950_v49 = vld [vmem:[#allocation107_spill] sm:$0xff]  ;;  %v13951_v48 = vld [vmem:[#allocation98_spill] sm:$0xff] }
 0x288   : > { %v7273_v12 = vpop.eup %7272  ;;  %v1538_v61 = vand.u32 65535, %v8694_v59  ;;  %v1512_v24 = vcvt.s32.f32 %v1510_v57  ;;  %vm1530_vm0 = vcmp.eq.f32.partialorder %v13951_v48, %v9353_v23  ;;  %v1526_v30 = vcvt.s32.f32 %v1524_v9 }
 0x289   : > { %13945 = vst [vmem:[#allocation97_spill] sm:$0xff] %v9389_v7  ;;  %13948 = vst [vmem:[#allocation186_spill] sm:$0xff] %v9397_v51  ;;  %2018 = vmin.xlane.f32.xlu0 %v9389_v7  ;;  %v2057_v46 = vshra.s32 %v9395_v25, 16  ;;  %v5445_v63 = vmul.f32 %v7273_v12, %v9254_v31 }
 0x28a   : > { %v9400_v16 = vpop.xlane.xlu0 %1114  ;;  %v7275_v33 = vpop.eup %7274  ;;  %2032 = vmin.xlane.f32.xlu1 %v9397_v51  ;;  %v1517_v51 = vsel %vm1516_vm13, %v1512_v24, inf  ;;  %v1531_v9 = vsel %vm1530_vm0, %v1526_v30, inf  ;;  %v1540_v31 = vcvt.s32.f32 %v1538_v61 }
 0x28b   : > { %13949 = vst [vmem:[#allocation187_spill] sm:$0xff] %v9400_v16  ;;  %vm1186_vm14 = vcmp.eq.f32.partialorder %v13950_v49, %v9400_v16  ;;  %v7277_v32 = vpop.eup %7276  ;;  %v9413_v28 = vpop.xlane.xlu1 %1120  ;;  %v13955_v49 = vld [vmem:[#allocation103_spill] sm:$0xff]  ;;  %v5443_v34 = vmul.f32 %v7275_v33, %v9265_v17 }
 0x28c   : > { %v9411_v1 = vsel %vm1186_vm14, %v7914_v54, 128  ;;  %13953 = vst [vmem:[#allocation188_spill] sm:$0xff] %v9413_v28  ;;  %v5257_v59 = vadd.f32 1.0, %v7277_v32  ;;  %vm1189_vm15 = vcmp.eq.f32.partialorder %v13954_v11, %v9413_v28  ;;  %v1552_v7 = vand.u32 65535, %v13955_v49 }
 0x28d   : > { %13952 = vst [vmem:[#allocation98_spill] sm:$0xff] %v9411_v1  ;;  %v7279_v14 = vpop.eup %7278  ;;  %v2043_v57 = vshra.s32 %v9411_v1, 16  ;;  %1518 = vmin.xlane.f32.xlu0 %v1517_v51  ;;  %v9429_v1 = vpop.f32.mrb[32].mxu1  ;;  %v9437_v30 = vsel %vm1189_vm15, %v7914_v54, 128 }
 0x28e   : > { %v7281_v16 = vpop.eup %7280  ;;  %v5446_v39 = vmul.f32 %v7279_v14, %v9269_v38  ;;  %v9425_v25 = vpop.xlane.xlu0 %1542  ;;  %1532 = vmin.xlane.f32.xlu1 %v1531_v9  ;;  %13956 = vst [vmem:[#allocation103_spill] sm:$0xff] %v9437_v30  ;;  %7288 = vrcp.f32 %v5257_v59  ;;  %v6390_v61 = vmul.f32 -1.442695, %v9429_v1 }
 0x28f   : > { %v7283_v32 = vpop.eup %7282  ;;  %v5444_v24 = vmul.f32 %v7281_v16, %v9277_v4  ;;  %v9431_v49 = vcvt.s32.f32 %v2043_v57  ;;  %v9439_v51 = vpop.xlane.xlu1 %1584  ;;  %v9443_v4 = vcvt.s32.f32 %v2057_v46  ;;  %vm1544_vm1 = vcmp.eq.f32.partialorder %v8728_v26, %v9425_v25  ;;  %v13959_v46 = vld [vmem:[#allocation104_spill] sm:$0xff] }
 0x290   : > { %v7285_v12 = vpop.eup %7284  ;;  %v5496_v38 = vpack.c.bf16 %v5446_v39, %v5445_v63  ;;  %v5255_v14 = vadd.f32 1.0, %v7283_v32  ;;  %13957 = vst [vmem:[#allocation189_spill] sm:$0xff] %v9439_v51  ;;  %v9441_v17 = vpop.f32.mrb[33].mxu1  ;;  %vm1558_vm3 = vcmp.eq.f32.partialorder %v13959_v46, %v9392_v56 }
 0x291   : > { %v7287_v16 = vpop.eup %7286  ;;  %v5495_v33 = vpack.c.bf16 %v5444_v24, %v5443_v34  ;;  %v5258_v48 = vadd.f32 1.0, %v7285_v12  ;;  %v9446_v63 = vpop.f32.mrb[34].mxu1  ;;  %v6388_v57 = vmul.f32 -1.442695, %v9441_v17  ;;  %2046 = vmin.xlane.f32.xlu0 %v9431_v49  ;;  %v1554_v12 = vcvt.s32.f32 %v1552_v7  ;;  %v13966_v7 = vld [vmem:[#allocation109_spill] sm:$0xff] }
 0x292   : > { %7290 = vrcp.f32 %v5255_v14  ;;  %v5256_v39 = vadd.f32 1.0, %v7287_v16  ;;  %v9450_v9 = vpop.xlane.xlu0 %1118  ;;  %v9452_v32 = vpop.f32.mrb[35].mxu1  ;;  %2060 = vmin.xlane.f32.xlu1 %v9443_v4  ;;  %v6391_v34 = vmul.f32 -1.442695, %v9446_v63  ;;  %v1545_v14 = vsel %vm1544_vm1, %v1540_v31, inf }
 0x293   : > { %13958 = vst [vmem:[#allocation190_spill] sm:$0xff] %v9450_v9  ;;  %7292 = vrcp.f32 %v5258_v48  ;;  %vm1188_vm2 = vcmp.eq.f32.partialorder %v8749_v3, %v9450_v9  ;;  %6758 = vmatprep.mubr.bf16.mxu1 %v5495_v33  ;;  %v6389_v24 = vmul.f32 -1.442695, %v9452_v32  ;;  %v9466_v26 = vpop.xlane.xlu1 %1124  ;;  %v2085_v48 = vshra.s32 %v9437_v30, 16  ;;  %v13964_v9 = vld [vmem:[#allocation115_spill] sm:$0xff] }
 0x294   : > { %7294 = vrcp.f32 %v5256_v39  ;;  %v9463_v59 = vsel %vm1188_vm2, %v7914_v54, 128  ;;  %6759 = vmatmul.mubr.bf16.gmra.mrb[88].mxu1 %v5496_v38  ;;  %13961 = vst [vmem:[#allocation191_spill] sm:$0xff] %v9466_v26  ;;  %v1559_v33 = vsel %vm1558_vm3, %v1554_v12, inf  ;;  %v13963_v39 = vld [vmem:[#allocation110_spill] sm:$0xff]  ;;  %vm1191_vm4 = vcmp.eq.f32.partialorder %v13964_v9, %v9466_v26 }
 0x295   : > { %13960 = vst [vmem:[#allocation104_spill] sm:$0xff] %v9463_v59  ;;  %7296 = vpow2.f32 %v6390_v61  ;;  %v2071_v16 = vshra.s32 %v9463_v59, 16  ;;  %1546 = vmin.xlane.f32.xlu0 %v1545_v14  ;;  %v1566_v28 = vand.u32 65535, %v13963_v39  ;;  %v1580_v31 = vand.u32 65535, %v13966_v7  ;;  %v13970_v14 = vld [vmem:[#allocation117_spill] sm:$0xff]  ;;  %v13973_v39 = vld [vmem:[#allocation116_spill] sm:$0xff] }
 0x296   : > { %7298 = vpow2.f32 %v6388_v57  ;;  %v9470_v46 = vpop.xlane.xlu0 %1570  ;;  %1560 = vmin.xlane.f32.xlu1 %v1559_v33  ;;  %v9480_v11 = vcvt.s32.f32 %v2085_v48  ;;  %v1594_v57 = vand.u32 65535, %v8774_v35  ;;  %v9484_v12 = vsel %vm1191_vm4, %v7914_v54, 128  ;;  %v13972_v33 = vld [vmem:[#allocation111_spill] sm:$0xff] }
 0x297   : > { %13962 = vst [vmem:[#allocation192_spill] sm:$0xff] %v9470_v46  ;;  %7300 = vpow2.f32 %v6391_v34  ;;  %v9475_v38 = vcvt.s32.f32 %v2071_v16  ;;  %v9478_v61 = vpop.xlane.xlu1 %1612  ;;  %13968 = vst [vmem:[#allocation193_spill] sm:$0xff] %v9484_v12  ;;  %vm1572_vm5 = vcmp.eq.f32.partialorder %v13970_v14, %v9470_v46  ;;  %v1568_v48 = vcvt.s32.f32 %v1566_v28 }
 0x298   : > { %7302 = vpow2.f32 %v6389_v24  ;;  %13967 = vst [vmem:[#allocation109_spill] sm:$0xff] %v9480_v11  ;;  %v7289_v16 = vpop.eup %7288  ;;  %v13971_v24 = vld [vmem:[#allocation121_spill] sm:$0xff]  ;;  %vm1586_vm7 = vcmp.eq.f32.partialorder %v13972_v33, %v9439_v51  ;;  %v1608_v7 = vand.u32 65535, %v13973_v39  ;;  %v1582_v3 = vcvt.s32.f32 %v1580_v31 }
 0x299   : > { %13965 = vst [vmem:[#allocation110_spill] sm:$0xff] %v9475_v38  ;;  %2074 = vmin.xlane.f32.xlu0 %v9475_v38  ;;  %v1573_v38 = vsel %vm1572_vm5, %v1568_v48, inf  ;;  %v2113_v30 = vshra.s32 %v9484_v12, 16  ;;  %v5449_v28 = vmul.f32 %v7289_v16, %v9339_v15  ;;  %v1596_v59 = vcvt.s32.f32 %v1594_v57  ;;  %v13976_v48 = vld [vmem:[#allocation122_spill] sm:$0xff]  ;;  %v13977_v57 = vld [vmem:[#allocation119_spill] sm:$0xff] }
 0x29a   : > { %v9487_v34 = vpop.xlane.xlu0 %1122  ;;  %2088 = vmin.xlane.f32.xlu1 %v9480_v11  ;;  %v1610_v16 = vcvt.s32.f32 %v1608_v7  ;;  %vm1614_vm9 = vcmp.eq.f32.partialorder %v13977_v57, %v9478_v61  ;;  %v13987_v57 = vld [vmem:[#allocation129_spill] sm:$0xff] }
 0x29b   : > { %13969 = vst [vmem:[#allocation194_spill] sm:$0xff] %v9487_v34  ;;  %vm1190_vm6 = vcmp.eq.f32.partialorder %v13971_v24, %v9487_v34  ;;  %v9500_v9 = vpop.xlane.xlu1 %1128  ;;  %v1587_v24 = vsel %vm1586_vm7, %v1582_v3, inf }
 0x29c   : > { %v7291_v35 = vpop.eup %7290  ;;  %v9498_v26 = vsel %vm1190_vm6, %v7914_v54, 128  ;;  %13975 = vst [vmem:[#allocation111_spill] sm:$0xff] %v9500_v9  ;;  %vm1193_vm8 = vcmp.eq.f32.partialorder %v13976_v48, %v9500_v9 }
 0x29d   : > { %13974 = vst [vmem:[#allocation117_spill] sm:$0xff] %v9498_v26  ;;  %v7293_v14 = vpop.eup %7292  ;;  %v2099_v11 = vshra.s32 %v9498_v26, 16  ;;  %1574 = vmin.xlane.f32.xlu0 %v1573_v38  ;;  %v5447_v46 = vmul.f32 %v7291_v35, %v9355_v2 }
 0x29e   : > { %v7295_v34 = vpop.eup %7294  ;;  %v5450_v33 = vmul.f32 %v7293_v14, %v9357_v22  ;;  %v9506_v39 = vpop.xlane.xlu0 %1598  ;;  %1588 = vmin.xlane.f32.xlu1 %v1587_v24  ;;  %v13978_v24 = vld [vmem:[#allocation124_spill] sm:$0xff] }
 0x29f   : > { %v7297_v51 = vpop.eup %7296  ;;  %v5448_v31 = vmul.f32 %v7295_v34, %v9365_v6  ;;  %v9512_v12 = vpop.f32.mrb[36].mxu1  ;;  %v9514_v26 = vcvt.s32.f32 %v2099_v11  ;;  %v9520_v34 = vcvt.s32.f32 %v2113_v30  ;;  %vm1600_vm10 = vcmp.eq.f32.partialorder %v13978_v24, %v9506_v39  ;;  %v13985_v24 = vld [vmem:[#allocation123_spill] sm:$0xff] }
 0x2a0   : > { %v7299_v15 = vpop.eup %7298  ;;  %v5498_v22 = vpack.c.bf16 %v5450_v33, %v5449_v28  ;;  %v5261_v38 = vadd.f32 1.0, %v7297_v51  ;;  %v9516_v3 = vpop.f32.mrb[37].mxu1  ;;  %v9530_v51 = vsel %vm1193_vm8, %v7914_v54, 128  ;;  %v6394_v7 = vmul.f32 -1.442695, %v9512_v12 }
 0x2a1   : > { %v7301_v2 = vpop.eup %7300  ;;  %v5497_v35 = vpack.c.bf16 %v5448_v31, %v5447_v46  ;;  %v5259_v6 = vadd.f32 1.0, %v7299_v15  ;;  %v9522_v14 = vpop.f32.mrb[38].mxu1  ;;  %13979 = vst [vmem:[#allocation116_spill] sm:$0xff] %v9530_v51  ;;  %2102 = vmin.xlane.f32.xlu0 %v9514_v26  ;;  %v6392_v31 = vmul.f32 -1.442695, %v9516_v3  ;;  %v2141_v9 = vshra.s32 %v9530_v51, 16 }
 0x2a2   : > { %v7303_v11 = vpop.eup %7302  ;;  %7304 = vrcp.f32 %v5261_v38  ;;  %v5262_v28 = vadd.f32 1.0, %v7301_v2  ;;  %v9534_v30 = vpop.xlane.xlu0 %1126  ;;  %2116 = vmin.xlane.f32.xlu1 %v9520_v34  ;;  %v6395_v15 = vmul.f32 -1.442695, %v9522_v14  ;;  %v1601_v2 = vsel %vm1600_vm10, %v1596_v59, inf }
 0x2a3   : > { %13980 = vst [vmem:[#allocation119_spill] sm:$0xff] %v9534_v30  ;;  %v9536_v46 = vpop.f32.mrb[39].mxu1  ;;  %7306 = vrcp.f32 %v5259_v6  ;;  %v5260_v33 = vadd.f32 1.0, %v7303_v11  ;;  %vm1192_vm11 = vcmp.eq.f32.partialorder %v8826_v55, %v9534_v30  ;;  %6762 = vmatprep.mubr.bf16.mxu1 %v5497_v35  ;;  %v1615_v35 = vsel %vm1614_vm9, %v1610_v16, inf  ;;  %v9558_v30 = vpop.xlane.xlu1 %1640 }
 0x2a4   : > { %7308 = vrcp.f32 %v5262_v28  ;;  %v9544_v38 = vsel %vm1192_vm11, %v7914_v54, 128  ;;  %6763 = vmatmul.mubr.bf16.gmra.mrb[92].mxu1 %v5498_v22  ;;  %v6393_v6 = vmul.f32 -1.442695, %v9536_v46  ;;  %v1622_v22 = vand.u32 65535, %v8817_v20  ;;  %13983 = vst [vmem:[#allocation196_spill] sm:$0xff] %v9558_v30 }
 0x2a5   : > { %13981 = vst [vmem:[#allocation124_spill] sm:$0xff] %v9544_v38  ;;  %7310 = vrcp.f32 %v5260_v33  ;;  %v2127_v11 = vshra.s32 %v9544_v38, 16  ;;  %1602 = vmin.xlane.f32.xlu0 %v1601_v2  ;;  %v1636_v33 = vand.u32 65535, %v13985_v24  ;;  %v9564_v2 = vcvt.s32.f32 %v2141_v9  ;;  %v13989_v9 = vld [vmem:[#allocation132_spill] sm:$0xff] }
 0x2a6   : > { %7312 = vpow2.f32 %v6394_v7  ;;  %v9555_v28 = vpop.xlane.xlu0 %1626  ;;  %1616 = vmin.xlane.f32.xlu1 %v1615_v35  ;;  %v1650_v7 = vand.u32 65535, %v8849_v5  ;;  %v1664_v16 = vand.u32 65535, %v13987_v57  ;;  %v1692_v20 = vand.u32 65535, %v8881_v43  ;;  %v13988_v5 = vld [vmem:[#allocation127_spill] sm:$0xff]  ;;  %v13990_v43 = vld [vmem:[#allocation134_spill] sm:$0xff] }
 0x2a7   : > { %13982 = vst [vmem:[#allocation195_spill] sm:$0xff] %v9555_v28  ;;  %7314 = vpow2.f32 %v6392_v31  ;;  %v9560_v59 = vcvt.s32.f32 %v2127_v11  ;;  %13986 = vst [vmem:[#allocation123_spill] sm:$0xff] %v9564_v2  ;;  %vm1628_vm12 = vcmp.eq.f32.partialorder %v8856_v45, %v9555_v28  ;;  %v9573_v31 = vpop.xlane.xlu1 %1668  ;;  %vm1642_vm13 = vcmp.eq.f32.partialorder %v13988_v5, %v9558_v30 }
 0x2a8   : > { %7316 = vpow2.f32 %v6395_v15  ;;  %v1624_v15 = vcvt.s32.f32 %v1622_v22  ;;  %v1638_v35 = vcvt.s32.f32 %v1636_v33  ;;  %v1652_v55 = vcvt.s32.f32 %v1650_v7 }
 0x2a9   : > { %13984 = vst [vmem:[#allocation197_spill] sm:$0xff] %v9560_v59  ;;  %7318 = vpow2.f32 %v6393_v6  ;;  %2130 = vmin.xlane.f32.xlu0 %v9560_v59  ;;  %v1678_v6 = vand.u32 65535, %v13989_v9  ;;  %v1666_v51 = vcvt.s32.f32 %v1664_v16 }
 0x2aa   : > { %v9568_v48 = vpop.xlane.xlu0 %1654  ;;  %2144 = vmin.xlane.f32.xlu1 %v9564_v2  ;;  %v1629_v57 = vsel %vm1628_vm12, %v1624_v15, inf  ;;  %v1643_v45 = vsel %vm1642_vm13, %v1638_v35, inf  ;;  %v13991_v2 = vld [vmem:[#allocation130_spill] sm:$0xff] }
 0x2ab   : > { %vm1656_vm14 = vcmp.eq.f32.partialorder %v13990_v43, %v9568_v48  ;;  %vm1670_vm0 = vcmp.eq.f32.partialorder %v13991_v2, %v9573_v31  ;;  %v1680_v7 = vcvt.s32.f32 %v1678_v6 }
 0x2ac   : > { %v7305_v11 = vpop.eup %7304 }
 0x2ad   : > { %v7307_v24 = vpop.eup %7306  ;;  %1630 = vmin.xlane.f32.xlu0 %v1629_v57  ;;  %v5453_v5 = vmul.f32 %v7305_v11, %v9429_v1  ;;  %v1694_v57 = vcvt.s32.f32 %v1692_v20  ;;  %v1706_v1 = vand.u32 65535, %v8911_v8  ;;  %v1657_v20 = vsel %vm1656_vm14, %v1652_v55, inf }
 0x2ae   : > { %v7309_v59 = vpop.eup %7308  ;;  %1644 = vmin.xlane.f32.xlu1 %v1643_v45  ;;  %v9585_v33 = vpop.xlane.xlu0 %1682  ;;  %v5451_v38 = vmul.f32 %v7307_v24, %v9441_v17  ;;  %v1671_v17 = vsel %vm1670_vm0, %v1666_v51, inf }
 0x2af   : > { %v7311_v22 = vpop.eup %7310  ;;  %v5454_v9 = vmul.f32 %v7309_v59, %v9446_v63  ;;  %v9587_v15 = vpop.f32.mrb[40].mxu1  ;;  %vm1684_vm15 = vcmp.eq.f32.partialorder %v8883_v62, %v9585_v33 }
 0x2b0   : > { %v7313_v35 = vpop.eup %7312  ;;  %v5452_v16 = vmul.f32 %v7311_v22, %v9452_v32  ;;  %v6398_v28 = vmul.f32 -1.442695, %v9587_v15  ;;  %v9592_v30 = vpop.f32.mrb[41].mxu1  ;;  %v1685_v62 = vsel %vm1684_vm15, %v1680_v7, inf }
 0x2b1   : > { %v7315_v11 = vpop.eup %7314  ;;  %v5500_v63 = vpack.c.bf16 %v5454_v9, %v5453_v5  ;;  %v5265_v59 = vadd.f32 1.0, %v7313_v35  ;;  %v9595_v45 = vpop.xlane.xlu1 %1696  ;;  %1658 = vmin.xlane.f32.xlu0 %v1657_v20  ;;  %v13992_v9 = vld [vmem:[#allocation138_spill] sm:$0xff]  ;;  %v6396_v2 = vmul.f32 -1.442695, %v9592_v30 }
 0x2b2   : > { %v9603_v32 = vpop.f32.mrb[42].mxu1  ;;  %v7317_v6 = vpop.eup %7316  ;;  %v5499_v24 = vpack.c.bf16 %v5452_v16, %v5451_v38  ;;  %v5263_v22 = vadd.f32 1.0, %v7315_v11  ;;  %7320 = vpow2.f32 %v6398_v28  ;;  %v1720_v43 = vand.u32 65535, %v13992_v9  ;;  %1672 = vmin.xlane.f32.xlu1 %v1671_v17  ;;  %v13993_v28 = vld [vmem:[#allocation135_spill] sm:$0xff] }
 0x2b3   : > { %v9605_v8 = vpop.f32.mrb[43].mxu1  ;;  %v7319_v5 = vpop.eup %7318  ;;  %7322 = vrcp.f32 %v5265_v59  ;;  %v5266_v55 = vadd.f32 1.0, %v7317_v6  ;;  %v6399_v38 = vmul.f32 -1.442695, %v9603_v32  ;;  %vm1698_vm1 = vcmp.eq.f32.partialorder %v13993_v28, %v9595_v45  ;;  %v13994_v17 = vld [vmem:[#allocation139_spill] sm:$0xff] }
 0x2b4   : > { %7324 = vrcp.f32 %v5263_v22  ;;  %v5264_v51 = vadd.f32 1.0, %v7319_v5  ;;  %6766 = vmatprep.mubr.bf16.mxu1 %v5499_v24  ;;  %v6397_v35 = vmul.f32 -1.442695, %v9605_v8  ;;  %v1699_v16 = vsel %vm1698_vm1, %v1694_v57, inf  ;;  %v9615_v11 = vpop.xlane.xlu0 %1710  ;;  %v13995_v22 = vld [vmem:[#allocation140_spill] sm:$0xff] }
 0x2b5   : > { %7326 = vrcp.f32 %v5266_v55  ;;  %6767 = vmatmul.mubr.bf16.gmra.mrb[96].mxu1 %v5500_v63  ;;  %1686 = vmin.xlane.f32.xlu0 %v1685_v62  ;;  %v1708_v59 = vcvt.s32.f32 %v1706_v1  ;;  %v9617_v20 = vpop.xlane.xlu1 %1724  ;;  %vm1712_vm2 = vcmp.eq.f32.partialorder %v13994_v17, %v9615_v11  ;;  %v1722_v6 = vcvt.s32.f32 %v1720_v43  ;;  %v13996_v63 = vld [vmem:[#allocation142_spill] sm:$0xff] }
 0x2b6   : > { %7328 = vrcp.f32 %v5264_v51  ;;  %1700 = vmin.xlane.f32.xlu1 %v1699_v16  ;;  %vm1726_vm3 = vcmp.eq.f32.partialorder %v13995_v22, %v9617_v20  ;;  %v1734_v57 = vand.u32 65535, %v13996_v63  ;;  %v1748_v1 = vand.u32 65535, %v8941_v13 }
 0x2b7   : > { %7330 = vpow2.f32 %v6396_v2  ;;  %v1713_v24 = vsel %vm1712_vm2, %v1708_v59, inf  ;;  %v1727_v7 = vsel %vm1726_vm3, %v1722_v6, inf  ;;  %v1762_v13 = vand.u32 65535, %v8971_v58 }
 0x2b8   : > { %7332 = vpow2.f32 %v6399_v38  ;;  %v1736_v51 = vcvt.s32.f32 %v1734_v57  ;;  %v1750_v16 = vcvt.s32.f32 %v1748_v1 }
 0x2b9   : > { %7334 = vpow2.f32 %v6397_v35  ;;  %1714 = vmin.xlane.f32.xlu0 %v1713_v24 }
 0x2ba   : > { %1728 = vmin.xlane.f32.xlu1 %v1727_v7 }
 0x2bb   : > { %v9625_v2 = vpop.xlane.xlu0 %1738 }
 0x2bc   : > { %v7321_v5 = vpop.eup %7320  ;;  %vm1740_vm4 = vcmp.eq.f32.partialorder %v8945_v40, %v9625_v2 }
 0x2bd   : > { %v7323_v9 = vpop.eup %7322  ;;  %v5269_v55 = vadd.f32 1.0, %v7321_v5  ;;  %v9631_v35 = vpop.xlane.xlu1 %1752  ;;  %v1741_v62 = vsel %vm1740_vm4, %v1736_v51, inf }
 0x2be   : > { %v7325_v43 = vpop.eup %7324  ;;  %v9629_v28 = vpop.f32.mrb[44].mxu1  ;;  %v5457_v17 = vmul.f32 %v7323_v9, %v9512_v12  ;;  %1742 = vmin.xlane.f32.xlu0 %v1741_v62  ;;  %vm1754_vm5 = vcmp.eq.f32.partialorder %v8955_v37, %v9631_v35  ;;  %v1269_v12 = vcvt.f32.s32 %v8980_v0  ;;  %v1764_v0 = vcvt.s32.f32 %v1762_v13  ;;  %v14000_v13 = vld [vmem:[#allocation146_spill] sm:$0xff] }
 0x2bf   : > { %v7327_v38 = vpop.eup %7326  ;;  %v5455_v6 = vmul.f32 %v7325_v43, %v9516_v3  ;;  %v6402_v22 = vmul.f32 -1.442695, %v9629_v28  ;;  %v9638_v7 = vpop.f32.mrb[45].mxu1  ;;  %7336 = vrcp.f32 %v5269_v55  ;;  %v1755_v62 = vsel %vm1754_vm5, %v1750_v16, inf }
 0x2c0   : > { %v7329_v59 = vpop.eup %7328  ;;  %v5458_v24 = vmul.f32 %v7327_v38, %v9522_v14  ;;  %v6400_v57 = vmul.f32 -1.442695, %v9638_v7  ;;  %v9642_v1 = vpop.f32.mrb[46].mxu1  ;;  %1756 = vmin.xlane.f32.xlu1 %v1755_v62 }
 0x2c1   : > { %v7331_v40 = vpop.eup %7330  ;;  %v5456_v63 = vmul.f32 %v7329_v59, %v9536_v46  ;;  %7338 = vpow2.f32 %v6402_v22  ;;  %v9647_v5 = vpop.f32.mrb[47].mxu1  ;;  %v6403_v46 = vmul.f32 -1.442695, %v9642_v1  ;;  %v1270_v59 = vshll.u32 %v1269_v12, 16 }
 0x2c2   : > { %v7333_v58 = vpop.eup %7332  ;;  %v5502_v3 = vpack.c.bf16 %v5458_v24, %v5457_v17  ;;  %v5267_v14 = vadd.f32 1.0, %v7331_v40  ;;  %7340 = vpow2.f32 %v6400_v57  ;;  %v6401_v38 = vmul.f32 -1.442695, %v9647_v5 }
 0x2c3   : > { %v7335_v9 = vpop.eup %7334  ;;  %v5501_v51 = vpack.c.bf16 %v5456_v63, %v5455_v6  ;;  %v5270_v43 = vadd.f32 1.0, %v7333_v58  ;;  %v13997_v6 = vld [vmem:[#allocation147_spill] sm:$0xff]  ;;  %v13999_v63 = vld [vmem:[#allocation46_spill] sm:$0xff]  ;;  %v1776_v12 = vand.u32 65535, %v14000_v13 }
 0x2c4   : > { %7342 = vrcp.f32 %v5267_v14  ;;  %v5268_v55 = vadd.f32 1.0, %v7335_v9  ;;  %v9651_v37 = vpop.xlane.xlu0 %1766  ;;  %v1267_v17 = vpop.xlane.xlu1 %1266  ;;  %v1283_v24 = vcvt.f32.s32 %v13997_v6  ;;  %v1297_v57 = vcvt.f32.s32 %v13999_v63 }
 0x2c5   : > { %7344 = vrcp.f32 %v5270_v43  ;;  %6770 = vmatprep.mubr.bf16.mxu1 %v5501_v51  ;;  %vm1768_vm6 = vcmp.eq.f32.partialorder %v8982_v42, %v9651_v37  ;;  %v1268_v22 = vcvt.f32.s32 %v1267_v17  ;;  %v14001_v42 = vld [vmem:[#allocation151_spill] sm:$0xff] }
 0x2c6   : > { %7346 = vrcp.f32 %v5268_v55  ;;  %6771 = vmatmul.mubr.bf16.gmra.mrb[100].mxu1 %v5502_v3  ;;  %v1769_v40 = vsel %vm1768_vm6, %v1764_v0, inf  ;;  %v1284_v3 = vshll.u32 %v1283_v24, 16  ;;  %v1790_v51 = vand.u32 65535, %v14001_v42  ;;  %v14006_v42 = vld [vmem:[#allocation150_spill] sm:$0xff] }
 0x2c7   : > { %7348 = vpow2.f32 %v6403_v46  ;;  %1770 = vmin.xlane.f32.xlu0 %v1769_v40  ;;  %v9656_v16 = vadd.s32 %v1270_v59, %v1268_v22  ;;  %v14002_v46 = vld [vmem:[#allocation2_spill] sm:$0xff]  ;;  %v1298_v17 = vshll.u32 %v1297_v57, 16  ;;  %v1778_v22 = vcvt.s32.f32 %v1776_v12 }
 0x2c8   : > { %7350 = vpow2.f32 %v6401_v38  ;;  %v1281_v58 = vpop.xlane.xlu1 %1280 }
 0x2c9   : > { %13998 = vst [vmem:[#allocation129_spill] sm:$0xff] %v9656_v16  ;;  %v7337_v14 = vpop.eup %7336  ;;  %v1282_v9 = vcvt.f32.s32 %v1281_v58  ;;  %vm2154_vm7 = vcmp.eq.s32.totalorder %v7914_v54, %v9656_v16 }
 0x2ca   : > { %v9667_v55 = vsel %vm2154_vm7, -1e+30, %v14002_v46  ;;  %v5461_v63 = vmul.f32 %v7337_v14, %v9587_v15 }
 0x2cb   : > { %v7339_v43 = vpop.eup %7338  ;;  %14003 = vst [vmem:[#allocation127_spill] sm:$0xff] %v9667_v55  ;;  %v9669_v0 = vadd.s32 %v1284_v3, %v1282_v9  ;;  %2282 = vmax.xlane.f32.xlu0 %v9667_v55  ;;  %v1792_v3 = vcvt.s32.f32 %v1790_v51 }
 0x2cc   : > { %v7341_v38 = vpop.eup %7340  ;;  %v5273_v62 = vadd.f32 1.0, %v7339_v43  ;;  %v9672_v24 = vpop.xlane.xlu1 %1780 }
 0x2cd   : > { %14004 = vst [vmem:[#allocation132_spill] sm:$0xff] %v9669_v0  ;;  %v5271_v6 = vadd.f32 1.0, %v7341_v38  ;;  %14005 = vst [vmem:[#allocation134_spill] sm:$0xff] %v9672_v24  ;;  %vm1782_vm8 = vcmp.eq.f32.partialorder %v14006_v42, %v9672_v24  ;;  %vm2155_vm9 = vcmp.eq.s32.totalorder %v7914_v54, %v9669_v0 }
 0x2ce   : > { %v7343_v59 = vpop.eup %7342  ;;  %v9676_v13 = vpop.f32.mrb[48].mxu1  ;;  %7352 = vrcp.f32 %v5273_v62  ;;  %v1783_v12 = vsel %vm1782_vm8, %v1778_v22, inf }
 0x2cf   : > { %v7345_v40 = vpop.eup %7344  ;;  %v5459_v58 = vmul.f32 %v7343_v59, %v9592_v30  ;;  %v6406_v57 = vmul.f32 -1.442695, %v9676_v13  ;;  %v9682_v46 = vpop.f32.mrb[49].mxu1  ;;  %7354 = vrcp.f32 %v5271_v6  ;;  %1784 = vmin.xlane.f32.xlu1 %v1783_v12  ;;  %v14008_v12 = vld [vmem:[#allocation154_spill] sm:$0xff] }
 0x2d0   : > { %v7347_v9 = vpop.eup %7346  ;;  %v5462_v43 = vmul.f32 %v7345_v40, %v9603_v32  ;;  %v6404_v30 = vmul.f32 -1.442695, %v9682_v46  ;;  %v9686_v14 = vpop.f32.mrb[50].mxu1  ;;  %v1311_v16 = vcvt.f32.s32 %v14008_v12 }
 0x2d1   : > { %v7349_v38 = vpop.eup %7348  ;;  %v5460_v15 = vmul.f32 %v7347_v9, %v9605_v8  ;;  %7356 = vpow2.f32 %v6406_v57  ;;  %v6407_v59 = vmul.f32 -1.442695, %v9686_v14  ;;  %v9691_v40 = vpop.f32.mrb[51].mxu1 }
 0x2d2   : > { %v7351_v51 = vpop.eup %7350  ;;  %v5504_v32 = vpack.c.bf16 %v5462_v43, %v5461_v63  ;;  %v5274_v62 = vadd.f32 1.0, %v7349_v38  ;;  %7358 = vpow2.f32 %v6404_v30  ;;  %v9693_v8 = vpop.xlane.xlu0 %1794  ;;  %v6405_v9 = vmul.f32 -1.442695, %v9691_v40  ;;  %v14009_v63 = vld [vmem:[#allocation153_spill] sm:$0xff] }
 0x2d3   : > { %v5503_v22 = vpack.c.bf16 %v5460_v15, %v5459_v58  ;;  %v5272_v42 = vadd.f32 1.0, %v7351_v51  ;;  %14007 = vst [vmem:[#allocation130_spill] sm:$0xff] %v9693_v8  ;;  %v1295_v6 = vpop.xlane.xlu1 %1294  ;;  %vm1796_vm10 = vcmp.eq.f32.partialorder %v14009_v63, %v9693_v8  ;;  %v14011_v58 = vld [vmem:[#allocation3_spill] sm:$0xff]  ;;  %v14013_v30 = vld [vmem:[#allocation49_spill] sm:$0xff] }
 0x2d4   : > { %7360 = vrcp.f32 %v5274_v62  ;;  %v1296_v55 = vcvt.f32.s32 %v1295_v6  ;;  %v1797_v43 = vsel %vm1796_vm10, %v1792_v3, inf  ;;  %v9705_v38 = vsel %vm2155_vm9, -1e+30, %v14011_v58  ;;  %v14016_v3 = vld [vmem:[#allocation155_spill] sm:$0xff] }
 0x2d5   : > { %7362 = vrcp.f32 %v5272_v42  ;;  %6774 = vmatprep.mubr.bf16.mxu1 %v5503_v22  ;;  %1798 = vmin.xlane.f32.xlu0 %v1797_v43  ;;  %14012 = vst [vmem:[#allocation135_spill] sm:$0xff] %v9705_v38  ;;  %v1804_v51 = vand.u32 65535, %v14013_v30  ;;  %v1312_v62 = vshll.u32 %v1311_v16, 16  ;;  %v1339_v42 = vcvt.f32.s32 %v9052_v21  ;;  %v14018_v16 = vld [vmem:[#allocation156_spill] sm:$0xff] }
 0x2d6   : > { %7364 = vpow2.f32 %v6407_v59  ;;  %v9699_v57 = vadd.s32 %v1298_v17, %v1296_v55  ;;  %6775 = vmatmul.mubr.bf16.gmra.mrb[104].mxu1 %v5504_v32  ;;  %2284 = vmax.xlane.f32.xlu1 %v9705_v38  ;;  %v14014_v55 = vld [vmem:[#allocation4_spill] sm:$0xff]  ;;  %v1832_v32 = vand.u32 65535, %v14016_v3 }
 0x2d7   : > { %7366 = vpow2.f32 %v6405_v9  ;;  %v1309_v15 = vpop.xlane.xlu1 %1308  ;;  %v1818_v9 = vand.u32 65535, %v14018_v16  ;;  %v1806_v43 = vcvt.s32.f32 %v1804_v51  ;;  %v1340_v3 = vshll.u32 %v1339_v42, 16 }
 0x2d8   : > { %14010 = vst [vmem:[#allocation138_spill] sm:$0xff] %v9699_v57  ;;  %v1310_v22 = vcvt.f32.s32 %v1309_v15  ;;  %vm2156_vm11 = vcmp.eq.s32.totalorder %v7914_v54, %v9699_v57  ;;  %v7353_v59 = vpop.eup %7352  ;;  %v14020_v15 = vld [vmem:[#allocation158_spill] sm:$0xff]  ;;  %v1325_v57 = vcvt.f32.s32 %v9073_v10 }
 0x2d9   : > { %v9715_v17 = vsel %vm2156_vm11, -1e+30, %v14014_v55  ;;  %v7355_v12 = vpop.eup %7354  ;;  %v1820_v51 = vcvt.s32.f32 %v1818_v9  ;;  %v5465_v38 = vmul.f32 %v7353_v59, %v9629_v28 }
 0x2da   : > { %14015 = vst [vmem:[#allocation139_spill] sm:$0xff] %v9715_v17  ;;  %v9719_v6 = vadd.s32 %v1312_v62, %v1310_v22  ;;  %2286 = vmax.xlane.f32.xlu0 %v9715_v17  ;;  %v1834_v62 = vcvt.s32.f32 %v1832_v32  ;;  %v14023_v32 = vld [vmem:[#allocation5_spill] sm:$0xff] }
 0x2db   : > { %v9723_v63 = vpop.xlane.xlu1 %1808  ;;  %v7357_v58 = vpop.eup %7356 }
 0x2dc   : > { %14017 = vst [vmem:[#allocation140_spill] sm:$0xff] %v9719_v6  ;;  %14019 = vst [vmem:[#allocation142_spill] sm:$0xff] %v9723_v63  ;;  %vm1810_vm12 = vcmp.eq.f32.partialorder %v14020_v15, %v9723_v63  ;;  %vm2157_vm13 = vcmp.eq.s32.totalorder %v7914_v54, %v9719_v6  ;;  %v7359_v30 = vpop.eup %7358  ;;  %v5277_v55 = vadd.f32 1.0, %v7357_v58  ;;  %v9730_v0 = vpop.xlane.xlu0 %1822  ;;  %v5463_v15 = vmul.f32 %v7355_v12, %v9638_v7  ;;  %v14025_v7 = vld [vmem:[#allocation52_spill] sm:$0xff] }
 0x2dd   : > { %v1811_v21 = vsel %vm1810_vm12, %v1806_v43, inf  ;;  %v5275_v16 = vadd.f32 1.0, %v7359_v30  ;;  %14021 = vst [vmem:[#allocation147_spill] sm:$0xff] %v9730_v0  ;;  %v9743_v10 = vsel %vm2157_vm13, -1e+30, %v14023_v32  ;;  %vm1824_vm14 = vcmp.eq.f32.partialorder %v14025_v7, %v9730_v0 }
 0x2de   : > { %v7361_v22 = vpop.eup %7360  ;;  %1812 = vmin.xlane.f32.xlu1 %v1811_v21  ;;  %v9737_v43 = vpop.f32.mrb[52].mxu1  ;;  %14024 = vst [vmem:[#allocation146_spill] sm:$0xff] %v9743_v10  ;;  %7368 = vrcp.f32 %v5277_v55  ;;  %v1825_v55 = vsel %vm1824_vm14, %v1820_v51, inf }
 0x2df   : > { %v7363_v17 = vpop.eup %7362  ;;  %v5466_v63 = vmul.f32 %v7361_v22, %v9642_v1  ;;  %v9735_v8 = vpop.xlane.xlu1 %1836  ;;  %v6410_v28 = vmul.f32 -1.442695, %v9737_v43  ;;  %7370 = vrcp.f32 %v5275_v16  ;;  %v1326_v22 = vshll.u32 %v1325_v57, 16  ;;  %1826 = vmin.xlane.f32.xlu0 %v1825_v55 }
 0x2e0   : > { %14022 = vst [vmem:[#allocation46_spill] sm:$0xff] %v9735_v8  ;;  %v7365_v42 = vpop.eup %7364  ;;  %v5464_v9 = vmul.f32 %v7363_v17, %v9647_v5  ;;  %v9747_v59 = vpop.f32.mrb[53].mxu1 }
 0x2e1   : > { %v7367_v1 = vpop.eup %7366  ;;  %v5506_v12 = vpack.c.bf16 %v5466_v63, %v5465_v38  ;;  %v5278_v58 = vadd.f32 1.0, %v7365_v42  ;;  %v6408_v30 = vmul.f32 -1.442695, %v9747_v59  ;;  %v9752_v21 = vpop.f32.mrb[54].mxu1  ;;  %7372 = vpow2.f32 %v6410_v28  ;;  %v14029_v28 = vld [vmem:[#allocation164_spill] sm:$0xff] }
 0x2e2   : > { %v5505_v32 = vpack.c.bf16 %v5464_v9, %v5463_v15  ;;  %v5276_v6 = vadd.f32 1.0, %v7367_v1  ;;  %2288 = vmax.xlane.f32.xlu1 %v9743_v10  ;;  %v1323_v5 = vpop.xlane.xlu0 %1322  ;;  %v9755_v17 = vpop.f32.mrb[55].mxu1  ;;  %v6411_v7 = vmul.f32 -1.442695, %v9752_v21  ;;  %v14026_v15 = vld [vmem:[#allocation159_spill] sm:$0xff]  ;;  %v1846_v1 = vand.u32 65535, %v14029_v28 }
 0x2e3   : > { %7374 = vrcp.f32 %v5278_v58  ;;  %v1324_v38 = vcvt.f32.s32 %v1323_v5  ;;  %v1337_v63 = vpop.xlane.xlu1 %1336  ;;  %v6409_v57 = vmul.f32 -1.442695, %v9755_v17  ;;  %vm1838_vm0 = vcmp.eq.f32.partialorder %v14026_v15, %v9735_v8 }
 0x2e4   : > { %7376 = vrcp.f32 %v5276_v6  ;;  %v1338_v16 = vcvt.f32.s32 %v1337_v63  ;;  %6778 = vmatprep.mubr.bf16.mxu1 %v5505_v32  ;;  %v1839_v9 = vsel %vm1838_vm0, %v1834_v62, inf  ;;  %v14030_v6 = vld [vmem:[#allocation57_spill] sm:$0xff]  ;;  %v1848_v15 = vcvt.s32.f32 %v1846_v1 }
 0x2e5   : > { %7378 = vpow2.f32 %v6408_v30  ;;  %v9761_v42 = vadd.s32 %v1326_v22, %v1324_v38  ;;  %6779 = vmatmul.mubr.bf16.gmra.mrb[108].mxu1 %v5506_v12  ;;  %v1353_v58 = vcvt.f32.s32 %v14030_v6  ;;  %v14032_v30 = vld [vmem:[#allocation160_spill] sm:$0xff]  ;;  %v14033_v12 = vld [vmem:[#allocation6_spill] sm:$0xff]  ;;  %v14036_v38 = vld [vmem:[#allocation7_spill] sm:$0xff] }
 0x2e6   : > { %7380 = vpow2.f32 %v6411_v7  ;;  %v9763_v51 = vadd.s32 %v1340_v3, %v1338_v16  ;;  %1840 = vmin.xlane.f32.xlu1 %v1839_v9  ;;  %v9767_v32 = vpop.xlane.xlu0 %1850  ;;  %v1860_v22 = vand.u32 65535, %v14032_v30  ;;  %v14035_v3 = vld [vmem:[#allocation161_spill] sm:$0xff]  ;;  %v1395_v7 = vcvt.f32.s32 %v9135_v27  ;;  %v14039_v9 = vld [vmem:[#allocation166_spill] sm:$0xff] }
 0x2e7   : > { %14027 = vst [vmem:[#allocation151_spill] sm:$0xff] %v9761_v42  ;;  %7382 = vpow2.f32 %v6409_v57  ;;  %14031 = vst [vmem:[#allocation150_spill] sm:$0xff] %v9767_v32  ;;  %v9769_v5 = vpop.xlane.xlu1 %1864  ;;  %vm2158_vm15 = vcmp.eq.s32.totalorder %v7914_v54, %v9761_v42  ;;  %v1367_v55 = vcvt.f32.s32 %v14035_v3  ;;  %v14038_v16 = vld [vmem:[#allocation165_spill] sm:$0xff]  ;;  %v1354_v27 = vshll.u32 %v1353_v58, 16  ;;  %v14040_v3 = vld [vmem:[#allocation58_spill] sm:$0xff] }
 0x2e8   : > { %14028 = vst [vmem:[#allocation2_spill] sm:$0xff] %v9763_v51  ;;  %v9778_v62 = vsel %vm2158_vm15, -1e+30, %v14033_v12  ;;  %vm2159_vm1 = vcmp.eq.s32.totalorder %v7914_v54, %v9763_v51  ;;  %vm1852_vm2 = vcmp.eq.f32.partialorder %v14038_v16, %v9767_v32  ;;  %v7369_v57 = vpop.eup %7368  ;;  %vm1866_vm3 = vcmp.eq.f32.partialorder %v14039_v9, %v9769_v5 }
 0x2e9   : > { %14034 = vst [vmem:[#allocation154_spill] sm:$0xff] %v9778_v62  ;;  %2290 = vmax.xlane.f32.xlu0 %v9778_v62  ;;  %v9789_v63 = vsel %vm2159_vm1, -1e+30, %v14036_v38  ;;  %v7371_v28 = vpop.eup %7370  ;;  %v1862_v12 = vcvt.s32.f32 %v1860_v22  ;;  %v1888_v42 = vand.u32 65535, %v14040_v3  ;;  %v1381_v38 = vcvt.f32.s32 %v9162_v44  ;;  %v14042_v44 = vld [vmem:[#allocation64_spill] sm:$0xff] }
 0x2ea   : > { %14037 = vst [vmem:[#allocation153_spill] sm:$0xff] %v9789_v63  ;;  %2292 = vmax.xlane.f32.xlu1 %v9789_v63  ;;  %v1351_v6 = vpop.xlane.xlu0 %1350  ;;  %v1853_v16 = vsel %vm1852_vm2, %v1848_v15, inf  ;;  %v1368_v8 = vshll.u32 %v1367_v55, 16  ;;  %v1396_v63 = vshll.u32 %v1395_v7, 16  ;;  %v5469_v22 = vmul.f32 %v7369_v57, %v9676_v13 }
 0x2eb   : > { %v1365_v30 = vpop.xlane.xlu1 %1364  ;;  %v7373_v51 = vpop.eup %7372  ;;  %v1352_v62 = vcvt.f32.s32 %v1351_v6  ;;  %v1867_v58 = vsel %vm1866_vm3, %v1862_v12, inf  ;;  %v1874_v6 = vand.u32 65535, %v14042_v44  ;;  %v5467_v55 = vmul.f32 %v7371_v28, %v9682_v46 }
 0x2ec   : > { %v1366_v10 = vcvt.f32.s32 %v1365_v30  ;;  %v5281_v1 = vadd.f32 1.0, %v7373_v51  ;;  %v1890_v12 = vcvt.s32.f32 %v1888_v42  ;;  %v1382_v57 = vshll.u32 %v1381_v38, 16  ;;  %v14044_v38 = vld [vmem:[#allocation8_spill] sm:$0xff] }
 0x2ed   : > { %v7375_v32 = vpop.eup %7374  ;;  %1854 = vmin.xlane.f32.xlu0 %v1853_v16  ;;  %v9803_v24 = vadd.s32 %v1354_v27, %v1352_v62  ;;  %v1876_v42 = vcvt.s32.f32 %v1874_v6 }
 0x2ee   : > { %v7377_v0 = vpop.eup %7376  ;;  %v5470_v3 = vmul.f32 %v7375_v32, %v9686_v14  ;;  %1868 = vmin.xlane.f32.xlu1 %v1867_v58  ;;  %v9808_v7 = vadd.s32 %v1368_v8, %v1366_v10  ;;  %v9810_v30 = vpop.xlane.xlu0 %1878  ;;  %7384 = vrcp.f32 %v5281_v1 }
 0x2ef   : > { %14041 = vst [vmem:[#allocation3_spill] sm:$0xff] %v9803_v24  ;;  %v7379_v15 = vpop.eup %7378  ;;  %v5468_v51 = vmul.f32 %v7377_v0, %v9691_v40  ;;  %v9812_v9 = vpop.xlane.xlu1 %1892  ;;  %vm2160_vm4 = vcmp.eq.s32.totalorder %v7914_v54, %v9803_v24  ;;  %v1423_v40 = vcvt.f32.s32 %v9179_v41  ;;  %vm1880_vm6 = vcmp.eq.f32.partialorder %v9169_v50, %v9810_v30  ;;  %v14061_v24 = vld [vmem:[#allocation72_spill] sm:$0xff] }
 0x2f0   : > { %14043 = vst [vmem:[#allocation49_spill] sm:$0xff] %v9808_v7  ;;  %v7381_v13 = vpop.eup %7380  ;;  %v5508_v14 = vpack.c.bf16 %v5470_v3, %v5469_v22  ;;  %v5279_v32 = vadd.f32 1.0, %v7379_v15  ;;  %v9814_v62 = vpop.f32.mrb[56].mxu1  ;;  %v9829_v1 = vsel %vm2160_vm4, -1e+30, %v14044_v38  ;;  %vm2161_vm5 = vcmp.eq.s32.totalorder %v7914_v54, %v9808_v7  ;;  %v14045_v3 = vld [vmem:[#allocation9_spill] sm:$0xff] }
 0x2f1   : > { %v7383_v27 = vpop.eup %7382  ;;  %v5507_v16 = vpack.c.bf16 %v5468_v51, %v5467_v55  ;;  %v5282_v58 = vadd.f32 1.0, %v7381_v13  ;;  %v6414_v46 = vmul.f32 -1.442695, %v9814_v62  ;;  %v9817_v0 = vpop.f32.mrb[57].mxu1  ;;  %2294 = vmax.xlane.f32.xlu0 %v9829_v1  ;;  %v9840_v44 = vsel %vm2161_vm5, -1e+30, %v14045_v3 }
 0x2f2   : > { %7386 = vrcp.f32 %v5279_v32  ;;  %v5280_v8 = vadd.f32 1.0, %v7383_v27  ;;  %v9822_v10 = vpop.f32.mrb[58].mxu1  ;;  %v6412_v28 = vmul.f32 -1.442695, %v9817_v0  ;;  %v1379_v22 = vpop.xlane.xlu0 %1378  ;;  %14046 = vst [vmem:[#allocation4_spill] sm:$0xff] %v9840_v44  ;;  %2296 = vmax.xlane.f32.xlu1 %v9840_v44  ;;  %v1409_v32 = vcvt.f32.s32 %v9213_v52  ;;  %v14051_v52 = vld [vmem:[#allocation171_spill] sm:$0xff] }
 0x2f3   : > { %7388 = vrcp.f32 %v5282_v58  ;;  %6782 = vmatprep.mubr.bf16.mxu1 %v5507_v16  ;;  %v9833_v41 = vpop.f32.mrb[59].mxu1  ;;  %v6415_v6 = vmul.f32 -1.442695, %v9822_v10  ;;  %v1380_v15 = vcvt.f32.s32 %v1379_v22  ;;  %v1393_v55 = vpop.xlane.xlu1 %1392  ;;  %v14048_v16 = vld [vmem:[#allocation169_spill] sm:$0xff]  ;;  %v1451_v58 = vcvt.f32.s32 %v9221_v29  ;;  %v14055_v22 = vld [vmem:[#allocation11_spill] sm:$0xff] }
 0x2f4   : > { %7390 = vrcp.f32 %v5280_v8  ;;  %6783 = vmatmul.mubr.bf16.gmra.mrb[112].mxu1 %v5508_v14  ;;  %v1394_v51 = vcvt.f32.s32 %v1393_v55  ;;  %v6413_v13 = vmul.f32 -1.442695, %v9833_v41  ;;  %vm1894_vm8 = vcmp.eq.f32.partialorder %v14048_v16, %v9812_v9 }
 0x2f5   : > { %7392 = vpow2.f32 %v6414_v46  ;;  %v9848_v27 = vadd.s32 %v1382_v57, %v1380_v15  ;;  %v1881_v46 = vsel %vm1880_vm6, %v1876_v42, inf  ;;  %v1895_v38 = vsel %vm1894_vm8, %v1890_v12, inf }
 0x2f6   : > { %7394 = vpow2.f32 %v6412_v28  ;;  %v9853_v14 = vadd.s32 %v1396_v63, %v1394_v51  ;;  %v9855_v8 = vpop.xlane.xlu0 %1906  ;;  %1882 = vmin.xlane.f32.xlu0 %v1881_v46  ;;  %v1902_v57 = vand.u32 65535, %v14051_v52  ;;  %1896 = vmin.xlane.f32.xlu1 %v1895_v38  ;;  %v14052_v28 = vld [vmem:[#allocation10_spill] sm:$0xff]  ;;  %v14054_v63 = vld [vmem:[#allocation168_spill] sm:$0xff]  ;;  %v1410_v15 = vshll.u32 %v1409_v32, 16 }
 0x2f7   : > { %14047 = vst [vmem:[#allocation155_spill] sm:$0xff] %v9848_v27  ;;  %7396 = vpow2.f32 %v6415_v6  ;;  %v9857_v50 = vpop.xlane.xlu1 %1920  ;;  %vm2162_vm10 = vcmp.eq.s32.totalorder %v7914_v54, %v9848_v27  ;;  %v1916_v42 = vand.u32 65535, %v14054_v63  ;;  %v1424_v6 = vshll.u32 %v1423_v40, 16  ;;  %v14057_v52 = vld [vmem:[#allocation70_spill] sm:$0xff] }
 0x2f8   : > { %14049 = vst [vmem:[#allocation156_spill] sm:$0xff] %v9853_v14  ;;  %7398 = vpow2.f32 %v6413_v13  ;;  %14050 = vst [vmem:[#allocation158_spill] sm:$0xff] %v9857_v50  ;;  %v9866_v29 = vsel %vm2162_vm10, -1e+30, %v14052_v28  ;;  %vm2163_vm12 = vcmp.eq.s32.totalorder %v7914_v54, %v9853_v14  ;;  %v7385_v12 = vpop.eup %7384  ;;  %v9877_v55 = vshll.u32 %v1451_v58, 16  ;;  %v14058_v28 = vld [vmem:[#allocation71_spill] sm:$0xff] }
 0x2f9   : > { %14053 = vst [vmem:[#allocation5_spill] sm:$0xff] %v9866_v29  ;;  %v9875_v3 = vsel %vm2163_vm12, -1e+30, %v14055_v22  ;;  %v1904_v38 = vcvt.s32.f32 %v1902_v57  ;;  %vm1908_vm14 = vcmp.eq.f32.partialorder %v14057_v52, %v9855_v8  ;;  %v1930_v63 = vand.u32 65535, %v14058_v28  ;;  %v14059_v58 = vld [vmem:[#allocation172_spill] sm:$0xff] }
 0x2fa   : > { %14056 = vst [vmem:[#allocation52_spill] sm:$0xff] %v9875_v3  ;;  %v1407_v51 = vpop.xlane.xlu0 %1406  ;;  %2298 = vmax.xlane.f32.xlu0 %v9866_v29  ;;  %v1437_v22 = vcvt.f32.s32 %v9248_v36  ;;  %2300 = vmax.xlane.f32.xlu1 %v9875_v3  ;;  %v1918_v32 = vcvt.s32.f32 %v1916_v42  ;;  %vm1922_vm0 = vcmp.eq.f32.partialorder %v14059_v58, %v9857_v50  ;;  %v1944_v29 = vand.u32 65535, %v14061_v24  ;;  %v14065_v58 = vld [vmem:[#allocation12_spill] sm:$0xff] }
 0x2fb   : > { %v1408_v16 = vcvt.f32.s32 %v1407_v51  ;;  %v1421_v46 = vpop.xlane.xlu1 %1420  ;;  %v5473_v51 = vmul.f32 %v7385_v12, %v9737_v43  ;;  %v1909_v42 = vsel %vm1908_vm14, %v1904_v38, inf }
 0x2fc   : > { %v7387_v13 = vpop.eup %7386  ;;  %v1422_v40 = vcvt.f32.s32 %v1421_v46  ;;  %v1923_v24 = vsel %vm1922_vm0, %v1918_v32, inf }
 0x2fd   : > { %v7389_v27 = vpop.eup %7388  ;;  %v9889_v7 = vadd.s32 %v1410_v15, %v1408_v16  ;;  %v5471_v44 = vmul.f32 %v7387_v13, %v9747_v59  ;;  %v1438_v15 = vshll.u32 %v1437_v22, 16 }
 0x2fe   : > { %v7391_v14 = vpop.eup %7390  ;;  %v5474_v57 = vmul.f32 %v7389_v27, %v9752_v21  ;;  %v9894_v3 = vadd.s32 %v1424_v6, %v1422_v40  ;;  %v9899_v46 = vpop.xlane.xlu0 %1934  ;;  %1910 = vmin.xlane.f32.xlu0 %v1909_v42  ;;  %1924 = vmin.xlane.f32.xlu1 %v1923_v24 }
 0x2ff   : > { %14060 = vst [vmem:[#allocation159_spill] sm:$0xff] %v9889_v7  ;;  %v7393_v28 = vpop.eup %7392  ;;  %v5472_v36 = vmul.f32 %v7391_v14, %v9755_v17  ;;  %14063 = vst [vmem:[#allocation57_spill] sm:$0xff] %v9899_v46  ;;  %v9901_v43 = vpop.f32.mrb[60].mxu1  ;;  %v1932_v14 = vcvt.s32.f32 %v1930_v63  ;;  %vm2164_vm2 = vcmp.eq.s32.totalorder %v7914_v54, %v9889_v7 }
 0x300   : > { %14062 = vst [vmem:[#allocation164_spill] sm:$0xff] %v9894_v3  ;;  %v7395_v21 = vpop.eup %7394  ;;  %v5510_v27 = vpack.c.bf16 %v5474_v57, %v5473_v51  ;;  %v5285_v12 = vadd.f32 1.0, %v7393_v28  ;;  %v9906_v59 = vpop.xlane.xlu1 %1948  ;;  %v6418_v32 = vmul.f32 -1.442695, %v9901_v43  ;;  %v9919_v63 = vsel %vm2164_vm2, -1e+30, %v14065_v58 }
 0x301   : > { %14064 = vst [vmem:[#allocation160_spill] sm:$0xff] %v9906_v59  ;;  %v9908_v17 = vpop.f32.mrb[61].mxu1  ;;  %v7397_v6 = vpop.eup %7396  ;;  %v5509_v13 = vpack.c.bf16 %v5472_v36, %v5471_v44  ;;  %v5283_v16 = vadd.f32 1.0, %v7395_v21  ;;  %14066 = vst [vmem:[#allocation6_spill] sm:$0xff] %v9919_v63  ;;  %vm2165_vm3 = vcmp.eq.s32.totalorder %v7914_v54, %v9894_v3  ;;  %v1946_v57 = vcvt.s32.f32 %v1944_v29  ;;  %v14067_v28 = vld [vmem:[#allocation13_spill] sm:$0xff] }
 0x302   : > { %v9912_v38 = vpop.f32.mrb[62].mxu1  ;;  %v7399_v52 = vpop.eup %7398  ;;  %7400 = vrcp.f32 %v5285_v12  ;;  %v5286_v40 = vadd.f32 1.0, %v7397_v6  ;;  %2302 = vmax.xlane.f32.xlu0 %v9919_v63  ;;  %v9930_v36 = vsel %vm2165_vm3, -1e+30, %v14067_v28  ;;  %v6416_v42 = vmul.f32 -1.442695, %v9908_v17 }
 0x303   : > { %v9921_v22 = vpop.f32.mrb[63].mxu1  ;;  %7402 = vrcp.f32 %v5283_v16  ;;  %v5284_v44 = vadd.f32 1.0, %v7399_v52  ;;  %v1435_v51 = vpop.xlane.xlu0 %1434  ;;  %6786 = vmatprep.mubr.bf16.mxu1 %v5509_v13  ;;  %14068 = vst [vmem:[#allocation161_spill] sm:$0xff] %v9930_v36  ;;  %2304 = vmax.xlane.f32.xlu1 %v9930_v36  ;;  %v6419_v29 = vmul.f32 -1.442695, %v9912_v38  ;;  %v14070_v16 = vld [vmem:[#allocation175_spill] sm:$0xff] }
 0x304   : > { %7404 = vrcp.f32 %v5286_v40  ;;  %v1436_v21 = vcvt.f32.s32 %v1435_v51  ;;  %v1449_v12 = vpop.xlane.xlu1 %1448  ;;  %6787 = vmatmul.mubr.bf16.gmra.mrb[116].mxu1 %v5510_v27  ;;  %v6417_v6 = vmul.f32 -1.442695, %v9921_v22  ;;  %vm1936_vm6 = vcmp.eq.f32.partialorder %v14070_v16, %v9899_v46  ;;  %v14071_v52 = vld [vmem:[#allocation176_spill] sm:$0xff] }
 0x305   : > { %7406 = vrcp.f32 %v5284_v44  ;;  %v1450_v24 = vcvt.f32.s32 %v1449_v12  ;;  %vm1950_vm8 = vcmp.eq.f32.partialorder %v14071_v52, %v9906_v59  ;;  %v1479_v40 = vcvt.f32.s32 %v9263_v53 }
 0x306   : > { %7408 = vpow2.f32 %v6418_v32  ;;  %v9936_v13 = vadd.s32 %v1438_v15, %v1436_v21  ;;  %v1937_v58 = vsel %vm1936_vm6, %v1932_v14, inf  ;;  %v9948_v51 = vpop.f32.mrb[64].mxu1  ;;  %v14073_v32 = vld [vmem:[#allocation179_spill] sm:$0xff]  ;;  %v1951_v28 = vsel %vm1950_vm8, %v1946_v57, inf  ;;  %v14076_v57 = vld [vmem:[#allocation178_spill] sm:$0xff] }
 0x307   : > { %7410 = vpow2.f32 %v6416_v42  ;;  %v9944_v27 = vadd.s32 %v9877_v55, %v1450_v24  ;;  %v9946_v44 = vpop.xlane.xlu0 %1962  ;;  %v1465_v15 = vcvt.f32.s32 %v14073_v32  ;;  %1938 = vmin.xlane.f32.xlu0 %v1937_v58  ;;  %v9955_v53 = vpop.f32.mrb[65].mxu1  ;;  %1952 = vmin.xlane.f32.xlu1 %v1951_v28  ;;  %v14074_v55 = vld [vmem:[#allocation14_spill] sm:$0xff]  ;;  %v1958_v12 = vand.u32 65535, %v14076_v57 }
 0x308   : > { %14069 = vst [vmem:[#allocation7_spill] sm:$0xff] %v9936_v13  ;;  %7412 = vpow2.f32 %v6419_v29  ;;  %v9951_v21 = vpop.xlane.xlu1 %1976  ;;  %vm13447_vm14 = vcmp.eq.s32.totalorder %v7914_v54, %v9936_v13  ;;  %v9965_v42 = vpop.f32.mrb[66].mxu1  ;;  %v1507_v24 = vcvt.f32.s32 %v9304_v18  ;;  %v14077_v29 = vld [vmem:[#allocation15_spill] sm:$0xff]  ;;  %v14079_v58 = vld [vmem:[#allocation174_spill] sm:$0xff]  ;;  %v1480_v7 = vshll.u32 %v1479_v40, 16 }
 0x309   : > { %14072 = vst [vmem:[#allocation165_spill] sm:$0xff] %v9944_v27  ;;  %7414 = vpow2.f32 %v6417_v6  ;;  %v9961_v14 = vsel %vm13447_vm14, -1e+30, %v14074_v55  ;;  %vm13351_vm0 = vcmp.eq.s32.totalorder %v7914_v54, %v9944_v27  ;;  %v9977_v52 = vpop.f32.mrb[67].mxu1  ;;  %v1972_v32 = vand.u32 65535, %v14079_v58  ;;  %v14081_v58 = vld [vmem:[#allocation180_spill] sm:$0xff] }
 0x30a   : > { %14075 = vst [vmem:[#allocation166_spill] sm:$0xff] %v9961_v14  ;;  %v9973_v6 = vsel %vm13351_vm0, -1e+30, %v14077_v29  ;;  %v1466_v13 = vshll.u32 %v1465_v15, 16  ;;  %v14080_v29 = vld [vmem:[#allocation83_spill] sm:$0xff]  ;;  %v1960_v36 = vcvt.s32.f32 %v1958_v12  ;;  %vm1978_vm8 = vcmp.eq.f32.partialorder %v14081_v58, %v9951_v21 }
 0x30b   : > { %14078 = vst [vmem:[#allocation58_spill] sm:$0xff] %v9973_v6  ;;  %v1463_v28 = vpop.xlane.xlu0 %1462  ;;  %2306 = vmax.xlane.f32.xlu0 %v9961_v14  ;;  %vm1964_vm6 = vcmp.eq.f32.partialorder %v14080_v29, %v9946_v44  ;;  %2308 = vmax.xlane.f32.xlu1 %v9973_v6  ;;  %v1508_v55 = vshll.u32 %v1507_v24, 16  ;;  %v1493_v15 = vcvt.f32.s32 %v9335_v47 }
 0x30c   : > { %v7401_v57 = vpop.eup %7400  ;;  %v1464_v18 = vcvt.f32.s32 %v1463_v28  ;;  %v1477_v3 = vpop.xlane.xlu1 %1476  ;;  %v1974_v28 = vcvt.s32.f32 %v1972_v32 }
 0x30d   : > { %v7403_v27 = vpop.eup %7402  ;;  %v1478_v16 = vcvt.f32.s32 %v1477_v3  ;;  %v5477_v46 = vmul.f32 %v7401_v57, %v9814_v62  ;;  %v1965_v3 = vsel %vm1964_vm6, %v1960_v36, inf  ;;  %v14084_v36 = vld [vmem:[#allocation16_spill] sm:$0xff] }
 0x30e   : > { %v7405_v59 = vpop.eup %7404  ;;  %v9989_v63 = vadd.s32 %v1466_v13, %v1464_v18  ;;  %v5475_v24 = vmul.f32 %v7403_v27, %v9817_v0  ;;  %v1979_v62 = vsel %vm1978_vm8, %v1974_v28, inf  ;;  %v14086_v57 = vld [vmem:[#allocation84_spill] sm:$0xff] }
 0x30f   : > { %v7407_v14 = vpop.eup %7406  ;;  %v5478_v50 = vmul.f32 %v7405_v59, %v9822_v10  ;;  %v9993_v40 = vadd.s32 %v1480_v7, %v1478_v16  ;;  %v9998_v12 = vpop.xlane.xlu0 %1990  ;;  %1966 = vmin.xlane.f32.xlu0 %v1965_v3  ;;  %1980 = vmin.xlane.f32.xlu1 %v1979_v62  ;;  %v2000_v18 = vand.u32 65535, %v14086_v57 }
 0x310   : > { %14082 = vst [vmem:[#allocation64_spill] sm:$0xff] %v9989_v63  ;;  %v7409_v6 = vpop.eup %7408  ;;  %v5476_v47 = vmul.f32 %v7407_v14, %v9833_v41  ;;  %v10005_v13 = vpop.xlane.xlu1 %2004  ;;  %vm13353_vm0 = vcmp.eq.s32.totalorder %v7914_v54, %v9989_v63  ;;  %v14085_v41 = vld [vmem:[#allocation85_spill] sm:$0xff]  ;;  %vm1992_vm8 = vcmp.eq.f32.partialorder %v9341_v60, %v9998_v12 }
 0x311   : > { %14083 = vst [vmem:[#allocation8_spill] sm:$0xff] %v9993_v40  ;;  %v7411_v7 = vpop.eup %7410  ;;  %v5512_v10 = vpack.c.bf16 %v5478_v50, %v5477_v46  ;;  %v5289_v59 = vadd.f32 1.0, %v7409_v6  ;;  %v10013_v0 = vsel %vm13353_vm0, -1e+30, %v14084_v36  ;;  %v1986_v27 = vand.u32 65535, %v14085_v41  ;;  %v14087_v6 = vld [vmem:[#allocation17_spill] sm:$0xff] }
 0x312   : > { %v7413_v14 = vpop.eup %7412  ;;  %v5511_v16 = vpack.c.bf16 %v5476_v47, %v5475_v24  ;;  %v5287_v32 = vadd.f32 1.0, %v7411_v7  ;;  %vm13352_vm6 = vcmp.eq.s32.totalorder %v7914_v54, %v9993_v40  ;;  %v1494_v50 = vshll.u32 %v1493_v15, 16  ;;  %v14090_v60 = vld [vmem:[#allocation185_spill] sm:$0xff] }
 0x313   : > { %v7415_v29 = vpop.eup %7414  ;;  %7416 = vrcp.f32 %v5289_v59  ;;  %v5290_v46 = vadd.f32 1.0, %v7413_v14  ;;  %v10023_v58 = vsel %vm13352_vm6, -1e+30, %v14087_v6  ;;  %v1491_v28 = vpop.xlane.xlu0 %1490  ;;  %2310 = vmax.xlane.f32.xlu0 %v10013_v0  ;;  %v1988_v62 = vcvt.s32.f32 %v1986_v27 }
 0x314   : > { %7418 = vrcp.f32 %v5287_v32  ;;  %v5288_v3 = vadd.f32 1.0, %v7415_v29  ;;  %v1492_v24 = vcvt.f32.s32 %v1491_v28  ;;  %v1505_v47 = vpop.xlane.xlu1 %1504  ;;  %6790 = vmatprep.mubr.bf16.mxu1 %v5511_v16  ;;  %2312 = vmax.xlane.f32.xlu1 %v10023_v58  ;;  %vm2006_vm6 = vcmp.eq.f32.partialorder %v9343_v19, %v10005_v13  ;;  %v14094_v28 = vld [vmem:[#allocation19_spill] sm:$0xff] }
 0x315   : > { %7420 = vrcp.f32 %v5290_v46  ;;  %v1506_v15 = vcvt.f32.s32 %v1505_v47  ;;  %6791 = vmatmul.mubr.bf16.gmra.mrb[120].mxu1 %v5512_v10  ;;  %v2002_v59 = vcvt.s32.f32 %v2000_v18  ;;  %v1993_v41 = vsel %vm1992_vm8, %v1988_v62, inf  ;;  %v14091_v18 = vld [vmem:[#allocation18_spill] sm:$0xff] }
 0x316   : > { %7422 = vrcp.f32 %v5288_v3  ;;  %v10031_v7 = vadd.s32 %v1494_v50, %v1492_v24  ;;  %v10037_v16 = vpop.f32.mrb[68].mxu1  ;;  %v1521_v32 = vcvt.f32.s32 %v14090_v60  ;;  %v1535_v19 = vcvt.f32.s32 %v9353_v23  ;;  %v14093_v50 = vld [vmem:[#allocation91_spill] sm:$0xff]  ;;  %v14096_v24 = vld [vmem:[#allocation182_spill] sm:$0xff] }
 0x317   : > { %v10033_v36 = vadd.s32 %v1508_v55, %v1506_v15  ;;  %v10035_v14 = vpop.xlane.xlu0 %2018  ;;  %1994 = vmin.xlane.f32.xlu0 %v1993_v41  ;;  %v2007_v57 = vsel %vm2006_vm6, %v2002_v59, inf  ;;  %v10042_v27 = vpop.f32.mrb[69].mxu1  ;;  %v2014_v46 = vand.u32 65535, %v14093_v50  ;;  %v2028_v47 = vand.u32 65535, %v14096_v24  ;;  %v14098_v24 = vld [vmem:[#allocation186_spill] sm:$0xff] }
 0x318   : > { %14088 = vst [vmem:[#allocation9_spill] sm:$0xff] %v10031_v7  ;;  %v10040_v10 = vpop.xlane.xlu1 %2032  ;;  %vm13361_vm0 = vcmp.eq.s32.totalorder %v7914_v54, %v10031_v7  ;;  %2008 = vmin.xlane.f32.xlu1 %v2007_v57  ;;  %v10047_v55 = vpop.f32.mrb[70].mxu1  ;;  %v1522_v59 = vshll.u32 %v1521_v32, 16  ;;  %v14097_v57 = vld [vmem:[#allocation97_spill] sm:$0xff]  ;;  %v1536_v50 = vshll.u32 %v1535_v19, 16  ;;  %v1563_v15 = vcvt.f32.s32 %v9392_v56 }
 0x319   : > { %14089 = vst [vmem:[#allocation169_spill] sm:$0xff] %v10033_v36  ;;  %v10053_v29 = vsel %vm13361_vm0, -1e+30, %v14091_v18  ;;  %vm13354_vm6 = vcmp.eq.s32.totalorder %v7914_v54, %v10033_v36  ;;  %v10066_v3 = vpop.f32.mrb[71].mxu1  ;;  %vm2020_vm8 = vcmp.eq.f32.partialorder %v14097_v57, %v10035_v14  ;;  %v2016_v6 = vcvt.s32.f32 %v2014_v46 }
 0x31a   : > { %14092 = vst [vmem:[#allocation171_spill] sm:$0xff] %v10053_v29  ;;  %v10064_v23 = vsel %vm13354_vm6, -1e+30, %v14094_v28  ;;  %vm2034_vm6 = vcmp.eq.f32.partialorder %v14098_v24, %v10040_v10  ;;  %v2030_v7 = vcvt.s32.f32 %v2028_v47  ;;  %v1549_v40 = vcvt.f32.s32 %v9425_v25  ;;  %v14102_v47 = vld [vmem:[#allocation20_spill] sm:$0xff] }
 0x31b   : > { %14095 = vst [vmem:[#allocation10_spill] sm:$0xff] %v10064_v23  ;;  %v1519_v62 = vpop.xlane.xlu0 %1518  ;;  %2314 = vmax.xlane.f32.xlu0 %v10053_v29  ;;  %v2021_v57 = vsel %vm2020_vm8, %v2016_v6, inf }
 0x31c   : > { %v1520_v41 = vcvt.f32.s32 %v1519_v62  ;;  %v1533_v60 = vpop.xlane.xlu1 %1532  ;;  %2316 = vmax.xlane.f32.xlu1 %v10064_v23  ;;  %v14101_v23 = vld [vmem:[#allocation98_spill] sm:$0xff]  ;;  %v2035_v56 = vsel %vm2034_vm6, %v2030_v7, inf }
 0x31d   : > { %v7417_v18 = vpop.eup %7416  ;;  %v1534_v28 = vcvt.f32.s32 %v1533_v60  ;;  %v2042_v60 = vand.u32 65535, %v14101_v23 }
 0x31e   : > { %v7419_v36 = vpop.eup %7418  ;;  %v10078_v32 = vadd.s32 %v1522_v59, %v1520_v41  ;;  %v5481_v29 = vmul.f32 %v7417_v18, %v9901_v43  ;;  %v1550_v18 = vshll.u32 %v1549_v40, 16 }
 0x31f   : > { %v7421_v62 = vpop.eup %7420  ;;  %v10081_v63 = vadd.s32 %v1536_v50, %v1534_v28  ;;  %v10083_v19 = vpop.xlane.xlu0 %2046  ;;  %2022 = vmin.xlane.f32.xlu0 %v2021_v57  ;;  %v5479_v25 = vmul.f32 %v7419_v36, %v9908_v17  ;;  %v14104_v17 = vld [vmem:[#allocation96_spill] sm:$0xff]  ;;  %v2044_v57 = vcvt.s32.f32 %v2042_v60 }
 0x320   : > { %14099 = vst [vmem:[#allocation168_spill] sm:$0xff] %v10078_v32  ;;  %v7423_v46 = vpop.eup %7422  ;;  %v5482_v24 = vmul.f32 %v7421_v62, %v9912_v38  ;;  %v10088_v59 = vpop.xlane.xlu1 %2060  ;;  %vm13363_vm0 = vcmp.eq.s32.totalorder %v7914_v54, %v10078_v32  ;;  %2036 = vmin.xlane.f32.xlu1 %v2035_v56  ;;  %v14103_v38 = vld [vmem:[#allocation21_spill] sm:$0xff]  ;;  %v2056_v36 = vand.u32 65535, %v14104_v17  ;;  %vm2048_vm6 = vcmp.eq.f32.partialorder %v9431_v49, %v10083_v19  ;;  %v14110_v17 = vld [vmem:[#allocation22_spill] sm:$0xff] }
 0x321   : > { %14100 = vst [vmem:[#allocation11_spill] sm:$0xff] %v10081_v63  ;;  %v5480_v6 = vmul.f32 %v7423_v46, %v9921_v22  ;;  %v10098_v23 = vsel %vm13363_vm0, -1e+30, %v14102_v47  ;;  %vm13362_vm8 = vcmp.eq.s32.totalorder %v7914_v54, %v10081_v63  ;;  %v1564_v62 = vshll.u32 %v1563_v15, 16 }
 0x322   : > { %v5514_v43 = vpack.c.bf16 %v5482_v24, %v5481_v29  ;;  %v10106_v7 = vsel %vm13362_vm8, -1e+30, %v14103_v38  ;;  %vm2062_vm8 = vcmp.eq.f32.partialorder %v9443_v4, %v10088_v59  ;;  %v2058_v40 = vcvt.s32.f32 %v2056_v36  ;;  %v14109_v4 = vld [vmem:[#allocation189_spill] sm:$0xff] }
 0x323   : > { %v5513_v22 = vpack.c.bf16 %v5480_v6, %v5479_v25  ;;  %v1547_v41 = vpop.xlane.xlu0 %1546  ;;  %2318 = vmax.xlane.f32.xlu0 %v10098_v23  ;;  %v2049_v56 = vsel %vm2048_vm6, %v2044_v57, inf  ;;  %v14107_v6 = vld [vmem:[#allocation192_spill] sm:$0xff]  ;;  %v1591_v60 = vcvt.f32.s32 %v14109_v4  ;;  %v14117_v57 = vld [vmem:[#allocation109_spill] sm:$0xff] }
 0x324   : > { %v1548_v50 = vcvt.f32.s32 %v1547_v41  ;;  %v1561_v28 = vpop.xlane.xlu1 %1560  ;;  %2320 = vmax.xlane.f32.xlu1 %v10106_v7  ;;  %v1577_v49 = vcvt.f32.s32 %v14107_v6  ;;  %v2063_v15 = vsel %vm2062_vm8, %v2058_v40, inf }
 0x325   : > { %v1562_v29 = vcvt.f32.s32 %v1561_v28  ;;  %6794 = vmatprep.mubr.bf16.mxu1 %v5513_v22  ;;  %v14112_v22 = vld [vmem:[#allocation104_spill] sm:$0xff] }
 0x326   : > { %v10115_v46 = vadd.s32 %v1550_v18, %v1548_v50  ;;  %6795 = vmatmul.mubr.bf16.gmra.mrb[124].mxu1 %v5514_v43  ;;  %v2070_v41 = vand.u32 65535, %v14112_v22  ;;  %v14113_v50 = vld [vmem:[#allocation23_spill] sm:$0xff]  ;;  %v1578_v6 = vshll.u32 %v1577_v49, 16  ;;  %v14116_v22 = vld [vmem:[#allocation110_spill] sm:$0xff] }
 0x327   : > { %v10117_v24 = vadd.s32 %v1564_v62, %v1562_v29  ;;  %v10119_v25 = vpop.xlane.xlu0 %2074  ;;  %2050 = vmin.xlane.f32.xlu0 %v2049_v56  ;;  %v10124_v38 = vpop.f32.mrb[72].mxu1  ;;  %v14115_v62 = vld [vmem:[#allocation103_spill] sm:$0xff] }
 0x328   : > { %14105 = vst [vmem:[#allocation70_spill] sm:$0xff] %v10115_v46  ;;  %v10122_v47 = vpop.xlane.xlu1 %2088  ;;  %vm13369_vm0 = vcmp.eq.s32.totalorder %v7914_v54, %v10115_v46  ;;  %2064 = vmin.xlane.f32.xlu1 %v2063_v15  ;;  %v10129_v43 = vpop.f32.mrb[73].mxu1  ;;  %v2084_v29 = vand.u32 65535, %v14115_v62  ;;  %vm2076_vm6 = vcmp.eq.f32.partialorder %v14116_v22, %v10119_v25 }
 0x329   : > { %14106 = vst [vmem:[#allocation71_spill] sm:$0xff] %v10117_v24  ;;  %14108 = vst [vmem:[#allocation172_spill] sm:$0xff] %v10122_v47  ;;  %v10135_v36 = vsel %vm13369_vm0, -1e+30, %v14110_v17  ;;  %vm13365_vm8 = vcmp.eq.s32.totalorder %v7914_v54, %v10117_v24  ;;  %v10140_v18 = vpop.f32.mrb[74].mxu1  ;;  %v2072_v24 = vcvt.s32.f32 %v2070_v41  ;;  %v1619_v41 = vcvt.f32.s32 %v9478_v61 }
 0x32a   : > { %14111 = vst [vmem:[#allocation72_spill] sm:$0xff] %v10135_v36  ;;  %v10146_v28 = vsel %vm13365_vm8, -1e+30, %v14113_v50  ;;  %v10151_v40 = vpop.f32.mrb[75].mxu1  ;;  %v1592_v50 = vshll.u32 %v1591_v60, 16  ;;  %vm2090_vm8 = vcmp.eq.f32.partialorder %v14117_v57, %v10122_v47  ;;  %v2086_v49 = vcvt.s32.f32 %v2084_v29  ;;  %v14122_v57 = vld [vmem:[#allocation24_spill] sm:$0xff] }
 0x32b   : > { %14114 = vst [vmem:[#allocation12_spill] sm:$0xff] %v10146_v28  ;;  %v1575_v56 = vpop.xlane.xlu0 %1574  ;;  %2322 = vmax.xlane.f32.xlu0 %v10135_v36  ;;  %v2077_v32 = vsel %vm2076_vm6, %v2072_v24, inf  ;;  %v14125_v24 = vld [vmem:[#allocation25_spill] sm:$0xff] }
 0x32c   : > { %v1576_v4 = vcvt.f32.s32 %v1575_v56  ;;  %v1589_v17 = vpop.xlane.xlu1 %1588  ;;  %2324 = vmax.xlane.f32.xlu1 %v10146_v28  ;;  %v1605_v56 = vcvt.f32.s32 %v9506_v39  ;;  %v2091_v22 = vsel %vm2090_vm8, %v2086_v49, inf  ;;  %v14124_v39 = vld [vmem:[#allocation117_spill] sm:$0xff]  ;;  %v14132_v28 = vld [vmem:[#allocation195_spill] sm:$0xff] }
 0x32d   : > { %v1590_v62 = vcvt.f32.s32 %v1589_v17 }
 0x32e   : > { %v10161_v46 = vadd.s32 %v1578_v6, %v1576_v4  ;;  %v14127_v4 = vld [vmem:[#allocation193_spill] sm:$0xff] }
 0x32f   : > { %v10163_v63 = vadd.s32 %v1592_v50, %v1590_v62  ;;  %v10165_v15 = vpop.xlane.xlu0 %2102  ;;  %2078 = vmin.xlane.f32.xlu0 %v2077_v32  ;;  %v2098_v32 = vand.u32 65535, %v14124_v39  ;;  %v2112_v61 = vand.u32 65535, %v14127_v4  ;;  %v1606_v50 = vshll.u32 %v1605_v56, 16 }
 0x330   : > { %14118 = vst [vmem:[#allocation13_spill] sm:$0xff] %v10161_v46  ;;  %14120 = vst [vmem:[#allocation176_spill] sm:$0xff] %v10165_v15  ;;  %v10168_v60 = vpop.xlane.xlu1 %2116  ;;  %vm13376_vm0 = vcmp.eq.s32.totalorder %v7914_v54, %v10161_v46  ;;  %2092 = vmin.xlane.f32.xlu1 %v2091_v22  ;;  %vm2104_vm8 = vcmp.eq.f32.partialorder %v9514_v26, %v10165_v15  ;;  %v1620_v22 = vshll.u32 %v1619_v41, 16  ;;  %v1633_v26 = vcvt.f32.s32 %v14132_v28  ;;  %v14135_v28 = vld [vmem:[#allocation124_spill] sm:$0xff] }
 0x331   : > { %14119 = vst [vmem:[#allocation175_spill] sm:$0xff] %v10163_v63  ;;  %14121 = vst [vmem:[#allocation179_spill] sm:$0xff] %v10168_v60  ;;  %v10177_v29 = vsel %vm13376_vm0, -1e+30, %v14122_v57  ;;  %vm13370_vm6 = vcmp.eq.s32.totalorder %v7914_v54, %v10163_v63  ;;  %v2100_v39 = vcvt.s32.f32 %v2098_v32  ;;  %v2114_v4 = vcvt.s32.f32 %v2112_v61  ;;  %v14129_v63 = vld [vmem:[#allocation196_spill] sm:$0xff]  ;;  %v14133_v32 = vld [vmem:[#allocation26_spill] sm:$0xff] }
 0x332   : > { %14123 = vst [vmem:[#allocation14_spill] sm:$0xff] %v10177_v29  ;;  %v10186_v6 = vsel %vm13370_vm6, -1e+30, %v14125_v24  ;;  %vm2118_vm6 = vcmp.eq.f32.partialorder %v9520_v34, %v10168_v60  ;;  %v1647_v56 = vcvt.f32.s32 %v14129_v63  ;;  %v2126_v61 = vand.u32 65535, %v14135_v28 }
 0x333   : > { %14126 = vst [vmem:[#allocation178_spill] sm:$0xff] %v10186_v6  ;;  %v1603_v17 = vpop.xlane.xlu0 %1602  ;;  %2326 = vmax.xlane.f32.xlu0 %v10177_v29  ;;  %v2119_v41 = vsel %vm2118_vm6, %v2114_v4, inf  ;;  %v1675_v4 = vcvt.f32.s32 %v9573_v31 }
 0x334   : > { %v1604_v62 = vcvt.f32.s32 %v1603_v17  ;;  %v1617_v49 = vpop.xlane.xlu1 %1616  ;;  %2328 = vmax.xlane.f32.xlu1 %v10186_v6  ;;  %v2105_v17 = vsel %vm2104_vm8, %v2100_v39, inf  ;;  %v1648_v39 = vshll.u32 %v1647_v56, 16  ;;  %v2128_v56 = vcvt.s32.f32 %v2126_v61 }
 0x335   : > { %v1618_v57 = vcvt.f32.s32 %v1617_v49  ;;  %v1676_v61 = vshll.u32 %v1675_v4, 16 }
 0x336   : > { %v10195_v24 = vadd.s32 %v1606_v50, %v1604_v62  ;;  %v14136_v62 = vld [vmem:[#allocation27_spill] sm:$0xff] }
 0x337   : > { %v10198_v46 = vadd.s32 %v1620_v22, %v1618_v57  ;;  %v10200_v29 = vpop.xlane.xlu0 %2130  ;;  %2106 = vmin.xlane.f32.xlu0 %v2105_v17  ;;  %v14138_v22 = vld [vmem:[#allocation116_spill] sm:$0xff]  ;;  %v1661_v17 = vcvt.f32.s32 %v9568_v48 }
 0x338   : > { %14128 = vst [vmem:[#allocation15_spill] sm:$0xff] %v10195_v24  ;;  %14131 = vst [vmem:[#allocation83_spill] sm:$0xff] %v10200_v29  ;;  %v10203_v6 = vpop.xlane.xlu1 %2144  ;;  %vm13387_vm0 = vcmp.eq.s32.totalorder %v7914_v54, %v10195_v24  ;;  %2120 = vmin.xlane.f32.xlu1 %v2119_v41  ;;  %v10207_v34 = vpop.f32.mrb[76].mxu1  ;;  %v2140_v57 = vand.u32 65535, %v14138_v22  ;;  %v1634_v24 = vshll.u32 %v1633_v26, 16  ;;  %v14139_v22 = vld [vmem:[#allocation197_spill] sm:$0xff] }
 0x339   : > { %14130 = vst [vmem:[#allocation174_spill] sm:$0xff] %v10198_v46  ;;  %v10213_v63 = vsel %vm13387_vm0, -1e+30, %v14133_v32  ;;  %vm13380_vm8 = vcmp.eq.s32.totalorder %v7914_v54, %v10198_v46  ;;  %v10218_v50 = vpop.f32.mrb[77].mxu1  ;;  %vm2132_vm6 = vcmp.eq.f32.partialorder %v14139_v22, %v10200_v29  ;;  %v14140_v26 = vld [vmem:[#allocation123_spill] sm:$0xff]  ;;  %v1662_v15 = vshll.u32 %v1661_v17, 16 }
 0x33a   : > { %14134 = vst [vmem:[#allocation180_spill] sm:$0xff] %v10213_v63  ;;  %v10224_v49 = vsel %vm13380_vm8, -1e+30, %v14136_v62  ;;  %v10229_v41 = vpop.f32.mrb[78].mxu1  ;;  %vm2146_vm8 = vcmp.eq.f32.partialorder %v14140_v26, %v10203_v6  ;;  %v2133_v36 = vsel %vm2132_vm6, %v2128_v56, inf  ;;  %v14147_v26 = vld [vmem:[#allocation30_spill] sm:$0xff] }
 0x33b   : > { %14137 = vst [vmem:[#allocation16_spill] sm:$0xff] %v10224_v49  ;;  %v1631_v32 = vpop.xlane.xlu0 %1630  ;;  %2330 = vmax.xlane.f32.xlu0 %v10213_v63  ;;  %v10234_v60 = vpop.f32.mrb[79].mxu1  ;;  %v2142_v63 = vcvt.s32.f32 %v2140_v57  ;;  %v14143_v57 = vld [vmem:[#allocation28_spill] sm:$0xff] }
 0x33c   : > { %v1632_v62 = vcvt.f32.s32 %v1631_v32  ;;  %v1645_v46 = vpop.xlane.xlu1 %1644  ;;  %2332 = vmax.xlane.f32.xlu1 %v10224_v49  ;;  %v1689_v32 = vcvt.f32.s32 %v9585_v33  ;;  %v1703_v49 = vcvt.f32.s32 %v9595_v45 }
 0x33d   : > { %v1646_v31 = vcvt.f32.s32 %v1645_v46  ;;  %v2147_v29 = vsel %vm2146_vm8, %v2142_v63, inf }
 0x33e   : > { %v10243_v28 = vadd.s32 %v1634_v24, %v1632_v62  ;;  %v1704_v17 = vshll.u32 %v1703_v49, 16  ;;  %v1717_v62 = vcvt.f32.s32 %v9615_v11  ;;  %v14149_v49 = vld [vmem:[#allocation31_spill] sm:$0xff] }
 0x33f   : > { %v10246_v47 = vadd.s32 %v1648_v39, %v1646_v31  ;;  %v1659_v22 = vpop.xlane.xlu0 %1658  ;;  %2134 = vmin.xlane.f32.xlu0 %v2133_v36  ;;  %v14145_v36 = vld [vmem:[#allocation29_spill] sm:$0xff]  ;;  %v1690_v39 = vshll.u32 %v1689_v32, 16 }
 0x340   : > { %14141 = vst [vmem:[#allocation85_spill] sm:$0xff] %v10243_v28  ;;  %v1660_v48 = vcvt.f32.s32 %v1659_v22  ;;  %v1673_v46 = vpop.xlane.xlu1 %1672  ;;  %vm13397_vm0 = vcmp.eq.s32.totalorder %v7914_v54, %v10243_v28  ;;  %2148 = vmin.xlane.f32.xlu1 %v2147_v29 }
 0x341   : > { %14142 = vst [vmem:[#allocation84_spill] sm:$0xff] %v10246_v47  ;;  %v1674_v24 = vcvt.f32.s32 %v1673_v46  ;;  %v10255_v33 = vsel %vm13397_vm0, -1e+30, %v14143_v57  ;;  %vm13388_vm6 = vcmp.eq.s32.totalorder %v7914_v54, %v10246_v47 }
 0x342   : > { %v10259_v45 = vadd.s32 %v1662_v15, %v1660_v48  ;;  %v10265_v63 = vsel %vm13388_vm6, -1e+30, %v14145_v36  ;;  %v1731_v15 = vcvt.f32.s32 %v9617_v20 }
 0x343   : > { %v10267_v29 = vadd.s32 %v1676_v61, %v1674_v24  ;;  %v1687_v4 = vpop.xlane.xlu0 %1686  ;;  %2334 = vmax.xlane.f32.xlu0 %v10255_v33  ;;  %v1718_v61 = vshll.u32 %v1717_v62, 16  ;;  %v1745_v62 = vcvt.f32.s32 %v9625_v2 }
 0x344   : > { %14144 = vst [vmem:[#allocation17_spill] sm:$0xff] %v10259_v45  ;;  %v1688_v31 = vcvt.f32.s32 %v1687_v4  ;;  %v1701_v56 = vpop.xlane.xlu1 %1700  ;;  %vm13389_vm8 = vcmp.eq.s32.totalorder %v7914_v54, %v10259_v45  ;;  %2336 = vmax.xlane.f32.xlu1 %v10265_v63  ;;  %v1732_v36 = vshll.u32 %v1731_v15, 16 }
 0x345   : > { %14146 = vst [vmem:[#allocation185_spill] sm:$0xff] %v10267_v29  ;;  %v1702_v48 = vcvt.f32.s32 %v1701_v56  ;;  %v10279_v32 = vsel %vm13389_vm8, -1e+30, %v14147_v26  ;;  %vm13390_vm6 = vcmp.eq.s32.totalorder %v7914_v54, %v10267_v29  ;;  %v14153_v26 = vld [vmem:[#allocation33_spill] sm:$0xff] }
 0x346   : > { %v10283_v11 = vadd.s32 %v1690_v39, %v1688_v31  ;;  %v10289_v22 = vsel %vm13390_vm6, -1e+30, %v14149_v49  ;;  %v14151_v31 = vld [vmem:[#allocation32_spill] sm:$0xff] }
 0x347   : > { %v10291_v20 = vadd.s32 %v1704_v17, %v1702_v48  ;;  %v1715_v46 = vpop.xlane.xlu0 %1714  ;;  %2338 = vmax.xlane.f32.xlu0 %v10279_v32 }
 0x348   : > { %14148 = vst [vmem:[#allocation18_spill] sm:$0xff] %v10283_v11  ;;  %v1716_v24 = vcvt.f32.s32 %v1715_v46  ;;  %v1729_v57 = vpop.xlane.xlu1 %1728  ;;  %vm13391_vm8 = vcmp.eq.s32.totalorder %v7914_v54, %v10283_v11  ;;  %2340 = vmax.xlane.f32.xlu1 %v10289_v22 }
 0x349   : > { %14150 = vst [vmem:[#allocation91_spill] sm:$0xff] %v10291_v20  ;;  %v6752_v39 = vpop.f32.mrb[80].mxu1  ;;  %v1730_v4 = vcvt.f32.s32 %v1729_v57  ;;  %v10301_v17 = vsel %vm13391_vm8, -1e+30, %v14151_v31  ;;  %vm13392_vm6 = vcmp.eq.s32.totalorder %v7914_v54, %v10291_v20 }
 0x34a   : > { %v10306_v56 = vadd.s32 %v1718_v61, %v1716_v24  ;;  %v5677_v48 = vpop.f32.mrb[81].mxu1  ;;  %v10312_v15 = vsel %vm13392_vm6, -1e+30, %v14153_v26  ;;  %v14155_v61 = vld [vmem:[#allocation34_spill] sm:$0xff] }
 0x34b   : > { %v10314_v49 = vadd.s32 %v1732_v36, %v1730_v4  ;;  %v6753_v46 = vpop.f32.mrb[82].mxu1  ;;  %2342 = vmax.xlane.f32.xlu0 %v10301_v17  ;;  %v1743_v26 = vpop.xlane.xlu0 %1742  ;;  %v1746_v36 = vshll.u32 %v1745_v62, 16  ;;  %v14156_v4 = vld [vmem:[#allocation35_spill] sm:$0xff]  ;;  %v1773_v62 = vcvt.f32.s32 %v9651_v37 }
 0x34c   : > { %14152 = vst [vmem:[#allocation19_spill] sm:$0xff] %v10306_v56  ;;  %v5909_v57 = vpack.c.bf16 %v6753_v46, %v6752_v39  ;;  %v5680_v31 = vpop.f32.mrb[83].mxu1  ;;  %vm13395_vm8 = vcmp.eq.s32.totalorder %v7914_v54, %v10306_v56  ;;  %2344 = vmax.xlane.f32.xlu1 %v10312_v15  ;;  %v1744_v39 = vcvt.f32.s32 %v1743_v26 }
 0x34d   : > { %14154 = vst [vmem:[#allocation182_spill] sm:$0xff] %v10314_v49  ;;  %v5908_v2 = vpack.c.bf16 %v5680_v31, %v5677_v48  ;;  %v10324_v24 = vsel %vm13395_vm8, -1e+30, %v14155_v61  ;;  %vm13393_vm6 = vcmp.eq.s32.totalorder %v7914_v54, %v10314_v49  ;;  %v1759_v48 = vcvt.f32.s32 %v9631_v35  ;;  %v1757_v26 = vpop.xlane.xlu1 %1756 }
 0x34e   : > { %v10332_v46 = vsel %vm13393_vm6, -1e+30, %v14156_v4  ;;  %v14157_v31 = vpack.c.bf16 %v9977_v52, %v9955_v53  ;;  %v10339_v61 = vadd.s32 %v1746_v36, %v1744_v39  ;;  %v1758_v35 = vcvt.f32.s32 %v1757_v26 }
 0x34f   : > { %6510 = vmatprep.subr.bf16.mxu0 %v5908_v2  ;;  %2346 = vmax.xlane.f32.xlu0 %v10324_v24  ;;  %v1760_v4 = vshll.u32 %v1759_v48, 16  ;;  %v14159_v2 = vld [vmem:[#allocation36_spill] sm:$0xff]  ;;  %v14160_v53 = vpack.c.bf16 %v9965_v42, %v9948_v51 }
 0x350   : > { %6511 = vmatpush3.bf16.msra.mxu0 %v14157_v31  ;;  %14158 = vst [vmem:[#allocation97_spill] sm:$0xff] %v10339_v61  ;;  %2348 = vmax.xlane.f32.xlu1 %v10332_v46  ;;  %vm13396_vm6 = vcmp.eq.s32.totalorder %v7914_v54, %v10339_v61  ;;  %v14163_v31 = vld [vmem:[#allocation37_spill] sm:$0xff] }
 0x351   : > { %6512 = vmatprep.subr.bf16.mxu0 %v5909_v57  ;;  %v10349_v29 = vsel %vm13396_vm6, -1e+30, %v14159_v2  ;;  %v10355_v52 = vadd.s32 %v1760_v4, %v1758_v35  ;;  %v1774_v57 = vshll.u32 %v1773_v62, 16  ;;  %v14165_v62 = vld [vmem:[#allocation134_spill] sm:$0xff] }
 0x352   : > { %v1787_v35 = vcvt.f32.s32 %v14165_v62  ;;  %v14168_v62 = vpack.c.bf16 %v10066_v3, %v10042_v27 }
 0x353   : > { %2350 = vmax.xlane.f32.xlu0 %v10349_v29  ;;  %14161 = vst [vmem:[#allocation186_spill] sm:$0xff] %v10355_v52  ;;  %vm13404_vm8 = vcmp.eq.s32.totalorder %v7914_v54, %v10355_v52 }
 0x354   : > { %6513 = vmatpush3.bf16.msra.mxu0 %v14160_v53  ;;  %v1771_v37 = vpop.xlane.xlu0 %1770  ;;  %v10365_v26 = vsel %vm13404_vm8, -1e+30, %v14163_v31 }
 0x355   : > { %v1772_v36 = vcvt.f32.s32 %v1771_v37  ;;  %2352 = vmax.xlane.f32.xlu1 %v10365_v26  ;;  %v14166_v37 = vld [vmem:[#allocation127_spill] sm:$0xff] }
 0x357   : > { %v10359_v39 = vadd.s32 %v1774_v57, %v1772_v36  ;;  %v14167_v57 = vld [vmem:[#allocation39_spill] sm:$0xff] }
 0x358   : > { %v6756_v48 = vpop.f32.mrb[84].mxu1  ;;  %v10368_v4 = vpop.xlane.xlu0 %2282 }
 0x359   : > { %14162 = vst [vmem:[#allocation98_spill] sm:$0xff] %v10359_v39  ;;  %v5693_v51 = vpop.f32.mrb[85].mxu1  ;;  %14164 = vst [vmem:[#allocation20_spill] sm:$0xff] %v10368_v4  ;;  %vm13402_vm6 = vcmp.eq.s32.totalorder %v7914_v54, %v10359_v39  ;;  %vm2410_vm0 = vcmp.eq.f32.partialorder %v14166_v37, %v10368_v4 }
 0x35a   : > { %v6757_v42 = vpop.f32.mrb[86].mxu1  ;;  %v10379_v36 = vsel %vm13402_vm6, -1e+30, %v14167_v57  ;;  %v10382_v45 = vsel %vm2410_vm0, %v7914_v54, 128  ;;  %v14169_v57 = vld [vmem:[#allocation130_spill] sm:$0xff] }
 0x35b   : > { %v5911_v2 = vpack.c.bf16 %v6757_v42, %v6756_v48  ;;  %v5696_v53 = vpop.f32.mrb[87].mxu1  ;;  %2354 = vmax.xlane.f32.xlu0 %v10379_v36  ;;  %v2539_v52 = vshra.s32 %v10382_v45, 16  ;;  %v1788_v42 = vshll.u32 %v1787_v35, 16  ;;  %v1801_v39 = vcvt.f32.s32 %v14169_v57 }
 0x35c   : > { %v5910_v31 = vpack.c.bf16 %v5696_v53, %v5693_v51  ;;  %v1785_v48 = vpop.xlane.xlu1 %1784  ;;  %v14171_v53 = vpack.c.bf16 %v10047_v55, %v10037_v16 }
 0x35d   : > { %v1786_v37 = vcvt.f32.s32 %v1785_v48  ;;  %v10389_v61 = vcvt.s32.f32 %v2539_v52  ;;  %v1802_v27 = vshll.u32 %v1801_v39, 16  ;;  %v14173_v52 = vld [vmem:[#allocation40_spill] sm:$0xff]  ;;  %v14174_v48 = vld [vmem:[#allocation135_spill] sm:$0xff] }
 0x35e   : > { %6514 = vmatprep.subr.bf16.mxu0 %v5910_v31 }
 0x35f   : > { %6515 = vmatpush3.bf16.msra.mxu0 %v14168_v62  ;;  %v10392_v51 = vadd.s32 %v1788_v42, %v1786_v37  ;;  %2542 = vmin.xlane.f32.xlu0 %v10389_v61  ;;  %v14177_v37 = vld [vmem:[#allocation142_spill] sm:$0xff] }
 0x360   : > { %6516 = vmatprep.subr.bf16.mxu0 %v5911_v2  ;;  %v1815_v57 = vcvt.f32.s32 %v14177_v37 }
 0x361   : > { %14170 = vst [vmem:[#allocation21_spill] sm:$0xff] %v10392_v51  ;;  %vm13403_vm0 = vcmp.eq.s32.totalorder %v7914_v54, %v10392_v51 }
 0x362   : > { %v1799_v31 = vpop.xlane.xlu0 %1798  ;;  %v10406_v2 = vsel %vm13403_vm0, -1e+30, %v14173_v52  ;;  %v14179_v52 = vld [vmem:[#allocation45_spill] sm:$0xff]  ;;  %v1816_v11 = vshll.u32 %v1815_v57, 16 }
 0x363   : > { %6517 = vmatpush3.bf16.msra.mxu0 %v14171_v53  ;;  %v1800_v3 = vcvt.f32.s32 %v1799_v31  ;;  %v10400_v35 = vpop.xlane.xlu1 %2284  ;;  %2356 = vmax.xlane.f32.xlu1 %v10406_v2  ;;  %v14178_v53 = vld [vmem:[#allocation139_spill] sm:$0xff] }
 0x364   : > { %14172 = vst [vmem:[#allocation96_spill] sm:$0xff] %v10400_v35  ;;  %vm2411_vm6 = vcmp.eq.f32.partialorder %v14174_v48, %v10400_v35 }
 0x365   : > { %v10411_v16 = vadd.s32 %v1802_v27, %v1800_v3  ;;  %v10414_v55 = vsel %vm2411_vm6, %v7914_v54, 128 }
 0x366   : > { %v2553_v62 = vshra.s32 %v10414_v55, 16 }
 0x367   : > { %14175 = vst [vmem:[#allocation192_spill] sm:$0xff] %v10411_v16  ;;  %v10416_v39 = vpop.xlane.xlu0 %2286  ;;  %v6760_v42 = vpop.f32.mrb[88].mxu1  ;;  %vm13416_vm8 = vcmp.eq.s32.totalorder %v7914_v54, %v10411_v16  ;;  %v14180_v16 = vld [vmem:[#allocation147_spill] sm:$0xff] }
 0x368   : > { %14176 = vst [vmem:[#allocation189_spill] sm:$0xff] %v10416_v39  ;;  %vm2412_vm0 = vcmp.eq.f32.partialorder %v14178_v53, %v10416_v39  ;;  %v5709_v31 = vpop.f32.mrb[89].mxu1  ;;  %v10431_v48 = vsel %vm13416_vm8, -1e+30, %v14179_v52  ;;  %v10433_v51 = vcvt.s32.f32 %v2553_v62  ;;  %v1829_v52 = vcvt.f32.s32 %v14180_v16 }
 0x369   : > { %v10425_v27 = vsel %vm2412_vm0, %v7914_v54, 128  ;;  %v6761_v3 = vpop.f32.mrb[90].mxu1  ;;  %2358 = vmax.xlane.f32.xlu0 %v10431_v48  ;;  %v14188_v16 = vpack.c.bf16 %v10140_v18, %v10124_v38  ;;  %v14194_v38 = vld [vmem:[#allocation55_spill] sm:$0xff] }
 0x36a   : > { %v5913_v37 = vpack.c.bf16 %v6761_v3, %v6760_v42  ;;  %v5712_v53 = vpop.f32.mrb[91].mxu1  ;;  %v2567_v49 = vshra.s32 %v10425_v27, 16  ;;  %2556 = vmin.xlane.f32.xlu1 %v10433_v51  ;;  %v14182_v42 = vpack.c.bf16 %v10151_v40, %v10129_v43  ;;  %v1830_v40 = vshll.u32 %v1829_v52, 16 }
 0x36b   : > { %v5912_v56 = vpack.c.bf16 %v5712_v53, %v5709_v31  ;;  %v1813_v20 = vpop.xlane.xlu1 %1812  ;;  %v14184_v31 = vld [vmem:[#allocation46_spill] sm:$0xff] }
 0x36c   : > { %v1814_v47 = vcvt.f32.s32 %v1813_v20  ;;  %v10438_v28 = vcvt.s32.f32 %v2567_v49  ;;  %v1843_v3 = vcvt.f32.s32 %v14184_v31  ;;  %v14185_v20 = vld [vmem:[#allocation146_spill] sm:$0xff] }
 0x36d   : > { %6518 = vmatprep.subr.bf16.mxu0 %v5912_v56  ;;  %v1827_v56 = vpop.xlane.xlu0 %1826 }
 0x36e   : > { %v10441_v39 = vadd.s32 %v1816_v11, %v1814_v47  ;;  %2570 = vmin.xlane.f32.xlu0 %v10438_v28  ;;  %6519 = vmatpush3.bf16.msra.mxu0 %v14182_v42  ;;  %v14187_v11 = vld [vmem:[#allocation43_spill] sm:$0xff]  ;;  %v1828_v49 = vcvt.f32.s32 %v1827_v56  ;;  %v1844_v53 = vshll.u32 %v1843_v3, 16  ;;  %v14193_v56 = vld [vmem:[#allocation150_spill] sm:$0xff] }
 0x36f   : > { %v10447_v62 = vpop.xlane.xlu1 %2288  ;;  %6520 = vmatprep.subr.bf16.mxu0 %v5913_v37  ;;  %v14196_v3 = vld [vmem:[#allocation154_spill] sm:$0xff] }
 0x370   : > { %14181 = vst [vmem:[#allocation22_spill] sm:$0xff] %v10441_v39  ;;  %14183 = vst [vmem:[#allocation104_spill] sm:$0xff] %v10447_v62  ;;  %vm2413_vm6 = vcmp.eq.f32.partialorder %v14185_v20, %v10447_v62  ;;  %vm13415_vm0 = vcmp.eq.s32.totalorder %v7914_v54, %v10441_v39  ;;  %v10468_v42 = vadd.s32 %v1830_v40, %v1828_v49 }
 0x371   : > { %v10455_v47 = vsel %vm2413_vm6, %v7914_v54, 128  ;;  %v10461_v43 = vsel %vm13415_vm0, -1e+30, %v14187_v11  ;;  %v1857_v11 = vcvt.f32.s32 %v14193_v56 }
 0x372   : > { %14186 = vst [vmem:[#allocation23_spill] sm:$0xff] %v10455_v47  ;;  %2360 = vmax.xlane.f32.xlu1 %v10461_v43  ;;  %6521 = vmatpush3.bf16.msra.mxu0 %v14188_v16  ;;  %v2581_v57 = vshra.s32 %v10455_v47, 16  ;;  %14189 = vst [vmem:[#allocation103_spill] sm:$0xff] %v10468_v42  ;;  %vm13417_vm6 = vcmp.eq.s32.totalorder %v7914_v54, %v10468_v42  ;;  %v1871_v16 = vcvt.f32.s32 %v9769_v5  ;;  %v14199_v5 = vld [vmem:[#allocation50_spill] sm:$0xff] }
 0x373   : > { %v1841_v37 = vpop.xlane.xlu1 %1840  ;;  %v10483_v18 = vsel %vm13417_vm6, -1e+30, %v14194_v38 }
 0x374   : > { %v1842_v31 = vcvt.f32.s32 %v1841_v37  ;;  %v10470_v20 = vcvt.s32.f32 %v2581_v57  ;;  %14195 = vst [vmem:[#allocation117_spill] sm:$0xff] %v10483_v18  ;;  %2362 = vmax.xlane.f32.xlu0 %v10483_v18  ;;  %v14198_v37 = vld [vmem:[#allocation153_spill] sm:$0xff]  ;;  %v1872_v18 = vshll.u32 %v1871_v16, 16 }
 0x376   : > { %14190 = vst [vmem:[#allocation110_spill] sm:$0xff] %v10470_v20  ;;  %v10472_v39 = vadd.s32 %v1844_v53, %v1842_v31  ;;  %v10476_v52 = vpop.xlane.xlu0 %2290  ;;  %2584 = vmin.xlane.f32.xlu1 %v10470_v20 }
 0x377   : > { %14192 = vst [vmem:[#allocation24_spill] sm:$0xff] %v10476_v52  ;;  %vm2414_vm0 = vcmp.eq.f32.partialorder %v14196_v3, %v10476_v52  ;;  %v10488_v40 = vpop.xlane.xlu1 %2292  ;;  %v6764_v49 = vpop.f32.mrb[92].mxu1 }
 0x378   : > { %14191 = vst [vmem:[#allocation109_spill] sm:$0xff] %v10472_v39  ;;  %14197 = vst [vmem:[#allocation25_spill] sm:$0xff] %v10488_v40  ;;  %v10493_v57 = vsel %vm2414_vm0, %v7914_v54, 128  ;;  %vm2415_vm8 = vcmp.eq.f32.partialorder %v14198_v37, %v10488_v40  ;;  %v5725_v53 = vpop.f32.mrb[93].mxu1  ;;  %vm13428_vm6 = vcmp.eq.s32.totalorder %v7914_v54, %v10472_v39  ;;  %v1858_v37 = vshll.u32 %v1857_v11, 16 }
 0x379   : > { %v10498_v31 = vsel %vm2415_vm8, %v7914_v54, 128  ;;  %v6765_v56 = vpop.f32.mrb[94].mxu1  ;;  %v2595_v38 = vshra.s32 %v10493_v57, 16  ;;  %v10507_v42 = vsel %vm13428_vm6, -1e+30, %v14199_v5 }
 0x37a   : > { %v5915_v3 = vpack.c.bf16 %v6765_v56, %v6764_v49  ;;  %v5728_v52 = vpop.f32.mrb[95].mxu1  ;;  %v1855_v62 = vpop.xlane.xlu0 %1854  ;;  %2364 = vmax.xlane.f32.xlu1 %v10507_v42  ;;  %v2609_v49 = vshra.s32 %v10498_v31, 16 }
 0x37b   : > { %v5914_v40 = vpack.c.bf16 %v5728_v52, %v5725_v53  ;;  %v1856_v35 = vcvt.f32.s32 %v1855_v62  ;;  %v1869_v4 = vpop.xlane.xlu1 %1868  ;;  %v10510_v20 = vcvt.s32.f32 %v2595_v38  ;;  %v14203_v52 = vpack.c.bf16 %v10234_v60, %v10218_v50  ;;  %v14206_v60 = vld [vmem:[#allocation56_spill] sm:$0xff] }
 0x37c   : > { %v1870_v47 = vcvt.f32.s32 %v1869_v4  ;;  %v10518_v39 = vcvt.s32.f32 %v2609_v49  ;;  %v14204_v4 = vld [vmem:[#allocation62_spill] sm:$0xff]  ;;  %v14211_v53 = vld [vmem:[#allocation4_spill] sm:$0xff] }
 0x37d   : > { %v10513_v56 = vadd.s32 %v1858_v37, %v1856_v35  ;;  %6522 = vmatprep.subr.bf16.mxu0 %v5914_v40  ;;  %2598 = vmin.xlane.f32.xlu0 %v10510_v20  ;;  %v1899_v40 = vcvt.f32.s32 %v9812_v9 }
 0x37e   : > { %v10516_v5 = vadd.s32 %v1872_v18, %v1870_v47  ;;  %14202 = vst [vmem:[#allocation195_spill] sm:$0xff] %v10518_v39  ;;  %6523 = vmatpush3.bf16.msra.mxu0 %v14203_v52  ;;  %2612 = vmin.xlane.f32.xlu1 %v10518_v39  ;;  %v10534_v62 = vpop.xlane.xlu0 %2294  ;;  %v1885_v47 = vcvt.f32.s32 %v9810_v30  ;;  %v14209_v18 = vpack.c.bf16 %v10229_v41, %v10207_v34 }
 0x37f   : > { %14200 = vst [vmem:[#allocation193_spill] sm:$0xff] %v10513_v56  ;;  %6524 = vmatprep.subr.bf16.mxu0 %v5915_v3  ;;  %vm13431_vm8 = vcmp.eq.s32.totalorder %v7914_v54, %v10513_v56  ;;  %14205 = vst [vmem:[#allocation26_spill] sm:$0xff] %v10534_v62  ;;  %vm2416_vm6 = vcmp.eq.f32.partialorder %v9829_v1, %v10534_v62  ;;  %v10546_v11 = vpop.xlane.xlu1 %2296  ;;  %v1900_v49 = vshll.u32 %v1899_v40, 16  ;;  %v14218_v40 = vld [vmem:[#allocation5_spill] sm:$0xff]  ;;  %v14224_v56 = vld [vmem:[#allocation68_spill] sm:$0xff] }
 0x380   : > { %14201 = vst [vmem:[#allocation196_spill] sm:$0xff] %v10516_v5  ;;  %v10530_v35 = vsel %vm13431_vm8, -1e+30, %v14204_v4  ;;  %vm13429_vm0 = vcmp.eq.s32.totalorder %v7914_v54, %v10516_v5  ;;  %14208 = vst [vmem:[#allocation27_spill] sm:$0xff] %v10546_v11  ;;  %v10553_v16 = vsel %vm2416_vm6, %v7914_v54, 128  ;;  %v1886_v34 = vshll.u32 %v1885_v47, 16 }
 0x381   : > { %2366 = vmax.xlane.f32.xlu0 %v10530_v35  ;;  %v10541_v50 = vsel %vm13429_vm0, -1e+30, %v14206_v60  ;;  %14210 = vst [vmem:[#allocation116_spill] sm:$0xff] %v10553_v16  ;;  %vm2417_vm0 = vcmp.eq.f32.partialorder %v14211_v53, %v10546_v11  ;;  %v2623_v30 = vshra.s32 %v10553_v16, 16 }
 0x382   : > { %14207 = vst [vmem:[#allocation124_spill] sm:$0xff] %v10541_v50  ;;  %6525 = vmatpush3.bf16.msra.mxu0 %v14209_v18  ;;  %v10558_v38 = vsel %vm2417_vm0, %v7914_v54, 128  ;;  %2368 = vmax.xlane.f32.xlu1 %v10541_v50 }
 0x383   : > { %14212 = vst [vmem:[#allocation197_spill] sm:$0xff] %v10558_v38  ;;  %v1883_v1 = vpop.xlane.xlu0 %1882  ;;  %v2637_v3 = vshra.s32 %v10558_v38, 16  ;;  %v1897_v37 = vpop.xlane.xlu1 %1896  ;;  %v10563_v9 = vcvt.s32.f32 %v2623_v30  ;;  %v1913_v30 = vcvt.f32.s32 %v9855_v8 }
 0x384   : > { %v1884_v41 = vcvt.f32.s32 %v1883_v1  ;;  %v1898_v52 = vcvt.f32.s32 %v1897_v37 }
 0x385   : > { %14213 = vst [vmem:[#allocation123_spill] sm:$0xff] %v10563_v9  ;;  %v10565_v4 = vcvt.s32.f32 %v2637_v3  ;;  %2626 = vmin.xlane.f32.xlu0 %v10563_v9 }
 0x386   : > { %v10567_v60 = vadd.s32 %v1886_v34, %v1884_v41  ;;  %v10572_v53 = vadd.s32 %v1900_v49, %v1898_v52  ;;  %v14220_v34 = vld [vmem:[#allocation158_spill] sm:$0xff]  ;;  %v14222_v49 = vld [vmem:[#allocation52_spill] sm:$0xff] }
 0x387   : > { %14214 = vst [vmem:[#allocation28_spill] sm:$0xff] %v10565_v4  ;;  %2640 = vmin.xlane.f32.xlu1 %v10565_v4  ;;  %v10575_v5 = vpop.xlane.xlu0 %2298  ;;  %v10582_v1 = vpop.xlane.xlu1 %2300  ;;  %v1927_v41 = vcvt.f32.s32 %v14220_v34  ;;  %v14226_v34 = vld [vmem:[#allocation63_spill] sm:$0xff] }
 0x388   : > { %14215 = vst [vmem:[#allocation29_spill] sm:$0xff] %v10567_v60  ;;  %v10570_v18 = vpop.f32.mrb[96].mxu1  ;;  %14216 = vst [vmem:[#allocation30_spill] sm:$0xff] %v10572_v53  ;;  %vm2418_vm6 = vcmp.eq.f32.partialorder %v14218_v40, %v10575_v5  ;;  %vm13446_vm0 = vcmp.eq.s32.totalorder %v7914_v54, %v10567_v60  ;;  %vm2419_vm8 = vcmp.eq.f32.partialorder %v14222_v49, %v10582_v1  ;;  %v1914_v60 = vshll.u32 %v1913_v30, 16  ;;  %v14233_v30 = vld [vmem:[#allocation57_spill] sm:$0xff] }
 0x389   : > { %14217 = vst [vmem:[#allocation31_spill] sm:$0xff] %v10575_v5  ;;  %v10577_v47 = vpop.f32.mrb[97].mxu1  ;;  %14219 = vst [vmem:[#allocation32_spill] sm:$0xff] %v10582_v1  ;;  %v10590_v37 = vsel %vm2418_vm6, %v7914_v54, 128  ;;  %v10599_v40 = vsel %vm2419_vm8, %v7914_v54, 128  ;;  %vm13445_vm6 = vcmp.eq.s32.totalorder %v7914_v54, %v10572_v53 }
 0x38a   : > { %v10584_v3 = vpop.f32.mrb[98].mxu1  ;;  %14221 = vst [vmem:[#allocation33_spill] sm:$0xff] %v10590_v37  ;;  %14223 = vst [vmem:[#allocation34_spill] sm:$0xff] %v10599_v40  ;;  %v10605_v5 = vsel %vm13446_vm0, -1e+30, %v14224_v56  ;;  %v2651_v11 = vshra.s32 %v10590_v37, 16  ;;  %v1941_v37 = vcvt.f32.s32 %v14233_v30 }
 0x38b   : > { %v10596_v52 = vpop.f32.mrb[99].mxu1  ;;  %14225 = vst [vmem:[#allocation35_spill] sm:$0xff] %v10605_v5  ;;  %2370 = vmax.xlane.f32.xlu0 %v10605_v5  ;;  %v10614_v49 = vsel %vm13445_vm6, -1e+30, %v14226_v34  ;;  %v1911_v1 = vpop.xlane.xlu0 %1910  ;;  %v2665_v4 = vshra.s32 %v10599_v40, 16  ;;  %v1928_v5 = vshll.u32 %v1927_v41, 16 }
 0x38c   : > { %14227 = vst [vmem:[#allocation36_spill] sm:$0xff] %v10614_v49  ;;  %2372 = vmax.xlane.f32.xlu1 %v10614_v49  ;;  %v1912_v56 = vcvt.f32.s32 %v1911_v1  ;;  %v1925_v62 = vpop.xlane.xlu1 %1924  ;;  %v10621_v38 = vcvt.s32.f32 %v2651_v11  ;;  %v14234_v1 = vld [vmem:[#allocation6_spill] sm:$0xff]  ;;  %v14236_v11 = vld [vmem:[#allocation160_spill] sm:$0xff] }
 0x38d   : > { %v1926_v9 = vcvt.f32.s32 %v1925_v62  ;;  %v10625_v34 = vcvt.s32.f32 %v2665_v4  ;;  %v1955_v4 = vcvt.f32.s32 %v14236_v11  ;;  %v14240_v41 = vld [vmem:[#allocation74_spill] sm:$0xff] }
 0x38e   : > { %14228 = vst [vmem:[#allocation37_spill] sm:$0xff] %v10621_v38  ;;  %v10623_v53 = vadd.s32 %v1914_v60, %v1912_v56 }
 0x38f   : > { %14230 = vst [vmem:[#allocation127_spill] sm:$0xff] %v10625_v34  ;;  %v10627_v16 = vadd.s32 %v1928_v5, %v1926_v9  ;;  %2654 = vmin.xlane.f32.xlu0 %v10621_v38  ;;  %v10630_v8 = vpop.xlane.xlu0 %2302  ;;  %v14238_v9 = vld [vmem:[#allocation161_spill] sm:$0xff] }
 0x390   : > { %14229 = vst [vmem:[#allocation134_spill] sm:$0xff] %v10623_v53  ;;  %14232 = vst [vmem:[#allocation130_spill] sm:$0xff] %v10630_v8  ;;  %2668 = vmin.xlane.f32.xlu1 %v10625_v34  ;;  %vm2420_vm8 = vcmp.eq.f32.partialorder %v14234_v1, %v10630_v8  ;;  %v10636_v62 = vpop.xlane.xlu1 %2304  ;;  %vm13471_vm6 = vcmp.eq.s32.totalorder %v7914_v54, %v10623_v53  ;;  %v1956_v34 = vshll.u32 %v1955_v4, 16  ;;  %v14249_v4 = vld [vmem:[#allocation166_spill] sm:$0xff] }
 0x391   : > { %14231 = vst [vmem:[#allocation39_spill] sm:$0xff] %v10627_v16  ;;  %14235 = vst [vmem:[#allocation40_spill] sm:$0xff] %v10636_v62  ;;  %v10642_v5 = vsel %vm2420_vm8, %v7914_v54, 128  ;;  %vm2421_vm0 = vcmp.eq.f32.partialorder %v14238_v9, %v10636_v62  ;;  %v10653_v56 = vsel %vm13471_vm6, -1e+30, %v14240_v41  ;;  %vm13457_vm14 = vcmp.eq.s32.totalorder %v7914_v54, %v10627_v16  ;;  %v14242_v62 = vld [vmem:[#allocation69_spill] sm:$0xff] }
 0x392   : > { %14237 = vst [vmem:[#allocation135_spill] sm:$0xff] %v10642_v5  ;;  %v10647_v60 = vsel %vm2421_vm0, %v7914_v54, 128  ;;  %14241 = vst [vmem:[#allocation139_spill] sm:$0xff] %v10653_v56  ;;  %v2679_v1 = vshra.s32 %v10642_v5, 16  ;;  %v1942_v9 = vshll.u32 %v1941_v37, 16  ;;  %v14253_v16 = vld [vmem:[#allocation76_spill] sm:$0xff] }
 0x393   : > { %14239 = vst [vmem:[#allocation142_spill] sm:$0xff] %v10647_v60  ;;  %2374 = vmax.xlane.f32.xlu0 %v10653_v56  ;;  %v2693_v11 = vshra.s32 %v10647_v60, 16  ;;  %v10664_v8 = vsel %vm13457_vm14, -1e+30, %v14242_v62 }
 0x394   : > { %v1939_v30 = vpop.xlane.xlu0 %1938  ;;  %14243 = vst [vmem:[#allocation45_spill] sm:$0xff] %v10664_v8  ;;  %v1953_v41 = vpop.xlane.xlu1 %1952  ;;  %2376 = vmax.xlane.f32.xlu1 %v10664_v8  ;;  %v10667_v38 = vcvt.s32.f32 %v2679_v1 }
 0x395   : > { %v1940_v53 = vcvt.f32.s32 %v1939_v30  ;;  %v1954_v56 = vcvt.f32.s32 %v1953_v41  ;;  %v10669_v40 = vcvt.s32.f32 %v2693_v11  ;;  %v1969_v30 = vcvt.f32.s32 %v9946_v44 }
 0x396   : > { %14244 = vst [vmem:[#allocation147_spill] sm:$0xff] %v10667_v38 }
 0x397   : > { %14245 = vst [vmem:[#allocation46_spill] sm:$0xff] %v10669_v40  ;;  %v10671_v5 = vadd.s32 %v1942_v9, %v1940_v53  ;;  %v10673_v60 = vadd.s32 %v1956_v34, %v1954_v56  ;;  %2682 = vmin.xlane.f32.xlu0 %v10667_v38  ;;  %v1983_v53 = vcvt.f32.s32 %v9951_v21  ;;  %v14251_v56 = vld [vmem:[#allocation58_spill] sm:$0xff] }
 0x398   : > { %v10676_v37 = vpop.xlane.xlu0 %2306  ;;  %v10683_v41 = vpop.xlane.xlu1 %2308  ;;  %2696 = vmin.xlane.f32.xlu1 %v10669_v40  ;;  %v14255_v40 = vld [vmem:[#allocation81_spill] sm:$0xff] }
 0x399   : > { %14246 = vst [vmem:[#allocation146_spill] sm:$0xff] %v10671_v5  ;;  %14247 = vst [vmem:[#allocation43_spill] sm:$0xff] %v10673_v60  ;;  %v10678_v62 = vpop.f32.mrb[100].mxu1  ;;  %vm2422_vm0 = vcmp.eq.f32.partialorder %v14249_v4, %v10676_v37  ;;  %vm13470_vm8 = vcmp.eq.s32.totalorder %v7914_v54, %v10671_v5  ;;  %vm2423_vm14 = vcmp.eq.f32.partialorder %v14251_v56, %v10683_v41  ;;  %v1984_v8 = vshll.u32 %v1983_v53, 16 }
 0x39a   : > { %14248 = vst [vmem:[#allocation150_spill] sm:$0xff] %v10676_v37  ;;  %14250 = vst [vmem:[#allocation55_spill] sm:$0xff] %v10683_v41  ;;  %v10685_v1 = vpop.f32.mrb[101].mxu1  ;;  %v10692_v34 = vsel %vm2422_vm0, %v7914_v54, 128  ;;  %v10699_v11 = vsel %vm2423_vm14, %v7914_v54, 128  ;;  %vm13469_vm0 = vcmp.eq.s32.totalorder %v7914_v54, %v10673_v60  ;;  %v1970_v37 = vshll.u32 %v1969_v30, 16 }
 0x39b   : > { %v10696_v44 = vpop.f32.mrb[102].mxu1  ;;  %14252 = vst [vmem:[#allocation154_spill] sm:$0xff] %v10699_v11  ;;  %v10709_v21 = vsel %vm13470_vm8, -1e+30, %v14253_v16  ;;  %v10720_v9 = vsel %vm13469_vm0, -1e+30, %v14255_v40 }
 0x39c   : > { %v10703_v4 = vpop.f32.mrb[103].mxu1  ;;  %14254 = vst [vmem:[#allocation153_spill] sm:$0xff] %v10709_v21  ;;  %v1967_v41 = vpop.xlane.xlu0 %1966  ;;  %2378 = vmax.xlane.f32.xlu0 %v10709_v21  ;;  %v2707_v16 = vshra.s32 %v10692_v34, 16  ;;  %2380 = vmax.xlane.f32.xlu1 %v10720_v9  ;;  %v2721_v56 = vshra.s32 %v10699_v11, 16 }
 0x39d   : > { %v1968_v38 = vcvt.f32.s32 %v1967_v41  ;;  %v1981_v5 = vpop.xlane.xlu1 %1980  ;;  %v1997_v41 = vcvt.f32.s32 %v9998_v12 }
 0x39e   : > { %v1982_v49 = vcvt.f32.s32 %v1981_v5  ;;  %v10727_v30 = vcvt.s32.f32 %v2707_v16  ;;  %v10731_v39 = vcvt.s32.f32 %v2721_v56 }
 0x39f   : > { %v10725_v50 = vadd.s32 %v1970_v37, %v1968_v38  ;;  %v2011_v38 = vcvt.f32.s32 %v10005_v13  ;;  %v1998_v56 = vshll.u32 %v1997_v41, 16 }
 0x3a0   : > { %14257 = vst [vmem:[#allocation62_spill] sm:$0xff] %v10727_v30  ;;  %v10729_v21 = vadd.s32 %v1984_v8, %v1982_v49  ;;  %14259 = vst [vmem:[#allocation4_spill] sm:$0xff] %v10731_v39  ;;  %v10733_v40 = vpop.xlane.xlu0 %2310  ;;  %2710 = vmin.xlane.f32.xlu0 %v10727_v30  ;;  %2724 = vmin.xlane.f32.xlu1 %v10731_v39  ;;  %v14264_v49 = vld [vmem:[#allocation88_spill] sm:$0xff] }
 0x3a1   : > { %14256 = vst [vmem:[#allocation50_spill] sm:$0xff] %v10725_v50  ;;  %14260 = vst [vmem:[#allocation5_spill] sm:$0xff] %v10733_v40  ;;  %vm2424_vm14 = vcmp.eq.f32.partialorder %v10013_v0, %v10733_v40  ;;  %v10739_v5 = vpop.xlane.xlu1 %2312  ;;  %vm13493_vm0 = vcmp.eq.s32.totalorder %v7914_v54, %v10725_v50  ;;  %v2012_v60 = vshll.u32 %v2011_v38, 16  ;;  %v14273_v38 = vld [vmem:[#allocation171_spill] sm:$0xff] }
 0x3a2   : > { %14258 = vst [vmem:[#allocation56_spill] sm:$0xff] %v10729_v21  ;;  %14261 = vst [vmem:[#allocation158_spill] sm:$0xff] %v10739_v5  ;;  %v10746_v8 = vsel %vm2424_vm14, %v7914_v54, 128  ;;  %vm2425_vm8 = vcmp.eq.f32.partialorder %v10023_v58, %v10739_v5  ;;  %v10757_v0 = vsel %vm13493_vm0, -1e+30, %v14264_v49  ;;  %vm13480_vm6 = vcmp.eq.s32.totalorder %v7914_v54, %v10729_v21  ;;  %v14266_v58 = vld [vmem:[#allocation82_spill] sm:$0xff] }
 0x3a3   : > { %14262 = vst [vmem:[#allocation52_spill] sm:$0xff] %v10746_v8  ;;  %v10751_v12 = vsel %vm2425_vm8, %v7914_v54, 128  ;;  %14265 = vst [vmem:[#allocation63_spill] sm:$0xff] %v10757_v0  ;;  %v2735_v37 = vshra.s32 %v10746_v8, 16  ;;  %v10768_v16 = vsel %vm13480_vm6, -1e+30, %v14266_v58  ;;  %v2025_v58 = vcvt.f32.s32 %v10035_v14 }
 0x3a4   : > { %14263 = vst [vmem:[#allocation68_spill] sm:$0xff] %v10751_v12  ;;  %v1995_v13 = vpop.xlane.xlu0 %1994  ;;  %v2749_v53 = vshra.s32 %v10751_v12, 16  ;;  %2382 = vmax.xlane.f32.xlu0 %v10757_v0  ;;  %14267 = vst [vmem:[#allocation57_spill] sm:$0xff] %v10768_v16  ;;  %2384 = vmax.xlane.f32.xlu1 %v10768_v16  ;;  %v14276_v14 = vld [vmem:[#allocation10_spill] sm:$0xff] }
 0x3a5   : > { %v1996_v50 = vcvt.f32.s32 %v1995_v13  ;;  %v2009_v49 = vpop.xlane.xlu1 %2008  ;;  %v10771_v40 = vcvt.s32.f32 %v2735_v37 }
 0x3a6   : > { %v2010_v5 = vcvt.f32.s32 %v2009_v49  ;;  %v10773_v8 = vcvt.s32.f32 %v2749_v53 }
 0x3a7   : > { %14268 = vst [vmem:[#allocation6_spill] sm:$0xff] %v10771_v40  ;;  %v10775_v12 = vadd.s32 %v1998_v56, %v1996_v50  ;;  %v2039_v50 = vcvt.f32.s32 %v10040_v10 }
 0x3a8   : > { %14269 = vst [vmem:[#allocation160_spill] sm:$0xff] %v10773_v8  ;;  %v10777_v41 = vadd.s32 %v2012_v60, %v2010_v5  ;;  %v10779_v39 = vpop.xlane.xlu0 %2314  ;;  %2738 = vmin.xlane.f32.xlu0 %v10771_v40  ;;  %2752 = vmin.xlane.f32.xlu1 %v10773_v8 }
 0x3a9   : > { %14270 = vst [vmem:[#allocation161_spill] sm:$0xff] %v10775_v12  ;;  %14272 = vst [vmem:[#allocation69_spill] sm:$0xff] %v10779_v39  ;;  %v10781_v0 = vpop.f32.mrb[104].mxu1  ;;  %vm2426_vm8 = vcmp.eq.f32.partialorder %v14273_v38, %v10779_v39  ;;  %v10787_v13 = vpop.xlane.xlu1 %2316  ;;  %vm13492_vm14 = vcmp.eq.s32.totalorder %v7914_v54, %v10775_v12  ;;  %v14278_v38 = vld [vmem:[#allocation94_spill] sm:$0xff]  ;;  %v14280_v39 = vld [vmem:[#allocation89_spill] sm:$0xff]  ;;  %v2040_v40 = vshll.u32 %v2039_v50, 16 }
 0x3aa   : > { %14271 = vst [vmem:[#allocation74_spill] sm:$0xff] %v10777_v41  ;;  %14274 = vst [vmem:[#allocation166_spill] sm:$0xff] %v10787_v13  ;;  %v10789_v37 = vpop.f32.mrb[105].mxu1  ;;  %v10796_v60 = vsel %vm2426_vm8, %v7914_v54, 128  ;;  %vm2427_vm6 = vcmp.eq.f32.partialorder %v14276_v14, %v10787_v13  ;;  %v10813_v10 = vsel %vm13492_vm14, -1e+30, %v14278_v38  ;;  %vm13491_vm8 = vcmp.eq.s32.totalorder %v7914_v54, %v10777_v41 }
 0x3ab   : > { %14275 = vst [vmem:[#allocation58_spill] sm:$0xff] %v10796_v60  ;;  %v10800_v5 = vpop.f32.mrb[106].mxu1  ;;  %v10803_v53 = vsel %vm2427_vm6, %v7914_v54, 128  ;;  %14279 = vst [vmem:[#allocation81_spill] sm:$0xff] %v10813_v10  ;;  %v2026_v13 = vshll.u32 %v2025_v58, 16  ;;  %v2763_v38 = vshra.s32 %v10796_v60, 16 }
 0x3ac   : > { %14277 = vst [vmem:[#allocation76_spill] sm:$0xff] %v10803_v53  ;;  %v10807_v49 = vpop.f32.mrb[107].mxu1  ;;  %v2023_v21 = vpop.xlane.xlu0 %2022  ;;  %2386 = vmax.xlane.f32.xlu0 %v10813_v10  ;;  %v10824_v56 = vsel %vm13491_vm8, -1e+30, %v14280_v39  ;;  %v2777_v14 = vshra.s32 %v10803_v53, 16 }
 0x3ad   : > { %14281 = vst [vmem:[#allocation88_spill] sm:$0xff] %v10824_v56  ;;  %v2024_v8 = vcvt.f32.s32 %v2023_v21  ;;  %v2037_v12 = vpop.xlane.xlu1 %2036  ;;  %2388 = vmax.xlane.f32.xlu1 %v10824_v56  ;;  %v10831_v58 = vcvt.s32.f32 %v2763_v38  ;;  %v2053_v21 = vcvt.f32.s32 %v10083_v19 }
 0x3ae   : > { %v2038_v16 = vcvt.f32.s32 %v2037_v12  ;;  %v10835_v11 = vcvt.s32.f32 %v2777_v14 }
 0x3af   : > { %v10829_v30 = vadd.s32 %v2026_v13, %v2024_v8  ;;  %14283 = vst [vmem:[#allocation171_spill] sm:$0xff] %v10831_v58  ;;  %v2067_v8 = vcvt.f32.s32 %v10088_v59  ;;  %v2054_v14 = vshll.u32 %v2053_v21, 16 }
 0x3b0   : > { %v10833_v10 = vadd.s32 %v2040_v40, %v2038_v16  ;;  %14285 = vst [vmem:[#allocation94_spill] sm:$0xff] %v10835_v11  ;;  %v10837_v39 = vpop.xlane.xlu0 %2318  ;;  %2766 = vmin.xlane.f32.xlu0 %v10831_v58  ;;  %v14290_v16 = vld [vmem:[#allocation101_spill] sm:$0xff] }
 0x3b1   : > { %14282 = vst [vmem:[#allocation82_spill] sm:$0xff] %v10829_v30  ;;  %14286 = vst [vmem:[#allocation89_spill] sm:$0xff] %v10837_v39  ;;  %vm2428_vm6 = vcmp.eq.f32.partialorder %v10098_v23, %v10837_v39  ;;  %v10843_v12 = vpop.xlane.xlu1 %2320  ;;  %vm13517_vm8 = vcmp.eq.s32.totalorder %v7914_v54, %v10829_v30  ;;  %2780 = vmin.xlane.f32.xlu1 %v10835_v11  ;;  %v2068_v41 = vshll.u32 %v2067_v8, 16  ;;  %v14299_v8 = vld [vmem:[#allocation72_spill] sm:$0xff] }
 0x3b2   : > { %14284 = vst [vmem:[#allocation10_spill] sm:$0xff] %v10833_v10  ;;  %14287 = vst [vmem:[#allocation198_spill] sm:$0xff] %v10843_v12  ;;  %v10850_v40 = vsel %vm2428_vm6, %v7914_v54, 128  ;;  %vm2429_vm14 = vcmp.eq.f32.partialorder %v10106_v7, %v10843_v12  ;;  %v10861_v23 = vsel %vm13517_vm8, -1e+30, %v14290_v16  ;;  %vm13502_vm0 = vcmp.eq.s32.totalorder %v7914_v54, %v10833_v10  ;;  %v14292_v7 = vld [vmem:[#allocation95_spill] sm:$0xff] }
 0x3b3   : > { %14288 = vst [vmem:[#allocation199_spill] sm:$0xff] %v10850_v40  ;;  %v10855_v19 = vsel %vm2429_vm14, %v7914_v54, 128  ;;  %14291 = vst [vmem:[#allocation101_spill] sm:$0xff] %v10861_v23  ;;  %v2791_v13 = vshra.s32 %v10850_v40, 16  ;;  %v10872_v38 = vsel %vm13502_vm0, -1e+30, %v14292_v7 }
 0x3b4   : > { %14289 = vst [vmem:[#allocation200_spill] sm:$0xff] %v10855_v19  ;;  %v2051_v59 = vpop.xlane.xlu0 %2050  ;;  %v2805_v50 = vshra.s32 %v10855_v19, 16  ;;  %2390 = vmax.xlane.f32.xlu0 %v10861_v23  ;;  %14293 = vst [vmem:[#allocation95_spill] sm:$0xff] %v10872_v38  ;;  %v14305_v10 = vld [vmem:[#allocation107_spill] sm:$0xff] }
 0x3b5   : > { %v2052_v30 = vcvt.f32.s32 %v2051_v59  ;;  %v2065_v16 = vpop.xlane.xlu1 %2064  ;;  %2392 = vmax.xlane.f32.xlu1 %v10872_v38  ;;  %v10875_v39 = vcvt.s32.f32 %v2791_v13  ;;  %v2081_v59 = vcvt.f32.s32 %v10119_v25  ;;  %v14303_v25 = vld [vmem:[#allocation12_spill] sm:$0xff] }
 0x3b6   : > { %v2066_v12 = vcvt.f32.s32 %v2065_v16  ;;  %v10877_v40 = vcvt.s32.f32 %v2805_v50 }
 0x3b7   : > { %14294 = vst [vmem:[#allocation201_spill] sm:$0xff] %v10875_v39  ;;  %v10879_v19 = vadd.s32 %v2054_v14, %v2052_v30  ;;  %v14301_v30 = vld [vmem:[#allocation172_spill] sm:$0xff] }
 0x3b8   : > { %14295 = vst [vmem:[#allocation202_spill] sm:$0xff] %v10877_v40  ;;  %v10881_v21 = vpop.f32.mrb[108].mxu1  ;;  %v10883_v11 = vadd.s32 %v2068_v41, %v2066_v12  ;;  %v10885_v23 = vpop.xlane.xlu0 %2322  ;;  %2794 = vmin.xlane.f32.xlu0 %v10875_v39  ;;  %v2095_v41 = vcvt.f32.s32 %v14301_v30 }
 0x3b9   : > { %14296 = vst [vmem:[#allocation203_spill] sm:$0xff] %v10879_v19  ;;  %14298 = vst [vmem:[#allocation205_spill] sm:$0xff] %v10885_v23  ;;  %v10887_v7 = vpop.f32.mrb[109].mxu1  ;;  %vm2430_vm14 = vcmp.eq.f32.partialorder %v14299_v8, %v10885_v23  ;;  %v10893_v13 = vpop.xlane.xlu1 %2324  ;;  %vm13516_vm6 = vcmp.eq.s32.totalorder %v7914_v54, %v10879_v19  ;;  %2808 = vmin.xlane.f32.xlu1 %v10877_v40  ;;  %v2082_v23 = vshll.u32 %v2081_v59, 16  ;;  %v14307_v40 = vld [vmem:[#allocation102_spill] sm:$0xff] }
 0x3ba   : > { %14297 = vst [vmem:[#allocation204_spill] sm:$0xff] %v10883_v11  ;;  %14300 = vst [vmem:[#allocation72_spill] sm:$0xff] %v10893_v13  ;;  %v10895_v50 = vpop.f32.mrb[110].mxu1  ;;  %v10902_v12 = vsel %vm2430_vm14, %v7914_v54, 128  ;;  %vm2431_vm0 = vcmp.eq.f32.partialorder %v14303_v25, %v10893_v13  ;;  %v10917_v30 = vsel %vm13516_vm6, -1e+30, %v14305_v10  ;;  %vm13515_vm14 = vcmp.eq.s32.totalorder %v7914_v54, %v10883_v11 }
 0x3bb   : > { %14302 = vst [vmem:[#allocation172_spill] sm:$0xff] %v10902_v12  ;;  %v10906_v14 = vpop.f32.mrb[111].mxu1  ;;  %v10909_v16 = vsel %vm2431_vm0, %v7914_v54, 128  ;;  %14306 = vst [vmem:[#allocation107_spill] sm:$0xff] %v10917_v30  ;;  %v10928_v8 = vsel %vm13515_vm14, -1e+30, %v14307_v40 }
 0x3bc   : > { %14304 = vst [vmem:[#allocation12_spill] sm:$0xff] %v10909_v16  ;;  %v2079_v13 = vpop.xlane.xlu0 %2078  ;;  %2394 = vmax.xlane.f32.xlu0 %v10917_v30  ;;  %14308 = vst [vmem:[#allocation102_spill] sm:$0xff] %v10928_v8  ;;  %v2819_v10 = vshra.s32 %v10902_v12, 16  ;;  %v2096_v38 = vshll.u32 %v2095_v41, 16  ;;  %v2833_v25 = vshra.s32 %v10909_v16, 16  ;;  %v14315_v41 = vld [vmem:[#allocation14_spill] sm:$0xff] }
 0x3bd   : > { %v2080_v39 = vcvt.f32.s32 %v2079_v13  ;;  %v2093_v19 = vpop.xlane.xlu1 %2092  ;;  %2396 = vmax.xlane.f32.xlu1 %v10928_v8  ;;  %v14314_v13 = vld [vmem:[#allocation176_spill] sm:$0xff] }
 0x3be   : > { %v2094_v58 = vcvt.f32.s32 %v2093_v19  ;;  %v10935_v59 = vcvt.s32.f32 %v2819_v10  ;;  %v10939_v60 = vcvt.s32.f32 %v2833_v25  ;;  %v2109_v11 = vcvt.f32.s32 %v14314_v13  ;;  %v14321_v10 = vld [vmem:[#allocation114_spill] sm:$0xff] }
 0x3bf   : > { %v10933_v53 = vadd.s32 %v2082_v23, %v2080_v39  ;;  %v14317_v39 = vld [vmem:[#allocation179_spill] sm:$0xff] }
 0x3c0   : > { %14310 = vst [vmem:[#allocation207_spill] sm:$0xff] %v10935_v59  ;;  %v10937_v30 = vadd.s32 %v2096_v38, %v2094_v58  ;;  %14312 = vst [vmem:[#allocation209_spill] sm:$0xff] %v10939_v60  ;;  %v10941_v40 = vpop.xlane.xlu0 %2326  ;;  %2822 = vmin.xlane.f32.xlu0 %v10935_v59  ;;  %v2123_v23 = vcvt.f32.s32 %v14317_v39  ;;  %v14319_v38 = vld [vmem:[#allocation178_spill] sm:$0xff] }
 0x3c1   : > { %14309 = vst [vmem:[#allocation206_spill] sm:$0xff] %v10933_v53  ;;  %14313 = vst [vmem:[#allocation210_spill] sm:$0xff] %v10941_v40  ;;  %vm2432_vm0 = vcmp.eq.f32.partialorder %v14315_v41, %v10941_v40  ;;  %v10947_v19 = vpop.xlane.xlu1 %2328  ;;  %vm13532_vm14 = vcmp.eq.s32.totalorder %v7914_v54, %v10933_v53  ;;  %2836 = vmin.xlane.f32.xlu1 %v10939_v60  ;;  %v2110_v60 = vshll.u32 %v2109_v11, 16 }
 0x3c2   : > { %14311 = vst [vmem:[#allocation208_spill] sm:$0xff] %v10937_v30  ;;  %14316 = vst [vmem:[#allocation176_spill] sm:$0xff] %v10947_v19  ;;  %v10954_v58 = vsel %vm2432_vm0, %v7914_v54, 128  ;;  %vm2433_vm6 = vcmp.eq.f32.partialorder %v14319_v38, %v10947_v19  ;;  %v10965_v13 = vsel %vm13532_vm14, -1e+30, %v14321_v10  ;;  %vm13531_vm8 = vcmp.eq.s32.totalorder %v7914_v54, %v10937_v30  ;;  %v14323_v38 = vld [vmem:[#allocation108_spill] sm:$0xff] }
 0x3c3   : > { %14318 = vst [vmem:[#allocation14_spill] sm:$0xff] %v10954_v58  ;;  %v10959_v25 = vsel %vm2433_vm6, %v7914_v54, 128  ;;  %14322 = vst [vmem:[#allocation178_spill] sm:$0xff] %v10965_v13  ;;  %v2847_v39 = vshra.s32 %v10954_v58, 16  ;;  %v10976_v19 = vsel %vm13531_vm8, -1e+30, %v14323_v38 }
 0x3c4   : > { %14320 = vst [vmem:[#allocation179_spill] sm:$0xff] %v10959_v25  ;;  %v2107_v41 = vpop.xlane.xlu0 %2106  ;;  %v2861_v40 = vshra.s32 %v10959_v25, 16  ;;  %2398 = vmax.xlane.f32.xlu0 %v10965_v13  ;;  %v2124_v59 = vshll.u32 %v2123_v23, 16  ;;  %v14329_v30 = vld [vmem:[#allocation83_spill] sm:$0xff]  ;;  %v14330_v23 = vld [vmem:[#allocation180_spill] sm:$0xff] }
 0x3c5   : > { %v2108_v53 = vcvt.f32.s32 %v2107_v41  ;;  %v2121_v10 = vpop.xlane.xlu1 %2120  ;;  %2400 = vmax.xlane.f32.xlu1 %v10976_v19  ;;  %v10979_v12 = vcvt.s32.f32 %v2847_v39  ;;  %v2137_v41 = vcvt.f32.s32 %v14329_v30 }
 0x3c6   : > { %v2122_v16 = vcvt.f32.s32 %v2121_v10  ;;  %v10981_v58 = vcvt.s32.f32 %v2861_v40 }
 0x3c7   : > { %14324 = vst [vmem:[#allocation114_spill] sm:$0xff] %v10979_v12  ;;  %v6784_v25 = vpop.f32.mrb[112].mxu1  ;;  %v10983_v11 = vadd.s32 %v2110_v60, %v2108_v53  ;;  %v2151_v60 = vcvt.f32.s32 %v10203_v6 }
 0x3c8   : > { %14325 = vst [vmem:[#allocation108_spill] sm:$0xff] %v10981_v58  ;;  %v5805_v13 = vpop.f32.mrb[113].mxu1  ;;  %v10985_v8 = vadd.s32 %v2124_v59, %v2122_v16  ;;  %v10987_v56 = vpop.xlane.xlu0 %2330  ;;  %2850 = vmin.xlane.f32.xlu0 %v10979_v12  ;;  %v14333_v16 = vld [vmem:[#allocation16_spill] sm:$0xff]  ;;  %v14334_v59 = vld [vmem:[#allocation121_spill] sm:$0xff] }
 0x3c9   : > { %14326 = vst [vmem:[#allocation211_spill] sm:$0xff] %v10983_v11  ;;  %14328 = vst [vmem:[#allocation213_spill] sm:$0xff] %v10987_v56  ;;  %v6785_v38 = vpop.f32.mrb[114].mxu1  ;;  %vm2434_vm6 = vcmp.eq.f32.partialorder %v14330_v23, %v10987_v56  ;;  %v10993_v39 = vpop.xlane.xlu1 %2332  ;;  %2864 = vmin.xlane.f32.xlu1 %v10981_v58  ;;  %vm13565_vm8 = vcmp.eq.s32.totalorder %v7914_v54, %v10983_v11  ;;  %v2138_v23 = vshll.u32 %v2137_v41, 16 }
 0x3ca   : > { %14327 = vst [vmem:[#allocation212_spill] sm:$0xff] %v10985_v8  ;;  %14331 = vst [vmem:[#allocation83_spill] sm:$0xff] %v10993_v39  ;;  %v5925_v40 = vpack.c.bf16 %v6785_v38, %v6784_v25  ;;  %v5808_v10 = vpop.f32.mrb[115].mxu1  ;;  %v10998_v53 = vsel %vm2434_vm6, %v7914_v54, 128  ;;  %vm2435_vm0 = vcmp.eq.f32.partialorder %v14333_v16, %v10993_v39  ;;  %v11011_v25 = vsel %vm13565_vm8, -1e+30, %v14334_v59 }
 0x3cb   : > { %14332 = vst [vmem:[#allocation180_spill] sm:$0xff] %v10998_v53  ;;  %v11003_v30 = vsel %vm2435_vm0, %v7914_v54, 128  ;;  %vm13540_vm14 = vcmp.eq.s32.totalorder %v7914_v54, %v10985_v8  ;;  %v5924_v6 = vpack.c.bf16 %v5808_v10, %v5805_v13  ;;  %v14335_v16 = vld [vmem:[#allocation115_spill] sm:$0xff]  ;;  %v2875_v11 = vshra.s32 %v10998_v53, 16 }
 0x3cc   : > { %v2135_v38 = vpop.xlane.xlu0 %2134  ;;  %2402 = vmax.xlane.f32.xlu0 %v11011_v25  ;;  %v11020_v39 = vsel %vm13540_vm14, -1e+30, %v14335_v16  ;;  %v2152_v59 = vshll.u32 %v2151_v60, 16  ;;  %v2889_v13 = vshra.s32 %v11003_v30, 16  ;;  %v14337_v8 = vpack.c.bf16 %v10596_v52, %v10577_v47 }
 0x3cd   : > { %v2136_v56 = vcvt.f32.s32 %v2135_v38  ;;  %v2149_v58 = vpop.xlane.xlu1 %2148  ;;  %2404 = vmax.xlane.f32.xlu1 %v11020_v39  ;;  %6574 = vmatprep.subr.bf16.mxu1 %v5924_v6  ;;  %v11027_v10 = vcvt.s32.f32 %v2875_v11 }
 0x3ce   : > { %v2150_v12 = vcvt.f32.s32 %v2149_v58  ;;  %6575 = vmatpush3.bf16.msra.mxu1 %v14337_v8  ;;  %v11034_v38 = vcvt.s32.f32 %v2889_v13  ;;  %v14342_v8 = vpack.c.bf16 %v10584_v3, %v10570_v18 }
 0x3cf   : > { %v11025_v41 = vadd.s32 %v2138_v23, %v2136_v56  ;;  %6576 = vmatprep.subr.bf16.mxu1 %v5925_v40  ;;  %v14344_v40 = vld [vmem:[#allocation122_spill] sm:$0xff] }
 0x3d0   : > { %v11032_v16 = vadd.s32 %v2152_v59, %v2150_v12  ;;  %v11036_v53 = vpop.xlane.xlu0 %2334  ;;  %2878 = vmin.xlane.f32.xlu0 %v11027_v10  ;;  %v14341_v12 = vld [vmem:[#allocation125_spill] sm:$0xff] }
 0x3d1   : > { %14336 = vst [vmem:[#allocation16_spill] sm:$0xff] %v11025_v41  ;;  %14339 = vst [vmem:[#allocation115_spill] sm:$0xff] %v11036_v53  ;;  %vm2436_vm6 = vcmp.eq.f32.partialorder %v10255_v33, %v11036_v53  ;;  %v11041_v56 = vpop.xlane.xlu1 %2336  ;;  %vm13541_vm0 = vcmp.eq.s32.totalorder %v7914_v54, %v11025_v41  ;;  %2892 = vmin.xlane.f32.xlu1 %v11034_v38 }
 0x3d2   : > { %14338 = vst [vmem:[#allocation121_spill] sm:$0xff] %v11032_v16  ;;  %14340 = vst [vmem:[#allocation214_spill] sm:$0xff] %v11041_v56  ;;  %v11047_v47 = vsel %vm2436_vm6, %v7914_v54, 128  ;;  %vm2437_vm14 = vcmp.eq.f32.partialorder %v10265_v63, %v11041_v56  ;;  %v11058_v33 = vsel %vm13541_vm0, -1e+30, %v14341_v12  ;;  %6577 = vmatpush3.bf16.msra.mxu1 %v14342_v8  ;;  %vm13548_vm6 = vcmp.eq.s32.totalorder %v7914_v54, %v11032_v16 }
 0x3d3   : > { %v11052_v52 = vsel %vm2437_vm14, %v7914_v54, 128  ;;  %v2903_v63 = vshra.s32 %v11047_v47, 16  ;;  %v11074_v60 = vsel %vm13548_vm6, -1e+30, %v14344_v40 }
 0x3d4   : > { %v11065_v58 = vpop.xlane.xlu0 %2338  ;;  %v2917_v11 = vshra.s32 %v11052_v52, 16  ;;  %2406 = vmax.xlane.f32.xlu0 %v11058_v33 }
 0x3d5   : > { %14343 = vst [vmem:[#allocation125_spill] sm:$0xff] %v11065_v58  ;;  %vm2438_vm14 = vcmp.eq.f32.partialorder %v10279_v32, %v11065_v58  ;;  %v11078_v18 = vpop.xlane.xlu1 %2340  ;;  %2408 = vmax.xlane.f32.xlu1 %v11074_v60  ;;  %v11089_v59 = vcvt.s32.f32 %v2903_v63 }
 0x3d6   : > { %14345 = vst [vmem:[#allocation122_spill] sm:$0xff] %v11078_v18  ;;  %v11082_v3 = vsel %vm2438_vm14, %v7914_v54, 128  ;;  %vm2439_vm0 = vcmp.eq.f32.partialorder %v10289_v22, %v11078_v18  ;;  %v11091_v13 = vcvt.s32.f32 %v2917_v11 }
 0x3d7   : > { %v6788_v6 = vpop.f32.mrb[116].mxu1  ;;  %v11087_v23 = vsel %vm2439_vm0, %v7914_v54, 128  ;;  %v2931_v40 = vshra.s32 %v11082_v3, 16 }
 0x3d8   : > { %v5821_v12 = vpop.f32.mrb[117].mxu1  ;;  %v11093_v32 = vpop.xlane.xlu0 %2342  ;;  %v2945_v16 = vshra.s32 %v11087_v23, 16  ;;  %2906 = vmin.xlane.f32.xlu0 %v11089_v59 }
 0x3d9   : > { %14346 = vst [vmem:[#allocation215_spill] sm:$0xff] %v11093_v32  ;;  %v6789_v8 = vpop.f32.mrb[118].mxu1  ;;  %vm2440_vm14 = vcmp.eq.f32.partialorder %v10301_v17, %v11093_v32  ;;  %v11100_v22 = vpop.xlane.xlu1 %2344  ;;  %2920 = vmin.xlane.f32.xlu1 %v11091_v13  ;;  %v11111_v58 = vcvt.s32.f32 %v2931_v40 }
 0x3da   : > { %14347 = vst [vmem:[#allocation216_spill] sm:$0xff] %v11100_v22  ;;  %v5824_v41 = vpop.f32.mrb[119].mxu1  ;;  %vm2441_vm0 = vcmp.eq.f32.partialorder %v10312_v15, %v11100_v22  ;;  %v5927_v63 = vpack.c.bf16 %v6789_v8, %v6788_v6  ;;  %v11106_v11 = vsel %vm2440_vm14, %v7914_v54, 128  ;;  %v11113_v56 = vcvt.s32.f32 %v2945_v16 }
 0x3db   : > { %v11109_v18 = vsel %vm2441_vm0, %v7914_v54, 128  ;;  %v5926_v32 = vpack.c.bf16 %v5824_v41, %v5821_v12  ;;  %v2959_v41 = vshra.s32 %v11106_v11, 16  ;;  %v14350_v6 = vpack.c.bf16 %v10703_v4, %v10685_v1 }
 0x3dc   : > { %v11115_v17 = vpop.xlane.xlu0 %2346  ;;  %2934 = vmin.xlane.f32.xlu0 %v11111_v58 }
 0x3dd   : > { %14348 = vst [vmem:[#allocation217_spill] sm:$0xff] %v11115_v17  ;;  %vm2442_vm6 = vcmp.eq.f32.partialorder %v10324_v24, %v11115_v17  ;;  %v11119_v53 = vpop.xlane.xlu1 %2348  ;;  %2948 = vmin.xlane.f32.xlu1 %v11113_v56  ;;  %6578 = vmatprep.subr.bf16.mxu1 %v5926_v32  ;;  %v2973_v24 = vshra.s32 %v11109_v18, 16  ;;  %v11140_v17 = vcvt.s32.f32 %v2959_v41  ;;  %v14353_v41 = vpack.c.bf16 %v10696_v44, %v10678_v62 }
 0x3de   : > { %14349 = vst [vmem:[#allocation218_spill] sm:$0xff] %v11119_v53  ;;  %v11124_v15 = vsel %vm2442_vm6, %v7914_v54, 128  ;;  %vm2443_vm14 = vcmp.eq.f32.partialorder %v10332_v46, %v11119_v53  ;;  %6579 = vmatpush3.bf16.msra.mxu1 %v14350_v6 }
 0x3df   : > { %v11129_v16 = vsel %vm2443_vm14, %v7914_v54, 128  ;;  %v2987_v12 = vshra.s32 %v11124_v15, 16  ;;  %v11142_v46 = vcvt.s32.f32 %v2973_v24  ;;  %6580 = vmatprep.subr.bf16.mxu1 %v5927_v63 }
 0x3e0   : > { %v11137_v8 = vpop.xlane.xlu0 %2350  ;;  %v3001_v40 = vshra.s32 %v11129_v16, 16  ;;  %2962 = vmin.xlane.f32.xlu0 %v11140_v17 }
 0x3e1   : > { %14351 = vst [vmem:[#allocation219_spill] sm:$0xff] %v11137_v8  ;;  %vm2444_vm6 = vcmp.eq.f32.partialorder %v10349_v29, %v11137_v8  ;;  %2976 = vmin.xlane.f32.xlu1 %v11142_v46  ;;  %v11148_v1 = vcvt.s32.f32 %v2987_v12 }
 0x3e2   : > { %v11151_v4 = vsel %vm2444_vm6, %v7914_v54, 128  ;;  %v11153_v32 = vcvt.s32.f32 %v3001_v40  ;;  %6581 = vmatpush3.bf16.msra.mxu1 %v14353_v41  ;;  %v11159_v24 = vpop.xlane.xlu1 %2352 }
 0x3e3   : > { %v3015_v63 = vshra.s32 %v11151_v4, 16  ;;  %14354 = vst [vmem:[#allocation221_spill] sm:$0xff] %v11159_v24  ;;  %vm2445_vm0 = vcmp.eq.f32.partialorder %v10365_v26, %v11159_v24 }
 0x3e4   : > { %14352 = vst [vmem:[#allocation220_spill] sm:$0xff] %v11153_v32  ;;  %2990 = vmin.xlane.f32.xlu0 %v11148_v1  ;;  %v11166_v29 = vsel %vm2445_vm0, %v7914_v54, 128 }
 0x3e5   : > { %3004 = vmin.xlane.f32.xlu1 %v11153_v32  ;;  %14355 = vst [vmem:[#allocation222_spill] sm:$0xff] %v11166_v29  ;;  %v11168_v12 = vcvt.s32.f32 %v3015_v63  ;;  %v3029_v44 = vshra.s32 %v11166_v29, 16  ;;  %v2538_v32 = vand.u32 65535, %v10382_v45  ;;  %v14359_v45 = vpack.c.bf16 %v10800_v5, %v10781_v0 }
 0x3e7   : > { %v11178_v53 = vcvt.s32.f32 %v3029_v44  ;;  %v2552_v44 = vand.u32 65535, %v10414_v55 }
 0x3e8   : > { %v6792_v6 = vpop.f32.mrb[120].mxu1  ;;  %v11170_v62 = vpop.xlane.xlu0 %2354  ;;  %3018 = vmin.xlane.f32.xlu0 %v11168_v12 }
 0x3e9   : > { %v5837_v40 = vpop.f32.mrb[121].mxu1  ;;  %14356 = vst [vmem:[#allocation223_spill] sm:$0xff] %v11170_v62  ;;  %vm2446_vm14 = vcmp.eq.f32.partialorder %v10379_v36, %v11170_v62  ;;  %3032 = vmin.xlane.f32.xlu1 %v11178_v53 }
 0x3ea   : > { %v6793_v41 = vpop.f32.mrb[122].mxu1  ;;  %v11176_v8 = vsel %vm2446_vm14, %v7914_v54, 128 }
 0x3eb   : > { %v5929_v26 = vpack.c.bf16 %v6793_v41, %v6792_v6  ;;  %v5840_v24 = vpop.f32.mrb[123].mxu1  ;;  %v3043_v22 = vshra.s32 %v11176_v8, 16  ;;  %v14357_v6 = vpack.c.bf16 %v10807_v49, %v10789_v37 }
 0x3ec   : > { %v5928_v63 = vpack.c.bf16 %v5840_v24, %v5837_v40  ;;  %v11184_v29 = vpop.xlane.xlu0 %2542  ;;  %v2540_v24 = vcvt.s32.f32 %v2538_v32 }
 0x3ed   : > { %v11186_v36 = vcvt.s32.f32 %v3043_v22  ;;  %vm2544_vm6 = vcmp.eq.f32.partialorder %v10389_v61, %v11184_v29 }
 0x3ee   : > { %6582 = vmatprep.subr.bf16.mxu1 %v5928_v63  ;;  %v2545_v22 = vsel %vm2544_vm6, %v2540_v24, inf }
 0x3ef   : > { %6583 = vmatpush3.bf16.msra.mxu1 %v14357_v6  ;;  %3046 = vmin.xlane.f32.xlu0 %v11186_v36 }
 0x3f0   : > { %6584 = vmatprep.subr.bf16.mxu1 %v5929_v26  ;;  %v11194_v40 = vpop.xlane.xlu1 %2356  ;;  %v2554_v26 = vcvt.s32.f32 %v2552_v44 }
 0x3f1   : > { %14358 = vst [vmem:[#allocation224_spill] sm:$0xff] %v11194_v40  ;;  %vm2447_vm0 = vcmp.eq.f32.partialorder %v10406_v2, %v11194_v40  ;;  %v14362_v40 = vpack.c.bf16 %v10906_v14, %v10887_v7 }
 0x3f2   : > { %v11202_v37 = vsel %vm2447_vm0, %v7914_v54, 128 }
 0x3f3   : > { %6585 = vmatpush3.bf16.msra.mxu1 %v14359_v45  ;;  %2546 = vmin.xlane.f32.xlu0 %v2545_v22  ;;  %v3057_v49 = vshra.s32 %v11202_v37, 16 }
 0x3f5   : > { %v11208_v32 = vcvt.s32.f32 %v3057_v49 }
 0x3f6   : > { %v11206_v61 = vpop.xlane.xlu0 %2358 }
 0x3f7   : > { %14360 = vst [vmem:[#allocation225_spill] sm:$0xff] %v11206_v61  ;;  %vm2448_vm14 = vcmp.eq.f32.partialorder %v10431_v48, %v11206_v61  ;;  %v11212_v0 = vpop.xlane.xlu1 %2556  ;;  %3060 = vmin.xlane.f32.xlu1 %v11208_v32  ;;  %v2566_v48 = vand.u32 65535, %v10425_v27 }
 0x3f8   : > { %v11215_v2 = vsel %vm2448_vm14, %v7914_v54, 128  ;;  %vm2558_vm6 = vcmp.eq.f32.partialorder %v10433_v51, %v11212_v0 }
 0x3f9   : > { %v6796_v5 = vpop.f32.mrb[124].mxu1  ;;  %v3071_v55 = vshra.s32 %v11215_v2, 16  ;;  %v2559_v49 = vsel %vm2558_vm6, %v2554_v26, inf  ;;  %v2568_v44 = vcvt.s32.f32 %v2566_v48 }
 0x3fa   : > { %v5853_v41 = vpop.f32.mrb[125].mxu1 }
 0x3fb   : > { %v6797_v63 = vpop.f32.mrb[126].mxu1  ;;  %v11221_v6 = vpop.xlane.xlu0 %2570  ;;  %v11224_v22 = vcvt.s32.f32 %v3071_v55  ;;  %2560 = vmin.xlane.f32.xlu1 %v2559_v49  ;;  %v14364_v55 = vpack.c.bf16 %v10895_v50, %v10881_v21  ;;  %v2594_v21 = vand.u32 65535, %v10493_v57 }
 0x3fc   : > { %v5931_v24 = vpack.c.bf16 %v6797_v63, %v6796_v5  ;;  %v5856_v45 = vpop.f32.mrb[127].mxu1  ;;  %vm2572_vm0 = vcmp.eq.f32.partialorder %v10438_v28, %v11221_v6  ;;  %v14363_v28 = vld [vmem:[#allocation23_spill] sm:$0xff] }
 0x3fd   : > { %v5930_v61 = vpack.c.bf16 %v5856_v45, %v5853_v41  ;;  %3074 = vmin.xlane.f32.xlu0 %v11224_v22  ;;  %v2573_v5 = vsel %vm2572_vm0, %v2568_v44, inf }
 0x3ff   : > { %6586 = vmatprep.subr.bf16.mxu1 %v5930_v61  ;;  %v11229_v51 = vpop.xlane.xlu1 %2360  ;;  %v2580_v61 = vand.u32 65535, %v14363_v28  ;;  %v2608_v28 = vand.u32 65535, %v10498_v31 }
 0x400   : > { %14361 = vst [vmem:[#allocation226_spill] sm:$0xff] %v11229_v51  ;;  %6587 = vmatpush3.bf16.msra.mxu1 %v14362_v40  ;;  %vm2449_vm14 = vcmp.eq.f32.partialorder %v10461_v43, %v11229_v51  ;;  %v14366_v43 = vld [vmem:[#allocation117_spill] sm:$0xff]  ;;  %v14367_v40 = vld [vmem:[#allocation110_spill] sm:$0xff] }
 0x401   : > { %v11237_v27 = vsel %vm2449_vm14, %v7914_v54, 128  ;;  %6588 = vmatprep.subr.bf16.mxu1 %v5931_v24  ;;  %2574 = vmin.xlane.f32.xlu0 %v2573_v5  ;;  %v11248_v14 = vpop.xlane.xlu0 %2362  ;;  %v2582_v48 = vcvt.s32.f32 %v2580_v61  ;;  %v2610_v31 = vcvt.s32.f32 %v2608_v28  ;;  %v14377_v28 = vld [vmem:[#allocation197_spill] sm:$0xff] }
 0x402   : > { %v3085_v41 = vshra.s32 %v11237_v27, 16  ;;  %14365 = vst [vmem:[#allocation23_spill] sm:$0xff] %v11248_v14  ;;  %vm2450_vm6 = vcmp.eq.f32.partialorder %v14366_v43, %v11248_v14 }
 0x403   : > { %v11244_v26 = vpop.xlane.xlu1 %2584  ;;  %v11256_v63 = vsel %vm2450_vm6, %v7914_v54, 128 }
 0x404   : > { %6589 = vmatpush3.bf16.msra.mxu1 %v14364_v55  ;;  %v11246_v7 = vcvt.s32.f32 %v3085_v41  ;;  %vm2586_vm0 = vcmp.eq.f32.partialorder %v14367_v40, %v11244_v26  ;;  %v3099_v24 = vshra.s32 %v11256_v63, 16  ;;  %v2596_v41 = vcvt.s32.f32 %v2594_v21 }
 0x405   : > { %v2587_v45 = vsel %vm2586_vm0, %v2582_v48, inf }
 0x406   : > { %3088 = vmin.xlane.f32.xlu1 %v11246_v7  ;;  %v11267_v44 = vcvt.s32.f32 %v3099_v24  ;;  %v14372_v24 = vld [vmem:[#allocation124_spill] sm:$0xff] }
 0x407   : > { %v11259_v50 = vpop.xlane.xlu1 %2364 }
 0x408   : > { %14368 = vst [vmem:[#allocation117_spill] sm:$0xff] %v11259_v50  ;;  %vm2451_vm14 = vcmp.eq.f32.partialorder %v10507_v42, %v11259_v50  ;;  %3102 = vmin.xlane.f32.xlu0 %v11267_v44  ;;  %v2636_v50 = vand.u32 65535, %v14377_v28  ;;  %v14383_v28 = vld [vmem:[#allocation35_spill] sm:$0xff] }
 0x409   : > { %v11265_v49 = vsel %vm2451_vm14, %v7914_v54, 128 }
 0x40a   : > { %2588 = vmin.xlane.f32.xlu1 %v2587_v45  ;;  %v11269_v5 = vpop.xlane.xlu0 %2598  ;;  %v3113_v57 = vshra.s32 %v11265_v49, 16 }
 0x40b   : > { %vm2600_vm6 = vcmp.eq.f32.partialorder %v10510_v20, %v11269_v5  ;;  %v11276_v42 = vpop.xlane.xlu1 %2612  ;;  %v14370_v20 = vld [vmem:[#allocation195_spill] sm:$0xff] }
 0x40c   : > { %v2601_v61 = vsel %vm2600_vm6, %v2596_v41, inf  ;;  %v11278_v55 = vcvt.s32.f32 %v3113_v57  ;;  %vm2614_vm14 = vcmp.eq.f32.partialorder %v14370_v20, %v11276_v42  ;;  %v14373_v41 = vld [vmem:[#allocation116_spill] sm:$0xff] }
 0x40d   : > { %2602 = vmin.xlane.f32.xlu0 %v2601_v61  ;;  %v2615_v45 = vsel %vm2614_vm14, %v2610_v31, inf  ;;  %v2622_v57 = vand.u32 65535, %v14373_v41  ;;  %v14380_v41 = vld [vmem:[#allocation123_spill] sm:$0xff] }
 0x40e   : > { %v11280_v43 = vpop.xlane.xlu0 %2366  ;;  %3116 = vmin.xlane.f32.xlu1 %v11278_v55 }
 0x40f   : > { %14369 = vst [vmem:[#allocation110_spill] sm:$0xff] %v11280_v43  ;;  %vm2452_vm0 = vcmp.eq.f32.partialorder %v10530_v35, %v11280_v43  ;;  %v11290_v48 = vpop.xlane.xlu1 %2368  ;;  %v2624_v31 = vcvt.s32.f32 %v2622_v57 }
 0x410   : > { %v11288_v40 = vsel %vm2452_vm0, %v7914_v54, 128  ;;  %14371 = vst [vmem:[#allocation195_spill] sm:$0xff] %v11290_v48  ;;  %vm2453_vm6 = vcmp.eq.f32.partialorder %v14372_v24, %v11290_v48  ;;  %v2638_v48 = vcvt.s32.f32 %v2636_v50 }
 0x411   : > { %v3127_v21 = vshra.s32 %v11288_v40, 16  ;;  %v11297_v35 = vsel %vm2453_vm6, %v7914_v54, 128 }
 0x412   : > { %14374 = vst [vmem:[#allocation124_spill] sm:$0xff] %v11297_v35  ;;  %2616 = vmin.xlane.f32.xlu1 %v2615_v45  ;;  %v3141_v61 = vshra.s32 %v11297_v35, 16  ;;  %v11302_v43 = vpop.xlane.xlu0 %2626  ;;  %v14381_v45 = vld [vmem:[#allocation28_spill] sm:$0xff] }
 0x413   : > { %v11299_v20 = vcvt.s32.f32 %v3127_v21  ;;  %14376 = vst [vmem:[#allocation227_spill] sm:$0xff] %v11302_v43  ;;  %vm2628_vm0 = vcmp.eq.f32.partialorder %v14380_v41, %v11302_v43  ;;  %v14386_v41 = vld [vmem:[#allocation36_spill] sm:$0xff] }
 0x414   : > { %v11306_v14 = vpop.xlane.xlu1 %2640  ;;  %v11308_v24 = vcvt.s32.f32 %v3141_v61  ;;  %v2629_v21 = vsel %vm2628_vm0, %v2624_v31, inf }
 0x415   : > { %14375 = vst [vmem:[#allocation116_spill] sm:$0xff] %v11299_v20  ;;  %3130 = vmin.xlane.f32.xlu0 %v11299_v20  ;;  %14378 = vst [vmem:[#allocation197_spill] sm:$0xff] %v11306_v14  ;;  %vm2642_vm14 = vcmp.eq.f32.partialorder %v14381_v45, %v11306_v14  ;;  %v14392_v14 = vld [vmem:[#allocation34_spill] sm:$0xff] }
 0x416   : > { %14379 = vst [vmem:[#allocation228_spill] sm:$0xff] %v11308_v24  ;;  %3144 = vmin.xlane.f32.xlu1 %v11308_v24  ;;  %v2643_v61 = vsel %vm2642_vm14, %v2638_v48, inf  ;;  %v2664_v20 = vand.u32 65535, %v14392_v14 }
 0x418   : > { %v11315_v51 = vpop.xlane.xlu0 %2370 }
 0x419   : > { %2630 = vmin.xlane.f32.xlu0 %v2629_v21  ;;  %14382 = vst [vmem:[#allocation123_spill] sm:$0xff] %v11315_v51  ;;  %vm2454_vm6 = vcmp.eq.f32.partialorder %v14383_v28, %v11315_v51  ;;  %v11319_v62 = vpop.xlane.xlu1 %2372  ;;  %v14389_v28 = vld [vmem:[#allocation33_spill] sm:$0xff] }
 0x41a   : > { %14384 = vst [vmem:[#allocation28_spill] sm:$0xff] %v11319_v62  ;;  %v11322_v57 = vsel %vm2454_vm6, %v7914_v54, 128  ;;  %vm2455_vm8 = vcmp.eq.f32.partialorder %v14386_v41, %v11319_v62  ;;  %2644 = vmin.xlane.f32.xlu1 %v2643_v61  ;;  %v2650_v51 = vand.u32 65535, %v14389_v28  ;;  %v14394_v61 = vld [vmem:[#allocation37_spill] sm:$0xff]  ;;  %v14396_v28 = vld [vmem:[#allocation127_spill] sm:$0xff] }
 0x41b   : > { %14385 = vst [vmem:[#allocation35_spill] sm:$0xff] %v11322_v57  ;;  %v11327_v31 = vsel %vm2455_vm8, %v7914_v54, 128  ;;  %v3155_v50 = vshra.s32 %v11322_v57, 16  ;;  %v14487_v57 = vld [vmem:[#allocation96_spill] sm:$0xff] }
 0x41c   : > { %14387 = vst [vmem:[#allocation36_spill] sm:$0xff] %v11327_v31  ;;  %v11330_v21 = vpop.xlane.xlu0 %2654  ;;  %v3169_v45 = vshra.s32 %v11327_v31, 16  ;;  %v2652_v62 = vcvt.s32.f32 %v2650_v51  ;;  %v2666_v31 = vcvt.s32.f32 %v2664_v20  ;;  %v14403_v20 = vld [vmem:[#allocation135_spill] sm:$0xff] }
 0x41d   : > { %14388 = vst [vmem:[#allocation229_spill] sm:$0xff] %v11330_v21  ;;  %v11334_v24 = vpop.xlane.xlu1 %2668  ;;  %v11336_v48 = vcvt.s32.f32 %v3155_v50  ;;  %vm2656_vm8 = vcmp.eq.f32.partialorder %v14394_v61, %v11330_v21  ;;  %v14397_v50 = vld [vmem:[#allocation139_spill] sm:$0xff]  ;;  %v14400_v61 = vld [vmem:[#allocation45_spill] sm:$0xff] }
 0x41e   : > { %14390 = vst [vmem:[#allocation33_spill] sm:$0xff] %v11334_v24  ;;  %v11339_v43 = vcvt.s32.f32 %v3169_v45  ;;  %vm2670_vm0 = vcmp.eq.f32.partialorder %v14396_v28, %v11334_v24 }
 0x41f   : > { %14391 = vst [vmem:[#allocation230_spill] sm:$0xff] %v11336_v48  ;;  %3158 = vmin.xlane.f32.xlu0 %v11336_v48  ;;  %v2657_v48 = vsel %vm2656_vm8, %v2652_v62, inf }
 0x420   : > { %14393 = vst [vmem:[#allocation34_spill] sm:$0xff] %v11339_v43  ;;  %3172 = vmin.xlane.f32.xlu1 %v11339_v43  ;;  %v11345_v41 = vpop.xlane.xlu0 %2374  ;;  %v2671_v43 = vsel %vm2670_vm0, %v2666_v31, inf  ;;  %v14406_v31 = vld [vmem:[#allocation147_spill] sm:$0xff] }
 0x421   : > { %14395 = vst [vmem:[#allocation37_spill] sm:$0xff] %v11345_v41  ;;  %vm2456_vm14 = vcmp.eq.f32.partialorder %v14397_v50, %v11345_v41  ;;  %v11354_v45 = vpop.xlane.xlu1 %2376  ;;  %v2678_v50 = vand.u32 65535, %v14403_v20 }
 0x422   : > { %v11352_v14 = vsel %vm2456_vm14, %v7914_v54, 128  ;;  %14399 = vst [vmem:[#allocation139_spill] sm:$0xff] %v11354_v45  ;;  %vm2457_vm6 = vcmp.eq.f32.partialorder %v14400_v61, %v11354_v45 }
 0x423   : > { %14398 = vst [vmem:[#allocation127_spill] sm:$0xff] %v11352_v14  ;;  %2658 = vmin.xlane.f32.xlu0 %v2657_v48  ;;  %v3183_v51 = vshra.s32 %v11352_v14, 16  ;;  %v11360_v21 = vsel %vm2457_vm6, %v7914_v54, 128  ;;  %v14407_v48 = vld [vmem:[#allocation142_spill] sm:$0xff] }
 0x424   : > { %14401 = vst [vmem:[#allocation45_spill] sm:$0xff] %v11360_v21  ;;  %2672 = vmin.xlane.f32.xlu1 %v2671_v43  ;;  %v11362_v28 = vpop.xlane.xlu0 %2682  ;;  %v3197_v62 = vshra.s32 %v11360_v21, 16  ;;  %v2692_v61 = vand.u32 65535, %v14407_v48  ;;  %v2680_v43 = vcvt.s32.f32 %v2678_v50 }
 0x425   : > { %14402 = vst [vmem:[#allocation231_spill] sm:$0xff] %v11362_v28  ;;  %v11365_v41 = vcvt.s32.f32 %v3183_v51  ;;  %v11367_v24 = vpop.xlane.xlu1 %2696  ;;  %vm2684_vm8 = vcmp.eq.f32.partialorder %v14406_v31, %v11362_v28  ;;  %v14410_v51 = vld [vmem:[#allocation153_spill] sm:$0xff] }
 0x426   : > { %14405 = vst [vmem:[#allocation232_spill] sm:$0xff] %v11367_v24  ;;  %v11374_v45 = vcvt.s32.f32 %v3197_v62  ;;  %v2685_v21 = vsel %vm2684_vm8, %v2680_v43, inf  ;;  %v2694_v50 = vcvt.s32.f32 %v2692_v61 }
 0x427   : > { %14404 = vst [vmem:[#allocation135_spill] sm:$0xff] %v11365_v41  ;;  %3186 = vmin.xlane.f32.xlu0 %v11365_v41  ;;  %v14412_v41 = vld [vmem:[#allocation46_spill] sm:$0xff] }
 0x428   : > { %14408 = vst [vmem:[#allocation147_spill] sm:$0xff] %v11374_v45  ;;  %3200 = vmin.xlane.f32.xlu1 %v11374_v45  ;;  %vm2698_vm14 = vcmp.eq.f32.partialorder %v14412_v41, %v11367_v24  ;;  %v2706_v41 = vand.u32 65535, %v10692_v34  ;;  %v14422_v34 = vld [vmem:[#allocation63_spill] sm:$0xff] }
 0x429   : > { %v11376_v14 = vpop.xlane.xlu0 %2378  ;;  %v11381_v20 = vpop.xlane.xlu1 %2380 }
 0x42a   : > { %14409 = vst [vmem:[#allocation142_spill] sm:$0xff] %v11376_v14  ;;  %vm2458_vm0 = vcmp.eq.f32.partialorder %v14410_v51, %v11376_v14  ;;  %14411 = vst [vmem:[#allocation153_spill] sm:$0xff] %v11381_v20  ;;  %vm2459_vm6 = vcmp.eq.f32.partialorder %v10720_v9, %v11381_v20  ;;  %v2699_v51 = vsel %vm2698_vm14, %v2694_v50, inf  ;;  %v14420_v20 = vld [vmem:[#allocation62_spill] sm:$0xff] }
 0x42b   : > { %v11386_v31 = vsel %vm2458_vm0, %v7914_v54, 128  ;;  %2686 = vmin.xlane.f32.xlu0 %v2685_v21  ;;  %v11391_v62 = vsel %vm2459_vm6, %v7914_v54, 128  ;;  %v14419_v21 = vld [vmem:[#allocation154_spill] sm:$0xff] }
 0x42c   : > { %14413 = vst [vmem:[#allocation46_spill] sm:$0xff] %v11386_v31  ;;  %14414 = vst [vmem:[#allocation233_spill] sm:$0xff] %v11391_v62  ;;  %v3211_v48 = vshra.s32 %v11386_v31, 16  ;;  %v3225_v43 = vshra.s32 %v11391_v62, 16  ;;  %2700 = vmin.xlane.f32.xlu1 %v2699_v51  ;;  %v2720_v61 = vand.u32 65535, %v14419_v21  ;;  %v2708_v31 = vcvt.s32.f32 %v2706_v41  ;;  %v14426_v21 = vld [vmem:[#allocation57_spill] sm:$0xff] }
 0x42d   : > { %v11394_v14 = vpop.xlane.xlu0 %2710  ;;  %v11398_v45 = vpop.xlane.xlu1 %2724 }
 0x42e   : > { %14415 = vst [vmem:[#allocation234_spill] sm:$0xff] %v11394_v14  ;;  %14416 = vst [vmem:[#allocation235_spill] sm:$0xff] %v11398_v45  ;;  %v11400_v24 = vcvt.s32.f32 %v3211_v48  ;;  %v11402_v9 = vcvt.s32.f32 %v3225_v43  ;;  %vm2712_vm8 = vcmp.eq.f32.partialorder %v14420_v20, %v11394_v14  ;;  %v14424_v48 = vld [vmem:[#allocation4_spill] sm:$0xff] }
 0x42f   : > { %vm2726_vm14 = vcmp.eq.f32.partialorder %v14424_v48, %v11398_v45  ;;  %v2713_v20 = vsel %vm2712_vm8, %v2708_v31, inf  ;;  %v14429_v48 = vld [vmem:[#allocation52_spill] sm:$0xff] }
 0x430   : > { %14417 = vst [vmem:[#allocation236_spill] sm:$0xff] %v11400_v24  ;;  %14418 = vst [vmem:[#allocation237_spill] sm:$0xff] %v11402_v9  ;;  %3214 = vmin.xlane.f32.xlu0 %v11400_v24  ;;  %3228 = vmin.xlane.f32.xlu1 %v11402_v9  ;;  %v2722_v24 = vcvt.s32.f32 %v2720_v61  ;;  %v2734_v45 = vand.u32 65535, %v14429_v48  ;;  %v14433_v61 = vld [vmem:[#allocation68_spill] sm:$0xff] }
 0x431   : > { %v11408_v50 = vpop.xlane.xlu0 %2382  ;;  %v11413_v51 = vpop.xlane.xlu1 %2384 }
 0x432   : > { %14421 = vst [vmem:[#allocation154_spill] sm:$0xff] %v11408_v50  ;;  %vm2460_vm0 = vcmp.eq.f32.partialorder %v14422_v34, %v11408_v50  ;;  %14423 = vst [vmem:[#allocation62_spill] sm:$0xff] %v11413_v51  ;;  %vm2461_vm6 = vcmp.eq.f32.partialorder %v14426_v21, %v11413_v51  ;;  %v2727_v34 = vsel %vm2726_vm14, %v2722_v24, inf  ;;  %v2748_v21 = vand.u32 65535, %v14433_v61  ;;  %v14440_v61 = vld [vmem:[#allocation88_spill] sm:$0xff] }
 0x433   : > { %v11418_v43 = vsel %vm2460_vm0, %v7914_v54, 128  ;;  %v11423_v41 = vsel %vm2461_vm6, %v7914_v54, 128  ;;  %v2736_v51 = vcvt.s32.f32 %v2734_v45 }
 0x434   : > { %14425 = vst [vmem:[#allocation63_spill] sm:$0xff] %v11418_v43  ;;  %14427 = vst [vmem:[#allocation4_spill] sm:$0xff] %v11423_v41  ;;  %2714 = vmin.xlane.f32.xlu0 %v2713_v20  ;;  %v3239_v9 = vshra.s32 %v11418_v43, 16  ;;  %v3253_v14 = vshra.s32 %v11423_v41, 16  ;;  %2728 = vmin.xlane.f32.xlu1 %v2727_v34  ;;  %v14434_v20 = vld [vmem:[#allocation6_spill] sm:$0xff]  ;;  %v14436_v34 = vld [vmem:[#allocation81_spill] sm:$0xff] }
 0x435   : > { %v11426_v50 = vpop.xlane.xlu0 %2738  ;;  %v11430_v62 = vpop.xlane.xlu1 %2752 }
 0x436   : > { %14428 = vst [vmem:[#allocation57_spill] sm:$0xff] %v11426_v50  ;;  %14430 = vst [vmem:[#allocation52_spill] sm:$0xff] %v11430_v62  ;;  %v11432_v28 = vcvt.s32.f32 %v3239_v9  ;;  %v11434_v31 = vcvt.s32.f32 %v3253_v14  ;;  %vm2740_vm8 = vcmp.eq.f32.partialorder %v14434_v20, %v11426_v50  ;;  %v14438_v14 = vld [vmem:[#allocation160_spill] sm:$0xff] }
 0x437   : > { %vm2754_vm14 = vcmp.eq.f32.partialorder %v14438_v14, %v11430_v62  ;;  %v2741_v20 = vsel %vm2740_vm8, %v2736_v51, inf  ;;  %v14443_v14 = vld [vmem:[#allocation58_spill] sm:$0xff] }
 0x438   : > { %14431 = vst [vmem:[#allocation238_spill] sm:$0xff] %v11432_v28  ;;  %14432 = vst [vmem:[#allocation239_spill] sm:$0xff] %v11434_v31  ;;  %3242 = vmin.xlane.f32.xlu0 %v11432_v28  ;;  %3256 = vmin.xlane.f32.xlu1 %v11434_v31  ;;  %v2750_v28 = vcvt.s32.f32 %v2748_v21  ;;  %v2762_v62 = vand.u32 65535, %v14443_v14  ;;  %v14447_v21 = vld [vmem:[#allocation76_spill] sm:$0xff] }
 0x439   : > { %v11440_v24 = vpop.xlane.xlu0 %2386 }
 0x43a   : > { %14435 = vst [vmem:[#allocation68_spill] sm:$0xff] %v11440_v24  ;;  %vm2462_vm0 = vcmp.eq.f32.partialorder %v14436_v34, %v11440_v24  ;;  %v11445_v48 = vpop.xlane.xlu1 %2388  ;;  %v2755_v34 = vsel %vm2754_vm14, %v2750_v28, inf }
 0x43b   : > { %14437 = vst [vmem:[#allocation6_spill] sm:$0xff] %v11445_v48  ;;  %v11450_v9 = vsel %vm2462_vm0, %v7914_v54, 128  ;;  %vm2463_vm6 = vcmp.eq.f32.partialorder %v14440_v61, %v11445_v48  ;;  %v2776_v61 = vand.u32 65535, %v14447_v21  ;;  %v2764_v48 = vcvt.s32.f32 %v2762_v62  ;;  %v14454_v21 = vld [vmem:[#allocation95_spill] sm:$0xff] }
 0x43c   : > { %14439 = vst [vmem:[#allocation81_spill] sm:$0xff] %v11450_v9  ;;  %v11455_v45 = vsel %vm2463_vm6, %v7914_v54, 128  ;;  %2742 = vmin.xlane.f32.xlu0 %v2741_v20  ;;  %v3267_v31 = vshra.s32 %v11450_v9, 16  ;;  %2756 = vmin.xlane.f32.xlu1 %v2755_v34  ;;  %v14448_v20 = vld [vmem:[#allocation171_spill] sm:$0xff]  ;;  %v14450_v34 = vld [vmem:[#allocation101_spill] sm:$0xff] }
 0x43d   : > { %14441 = vst [vmem:[#allocation160_spill] sm:$0xff] %v11455_v45  ;;  %v11458_v24 = vpop.xlane.xlu0 %2766  ;;  %v3281_v50 = vshra.s32 %v11455_v45, 16 }
 0x43e   : > { %14442 = vst [vmem:[#allocation88_spill] sm:$0xff] %v11458_v24  ;;  %v11462_v41 = vpop.xlane.xlu1 %2780  ;;  %v11464_v43 = vcvt.s32.f32 %v3267_v31  ;;  %vm2768_vm8 = vcmp.eq.f32.partialorder %v14448_v20, %v11458_v24 }
 0x43f   : > { %14444 = vst [vmem:[#allocation58_spill] sm:$0xff] %v11462_v41  ;;  %v11466_v51 = vcvt.s32.f32 %v3281_v50  ;;  %v14452_v50 = vld [vmem:[#allocation94_spill] sm:$0xff]  ;;  %v2769_v20 = vsel %vm2768_vm8, %v2764_v48, inf }
 0x440   : > { %14445 = vst [vmem:[#allocation240_spill] sm:$0xff] %v11464_v43  ;;  %3270 = vmin.xlane.f32.xlu0 %v11464_v43  ;;  %vm2782_vm14 = vcmp.eq.f32.partialorder %v14452_v50, %v11462_v41  ;;  %v2778_v43 = vcvt.s32.f32 %v2776_v61  ;;  %v14457_v50 = vld [vmem:[#allocation199_spill] sm:$0xff]  ;;  %v14461_v61 = vld [vmem:[#allocation200_spill] sm:$0xff] }
 0x441   : > { %14446 = vst [vmem:[#allocation241_spill] sm:$0xff] %v11466_v51  ;;  %v11472_v28 = vpop.xlane.xlu0 %2390  ;;  %3284 = vmin.xlane.f32.xlu1 %v11466_v51  ;;  %v2790_v41 = vand.u32 65535, %v14457_v50 }
 0x442   : > { %14449 = vst [vmem:[#allocation76_spill] sm:$0xff] %v11472_v28  ;;  %vm2464_vm0 = vcmp.eq.f32.partialorder %v14450_v34, %v11472_v28  ;;  %v11477_v14 = vpop.xlane.xlu1 %2392  ;;  %v2783_v34 = vsel %vm2782_vm14, %v2778_v43, inf }
 0x443   : > { %14451 = vst [vmem:[#allocation171_spill] sm:$0xff] %v11477_v14  ;;  %v11482_v31 = vsel %vm2464_vm0, %v7914_v54, 128  ;;  %vm2465_vm6 = vcmp.eq.f32.partialorder %v14454_v21, %v11477_v14  ;;  %v2804_v21 = vand.u32 65535, %v14461_v61  ;;  %v2792_v14 = vcvt.s32.f32 %v2790_v41  ;;  %v14468_v61 = vld [vmem:[#allocation102_spill] sm:$0xff] }
 0x444   : > { %14453 = vst [vmem:[#allocation101_spill] sm:$0xff] %v11482_v31  ;;  %v11487_v62 = vsel %vm2465_vm6, %v7914_v54, 128  ;;  %2770 = vmin.xlane.f32.xlu0 %v2769_v20  ;;  %v3295_v51 = vshra.s32 %v11482_v31, 16  ;;  %v14462_v20 = vld [vmem:[#allocation201_spill] sm:$0xff] }
 0x445   : > { %14455 = vst [vmem:[#allocation94_spill] sm:$0xff] %v11487_v62  ;;  %v11490_v28 = vpop.xlane.xlu0 %2794  ;;  %v3309_v24 = vshra.s32 %v11487_v62, 16  ;;  %2784 = vmin.xlane.f32.xlu1 %v2783_v34  ;;  %v14464_v34 = vld [vmem:[#allocation107_spill] sm:$0xff] }
 0x446   : > { %14456 = vst [vmem:[#allocation95_spill] sm:$0xff] %v11490_v28  ;;  %v11494_v45 = vpop.xlane.xlu1 %2808  ;;  %v11496_v9 = vcvt.s32.f32 %v3295_v51  ;;  %vm2796_vm8 = vcmp.eq.f32.partialorder %v14462_v20, %v11490_v28 }
 0x447   : > { %14458 = vst [vmem:[#allocation199_spill] sm:$0xff] %v11494_v45  ;;  %v11498_v48 = vcvt.s32.f32 %v3309_v24  ;;  %v14466_v24 = vld [vmem:[#allocation202_spill] sm:$0xff]  ;;  %v2797_v20 = vsel %vm2796_vm8, %v2792_v14, inf }
 0x448   : > { %14459 = vst [vmem:[#allocation242_spill] sm:$0xff] %v11496_v9  ;;  %3298 = vmin.xlane.f32.xlu0 %v11496_v9  ;;  %vm2810_vm14 = vcmp.eq.f32.partialorder %v14466_v24, %v11494_v45  ;;  %v2806_v9 = vcvt.s32.f32 %v2804_v21  ;;  %v14471_v24 = vld [vmem:[#allocation172_spill] sm:$0xff] }
 0x449   : > { %14460 = vst [vmem:[#allocation243_spill] sm:$0xff] %v11498_v48  ;;  %v11504_v43 = vpop.xlane.xlu0 %2394  ;;  %3312 = vmin.xlane.f32.xlu1 %v11498_v48  ;;  %v2818_v45 = vand.u32 65535, %v14471_v24  ;;  %v14475_v21 = vld [vmem:[#allocation12_spill] sm:$0xff] }
 0x44a   : > { %14463 = vst [vmem:[#allocation200_spill] sm:$0xff] %v11504_v43  ;;  %vm2466_vm0 = vcmp.eq.f32.partialorder %v14464_v34, %v11504_v43  ;;  %v11509_v50 = vpop.xlane.xlu1 %2396  ;;  %v2811_v34 = vsel %vm2810_vm14, %v2806_v9, inf  ;;  %v14477_v9 = vld [vmem:[#allocation38_spill] sm:$0xff] }
 0x44b   : > { %14465 = vst [vmem:[#allocation201_spill] sm:$0xff] %v11509_v50  ;;  %v11514_v51 = vsel %vm2466_vm0, %v7914_v54, 128  ;;  %vm2467_vm6 = vcmp.eq.f32.partialorder %v14468_v61, %v11509_v50  ;;  %v2832_v61 = vand.u32 65535, %v14475_v21  ;;  %v14478_v50 = vld [vmem:[#allocation20_spill] sm:$0xff]  ;;  %v2820_v24 = vcvt.s32.f32 %v2818_v45 }
 0x44c   : > { %14467 = vst [vmem:[#allocation107_spill] sm:$0xff] %v11514_v51  ;;  %v11519_v41 = vsel %vm2467_vm6, %v7914_v54, 128  ;;  %2798 = vmin.xlane.f32.xlu0 %v2797_v20  ;;  %v3323_v48 = vshra.s32 %v11514_v51, 16  ;;  %v14476_v20 = vld [vmem:[#allocation207_spill] sm:$0xff]  ;;  %v3498_v51 = vsub.f32 %v14478_v50, %v14477_v9 }
 0x44d   : > { %14469 = vst [vmem:[#allocation202_spill] sm:$0xff] %v11519_v41  ;;  %v11522_v43 = vpop.xlane.xlu0 %2822  ;;  %v3337_v28 = vshra.s32 %v11519_v41, 16  ;;  %2812 = vmin.xlane.f32.xlu1 %v2811_v34  ;;  %v14482_v34 = vld [vmem:[#allocation209_spill] sm:$0xff] }
 0x44e   : > { %14470 = vst [vmem:[#allocation102_spill] sm:$0xff] %v11522_v43  ;;  %v11526_v62 = vpop.xlane.xlu1 %2836  ;;  %v11528_v31 = vcvt.s32.f32 %v3323_v48  ;;  %vm2824_vm8 = vcmp.eq.f32.partialorder %v14476_v20, %v11522_v43  ;;  %v14480_v48 = vld [vmem:[#allocation178_spill] sm:$0xff]  ;;  %v2834_v20 = vcvt.s32.f32 %v2832_v61 }
 0x44f   : > { %14472 = vst [vmem:[#allocation172_spill] sm:$0xff] %v11526_v62  ;;  %v11530_v14 = vcvt.s32.f32 %v3337_v28  ;;  %vm2838_vm14 = vcmp.eq.f32.partialorder %v14482_v34, %v11526_v62  ;;  %v2825_v50 = vsel %vm2824_vm8, %v2820_v24, inf  ;;  %v14485_v62 = vld [vmem:[#allocation14_spill] sm:$0xff] }
 0x450   : > { %14473 = vst [vmem:[#allocation244_spill] sm:$0xff] %v11528_v31  ;;  %3326 = vmin.xlane.f32.xlu0 %v11528_v31  ;;  %v14486_v31 = vld [vmem:[#allocation41_spill] sm:$0xff] }
 0x451   : > { %14474 = vst [vmem:[#allocation245_spill] sm:$0xff] %v11530_v14  ;;  %v11538_v41 = vpop.xlane.xlu0 %2398  ;;  %3340 = vmin.xlane.f32.xlu1 %v11530_v14  ;;  %v2846_v14 = vand.u32 65535, %v14485_v62  ;;  %v3499_v35 = vsub.f32 %v14487_v57, %v14486_v31  ;;  %v14492_v57 = vld [vmem:[#allocation42_spill] sm:$0xff]  ;;  %v14493_v31 = vld [vmem:[#allocation189_spill] sm:$0xff] }
 0x452   : > { %14479 = vst [vmem:[#allocation12_spill] sm:$0xff] %v11538_v41  ;;  %vm2468_vm0 = vcmp.eq.f32.partialorder %v14480_v48, %v11538_v41  ;;  %v11543_v28 = vpop.xlane.xlu1 %2400  ;;  %v3562_v48 = vmul.f32 1.442695, %v3498_v51  ;;  %v2839_v41 = vsel %vm2838_vm14, %v2834_v20, inf  ;;  %v14490_v51 = vld [vmem:[#allocation114_spill] sm:$0xff] }
 0x453   : > { %14481 = vst [vmem:[#allocation207_spill] sm:$0xff] %v11543_v28  ;;  %v11548_v21 = vsel %vm2468_vm0, %v7914_v54, 128  ;;  %vm2469_vm6 = vcmp.eq.f32.partialorder %v10976_v19, %v11543_v28  ;;  %v2848_v62 = vcvt.s32.f32 %v2846_v14 }
 0x454   : > { %v11553_v45 = vsel %vm2469_vm6, %v7914_v54, 128  ;;  %2826 = vmin.xlane.f32.xlu0 %v2825_v50  ;;  %v3351_v9 = vshra.s32 %v11548_v21, 16  ;;  %v14489_v50 = vld [vmem:[#allocation179_spill] sm:$0xff]  ;;  %7424 = vpow2.f32 %v3562_v48 }
 0x455   : > { %14483 = vst [vmem:[#allocation38_spill] sm:$0xff] %v11553_v45  ;;  %v11556_v43 = vpop.xlane.xlu0 %2850  ;;  %v3365_v34 = vshra.s32 %v11553_v45, 16  ;;  %2840 = vmin.xlane.f32.xlu1 %v2839_v41  ;;  %v2860_v28 = vand.u32 65535, %v14489_v50  ;;  %v3564_v45 = vmul.f32 1.442695, %v3499_v35  ;;  %v3500_v41 = vsub.f32 %v14493_v31, %v14492_v57 }
 0x456   : > { %14484 = vst [vmem:[#allocation20_spill] sm:$0xff] %v11556_v43  ;;  %v11562_v19 = vpop.xlane.xlu1 %2864  ;;  %v11564_v61 = vcvt.s32.f32 %v3351_v9  ;;  %vm2852_vm8 = vcmp.eq.f32.partialorder %v14490_v51, %v11556_v43 }
 0x457   : > { %14488 = vst [vmem:[#allocation178_spill] sm:$0xff] %v11562_v19  ;;  %v11566_v24 = vcvt.s32.f32 %v3365_v34  ;;  %v14495_v34 = vld [vmem:[#allocation108_spill] sm:$0xff]  ;;  %v2853_v35 = vsel %vm2852_vm8, %v2848_v62, inf  ;;  %v2862_v14 = vcvt.s32.f32 %v2860_v28  ;;  %7426 = vpow2.f32 %v3564_v45 }
 0x458   : > { %3354 = vmin.xlane.f32.xlu0 %v11564_v61  ;;  %vm2866_vm14 = vcmp.eq.f32.partialorder %v14495_v34, %v11562_v19  ;;  %v14498_v34 = vld [vmem:[#allocation180_spill] sm:$0xff]  ;;  %v3566_v19 = vmul.f32 1.442695, %v3500_v41  ;;  %v2888_v62 = vand.u32 65535, %v11003_v30 }
 0x459   : > { %v11572_v20 = vpop.xlane.xlu0 %2402  ;;  %3368 = vmin.xlane.f32.xlu1 %v11566_v24 }
 0x45a   : > { %14491 = vst [vmem:[#allocation209_spill] sm:$0xff] %v11572_v20  ;;  %vm2470_vm0 = vcmp.eq.f32.partialorder %v11011_v25, %v11572_v20  ;;  %v11579_v9 = vpop.xlane.xlu1 %2404  ;;  %v2867_v25 = vsel %vm2866_vm14, %v2862_v14, inf  ;;  %v2874_v20 = vand.u32 65535, %v14498_v34  ;;  %7428 = vpow2.f32 %v3566_v19 }
 0x45b   : > { %14494 = vst [vmem:[#allocation14_spill] sm:$0xff] %v11579_v9  ;;  %v11584_v50 = vsel %vm2470_vm0, %v7914_v54, 128  ;;  %vm2471_vm6 = vcmp.eq.f32.partialorder %v11020_v39, %v11579_v9  ;;  %v14501_v9 = vld [vmem:[#allocation104_spill] sm:$0xff] }
 0x45c   : > { %v11589_v48 = vsel %vm2471_vm6, %v7914_v54, 128  ;;  %2854 = vmin.xlane.f32.xlu0 %v2853_v35  ;;  %v3379_v51 = vshra.s32 %v11584_v50, 16  ;;  %v14500_v35 = vld [vmem:[#allocation44_spill] sm:$0xff]  ;;  %v2876_v41 = vcvt.s32.f32 %v2874_v20  ;;  %v2890_v20 = vcvt.s32.f32 %v2888_v62 }
 0x45d   : > { %14496 = vst [vmem:[#allocation41_spill] sm:$0xff] %v11589_v48  ;;  %v11592_v57 = vpop.xlane.xlu0 %2878  ;;  %v3393_v31 = vshra.s32 %v11589_v48, 16  ;;  %2868 = vmin.xlane.f32.xlu1 %v2867_v25  ;;  %v3501_v14 = vsub.f32 %v14501_v9, %v14500_v35  ;;  %v14503_v25 = vld [vmem:[#allocation47_spill] sm:$0xff] }
 0x45e   : > { %14497 = vst [vmem:[#allocation96_spill] sm:$0xff] %v11592_v57  ;;  %v11596_v43 = vpop.xlane.xlu1 %2892  ;;  %v11598_v39 = vcvt.s32.f32 %v3379_v51  ;;  %vm2880_vm8 = vcmp.eq.f32.partialorder %v11027_v10, %v11592_v57  ;;  %v14504_v51 = vld [vmem:[#allocation24_spill] sm:$0xff]  ;;  %v11619_v45 = vpop.eup %7424  ;;  %v14510_v57 = vld [vmem:[#allocation25_spill] sm:$0xff] }
 0x45f   : > { %14499 = vst [vmem:[#allocation179_spill] sm:$0xff] %v11596_v43  ;;  %v11600_v28 = vcvt.s32.f32 %v3393_v31  ;;  %v3502_v48 = vsub.f32 %v14504_v51, %v14503_v25  ;;  %vm2894_vm14 = vcmp.eq.f32.partialorder %v11034_v38, %v11596_v43  ;;  %v2881_v19 = vsel %vm2880_vm8, %v2876_v41, inf  ;;  %v14509_v43 = vld [vmem:[#allocation48_spill] sm:$0xff]  ;;  %v14513_v41 = vld [vmem:[#allocation53_spill] sm:$0xff] }
 0x460   : > { %3382 = vmin.xlane.f32.xlu0 %v11598_v39  ;;  %v3568_v9 = vmul.f32 1.442695, %v3501_v14  ;;  %v2895_v35 = vsel %vm2894_vm14, %v2890_v20, inf  ;;  %v2902_v51 = vand.u32 65535, %v11047_v47  ;;  %v2916_v20 = vand.u32 65535, %v11052_v52  ;;  %v14519_v52 = vld [vmem:[#allocation31_spill] sm:$0xff] }
 0x461   : > { %v11608_v34 = vpop.xlane.xlu0 %2406  ;;  %3396 = vmin.xlane.f32.xlu1 %v11600_v28  ;;  %v11649_v47 = vpop.eup %7426 }
 0x462   : > { %14502 = vst [vmem:[#allocation114_spill] sm:$0xff] %v11608_v34  ;;  %vm2472_vm0 = vcmp.eq.f32.partialorder %v11058_v33, %v11608_v34  ;;  %v11615_v30 = vpop.xlane.xlu1 %2408  ;;  %v3570_v34 = vmul.f32 1.442695, %v3502_v48  ;;  %7430 = vpow2.f32 %v3568_v9  ;;  %v14517_v48 = vld [vmem:[#allocation27_spill] sm:$0xff] }
 0x463   : > { %14505 = vst [vmem:[#allocation42_spill] sm:$0xff] %v11615_v30  ;;  %v11622_v10 = vsel %vm2472_vm0, %v7914_v54, 128  ;;  %vm2473_vm6 = vcmp.eq.f32.partialorder %v11074_v60, %v11615_v30  ;;  %v3503_v60 = vsub.f32 %v14510_v57, %v14509_v43  ;;  %v14516_v43 = vld [vmem:[#allocation54_spill] sm:$0xff] }
 0x464   : > { %14506 = vst [vmem:[#allocation189_spill] sm:$0xff] %v11622_v10  ;;  %v11627_v31 = vsel %vm2473_vm6, %v7914_v54, 128  ;;  %2882 = vmin.xlane.f32.xlu0 %v2881_v19  ;;  %v3407_v33 = vshra.s32 %v11622_v10, 16  ;;  %v14514_v19 = vld [vmem:[#allocation26_spill] sm:$0xff]  ;;  %v3505_v57 = vsub.f32 %v14517_v48, %v14516_v43  ;;  %7432 = vpow2.f32 %v3570_v34 }
 0x465   : > { %14507 = vst [vmem:[#allocation108_spill] sm:$0xff] %v11627_v31  ;;  %v11630_v25 = vpop.xlane.xlu0 %2906  ;;  %v3421_v38 = vshra.s32 %v11627_v31, 16  ;;  %2896 = vmin.xlane.f32.xlu1 %v2895_v35  ;;  %v3504_v30 = vsub.f32 %v14514_v19, %v14513_v41  ;;  %v3690_v31 = vadd.f32 1.0, %v11619_v45  ;;  %v2930_v35 = vand.u32 65535, %v11082_v3  ;;  %v14518_v41 = vld [vmem:[#allocation60_spill] sm:$0xff]  ;;  %v11664_v3 = vpop.eup %7428 }
 0x466   : > { %14508 = vst [vmem:[#allocation180_spill] sm:$0xff] %v11630_v25  ;;  %v11636_v62 = vpop.xlane.xlu1 %2920  ;;  %v11638_v14 = vcvt.s32.f32 %v3407_v33  ;;  %vm2908_vm8 = vcmp.eq.f32.partialorder %v11089_v59, %v11630_v25  ;;  %v2904_v33 = vcvt.s32.f32 %v2902_v51  ;;  %v3506_v19 = vsub.f32 %v14519_v52, %v14518_v41 }
 0x467   : > { %14511 = vst [vmem:[#allocation44_spill] sm:$0xff] %v11636_v62  ;;  %v11642_v10 = vcvt.s32.f32 %v3421_v38  ;;  %v3572_v38 = vmul.f32 1.442695, %v3503_v60  ;;  %vm2922_vm0 = vcmp.eq.f32.partialorder %v11091_v13, %v11636_v62  ;;  %v3574_v59 = vmul.f32 1.442695, %v3504_v30  ;;  %v14522_v30 = vld [vmem:[#allocation61_spill] sm:$0xff] }
 0x468   : > { %14512 = vst [vmem:[#allocation104_spill] sm:$0xff] %v11638_v14  ;;  %3410 = vmin.xlane.f32.xlu0 %v11638_v14  ;;  %v2909_v25 = vsel %vm2908_vm8, %v2904_v33, inf  ;;  %v2918_v43 = vcvt.s32.f32 %v2916_v20  ;;  %v2944_v51 = vand.u32 65535, %v11087_v23  ;;  %7434 = vrcp.f32 %v3690_v31  ;;  %v14523_v20 = vld [vmem:[#allocation32_spill] sm:$0xff] }
 0x469   : > { %14515 = vst [vmem:[#allocation47_spill] sm:$0xff] %v11642_v10  ;;  %3424 = vmin.xlane.f32.xlu1 %v11642_v10  ;;  %v11657_v9 = vpop.xlane.xlu0 %2934  ;;  %v3691_v34 = vadd.f32 1.0, %v11649_v47  ;;  %v3576_v60 = vmul.f32 1.442695, %v3505_v57  ;;  %v2932_v41 = vcvt.s32.f32 %v2930_v35  ;;  %v2958_v52 = vand.u32 65535, %v11106_v11  ;;  %v14549_v62 = vld [vmem:[#allocation92_spill] sm:$0xff] }
 0x46a   : > { %14520 = vst [vmem:[#allocation24_spill] sm:$0xff] %v11657_v9  ;;  %v11659_v14 = vpop.xlane.xlu1 %2948  ;;  %vm2936_vm14 = vcmp.eq.f32.partialorder %v11111_v58, %v11657_v9  ;;  %v2923_v48 = vsel %vm2922_vm0, %v2918_v43, inf  ;;  %7436 = vpow2.f32 %v3572_v38  ;;  %v3578_v13 = vmul.f32 1.442695, %v3506_v19  ;;  %v14526_v43 = vld [vmem:[#allocation66_spill] sm:$0xff] }
 0x46b   : > { %14521 = vst [vmem:[#allocation48_spill] sm:$0xff] %v11659_v14  ;;  %v3507_v33 = vsub.f32 %v14523_v20, %v14522_v30  ;;  %vm2950_vm6 = vcmp.eq.f32.partialorder %v11113_v56, %v11659_v14  ;;  %7438 = vpow2.f32 %v3574_v59  ;;  %v2937_v58 = vsel %vm2936_vm14, %v2932_v41, inf  ;;  %v14531_v30 = vld [vmem:[#allocation40_spill] sm:$0xff] }
 0x46c   : > { %2910 = vmin.xlane.f32.xlu0 %v2909_v25  ;;  %v2946_v25 = vcvt.s32.f32 %v2944_v51  ;;  %v2972_v57 = vand.u32 65535, %v11109_v18  ;;  %7440 = vrcp.f32 %v3691_v34  ;;  %v3692_v11 = vadd.f32 1.0, %v11664_v3  ;;  %v11683_v19 = vpop.eup %7430  ;;  %v14527_v51 = vld [vmem:[#allocation130_spill] sm:$0xff] }
 0x46d   : > { %2924 = vmin.xlane.f32.xlu1 %v2923_v48  ;;  %v11674_v23 = vpop.xlane.xlu0 %2962  ;;  %7442 = vpow2.f32 %v3576_v60  ;;  %v2960_v38 = vcvt.s32.f32 %v2958_v52  ;;  %v2986_v56 = vand.u32 65535, %v11124_v15  ;;  %v3580_v59 = vmul.f32 1.442695, %v3507_v33 }
 0x46e   : > { %14524 = vst [vmem:[#allocation25_spill] sm:$0xff] %v11674_v23  ;;  %v11676_v31 = vpop.xlane.xlu1 %2976  ;;  %vm2964_vm8 = vcmp.eq.f32.partialorder %v11140_v17, %v11674_v23  ;;  %v2951_v35 = vsel %vm2950_vm6, %v2946_v25, inf  ;;  %7444 = vpow2.f32 %v3578_v13  ;;  %v3508_v48 = vsub.f32 %v14527_v51, %v14526_v43  ;;  %v11695_v52 = vpop.eup %7432  ;;  %v14530_v13 = vld [vmem:[#allocation67_spill] sm:$0xff]  ;;  %v14532_v25 = vld [vmem:[#allocation222_spill] sm:$0xff]  ;;  %v14535_v43 = vld [vmem:[#allocation220_spill] sm:$0xff] }
 0x46f   : > { %14525 = vst [vmem:[#allocation53_spill] sm:$0xff] %v11676_v31  ;;  %vm2978_vm0 = vcmp.eq.f32.partialorder %v11142_v46, %v11676_v31  ;;  %v2965_v34 = vsel %vm2964_vm8, %v2960_v38, inf  ;;  %v2974_v60 = vcvt.s32.f32 %v2972_v57  ;;  %v3000_v41 = vand.u32 65535, %v11129_v16  ;;  %v14534_v38 = vld [vmem:[#allocation150_spill] sm:$0xff] }
 0x470   : > { %2938 = vmin.xlane.f32.xlu0 %v2937_v58  ;;  %v3014_v15 = vand.u32 65535, %v11151_v4  ;;  %7446 = vrcp.f32 %v3692_v11  ;;  %v3509_v20 = vsub.f32 %v14531_v30, %v14530_v13  ;;  %v3693_v46 = vadd.f32 1.0, %v11683_v19  ;;  %v14533_v4 = vld [vmem:[#allocation73_spill] sm:$0xff] }
 0x471   : > { %2952 = vmin.xlane.f32.xlu1 %v2951_v35  ;;  %v11689_v18 = vpop.xlane.xlu0 %2990  ;;  %v2979_v33 = vsel %vm2978_vm0, %v2974_v60, inf  ;;  %v2988_v58 = vcvt.s32.f32 %v2986_v56  ;;  %v3028_v57 = vand.u32 65535, %v14532_v25  ;;  %7448 = vpow2.f32 %v3580_v59  ;;  %v14538_v25 = vld [vmem:[#allocation55_spill] sm:$0xff] }
 0x472   : > { %14528 = vst [vmem:[#allocation26_spill] sm:$0xff] %v11689_v18  ;;  %v11691_v17 = vpop.xlane.xlu1 %3004  ;;  %vm2992_vm14 = vcmp.eq.f32.partialorder %v11148_v1, %v11689_v18  ;;  %v11703_v35 = vpop.eup %7434  ;;  %v3582_v16 = vmul.f32 1.442695, %v3508_v48  ;;  %v3510_v11 = vsub.f32 %v14534_v38, %v14533_v4  ;;  %v3002_v1 = vcvt.s32.f32 %v3000_v41  ;;  %v14537_v48 = vld [vmem:[#allocation75_spill] sm:$0xff] }
 0x473   : > { %14529 = vst [vmem:[#allocation54_spill] sm:$0xff] %v11691_v17  ;;  %vm3006_vm6 = vcmp.eq.f32.partialorder %v14535_v43, %v11691_v17  ;;  %v2993_v51 = vsel %vm2992_vm14, %v2988_v58, inf  ;;  %v3016_v13 = vcvt.s32.f32 %v3014_v15  ;;  %v3042_v56 = vand.u32 65535, %v11176_v8  ;;  %v14540_v38 = vld [vmem:[#allocation79_spill] sm:$0xff]  ;;  %v14541_v43 = vld [vmem:[#allocation5_spill] sm:$0xff]  ;;  %v14560_v17 = vld [vmem:[#allocation72_spill] sm:$0xff] }
 0x474   : > { %2966 = vmin.xlane.f32.xlu0 %v2965_v34  ;;  %v11712_v60 = vpop.eup %7436  ;;  %v3694_v30 = vadd.f32 1.0, %v11695_v52  ;;  %v3584_v59 = vmul.f32 1.442695, %v3509_v20  ;;  %v3511_v14 = vsub.f32 %v14538_v25, %v14537_v48  ;;  %v3007_v58 = vsel %vm3006_vm6, %v3002_v1, inf }
 0x475   : > { %2980 = vmin.xlane.f32.xlu1 %v2979_v33  ;;  %v11709_v34 = vpop.xlane.xlu0 %3018  ;;  %v11721_v41 = vpop.eup %7438  ;;  %v3030_v15 = vcvt.s32.f32 %v3028_v57  ;;  %7450 = vrcp.f32 %v3693_v46  ;;  %v3586_v20 = vmul.f32 1.442695, %v3510_v11  ;;  %v3044_v9 = vcvt.s32.f32 %v3042_v56 }
 0x476   : > { %14536 = vst [vmem:[#allocation27_spill] sm:$0xff] %v11709_v34  ;;  %vm3020_vm8 = vcmp.eq.f32.partialorder %v11168_v12, %v11709_v34  ;;  %v11719_v33 = vpop.xlane.xlu1 %3032  ;;  %v11725_v4 = vpop.eup %7440  ;;  %v3695_v12 = vadd.f32 1.0, %v11712_v60  ;;  %7452 = vpow2.f32 %v3582_v16  ;;  %v3696_v57 = vadd.f32 1.0, %v11721_v41 }
 0x477   : > { %14539 = vst [vmem:[#allocation60_spill] sm:$0xff] %v11719_v33  ;;  %vm3034_vm0 = vcmp.eq.f32.partialorder %v11178_v53, %v11719_v33  ;;  %v3021_v8 = vsel %vm3020_vm8, %v3016_v13, inf  ;;  %v11729_v48 = vpop.eup %7442  ;;  %7454 = vrcp.f32 %v3694_v30  ;;  %v3588_v46 = vmul.f32 1.442695, %v3511_v14  ;;  %v14545_v14 = vld [vmem:[#allocation86_spill] sm:$0xff] }
 0x478   : > { %2994 = vmin.xlane.f32.xlu0 %v2993_v51  ;;  %v3512_v51 = vsub.f32 %v14541_v43, %v14540_v38  ;;  %v3035_v25 = vsel %vm3034_vm0, %v3030_v15, inf  ;;  %v11734_v53 = vpop.eup %7444  ;;  %7456 = vpow2.f32 %v3584_v59  ;;  %v14544_v15 = vld [vmem:[#allocation158_spill] sm:$0xff]  ;;  %v3697_v56 = vadd.f32 1.0, %v11729_v48 }
 0x479   : > { %3008 = vmin.xlane.f32.xlu1 %v3007_v58  ;;  %7458 = vpow2.f32 %v3586_v20  ;;  %v14543_v58 = vld [vmem:[#allocation80_spill] sm:$0xff]  ;;  %v2549_v30 = vcvt.f32.s32 %v11184_v29  ;;  %v3056_v20 = vand.u32 65535, %v11202_v37 }
 0x47a   : > { %v11739_v13 = vpop.eup %7446  ;;  %v3590_v16 = vmul.f32 1.442695, %v3512_v51  ;;  %v3513_v38 = vsub.f32 %v14544_v15, %v14543_v58  ;;  %7460 = vrcp.f32 %v3695_v12  ;;  %v14548_v58 = vld [vmem:[#allocation166_spill] sm:$0xff] }
 0x47b   : > { %v11745_v43 = vpop.eup %7448  ;;  %7462 = vrcp.f32 %v3696_v57  ;;  %v14550_v57 = vld [vmem:[#allocation89_spill] sm:$0xff]  ;;  %v2550_v33 = vshll.u32 %v2549_v30, 16  ;;  %v3058_v37 = vcvt.s32.f32 %v3056_v20  ;;  %v4010_v30 = vmul.f32 %v11703_v35, %v11619_v45 }
 0x47c   : > { %v11732_v1 = vpop.xlane.xlu0 %3046  ;;  %3022 = vmin.xlane.f32.xlu0 %v3021_v8  ;;  %7464 = vpow2.f32 %v3588_v46  ;;  %v3592_v12 = vmul.f32 1.442695, %v3513_v38  ;;  %v3699_v29 = vadd.f32 1.0, %v11745_v43  ;;  %v14553_v45 = vld [vmem:[#allocation93_spill] sm:$0xff] }
 0x47d   : > { %14542 = vst [vmem:[#allocation31_spill] sm:$0xff] %v11732_v1  ;;  %vm3048_vm14 = vcmp.eq.f32.partialorder %v11186_v36, %v11732_v1  ;;  %3036 = vmin.xlane.f32.xlu1 %v3035_v25  ;;  %v3698_v36 = vadd.f32 1.0, %v11734_v53  ;;  %7466 = vpow2.f32 %v3590_v16  ;;  %v14547_v25 = vld [vmem:[#allocation87_spill] sm:$0xff]  ;;  %v3516_v1 = vsub.f32 %v14550_v57, %v14549_v62 }
 0x47e   : > { %v3049_v11 = vsel %vm3048_vm14, %v3044_v9, inf  ;;  %v14546_v9 = vld [vmem:[#allocation69_spill] sm:$0xff]  ;;  %v3515_v15 = vsub.f32 %v14548_v58, %v14547_v25  ;;  %7468 = vrcp.f32 %v3697_v56  ;;  %v2563_v16 = vcvt.f32.s32 %v11212_v0 }
 0x47f   : > { %v3514_v59 = vsub.f32 %v14546_v9, %v14545_v14  ;;  %v11756_v34 = vpop.eup %7450  ;;  %7470 = vrcp.f32 %v3698_v36  ;;  %v3070_v56 = vand.u32 65535, %v11215_v2  ;;  %v4011_v0 = vmul.f32 %v11725_v4, %v11649_v47 }
 0x480   : > { %v2547_v8 = vpop.xlane.xlu0 %2546  ;;  %3050 = vmin.xlane.f32.xlu0 %v3049_v11  ;;  %v11760_v46 = vpop.eup %7452  ;;  %7472 = vpow2.f32 %v3592_v12  ;;  %v3596_v62 = vmul.f32 1.442695, %v3515_v15  ;;  %v3882_v2 = vsel %vm2154_vm7, %v11703_v35, 0.0  ;;  %v3883_v58 = vsel %vm2155_vm9, %v11725_v4, 0.0 }
 0x481   : > { %v2548_v51 = vcvt.f32.s32 %v2547_v8  ;;  %v3594_v11 = vmul.f32 1.442695, %v3514_v59  ;;  %v11766_v8 = vpop.eup %7454  ;;  %7474 = vrcp.f32 %v3699_v29  ;;  %v3598_v59 = vmul.f32 1.442695, %v3516_v1  ;;  %v14558_v1 = vld [vmem:[#allocation205_spill] sm:$0xff] }
 0x482   : > { %v11770_v9 = vpop.eup %7456  ;;  %v3700_v20 = vadd.f32 1.0, %v11760_v46  ;;  %v2564_v15 = vshll.u32 %v2563_v16, 16  ;;  %v3072_v57 = vcvt.s32.f32 %v3070_v56  ;;  %v11799_v4 = vmul.f32 %v11739_v13, %v11664_v3 }
 0x483   : > { %v2551_v38 = vadd.s32 %v2550_v33, %v2548_v51  ;;  %v11778_v33 = vpop.eup %7458  ;;  %7476 = vpow2.f32 %v3594_v11  ;;  %v14554_v51 = vld [vmem:[#allocation198_spill] sm:$0xff]  ;;  %v3701_v11 = vadd.f32 1.0, %v11770_v9 }
 0x484   : > { %v11758_v14 = vpop.xlane.xlu1 %3060  ;;  %v3517_v12 = vsub.f32 %v14554_v51, %v14553_v45  ;;  %v11787_v47 = vpop.eup %7460  ;;  %7478 = vpow2.f32 %v3596_v62  ;;  %v3702_v16 = vadd.f32 1.0, %v11778_v33 }
 0x485   : > { %14551 = vst [vmem:[#allocation61_spill] sm:$0xff] %v11758_v14  ;;  %vm3062_vm6 = vcmp.eq.f32.partialorder %v11208_v32, %v11758_v14  ;;  %vm3434_vm8 = vcmp.eq.s32.totalorder %v7914_v54, %v2551_v38  ;;  %7480 = vpow2.f32 %v3598_v59  ;;  %v2577_v14 = vcvt.f32.s32 %v11221_v6 }
 0x486   : > { %v3063_v36 = vsel %vm3062_vm6, %v3058_v37, inf  ;;  %v11792_v37 = vpop.eup %7462  ;;  %v3600_v51 = vmul.f32 1.442695, %v3517_v12  ;;  %7482 = vrcp.f32 %v3700_v20  ;;  %v3084_v12 = vand.u32 65535, %v11237_v27  ;;  %v14564_v27 = vld [vmem:[#allocation210_spill] sm:$0xff] }
 0x487   : > { %3064 = vmin.xlane.f32.xlu1 %v3063_v36  ;;  %v11801_v36 = vpop.eup %7464  ;;  %7484 = vrcp.f32 %v3701_v11 }
 0x488   : > { %v2561_v25 = vpop.xlane.xlu1 %2560  ;;  %v11804_v56 = vpop.eup %7466  ;;  %v3703_v6 = vadd.f32 1.0, %v11801_v36  ;;  %7486 = vrcp.f32 %v3702_v16 }
 0x489   : > { %v2562_v29 = vcvt.f32.s32 %v2561_v25  ;;  %v14557_v25 = vld [vmem:[#allocation99_spill] sm:$0xff]  ;;  %v11811_v3 = vpop.eup %7468  ;;  %7488 = vpow2.f32 %v3600_v51  ;;  %v2591_v51 = vcvt.f32.s32 %v11244_v26 }
 0x48a   : > { %v11790_v35 = vpop.xlane.xlu0 %3074  ;;  %v3518_v62 = vsub.f32 %v14558_v1, %v14557_v25  ;;  %v2578_v1 = vshll.u32 %v2577_v14, 16  ;;  %7490 = vrcp.f32 %v3703_v6  ;;  %v4013_v6 = vmul.f32 %v11756_v34, %v11683_v19 }
 0x48b   : > { %14556 = vst [vmem:[#allocation32_spill] sm:$0xff] %v11790_v35  ;;  %vm3076_vm7 = vcmp.eq.f32.partialorder %v11224_v22, %v11790_v35  ;;  %v2565_v32 = vadd.s32 %v2564_v15, %v2562_v29  ;;  %v4074_v22 = vsel %vm3434_vm8, %v4010_v30, 0.0  ;;  %v14559_v35 = vld [vmem:[#allocation100_spill] sm:$0xff]  ;;  %v11817_v29 = vpop.eup %7470  ;;  %v3704_v30 = vadd.f32 1.0, %v11804_v56 }
 0x48c   : > { %v3077_v45 = vsel %vm3076_vm7, %v3072_v57, inf  ;;  %v3519_v59 = vsub.f32 %v14560_v17, %v14559_v35  ;;  %v11825_v17 = vpop.eup %7472  ;;  %v3602_v35 = vmul.f32 1.442695, %v3518_v62  ;;  %v2592_v19 = vshll.u32 %v2591_v51, 16 }
 0x48d   : > { %3078 = vmin.xlane.f32.xlu0 %v3077_v45  ;;  %vm3435_vm9 = vcmp.eq.s32.totalorder %v7914_v54, %v2565_v32  ;;  %v11821_v45 = vadd.f32 %v4074_v22, %v3882_v2  ;;  %v14563_v32 = vld [vmem:[#allocation105_spill] sm:$0xff]  ;;  %v11829_v11 = vpop.eup %7474  ;;  %v3086_v2 = vcvt.s32.f32 %v3084_v12  ;;  %7492 = vrcp.f32 %v3704_v30 }
 0x48e   : > { %v2575_v15 = vpop.xlane.xlu0 %2574  ;;  %v4075_v57 = vsel %vm3435_vm9, %v4011_v0, 0.0  ;;  %v3520_v25 = vsub.f32 %v14564_v27, %v14563_v32  ;;  %v3604_v18 = vmul.f32 1.442695, %v3519_v59  ;;  %v14565_v0 = vld [vmem:[#allocation106_spill] sm:$0xff]  ;;  %v11837_v22 = vpop.eup %7476  ;;  %v3705_v14 = vadd.f32 1.0, %v11825_v17 }
 0x48f   : > { %v2576_v38 = vcvt.f32.s32 %v2575_v15  ;;  %14561 = vst [vmem:[#allocation66_spill] sm:$0xff] %v11821_v45  ;;  %v11823_v20 = vadd.f32 %v4075_v57, %v3883_v58  ;;  %v14566_v15 = vld [vmem:[#allocation176_spill] sm:$0xff]  ;;  %v3098_v57 = vand.u32 65535, %v11256_v63  ;;  %v11844_v32 = vpop.eup %7478  ;;  %7494 = vpow2.f32 %v3602_v35  ;;  %v14572_v35 = vld [vmem:[#allocation213_spill] sm:$0xff] }
 0x490   : > { %v3521_v16 = vsub.f32 %v14566_v15, %v14565_v0  ;;  %v3606_v12 = vmul.f32 1.442695, %v3520_v25  ;;  %7496 = vpow2.f32 %v3604_v18  ;;  %v11856_v63 = vmul.f32 %v11766_v8, %v11695_v52 }
 0x491   : > { %14562 = vst [vmem:[#allocation130_spill] sm:$0xff] %v11823_v20  ;;  %v2579_v62 = vadd.s32 %v2578_v1, %v2576_v38  ;;  %v3884_v38 = vsel %vm2156_vm11, %v11739_v13, 0.0  ;;  %v3885_v25 = vsel %vm2157_vm13, %v11756_v34, 0.0  ;;  %v3112_v13 = vand.u32 65535, %v11265_v49 }
 0x492   : > { %v3608_v30 = vmul.f32 1.442695, %v3521_v16  ;;  %7498 = vrcp.f32 %v3705_v14  ;;  %v3706_v18 = vadd.f32 1.0, %v11837_v22  ;;  %v3707_v15 = vadd.f32 1.0, %v11844_v32 }
 0x493   : > { %v11833_v31 = vpop.xlane.xlu1 %3088  ;;  %vm3436_vm14 = vcmp.eq.s32.totalorder %v7914_v54, %v2579_v62  ;;  %v3100_v16 = vcvt.s32.f32 %v3098_v57  ;;  %7500 = vpow2.f32 %v3606_v12  ;;  %v2605_v14 = vcvt.f32.s32 %v11269_v5  ;;  %v14573_v12 = vld [vmem:[#allocation113_spill] sm:$0xff] }
 0x494   : > { %14567 = vst [vmem:[#allocation67_spill] sm:$0xff] %v11833_v31  ;;  %vm3090_vm0 = vcmp.eq.f32.partialorder %v11246_v7, %v11833_v31  ;;  %v11852_v7 = vpop.eup %7480  ;;  %7502 = vpow2.f32 %v3608_v30  ;;  %v3114_v30 = vcvt.s32.f32 %v3112_v13  ;;  %v2619_v5 = vcvt.f32.s32 %v11276_v42  ;;  %v14590_v31 = vld [vmem:[#allocation35_spill] sm:$0xff] }
 0x495   : > { %v3091_v59 = vsel %vm3090_vm0, %v3086_v2, inf  ;;  %v11864_v0 = vpop.eup %7482  ;;  %v11868_v52 = vpop.xlane.xlu0 %3102  ;;  %v3708_v34 = vadd.f32 1.0, %v11852_v7  ;;  %7504 = vrcp.f32 %v3706_v18 }
 0x496   : > { %3092 = vmin.xlane.f32.xlu1 %v3091_v59  ;;  %14570 = vst [vmem:[#allocation40_spill] sm:$0xff] %v11868_v52  ;;  %v11870_v2 = vpop.eup %7484  ;;  %vm3104_vm11 = vcmp.eq.f32.partialorder %v11267_v44, %v11868_v52  ;;  %v4076_v59 = vsel %vm3436_vm14, %v11799_v4, 0.0  ;;  %v3126_v4 = vand.u32 65535, %v11288_v40  ;;  %7506 = vrcp.f32 %v3707_v15 }
 0x497   : > { %v2589_v27 = vpop.xlane.xlu1 %2588  ;;  %v11875_v49 = vpop.eup %7486  ;;  %v3105_v26 = vsel %vm3104_vm11, %v3100_v16, inf  ;;  %7508 = vrcp.f32 %v3708_v34 }
 0x498   : > { %v2590_v1 = vcvt.f32.s32 %v2589_v27  ;;  %v11881_v57 = vpop.eup %7488  ;;  %v14571_v27 = vld [vmem:[#allocation112_spill] sm:$0xff]  ;;  %3106 = vmin.xlane.f32.xlu0 %v3105_v26 }
 0x499   : > { %v3522_v58 = vsub.f32 %v14572_v35, %v14571_v27  ;;  %v11894_v16 = vpop.eup %7490  ;;  %v3709_v42 = vadd.f32 1.0, %v11881_v57 }
 0x49a   : > { %v2593_v51 = vadd.s32 %v2592_v19, %v2590_v1  ;;  %v14574_v19 = vld [vmem:[#allocation83_spill] sm:$0xff]  ;;  %v2603_v62 = vpop.xlane.xlu0 %2602  ;;  %v11900_v26 = vpop.eup %7492 }
 0x49b   : > { %v3523_v1 = vsub.f32 %v14574_v19, %v14573_v12  ;;  %v11888_v44 = vpop.xlane.xlu1 %3116  ;;  %v2604_v27 = vcvt.f32.s32 %v2603_v62  ;;  %v11896_v12 = vadd.f32 %v4076_v59, %v3884_v38  ;;  %v11905_v13 = vpop.eup %7494  ;;  %v3610_v40 = vmul.f32 1.442695, %v3522_v58  ;;  %v14579_v62 = vld [vmem:[#allocation124_spill] sm:$0xff] }
 0x49c   : > { %vm3437_vm13 = vcmp.eq.s32.totalorder %v7914_v54, %v2593_v51  ;;  %14575 = vst [vmem:[#allocation222_spill] sm:$0xff] %v11888_v44  ;;  %vm3118_vm6 = vcmp.eq.f32.partialorder %v11278_v55, %v11888_v44  ;;  %v4015_v55 = vmul.f32 %v11787_v47, %v11712_v60  ;;  %v11913_v18 = vpop.eup %7496  ;;  %v3140_v60 = vand.u32 65535, %v14579_v62 }
 0x49d   : > { %v4077_v45 = vsel %vm3437_vm13, %v4013_v6, 0.0  ;;  %v3119_v35 = vsel %vm3118_vm6, %v3114_v30, inf  ;;  %14576 = vst [vmem:[#allocation73_spill] sm:$0xff] %v11896_v12  ;;  %v2606_v6 = vshll.u32 %v2605_v14, 16  ;;  %v2620_v14 = vshll.u32 %v2619_v5, 16  ;;  %v11922_v12 = vpop.eup %7498  ;;  %v14582_v5 = vld [vmem:[#allocation116_spill] sm:$0xff] }
 0x49e   : > { %v11898_v51 = vadd.f32 %v4077_v45, %v3885_v25  ;;  %3120 = vmin.xlane.f32.xlu1 %v3119_v35  ;;  %v3886_v25 = vsel %vm2158_vm15, %v11766_v8, 0.0  ;;  %v3612_v35 = vmul.f32 1.442695, %v3523_v1  ;;  %v3128_v58 = vcvt.s32.f32 %v3126_v4  ;;  %v14581_v8 = vld [vmem:[#allocation227_spill] sm:$0xff] }
 0x49f   : > { %v2617_v19 = vpop.xlane.xlu1 %2616  ;;  %v2607_v59 = vadd.s32 %v2606_v6, %v2604_v27  ;;  %v11920_v38 = vmul.f32 %v11792_v37, %v11721_v41  ;;  %7510 = vrcp.f32 %v3709_v42  ;;  %v2633_v45 = vcvt.f32.s32 %v14581_v8  ;;  %v11927_v27 = vpop.eup %7500  ;;  %v14583_v41 = vld [vmem:[#allocation118_spill] sm:$0xff] }
 0x4a0   : > { %14577 = vst [vmem:[#allocation150_spill] sm:$0xff] %v11898_v51  ;;  %v2618_v30 = vcvt.f32.s32 %v2617_v19  ;;  %v3710_v34 = vadd.f32 1.0, %v11905_v13  ;;  %v3711_v1 = vadd.f32 1.0, %v11913_v18  ;;  %7512 = vpow2.f32 %v3610_v40  ;;  %v11931_v6 = vpop.eup %7502  ;;  %v14584_v19 = vld [vmem:[#allocation115_spill] sm:$0xff] }
 0x4a1   : > { %v3524_v62 = vsub.f32 %v14584_v19, %v14583_v41  ;;  %vm3438_vm8 = vcmp.eq.s32.totalorder %v7914_v54, %v2607_v59  ;;  %7514 = vpow2.f32 %v3612_v35  ;;  %v3712_v41 = vadd.f32 1.0, %v11927_v27 }
 0x4a2   : > { %v11916_v15 = vpop.xlane.xlu0 %3130  ;;  %v2621_v51 = vadd.s32 %v2620_v14, %v2618_v30  ;;  %v3142_v14 = vcvt.s32.f32 %v3140_v60  ;;  %v14586_v30 = vld [vmem:[#allocation197_spill] sm:$0xff]  ;;  %v2634_v19 = vshll.u32 %v2633_v45, 16  ;;  %7516 = vrcp.f32 %v3710_v34 }
 0x4a3   : > { %14580 = vst [vmem:[#allocation220_spill] sm:$0xff] %v11916_v15  ;;  %vm3132_vm15 = vcmp.eq.f32.partialorder %v14582_v5, %v11916_v15  ;;  %v11937_v42 = vpop.xlane.xlu1 %3144  ;;  %v2647_v8 = vcvt.f32.s32 %v14586_v30  ;;  %v14587_v5 = vld [vmem:[#allocation228_spill] sm:$0xff]  ;;  %v3713_v44 = vadd.f32 1.0, %v11931_v6  ;;  %v4078_v60 = vsel %vm3438_vm8, %v11856_v63, 0.0  ;;  %v14602_v63 = vld [vmem:[#allocation33_spill] sm:$0xff] }
 0x4a4   : > { %v3133_v4 = vsel %vm3132_vm15, %v3128_v58, inf  ;;  %vm3439_vm7 = vcmp.eq.s32.totalorder %v7914_v54, %v2621_v51  ;;  %14585 = vst [vmem:[#allocation75_spill] sm:$0xff] %v11937_v42  ;;  %vm3146_vm9 = vcmp.eq.f32.partialorder %v14587_v5, %v11937_v42  ;;  %v4017_v58 = vmul.f32 %v11811_v3, %v11729_v48  ;;  %v14588_v30 = vld [vmem:[#allocation120_spill] sm:$0xff]  ;;  %v14589_v5 = vld [vmem:[#allocation214_spill] sm:$0xff] }
 0x4a5   : > { %3134 = vmin.xlane.f32.xlu0 %v3133_v4  ;;  %v3147_v20 = vsel %vm3146_vm9, %v3142_v14, inf  ;;  %v4079_v35 = vsel %vm3439_vm7, %v4015_v55, 0.0  ;;  %v11951_v4 = vpop.eup %7504  ;;  %7518 = vrcp.f32 %v3711_v1  ;;  %v3614_v48 = vmul.f32 1.442695, %v3524_v62  ;;  %v14592_v51 = vld [vmem:[#allocation36_spill] sm:$0xff] }
 0x4a6   : > { %v2631_v40 = vpop.xlane.xlu0 %2630  ;;  %3148 = vmin.xlane.f32.xlu1 %v3147_v20  ;;  %v3525_v45 = vsub.f32 %v14589_v5, %v14588_v30  ;;  %v11955_v34 = vpop.eup %7506  ;;  %v2648_v42 = vshll.u32 %v2647_v8, 16  ;;  %v3154_v59 = vand.u32 65535, %v14590_v31  ;;  %v3887_v20 = vsel %vm2159_vm1, %v11787_v47, 0.0  ;;  %v14596_v5 = vld [vmem:[#allocation125_spill] sm:$0xff] }
 0x4a7   : > { %v2632_v15 = vcvt.f32.s32 %v2631_v40  ;;  %v2645_v40 = vpop.xlane.xlu1 %2644  ;;  %7520 = vrcp.f32 %v3712_v41  ;;  %v3168_v55 = vand.u32 65535, %v14592_v51  ;;  %v11963_v1 = vadd.f32 %v4078_v60, %v3886_v25  ;;  %v14595_v41 = vld [vmem:[#allocation126_spill] sm:$0xff] }
 0x4a8   : > { %v2646_v52 = vcvt.f32.s32 %v2645_v40  ;;  %v11965_v62 = vadd.f32 %v4079_v35, %v3887_v20  ;;  %7522 = vrcp.f32 %v3713_v44  ;;  %v4018_v8 = vmul.f32 %v11817_v29, %v11734_v53  ;;  %v14599_v53 = vld [vmem:[#allocation122_spill] sm:$0xff] }
 0x4a9   : > { %v2635_v14 = vadd.s32 %v2634_v19, %v2632_v15  ;;  %14593 = vst [vmem:[#allocation55_spill] sm:$0xff] %v11963_v1  ;;  %v11967_v15 = vpop.eup %7508  ;;  %v11973_v31 = vmul.f32 %v11829_v11, %v11745_v43  ;;  %v3616_v47 = vmul.f32 1.442695, %v3525_v45  ;;  %v3526_v25 = vsub.f32 %v14596_v5, %v14595_v41  ;;  %v14601_v45 = vld [vmem:[#allocation229_spill] sm:$0xff]  ;;  %v14608_v1 = vld [vmem:[#allocation215_spill] sm:$0xff] }
 0x4aa   : > { %14594 = vst [vmem:[#allocation79_spill] sm:$0xff] %v11965_v62  ;;  %v2649_v19 = vadd.s32 %v2648_v42, %v2646_v52  ;;  %v11975_v30 = vpop.eup %7510  ;;  %7524 = vpow2.f32 %v3614_v48  ;;  %v14598_v52 = vld [vmem:[#allocation128_spill] sm:$0xff]  ;;  %v3156_v35 = vcvt.s32.f32 %v3154_v59  ;;  %v2661_v40 = vcvt.f32.s32 %v14601_v45 }
 0x4ab   : > { %vm3440_vm1 = vcmp.eq.s32.totalorder %v7914_v54, %v2635_v14  ;;  %v11982_v44 = vpop.eup %7512  ;;  %v3527_v42 = vsub.f32 %v14599_v53, %v14598_v52  ;;  %v2675_v20 = vcvt.f32.s32 %v14602_v63  ;;  %v14603_v14 = vld [vmem:[#allocation230_spill] sm:$0xff]  ;;  %v3170_v41 = vcvt.s32.f32 %v3168_v55 }
 0x4ac   : > { %14597 = vst [vmem:[#allocation5_spill] sm:$0xff] %v11982_v44  ;;  %vm3441_vm0 = vcmp.eq.s32.totalorder %v7914_v54, %v2649_v19  ;;  %v11987_v43 = vpop.xlane.xlu0 %3158  ;;  %v11995_v5 = vpop.eup %7514  ;;  %v4080_v48 = vsel %vm3440_vm1, %v11920_v38, 0.0  ;;  %v14606_v19 = vld [vmem:[#allocation34_spill] sm:$0xff]  ;;  %v3714_v59 = vadd.f32 1.0, %v11982_v44  ;;  %7526 = vpow2.f32 %v3616_v47  ;;  %v14614_v47 = vld [vmem:[#allocation45_spill] sm:$0xff] }
 0x4ad   : > { %14600 = vst [vmem:[#allocation80_spill] sm:$0xff] %v11987_v43  ;;  %vm3160_vm14 = vcmp.eq.f32.partialorder %v14603_v14, %v11987_v43  ;;  %v11993_v51 = vpop.xlane.xlu1 %3172  ;;  %14605 = vst [vmem:[#allocation86_spill] sm:$0xff] %v11995_v5  ;;  %v4081_v52 = vsel %vm3441_vm0, %v4017_v58, 0.0  ;;  %v3618_v45 = vmul.f32 1.442695, %v3526_v25  ;;  %v12001_v60 = vpop.eup %7516  ;;  %v14607_v14 = vld [vmem:[#allocation131_spill] sm:$0xff] }
 0x4ae   : > { %14604 = vst [vmem:[#allocation158_spill] sm:$0xff] %v11993_v51  ;;  %vm3174_vm11 = vcmp.eq.f32.partialorder %v14606_v19, %v11993_v51  ;;  %v3161_v53 = vsel %vm3160_vm14, %v3156_v35, inf  ;;  %v3528_v55 = vsub.f32 %v14608_v1, %v14607_v14  ;;  %v14609_v43 = vld [vmem:[#allocation127_spill] sm:$0xff]  ;;  %v3888_v35 = vsel %vm2160_vm4, %v11792_v37, 0.0 }
 0x4af   : > { %3162 = vmin.xlane.f32.xlu0 %v3161_v53  ;;  %v3175_v63 = vsel %vm3174_vm11, %v3170_v41, inf  ;;  %v3182_v38 = vand.u32 65535, %v14609_v43  ;;  %v3889_v25 = vsel %vm2161_vm5, %v11811_v3, 0.0  ;;  %v12014_v41 = vpop.eup %7518  ;;  %v2662_v19 = vshll.u32 %v2661_v40, 16 }
 0x4b0   : > { %3176 = vmin.xlane.f32.xlu1 %v3175_v63  ;;  %v2659_v62 = vpop.xlane.xlu0 %2658  ;;  %v12016_v1 = vadd.f32 %v4080_v48, %v3888_v35  ;;  %v12018_v63 = vadd.f32 %v4081_v52, %v3889_v25  ;;  %v3715_v43 = vadd.f32 1.0, %v11995_v5  ;;  %v3620_v14 = vmul.f32 1.442695, %v3527_v42  ;;  %v14615_v48 = vld [vmem:[#allocation231_spill] sm:$0xff]  ;;  %v14618_v5 = vld [vmem:[#allocation216_spill] sm:$0xff] }
 0x4b1   : > { %v2660_v53 = vcvt.f32.s32 %v2659_v62  ;;  %v2673_v51 = vpop.xlane.xlu1 %2672  ;;  %v2676_v23 = vshll.u32 %v2675_v20, 16  ;;  %v12021_v37 = vpop.eup %7520  ;;  %7528 = vpow2.f32 %v3618_v45  ;;  %v3196_v3 = vand.u32 65535, %v14614_v47  ;;  %v14619_v45 = vld [vmem:[#allocation135_spill] sm:$0xff]  ;;  %v14621_v47 = vld [vmem:[#allocation217_spill] sm:$0xff] }
 0x4b2   : > { %14612 = vst [vmem:[#allocation69_spill] sm:$0xff] %v12016_v1  ;;  %14613 = vst [vmem:[#allocation87_spill] sm:$0xff] %v12018_v63  ;;  %v2674_v58 = vcvt.f32.s32 %v2673_v51  ;;  %v12026_v62 = vpop.eup %7522  ;;  %7530 = vrcp.f32 %v3714_v59  ;;  %v2689_v52 = vcvt.f32.s32 %v14615_v48  ;;  %v3184_v42 = vcvt.s32.f32 %v3182_v38  ;;  %v14617_v51 = vld [vmem:[#allocation133_spill] sm:$0xff] }
 0x4b3   : > { %v2663_v44 = vadd.s32 %v2662_v19, %v2660_v53  ;;  %v3622_v20 = vmul.f32 1.442695, %v3528_v55  ;;  %v3529_v10 = vsub.f32 %v14618_v5, %v14617_v51  ;;  %v14620_v53 = vld [vmem:[#allocation136_spill] sm:$0xff]  ;;  %v3198_v5 = vcvt.s32.f32 %v3196_v3 }
 0x4b4   : > { %v2677_v35 = vadd.s32 %v2676_v23, %v2674_v58  ;;  %v12029_v25 = vpop.xlane.xlu0 %3186  ;;  %v12036_v19 = vpop.eup %7524  ;;  %v3530_v59 = vsub.f32 %v14621_v47, %v14620_v53  ;;  %v3890_v58 = vsel %vm2162_vm10, %v11817_v29, 0.0  ;;  %v3891_v51 = vsel %vm2163_vm12, %v11829_v11, 0.0  ;;  %v14627_v53 = vld [vmem:[#allocation46_spill] sm:$0xff] }
 0x4b5   : > { %14616 = vst [vmem:[#allocation166_spill] sm:$0xff] %v12029_v25  ;;  %vm3442_vm4 = vcmp.eq.s32.totalorder %v7914_v54, %v2663_v44  ;;  %vm3188_vm5 = vcmp.eq.f32.partialorder %v14619_v45, %v12029_v25  ;;  %v12042_v55 = vpop.xlane.xlu1 %3200  ;;  %v14625_v45 = vld [vmem:[#allocation232_spill] sm:$0xff]  ;;  %v3210_v47 = vand.u32 65535, %v14627_v53  ;;  %7532 = vrcp.f32 %v3715_v43  ;;  %v14631_v53 = vld [vmem:[#allocation137_spill] sm:$0xff] }
 0x4b6   : > { %v4082_v40 = vsel %vm3442_vm4, %v4018_v8, 0.0  ;;  %vm3443_vm13 = vcmp.eq.s32.totalorder %v7914_v54, %v2677_v35  ;;  %v3189_v23 = vsel %vm3188_vm5, %v3184_v42, inf  ;;  %14622 = vst [vmem:[#allocation92_spill] sm:$0xff] %v12042_v55  ;;  %v2690_v8 = vshll.u32 %v2689_v52, 16  ;;  %v14626_v42 = vld [vmem:[#allocation147_spill] sm:$0xff]  ;;  %v12056_v3 = vpop.eup %7526 }
 0x4b7   : > { %v4083_v38 = vsel %vm3443_vm13, %v11973_v31, 0.0  ;;  %3190 = vmin.xlane.f32.xlu0 %v3189_v23  ;;  %v2703_v35 = vcvt.f32.s32 %v14625_v45  ;;  %vm3202_vm6 = vcmp.eq.f32.partialorder %v14626_v42, %v12042_v55  ;;  %v12058_v44 = vadd.f32 %v4082_v40, %v3890_v58 }
 0x4b8   : > { %v2687_v31 = vpop.xlane.xlu0 %2686  ;;  %v3203_v23 = vsel %vm3202_vm6, %v3198_v5, inf  ;;  %v12060_v29 = vadd.f32 %v4083_v38, %v3891_v51  ;;  %v4020_v11 = vmul.f32 %v11864_v0, %v11760_v46  ;;  %v4021_v52 = vmul.f32 %v11870_v2, %v11770_v9  ;;  %v14630_v5 = vld [vmem:[#allocation233_spill] sm:$0xff]  ;;  %v14632_v9 = vld [vmem:[#allocation218_spill] sm:$0xff] }
 0x4b9   : > { %v2688_v1 = vcvt.f32.s32 %v2687_v31  ;;  %14628 = vst [vmem:[#allocation89_spill] sm:$0xff] %v12058_v44  ;;  %3204 = vmin.xlane.f32.xlu1 %v3203_v23  ;;  %v4022_v48 = vmul.f32 %v11875_v49, %v11778_v33  ;;  %7534 = vpow2.f32 %v3620_v14  ;;  %v2701_v42 = vpop.xlane.xlu1 %2700  ;;  %v3224_v31 = vand.u32 65535, %v14630_v5 }
 0x4ba   : > { %14629 = vst [vmem:[#allocation129_spill] sm:$0xff] %v12060_v29  ;;  %7536 = vpow2.f32 %v3622_v20  ;;  %v3624_v43 = vmul.f32 1.442695, %v3529_v10  ;;  %v2704_v38 = vshll.u32 %v2703_v35, 16  ;;  %v2702_v58 = vcvt.f32.s32 %v2701_v42  ;;  %v14635_v10 = vld [vmem:[#allocation236_spill] sm:$0xff] }
 0x4bb   : > { %v2691_v45 = vadd.s32 %v2690_v8, %v2688_v1  ;;  %v12071_v51 = vpop.eup %7528  ;;  %v3626_v46 = vmul.f32 1.442695, %v3530_v59  ;;  %v3531_v23 = vsub.f32 %v14632_v9, %v14631_v53  ;;  %v3212_v1 = vcvt.s32.f32 %v3210_v47  ;;  %v14634_v8 = vld [vmem:[#allocation234_spill] sm:$0xff]  ;;  %v14638_v9 = vld [vmem:[#allocation235_spill] sm:$0xff] }
 0x4bc   : > { %v12078_v14 = vpop.eup %7530  ;;  %v2717_v5 = vcvt.f32.s32 %v14634_v8  ;;  %v2705_v20 = vadd.s32 %v2704_v38, %v2702_v58  ;;  %v3716_v35 = vadd.f32 1.0, %v12036_v19  ;;  %v3226_v53 = vcvt.s32.f32 %v3224_v31  ;;  %v14644_v38 = vld [vmem:[#allocation4_spill] sm:$0xff] }
 0x4bd   : > { %vm3444_vm10 = vcmp.eq.s32.totalorder %v7914_v54, %v2691_v45  ;;  %v12076_v33 = vpop.xlane.xlu0 %3214  ;;  %v12084_v59 = vpop.xlane.xlu1 %3228  ;;  %v3892_v47 = vsel %vm2164_vm2, %v11864_v0, 0.0  ;;  %v2731_v44 = vcvt.f32.s32 %v14638_v9  ;;  %v3893_v58 = vsel %vm2165_vm3, %v11870_v2, 0.0 }
 0x4be   : > { %14633 = vst [vmem:[#allocation93_spill] sm:$0xff] %v12076_v33  ;;  %v4084_v40 = vsel %vm3444_vm10, %v4020_v11, 0.0  ;;  %vm3216_vm12 = vcmp.eq.f32.partialorder %v14635_v10, %v12076_v33  ;;  %14636 = vst [vmem:[#allocation198_spill] sm:$0xff] %v12084_v59  ;;  %vm3445_vm15 = vcmp.eq.s32.totalorder %v7914_v54, %v2705_v20  ;;  %v14639_v11 = vld [vmem:[#allocation237_spill] sm:$0xff]  ;;  %v14641_v10 = vld [vmem:[#allocation63_spill] sm:$0xff]  ;;  %7538 = vpow2.f32 %v3624_v43 }
 0x4bf   : > { %v3217_v42 = vsel %vm3216_vm12, %v3212_v1, inf  ;;  %vm3230_vm8 = vcmp.eq.f32.partialorder %v14639_v11, %v12084_v59  ;;  %v4085_v1 = vsel %vm3445_vm15, %v4021_v52, 0.0  ;;  %v3238_v29 = vand.u32 65535, %v14641_v10  ;;  %v12105_v52 = vpop.eup %7532 }
 0x4c0   : > { %3218 = vmin.xlane.f32.xlu0 %v3217_v42  ;;  %v3231_v31 = vsel %vm3230_vm8, %v3226_v53, inf  ;;  %v12099_v45 = vadd.f32 %v4084_v40, %v3892_v47  ;;  %v2718_v0 = vshll.u32 %v2717_v5, 16  ;;  %v12101_v42 = vadd.f32 %v4085_v1, %v3893_v58  ;;  %v14645_v5 = vld [vmem:[#allocation141_spill] sm:$0xff]  ;;  %v14646_v47 = vld [vmem:[#allocation219_spill] sm:$0xff] }
 0x4c1   : > { %v2715_v8 = vpop.xlane.xlu0 %2714  ;;  %3232 = vmin.xlane.f32.xlu1 %v3231_v31  ;;  %v3717_v9 = vadd.f32 1.0, %v12056_v3  ;;  %7540 = vpow2.f32 %v3626_v46  ;;  %v3628_v11 = vmul.f32 1.442695, %v3531_v23  ;;  %v2729_v63 = vpop.xlane.xlu1 %2728  ;;  %v3252_v2 = vand.u32 65535, %v14644_v38 }
 0x4c2   : > { %14642 = vst [vmem:[#allocation132_spill] sm:$0xff] %v12099_v45  ;;  %v2716_v20 = vcvt.f32.s32 %v2715_v8  ;;  %14643 = vst [vmem:[#allocation99_spill] sm:$0xff] %v12101_v42  ;;  %v2732_v53 = vshll.u32 %v2731_v44, 16  ;;  %v2730_v10 = vcvt.f32.s32 %v2729_v63  ;;  %7542 = vrcp.f32 %v3716_v35  ;;  %v14648_v44 = vld [vmem:[#allocation57_spill] sm:$0xff] }
 0x4c3   : > { %v12109_v43 = vpop.eup %7534  ;;  %v3532_v58 = vsub.f32 %v14646_v47, %v14645_v5  ;;  %v4023_v46 = vmul.f32 %v11894_v16, %v11801_v36  ;;  %v3240_v1 = vcvt.s32.f32 %v3238_v29  ;;  %v2745_v8 = vcvt.f32.s32 %v14648_v44  ;;  %v14651_v36 = vld [vmem:[#allocation7_spill] sm:$0xff]  ;;  %v14653_v47 = vld [vmem:[#allocation52_spill] sm:$0xff]  ;;  %v14657_v44 = vld [vmem:[#allocation81_spill] sm:$0xff] }
 0x4c4   : > { %v2719_v59 = vadd.s32 %v2718_v0, %v2716_v20  ;;  %v12117_v31 = vpop.eup %7536  ;;  %v2733_v63 = vadd.s32 %v2732_v53, %v2730_v10  ;;  %v14649_v0 = vld [vmem:[#allocation238_spill] sm:$0xff]  ;;  %v3254_v5 = vcvt.s32.f32 %v3252_v2  ;;  %vm14652_vm7 = vcmp.eq.s32.totalorder %v7914_v54, %v14651_v36  ;;  %v14661_v45 = vld [vmem:[#allocation221_spill] sm:$0xff] }
 0x4c5   : > { %v12115_v23 = vpop.xlane.xlu0 %3242  ;;  %v12123_v20 = vpop.xlane.xlu1 %3256  ;;  %v3894_v29 = vsel %vm14652_vm7, %v11875_v49, 0.0  ;;  %v2759_v40 = vcvt.f32.s32 %v14653_v47  ;;  %7544 = vrcp.f32 %v3717_v9  ;;  %v2746_v49 = vshll.u32 %v2745_v8, 16 }
 0x4c6   : > { %14647 = vst [vmem:[#allocation205_spill] sm:$0xff] %v12115_v23  ;;  %vm3446_vm2 = vcmp.eq.s32.totalorder %v7914_v54, %v2719_v59  ;;  %vm3244_vm3 = vcmp.eq.f32.partialorder %v14649_v0, %v12115_v23  ;;  %14650 = vst [vmem:[#allocation100_spill] sm:$0xff] %v12123_v20  ;;  %vm3447_vm9 = vcmp.eq.s32.totalorder %v7914_v54, %v2733_v63  ;;  %v14654_v59 = vld [vmem:[#allocation239_spill] sm:$0xff]  ;;  %v3266_v0 = vand.u32 65535, %v14657_v44 }
 0x4c7   : > { %v4086_v35 = vsel %vm3446_vm2, %v4022_v48, 0.0  ;;  %v3245_v38 = vsel %vm3244_vm3, %v3240_v1, inf  ;;  %vm3258_vm1 = vcmp.eq.f32.partialorder %v14654_v59, %v12123_v20  ;;  %v14655_v48 = vld [vmem:[#allocation165_spill] sm:$0xff]  ;;  %v4087_v10 = vsel %vm3447_vm9, %v4023_v46, 0.0  ;;  %v14660_v59 = vld [vmem:[#allocation143_spill] sm:$0xff] }
 0x4c8   : > { %3246 = vmin.xlane.f32.xlu0 %v3245_v38  ;;  %vm14656_vm0 = vcmp.eq.s32.totalorder %v7914_v54, %v14655_v48  ;;  %v3259_v2 = vsel %vm3258_vm1, %v3254_v5, inf  ;;  %v12138_v36 = vadd.f32 %v4086_v35, %v3894_v29  ;;  %7546 = vpow2.f32 %v3628_v11  ;;  %v12145_v5 = vpop.eup %7538  ;;  %v14663_v29 = vld [vmem:[#allocation144_spill] sm:$0xff] }
 0x4c9   : > { %v3895_v53 = vsel %vm14656_vm0, %v11894_v16, 0.0  ;;  %v2743_v1 = vpop.xlane.xlu0 %2742  ;;  %3260 = vmin.xlane.f32.xlu1 %v3259_v2  ;;  %v3630_v38 = vmul.f32 1.442695, %v3532_v58  ;;  %v3533_v42 = vsub.f32 %v14661_v45, %v14660_v59  ;;  %v2757_v48 = vpop.xlane.xlu1 %2756  ;;  %v14662_v16 = vld [vmem:[#allocation160_spill] sm:$0xff]  ;;  %v2760_v20 = vshll.u32 %v2759_v40, 16 }
 0x4ca   : > { %14658 = vst [vmem:[#allocation72_spill] sm:$0xff] %v12138_v36  ;;  %v2744_v63 = vcvt.f32.s32 %v2743_v1  ;;  %v12140_v47 = vadd.f32 %v4087_v10, %v3895_v53  ;;  %v3280_v46 = vand.u32 65535, %v14662_v16  ;;  %v2758_v35 = vcvt.f32.s32 %v2757_v48  ;;  %v14664_v53 = vld [vmem:[#allocation223_spill] sm:$0xff]  ;;  %v14666_v40 = vld [vmem:[#allocation88_spill] sm:$0xff]  ;;  %v14678_v36 = vld [vmem:[#allocation145_spill] sm:$0xff] }
 0x4cb   : > { %v12149_v8 = vpop.eup %7540  ;;  %v3534_v11 = vsub.f32 %v14664_v53, %v14663_v29  ;;  %v4024_v58 = vmul.f32 %v11900_v26, %v11804_v56  ;;  %v4025_v45 = vmul.f32 %v11922_v12, %v11825_v17  ;;  %v3268_v2 = vcvt.s32.f32 %v3266_v0  ;;  %v14669_v17 = vld [vmem:[#allocation64_spill] sm:$0xff]  ;;  %v14671_v53 = vld [vmem:[#allocation58_spill] sm:$0xff] }
 0x4cc   : > { %14659 = vst [vmem:[#allocation105_spill] sm:$0xff] %v12140_v47  ;;  %v2747_v44 = vadd.s32 %v2746_v49, %v2744_v63  ;;  %v2773_v1 = vcvt.f32.s32 %v14666_v40  ;;  %v2761_v49 = vadd.s32 %v2760_v20, %v2758_v35  ;;  %v14667_v63 = vld [vmem:[#allocation240_spill] sm:$0xff]  ;;  %v12163_v59 = vpop.eup %7542  ;;  %v3282_v29 = vcvt.s32.f32 %v3280_v46  ;;  %v14672_v20 = vld [vmem:[#allocation241_spill] sm:$0xff] }
 0x4cd   : > { %v12157_v10 = vpop.xlane.xlu0 %3270  ;;  %vm14670_vm4 = vcmp.eq.s32.totalorder %v7914_v54, %v14669_v17  ;;  %v2787_v40 = vcvt.f32.s32 %v14671_v53  ;;  %7548 = vpow2.f32 %v3630_v38  ;;  %v14679_v47 = vld [vmem:[#allocation224_spill] sm:$0xff] }
 0x4ce   : > { %14665 = vst [vmem:[#allocation210_spill] sm:$0xff] %v12157_v10  ;;  %vm3448_vm14 = vcmp.eq.s32.totalorder %v7914_v54, %v2747_v44  ;;  %vm3272_vm11 = vcmp.eq.f32.partialorder %v14667_v63, %v12157_v10  ;;  %v12165_v16 = vpop.xlane.xlu1 %3284  ;;  %v3896_v0 = vsel %vm14670_vm4, %v11900_v26, 0.0  ;;  %vm3449_vm5 = vcmp.eq.s32.totalorder %v7914_v54, %v2761_v49  ;;  %v14673_v44 = vld [vmem:[#allocation8_spill] sm:$0xff]  ;;  %v14675_v63 = vld [vmem:[#allocation101_spill] sm:$0xff] }
 0x4cf   : > { %v4088_v48 = vsel %vm3448_vm14, %v4024_v58, 0.0  ;;  %14668 = vst [vmem:[#allocation106_spill] sm:$0xff] %v12165_v16  ;;  %v3273_v56 = vsel %vm3272_vm11, %v3268_v2, inf  ;;  %vm3286_vm13 = vcmp.eq.f32.partialorder %v14672_v20, %v12165_v16  ;;  %vm14674_vm6 = vcmp.eq.s32.totalorder %v7914_v54, %v14673_v44 }
 0x4d0   : > { %3274 = vmin.xlane.f32.xlu0 %v3273_v56  ;;  %v3897_v35 = vsel %vm14674_vm6, %v11922_v12, 0.0  ;;  %v4089_v58 = vsel %vm3449_vm5, %v4025_v45, 0.0  ;;  %v3287_v46 = vsel %vm3286_vm13, %v3282_v29, inf  ;;  %v3294_v9 = vand.u32 65535, %v14675_v63  ;;  %v14680_v12 = vld [vmem:[#allocation94_spill] sm:$0xff]  ;;  %v12187_v29 = vpop.eup %7544 }
 0x4d1   : > { %v2771_v2 = vpop.xlane.xlu0 %2770  ;;  %v12180_v17 = vadd.f32 %v4088_v48, %v3896_v0  ;;  %v2774_v26 = vshll.u32 %v2773_v1, 16  ;;  %3288 = vmin.xlane.f32.xlu1 %v3287_v46  ;;  %v12182_v53 = vadd.f32 %v4089_v58, %v3897_v35  ;;  %v3632_v20 = vmul.f32 1.442695, %v3533_v42  ;;  %v14681_v0 = vld [vmem:[#allocation148_spill] sm:$0xff]  ;;  %v14682_v35 = vld [vmem:[#allocation225_spill] sm:$0xff] }
 0x4d2   : > { %v2772_v49 = vcvt.f32.s32 %v2771_v2  ;;  %v3634_v56 = vmul.f32 1.442695, %v3534_v11  ;;  %v3535_v16 = vsub.f32 %v14679_v47, %v14678_v36  ;;  %v2785_v44 = vpop.xlane.xlu1 %2784  ;;  %v3308_v45 = vand.u32 65535, %v14680_v12  ;;  %v12191_v1 = vpop.eup %7546 }
 0x4d3   : > { %14676 = vst [vmem:[#allocation176_spill] sm:$0xff] %v12180_v17  ;;  %14677 = vst [vmem:[#allocation138_spill] sm:$0xff] %v12182_v53  ;;  %v2788_v10 = vshll.u32 %v2787_v40, 16  ;;  %v2786_v48 = vcvt.f32.s32 %v2785_v44  ;;  %v3536_v42 = vsub.f32 %v14682_v35, %v14681_v0  ;;  %v4026_v11 = vmul.f32 %v11951_v4, %v11837_v22  ;;  %v14684_v40 = vld [vmem:[#allocation95_spill] sm:$0xff]  ;;  %v14687_v22 = vld [vmem:[#allocation9_spill] sm:$0xff] }
 0x4d4   : > { %v2775_v63 = vadd.s32 %v2774_v26, %v2772_v49  ;;  %v4027_v36 = vmul.f32 %v11955_v34, %v11844_v32  ;;  %v3296_v58 = vcvt.s32.f32 %v3294_v9  ;;  %v2801_v46 = vcvt.f32.s32 %v14684_v40  ;;  %v14685_v26 = vld [vmem:[#allocation242_spill] sm:$0xff]  ;;  %v14689_v35 = vld [vmem:[#allocation199_spill] sm:$0xff] }
 0x4d5   : > { %v12199_v47 = vpop.xlane.xlu0 %3298  ;;  %v2789_v2 = vadd.s32 %v2788_v10, %v2786_v48  ;;  %v3310_v0 = vcvt.s32.f32 %v3308_v45  ;;  %vm14688_vm15 = vcmp.eq.s32.totalorder %v7914_v54, %v14687_v22  ;;  %v2815_v9 = vcvt.f32.s32 %v14689_v35  ;;  %v14691_v10 = vld [vmem:[#allocation169_spill] sm:$0xff]  ;;  %v14693_v40 = vld [vmem:[#allocation107_spill] sm:$0xff]  ;;  %v14733_v17 = vld [vmem:[#allocation86_spill] sm:$0xff] }
 0x4d6   : > { %14683 = vst [vmem:[#allocation140_spill] sm:$0xff] %v12199_v47  ;;  %vm3450_vm10 = vcmp.eq.s32.totalorder %v7914_v54, %v2775_v63  ;;  %vm3300_vm12 = vcmp.eq.f32.partialorder %v14685_v26, %v12199_v47  ;;  %v12205_v44 = vpop.xlane.xlu1 %3312  ;;  %v3898_v32 = vsel %vm14688_vm15, %v11951_v4, 0.0  ;;  %v14690_v63 = vld [vmem:[#allocation243_spill] sm:$0xff]  ;;  %vm14692_vm3 = vcmp.eq.s32.totalorder %v7914_v54, %v14691_v10  ;;  %v14731_v47 = vld [vmem:[#allocation5_spill] sm:$0xff] }
 0x4d7   : > { %v4090_v49 = vsel %vm3450_vm10, %v4026_v11, 0.0  ;;  %14686 = vst [vmem:[#allocation112_spill] sm:$0xff] %v12205_v44  ;;  %v3301_v12 = vsel %vm3300_vm12, %v3296_v58, inf  ;;  %vm3451_vm8 = vcmp.eq.s32.totalorder %v7914_v54, %v2789_v2  ;;  %vm3314_vm2 = vcmp.eq.f32.partialorder %v14690_v63, %v12205_v44 }
 0x4d8   : > { %3302 = vmin.xlane.f32.xlu0 %v3301_v12  ;;  %v3899_v48 = vsel %vm14692_vm3, %v11955_v34, 0.0  ;;  %v4091_v11 = vsel %vm3451_vm8, %v4027_v36, 0.0  ;;  %v3315_v45 = vsel %vm3314_vm2, %v3310_v0, inf  ;;  %v3322_v26 = vand.u32 65535, %v14693_v40  ;;  %v14694_v34 = vld [vmem:[#allocation202_spill] sm:$0xff]  ;;  %v12227_v0 = vpop.eup %7548 }
 0x4d9   : > { %v2799_v58 = vpop.xlane.xlu0 %2798  ;;  %v12220_v22 = vadd.f32 %v4090_v49, %v3898_v32  ;;  %7550 = vpow2.f32 %v3632_v20  ;;  %v2802_v4 = vshll.u32 %v2801_v46, 16  ;;  %3316 = vmin.xlane.f32.xlu1 %v3315_v45  ;;  %v12222_v35 = vadd.f32 %v4091_v11, %v3899_v48 }
 0x4da   : > { %v2800_v2 = vcvt.f32.s32 %v2799_v58  ;;  %v3718_v12 = vadd.f32 1.0, %v12071_v51  ;;  %v3719_v63 = vadd.f32 1.0, %v12109_v43  ;;  %7552 = vpow2.f32 %v3634_v56  ;;  %v2813_v10 = vpop.xlane.xlu1 %2812 }
 0x4db   : > { %v3336_v36 = vand.u32 65535, %v14694_v34  ;;  %v2816_v38 = vshll.u32 %v2815_v9, 16  ;;  %v2814_v49 = vcvt.f32.s32 %v2813_v10  ;;  %v3636_v46 = vmul.f32 1.442695, %v3535_v16  ;;  %v14696_v9 = vld [vmem:[#allocation244_spill] sm:$0xff] }
 0x4dc   : > { %v2803_v40 = vadd.s32 %v2802_v4, %v2800_v2  ;;  %v3638_v32 = vmul.f32 1.442695, %v3536_v42  ;;  %v4028_v48 = vmul.f32 %v11967_v15, %v11852_v7  ;;  %v3324_v45 = vcvt.s32.f32 %v3322_v26  ;;  %v14697_v4 = vld [vmem:[#allocation149_spill] sm:$0xff]  ;;  %v14698_v2 = vld [vmem:[#allocation226_spill] sm:$0xff] }
 0x4dd   : > { %v12233_v11 = vpop.xlane.xlu0 %3326  ;;  %v4029_v56 = vmul.f32 %v11975_v30, %v11881_v57  ;;  %v2817_v58 = vadd.s32 %v2816_v38, %v2814_v49  ;;  %v3537_v10 = vsub.f32 %v14698_v2, %v14697_v4  ;;  %v3338_v7 = vcvt.s32.f32 %v3336_v36  ;;  %v14700_v26 = vld [vmem:[#allocation245_spill] sm:$0xff]  ;;  %v14701_v57 = vld [vmem:[#allocation168_spill] sm:$0xff] }
 0x4de   : > { %14695 = vst [vmem:[#allocation213_spill] sm:$0xff] %v12233_v11  ;;  %vm3452_vm7 = vcmp.eq.s32.totalorder %v7914_v54, %v2803_v40  ;;  %vm3328_vm9 = vcmp.eq.f32.partialorder %v14696_v9, %v12233_v11  ;;  %v12242_v42 = vpop.xlane.xlu1 %3340  ;;  %vm14702_vm14 = vcmp.eq.s32.totalorder %v7914_v54, %v14701_v57  ;;  %v14703_v40 = vld [vmem:[#allocation11_spill] sm:$0xff]  ;;  %v3350_v36 = vand.u32 65535, %v11548_v21 }
 0x4df   : > { %v4092_v16 = vsel %vm3452_vm7, %v4028_v48, 0.0  ;;  %14699 = vst [vmem:[#allocation113_spill] sm:$0xff] %v12242_v42  ;;  %v3329_v34 = vsel %vm3328_vm9, %v3324_v45, inf  ;;  %vm3453_vm1 = vcmp.eq.s32.totalorder %v7914_v54, %v2817_v58  ;;  %vm3342_vm0 = vcmp.eq.f32.partialorder %v14700_v26, %v12242_v42 }
 0x4e0   : > { %3330 = vmin.xlane.f32.xlu0 %v3329_v34  ;;  %v3900_v38 = vsel %vm14702_vm14, %v11967_v15, 0.0  ;;  %vm14704_vm11 = vcmp.eq.s32.totalorder %v7914_v54, %v14703_v40  ;;  %v4093_v48 = vsel %vm3453_vm1, %v4029_v56, 0.0  ;;  %v3343_v9 = vsel %vm3342_vm0, %v3338_v7, inf  ;;  %v14707_v34 = vld [vmem:[#allocation38_spill] sm:$0xff]  ;;  %v14710_v40 = vld [vmem:[#allocation23_spill] sm:$0xff] }
 0x4e1   : > { %v3901_v49 = vsel %vm14704_vm11, %v11975_v30, 0.0  ;;  %v12255_v45 = vpop.xlane.xlu0 %2826  ;;  %v12258_v58 = vadd.f32 %v4092_v16, %v3900_v38  ;;  %7554 = vpow2.f32 %v3636_v46  ;;  %3344 = vmin.xlane.f32.xlu1 %v3343_v9  ;;  %v3640_v2 = vmul.f32 1.442695, %v3537_v10  ;;  %v14709_v38 = vld [vmem:[#allocation51_spill] sm:$0xff] }
 0x4e2   : > { %v12260_v4 = vadd.f32 %v4093_v48, %v3901_v49  ;;  %7556 = vrcp.f32 %v3718_v12  ;;  %v12262_v15 = vpop.xlane.xlu1 %2840  ;;  %v3364_v26 = vand.u32 65535, %v14707_v34  ;;  %v3720_v30 = vadd.f32 1.0, %v12117_v31  ;;  %v14711_v49 = vld [vmem:[#allocation152_spill] sm:$0xff]  ;;  %v14712_v48 = vld [vmem:[#allocation117_spill] sm:$0xff] }
 0x4e3   : > { %14705 = vst [vmem:[#allocation83_spill] sm:$0xff] %v12258_v58  ;;  %v12265_v57 = vpop.eup %7550  ;;  %7558 = vrcp.f32 %v3719_v63  ;;  %v3721_v46 = vadd.f32 1.0, %v12145_v5  ;;  %v3352_v12 = vcvt.s32.f32 %v3350_v36  ;;  %v3722_v10 = vadd.f32 1.0, %v12149_v8 }
 0x4e4   : > { %14706 = vst [vmem:[#allocation151_spill] sm:$0xff] %v12260_v4  ;;  %v12270_v56 = vpop.eup %7552  ;;  %7560 = vpow2.f32 %v3638_v32  ;;  %v3723_v7 = vadd.f32 1.0, %v12191_v1  ;;  %v3538_v63 = vsub.f32 %v14710_v40, %v14709_v38  ;;  %v3539_v9 = vsub.f32 %v14712_v48, %v14711_v49  ;;  %v14714_v48 = vld [vmem:[#allocation162_spill] sm:$0xff] }
 0x4e5   : > { %v12273_v16 = vpop.xlane.xlu0 %3354  ;;  %7562 = vpow2.f32 %v3640_v2  ;;  %v3366_v21 = vcvt.s32.f32 %v3364_v26  ;;  %v3724_v36 = vadd.f32 1.0, %v12227_v0  ;;  %v3725_v38 = vadd.f32 1.0, %v12265_v57 }
 0x4e6   : > { %14708 = vst [vmem:[#allocation124_spill] sm:$0xff] %v12273_v16  ;;  %vm3356_vm4 = vcmp.eq.f32.partialorder %v11564_v61, %v12273_v16  ;;  %v12283_v34 = vpop.xlane.xlu1 %3368  ;;  %7564 = vrcp.f32 %v3720_v30  ;;  %v3378_v2 = vand.u32 65535, %v11584_v50  ;;  %v3642_v49 = vmul.f32 1.442695, %v3538_v63  ;;  %v14718_v16 = vld [vmem:[#allocation195_spill] sm:$0xff] }
 0x4e7   : > { %14713 = vst [vmem:[#allocation227_spill] sm:$0xff] %v12283_v34  ;;  %v3357_v32 = vsel %vm3356_vm4, %v3352_v12, inf  ;;  %vm3370_vm5 = vcmp.eq.f32.partialorder %v11566_v24, %v12283_v34  ;;  %7566 = vrcp.f32 %v3721_v46  ;;  %v14715_v12 = vld [vmem:[#allocation110_spill] sm:$0xff]  ;;  %v3644_v30 = vmul.f32 1.442695, %v3539_v9  ;;  %v14716_v24 = vld [vmem:[#allocation41_spill] sm:$0xff] }
 0x4e8   : > { %3358 = vmin.xlane.f32.xlu0 %v3357_v32  ;;  %v3371_v40 = vsel %vm3370_vm5, %v3366_v21, inf  ;;  %7568 = vrcp.f32 %v3722_v10  ;;  %v3540_v26 = vsub.f32 %v14715_v12, %v14714_v48  ;;  %v3392_v32 = vand.u32 65535, %v14716_v24  ;;  %v14717_v34 = vld [vmem:[#allocation157_spill] sm:$0xff] }
 0x4e9   : > { %v12289_v61 = vpop.xlane.xlu0 %2854  ;;  %3372 = vmin.xlane.f32.xlu1 %v3371_v40  ;;  %7570 = vrcp.f32 %v3723_v7  ;;  %v3726_v21 = vadd.f32 1.0, %v12270_v56  ;;  %v3541_v50 = vsub.f32 %v14718_v16, %v14717_v34  ;;  %v3380_v40 = vcvt.s32.f32 %v3378_v2 }
 0x4ea   : > { %v12294_v20 = vpop.xlane.xlu1 %2868  ;;  %7572 = vrcp.f32 %v3724_v36  ;;  %v3646_v9 = vmul.f32 1.442695, %v3540_v26  ;;  %v3394_v34 = vcvt.s32.f32 %v3392_v32 }
 0x4eb   : > { %v12297_v46 = vpop.eup %7554  ;;  %7574 = vrcp.f32 %v3725_v38  ;;  %v3648_v38 = vmul.f32 1.442695, %v3541_v50 }
 0x4ec   : > { %v12302_v10 = vpop.eup %7556  ;;  %7576 = vpow2.f32 %v3642_v49  ;;  %v3727_v36 = vadd.f32 1.0, %v12297_v46 }
 0x4ed   : > { %14719 = vst [vmem:[#allocation116_spill] sm:$0xff] %v12302_v10  ;;  %v12304_v63 = vpop.xlane.xlu0 %3382  ;;  %v12306_v7 = vpop.eup %7558  ;;  %7578 = vpow2.f32 %v3644_v30 }
 0x4ee   : > { %14720 = vst [vmem:[#allocation118_spill] sm:$0xff] %v12304_v63  ;;  %14721 = vst [vmem:[#allocation115_spill] sm:$0xff] %v12306_v7  ;;  %vm3384_vm13 = vcmp.eq.f32.partialorder %v11598_v39, %v12304_v63  ;;  %v12310_v48 = vpop.eup %7560  ;;  %v12313_v12 = vpop.xlane.xlu1 %3396  ;;  %7580 = vrcp.f32 %v3726_v21  ;;  %v14723_v39 = vld [vmem:[#allocation189_spill] sm:$0xff] }
 0x4ef   : > { %14722 = vst [vmem:[#allocation197_spill] sm:$0xff] %v12313_v12  ;;  %v3385_v16 = vsel %vm3384_vm13, %v3380_v40, inf  ;;  %vm3398_vm6 = vcmp.eq.f32.partialorder %v11600_v28, %v12313_v12  ;;  %v12317_v2 = vpop.eup %7562  ;;  %v3406_v24 = vand.u32 65535, %v14723_v39  ;;  %v3728_v30 = vadd.f32 1.0, %v12310_v48  ;;  %v14724_v28 = vld [vmem:[#allocation108_spill] sm:$0xff] }
 0x4f0   : > { %3386 = vmin.xlane.f32.xlu0 %v3385_v16  ;;  %v3399_v49 = vsel %vm3398_vm6, %v3394_v34, inf  ;;  %v12322_v63 = vpop.eup %7564  ;;  %7582 = vpow2.f32 %v3646_v9  ;;  %v3420_v50 = vand.u32 65535, %v14724_v28  ;;  %v3729_v16 = vadd.f32 1.0, %v12317_v2  ;;  %v14726_v9 = vld [vmem:[#allocation104_spill] sm:$0xff] }
 0x4f1   : > { %v12319_v26 = vpop.xlane.xlu0 %2882  ;;  %3400 = vmin.xlane.f32.xlu1 %v3399_v49  ;;  %v12325_v32 = vpop.eup %7566  ;;  %7584 = vrcp.f32 %v3727_v36  ;;  %v3408_v12 = vcvt.s32.f32 %v3406_v24  ;;  %v12345_v49 = vmul.f32 %v12001_v60, %v11905_v13  ;;  %v14728_v13 = vld [vmem:[#allocation47_spill] sm:$0xff] }
 0x4f2   : > { %v12327_v21 = vpop.xlane.xlu1 %2896  ;;  %v12330_v40 = vpop.eup %7568  ;;  %7586 = vpow2.f32 %v3648_v38  ;;  %v12349_v38 = vmul.f32 %v12014_v41, %v11913_v18  ;;  %v3422_v24 = vcvt.s32.f32 %v3420_v50 }
 0x4f3   : > { %v12333_v34 = vpop.eup %7570  ;;  %7588 = vrcp.f32 %v3728_v30  ;;  %v12357_v30 = vmul.f32 %v12021_v37, %v11927_v27  ;;  %v12375_v27 = vmul.f32 %v12105_v52, %v14733_v17  ;;  %v12393_v17 = vmul.f32 %v12302_v10, %v12071_v51 }
 0x4f4   : > { %v12337_v42 = vpop.eup %7572  ;;  %7590 = vrcp.f32 %v3729_v16  ;;  %v12371_v16 = vmul.f32 %v12078_v14, %v14731_v47  ;;  %v12389_v47 = vmul.f32 %v12187_v29, %v12056_v3  ;;  %v12417_v33 = vmul.f32 %v12333_v34, %v12191_v1  ;;  %v14742_v1 = vld [vmem:[#allocation70_spill] sm:$0xff] }
 0x4f5   : > { %v12335_v39 = vpop.xlane.xlu0 %3410  ;;  %v12341_v36 = vpop.eup %7574  ;;  %14734 = vst [vmem:[#allocation35_spill] sm:$0xff] %v12375_v27  ;;  %14739 = vst [vmem:[#allocation126_spill] sm:$0xff] %v12393_v17  ;;  %vm14743_vm15 = vcmp.eq.s32.totalorder %v7914_v54, %v14742_v1  ;;  %v14746_v17 = vld [vmem:[#allocation71_spill] sm:$0xff]  ;;  %v14770_v27 = vld [vmem:[#allocation37_spill] sm:$0xff] }
 0x4f6   : > { %14725 = vst [vmem:[#allocation228_spill] sm:$0xff] %v12335_v39  ;;  %vm3412_vm10 = vcmp.eq.f32.partialorder %v14726_v9, %v12335_v39  ;;  %v12351_v28 = vpop.xlane.xlu1 %3424  ;;  %v12353_v44 = vpop.eup %7576  ;;  %v12361_v9 = vmul.f32 %v12026_v62, %v11931_v6  ;;  %v14729_v39 = vld [vmem:[#allocation59_spill] sm:$0xff]  ;;  %14732 = vst [vmem:[#allocation214_spill] sm:$0xff] %v12371_v16  ;;  %v12429_v25 = vmul.f32 %v12341_v36, %v12265_v57 }
 0x4f7   : > { %14727 = vst [vmem:[#allocation120_spill] sm:$0xff] %v12351_v28  ;;  %v3413_v11 = vsel %vm3412_vm10, %v3408_v12, inf  ;;  %vm3426_vm12 = vcmp.eq.f32.partialorder %v14728_v13, %v12351_v28  ;;  %v12365_v18 = vpop.eup %7578  ;;  %v14730_v12 = vld [vmem:[#allocation123_spill] sm:$0xff]  ;;  %14738 = vst [vmem:[#allocation36_spill] sm:$0xff] %v12389_v47  ;;  %vm14747_vm8 = vcmp.eq.s32.totalorder %v7914_v54, %v14746_v17 }
 0x4f8   : > { %3414 = vmin.xlane.f32.xlu0 %v3413_v11  ;;  %v3542_v50 = vsub.f32 %v14730_v12, %v14729_v39  ;;  %v3427_v53 = vsel %vm3426_vm12, %v3422_v24, inf  ;;  %v12379_v23 = vpop.eup %7580  ;;  %v14735_v13 = vld [vmem:[#allocation163_spill] sm:$0xff]  ;;  %v14736_v11 = vld [vmem:[#allocation28_spill] sm:$0xff]  ;;  %v12385_v39 = vmul.f32 %v12163_v59, %v12036_v19  ;;  %v3730_v24 = vadd.f32 1.0, %v12353_v44 }
 0x4f9   : > { %v12377_v6 = vpop.xlane.xlu0 %2910  ;;  %v3543_v28 = vsub.f32 %v14736_v11, %v14735_v13  ;;  %3428 = vmin.xlane.f32.xlu1 %v3427_v53  ;;  %v12400_v13 = vmul.f32 %v12306_v7, %v12109_v43  ;;  %v4040_v19 = vmul.f32 %v12322_v63, %v12117_v31  ;;  %v12406_v53 = vmul.f32 %v12325_v32, %v12145_v5 }
 0x4fa   : > { %14737 = vst [vmem:[#allocation2_spill] sm:$0xff] %v12385_v39  ;;  %v12396_v12 = vpop.xlane.xlu1 %2924  ;;  %v12408_v3 = vpop.eup %7582  ;;  %v3731_v51 = vadd.f32 1.0, %v12365_v18  ;;  %v12413_v11 = vmul.f32 %v12330_v40, %v12149_v8  ;;  %v12421_v43 = vmul.f32 %v12337_v42, %v12227_v0  ;;  %v3650_v5 = vmul.f32 1.442695, %v3542_v50  ;;  %v14745_v50 = vld [vmem:[#allocation25_spill] sm:$0xff] }
 0x4fb   : > { %14740 = vst [vmem:[#allocation125_spill] sm:$0xff] %v12400_v13  ;;  %v12423_v31 = vpop.eup %7584  ;;  %v12433_v8 = vmul.f32 %v12379_v23, %v12270_v56  ;;  %v12439_v7 = vsel %vm14743_vm15, %v12001_v60, 0.0  ;;  %v3652_v10 = vmul.f32 1.442695, %v3543_v28  ;;  %v2969_v13 = vcvt.f32.s32 %v14745_v50  ;;  %v14748_v56 = vld [vmem:[#allocation13_spill] sm:$0xff]  ;;  %v14752_v28 = vld [vmem:[#allocation175_spill] sm:$0xff] }
 0x4fc   : > { %v12441_v0 = vpop.eup %7586  ;;  %v12448_v57 = vsel %vm14747_vm8, %v12014_v41, 0.0  ;;  %vm14749_vm2 = vcmp.eq.s32.totalorder %v7914_v54, %v14748_v56  ;;  %7592 = vrcp.f32 %v3730_v24  ;;  %v3732_v60 = vadd.f32 1.0, %v12408_v3  ;;  %v14755_v41 = vld [vmem:[#allocation15_spill] sm:$0xff] }
 0x4fd   : > { %v12425_v55 = vpop.xlane.xlu0 %2938  ;;  %14744 = vst [vmem:[#allocation122_spill] sm:$0xff] %v12441_v0  ;;  %v12454_v47 = vsel %vm14749_vm2, %v12021_v37, 0.0  ;;  %vm14753_vm3 = vcmp.eq.s32.totalorder %v7914_v54, %v14752_v28  ;;  %vm14756_vm7 = vcmp.eq.s32.totalorder %v7914_v54, %v14755_v41  ;;  %v12471_v56 = vpop.eup %7588  ;;  %7594 = vrcp.f32 %v3731_v51  ;;  %v14758_v37 = vld [vmem:[#allocation53_spill] sm:$0xff]  ;;  %v14759_v28 = vld [vmem:[#allocation174_spill] sm:$0xff] }
 0x4fe   : > { %14741 = vst [vmem:[#allocation128_spill] sm:$0xff] %v12425_v55  ;;  %14750 = vst [vmem:[#allocation229_spill] sm:$0xff] %v12454_v47  ;;  %v12457_v1 = vpop.xlane.xlu1 %2952  ;;  %v12463_v50 = vsel %vm14753_vm3, %v12026_v62, 0.0  ;;  %v12469_v17 = vsel %vm14756_vm7, %v12078_v14, 0.0  ;;  %v2983_v24 = vcvt.f32.s32 %v14758_v37  ;;  %v12476_v39 = vmul.f32 %v12423_v31, %v12297_v46  ;;  %v14762_v41 = vld [vmem:[#allocation85_spill] sm:$0xff]  ;;  %v14765_v46 = vld [vmem:[#allocation84_spill] sm:$0xff] }
 0x4ff   : > { %14751 = vst [vmem:[#allocation33_spill] sm:$0xff] %v12457_v1  ;;  %14754 = vst [vmem:[#allocation230_spill] sm:$0xff] %v12463_v50  ;;  %vm14760_vm9 = vcmp.eq.s32.totalorder %v7914_v54, %v14759_v28  ;;  %v3733_v50 = vadd.f32 1.0, %v12441_v0  ;;  %7596 = vpow2.f32 %v3650_v5  ;;  %vm14763_vm1 = vcmp.eq.s32.totalorder %v7914_v54, %v14762_v41  ;;  %v14768_v28 = vld [vmem:[#allocation26_spill] sm:$0xff] }
 0x500   : > { %14757 = vst [vmem:[#allocation34_spill] sm:$0xff] %v12469_v17  ;;  %v12482_v62 = vsel %vm14760_vm9, %v12105_v52, 0.0  ;;  %v12489_v51 = vsel %vm14763_vm1, %v12163_v59, 0.0  ;;  %vm14766_vm0 = vcmp.eq.s32.totalorder %v7914_v54, %v14765_v46  ;;  %v12497_v17 = vpop.eup %7590  ;;  %7598 = vpow2.f32 %v3652_v10  ;;  %v14773_v10 = vld [vmem:[#allocation54_spill] sm:$0xff] }
 0x501   : > { %14761 = vst [vmem:[#allocation131_spill] sm:$0xff] %v12482_v62  ;;  %v2967_v14 = vpop.xlane.xlu0 %2966  ;;  %14764 = vst [vmem:[#allocation215_spill] sm:$0xff] %v12489_v51  ;;  %v12495_v37 = vsel %vm14766_vm0, %v12187_v29, 0.0  ;;  %v2970_v52 = vshll.u32 %v2969_v13, 16  ;;  %v2997_v0 = vcvt.f32.s32 %v14768_v28  ;;  %7600 = vrcp.f32 %v3732_v60  ;;  %v14769_v62 = vld [vmem:[#allocation65_spill] sm:$0xff]  ;;  %v14771_v29 = vld [vmem:[#allocation18_spill] sm:$0xff] }
 0x502   : > { %14767 = vst [vmem:[#allocation127_spill] sm:$0xff] %v12495_v37  ;;  %v2968_v5 = vcvt.f32.s32 %v2967_v14  ;;  %v3544_v16 = vsub.f32 %v14770_v27, %v14769_v62  ;;  %v2981_v41 = vpop.xlane.xlu1 %2980  ;;  %v12504_v59 = vmul.f32 %v12471_v56, %v12310_v48  ;;  %vm14772_vm14 = vcmp.eq.s32.totalorder %v7914_v54, %v14771_v29  ;;  %v14774_v60 = vld [vmem:[#allocation27_spill] sm:$0xff] }
 0x503   : > { %v3912_v46 = vsel %vm14772_vm14, %v12322_v63, 0.0  ;;  %v2984_v37 = vshll.u32 %v2983_v24, 16  ;;  %v3011_v13 = vcvt.f32.s32 %v14773_v10  ;;  %v2982_v28 = vcvt.f32.s32 %v2981_v41  ;;  %v14775_v48 = vld [vmem:[#allocation91_spill] sm:$0xff]  ;;  %v14779_v10 = vld [vmem:[#allocation60_spill] sm:$0xff] }
 0x504   : > { %v2971_v51 = vadd.s32 %v2970_v52, %v2968_v5  ;;  %7602 = vrcp.f32 %v3733_v50  ;;  %v3025_v14 = vcvt.f32.s32 %v14774_v60  ;;  %v12514_v27 = vmul.f32 %v12497_v17, %v12317_v2  ;;  %v14777_v5 = vld [vmem:[#allocation167_spill] sm:$0xff] }
 0x505   : > { %v2995_v47 = vpop.xlane.xlu0 %2994  ;;  %vm14776_vm11 = vcmp.eq.s32.totalorder %v7914_v54, %v14775_v48  ;;  %v2998_v29 = vshll.u32 %v2997_v0, 16  ;;  %v2985_v63 = vadd.s32 %v2984_v37, %v2982_v28  ;;  %v3654_v52 = vmul.f32 1.442695, %v3544_v16  ;;  %v14778_v50 = vld [vmem:[#allocation139_spill] sm:$0xff] }
 0x506   : > { %v3913_v62 = vsel %vm14776_vm11, %v12325_v32, 0.0  ;;  %vm3464_vm4 = vcmp.eq.s32.totalorder %v7914_v54, %v2971_v51  ;;  %v2996_v24 = vcvt.f32.s32 %v2995_v47  ;;  %v3545_v41 = vsub.f32 %v14778_v50, %v14777_v5  ;;  %v3009_v4 = vpop.xlane.xlu1 %3008  ;;  %v12525_v48 = vpop.eup %7592  ;;  %v14780_v0 = vld [vmem:[#allocation31_spill] sm:$0xff] }
 0x507   : > { %v3039_v60 = vcvt.f32.s32 %v14779_v10  ;;  %v4104_v58 = vsel %vm3464_vm4, %v4040_v19, 0.0  ;;  %v3012_v2 = vshll.u32 %v3011_v13, 16  ;;  %vm3465_vm5 = vcmp.eq.s32.totalorder %v7914_v54, %v2985_v63  ;;  %v12531_v28 = vpop.eup %7594 }
 0x508   : > { %v2999_v1 = vadd.s32 %v2998_v29, %v2996_v24  ;;  %v3010_v55 = vcvt.f32.s32 %v3009_v4  ;;  %v3026_v32 = vshll.u32 %v3025_v14, 16  ;;  %v3053_v51 = vcvt.f32.s32 %v14780_v0 }
 0x509   : > { %v4105_v47 = vsel %vm3465_vm5, %v12406_v53, 0.0  ;;  %v3023_v16 = vpop.xlane.xlu0 %3022  ;;  %v12529_v37 = vadd.f32 %v4104_v58, %v3912_v46  ;;  %v12536_v29 = vpop.eup %7596  ;;  %v3656_v4 = vmul.f32 1.442695, %v3545_v41  ;;  %v3040_v63 = vshll.u32 %v3039_v60, 16  ;;  %v14781_v53 = vld [vmem:[#allocation19_spill] sm:$0xff]  ;;  %v14783_v60 = vld [vmem:[#allocation182_spill] sm:$0xff] }
 0x50a   : > { %vm3466_vm13 = vcmp.eq.s32.totalorder %v7914_v54, %v2999_v1  ;;  %v3013_v19 = vadd.s32 %v3012_v2, %v3010_v55  ;;  %v3024_v13 = vcvt.f32.s32 %v3023_v16  ;;  %v12534_v5 = vadd.f32 %v4105_v47, %v3913_v62  ;;  %v3037_v24 = vpop.xlane.xlu1 %3036  ;;  %v12543_v46 = vpop.eup %7598 }
 0x50b   : > { %v4106_v14 = vsel %vm3466_vm13, %v12413_v11, 0.0  ;;  %vm14782_vm6 = vcmp.eq.s32.totalorder %v7914_v54, %v14781_v53  ;;  %v3038_v1 = vcvt.f32.s32 %v3037_v24  ;;  %v12548_v50 = vpop.eup %7600  ;;  %v3054_v41 = vshll.u32 %v3053_v51, 16  ;;  %v14788_v24 = vld [vmem:[#allocation142_spill] sm:$0xff] }
 0x50c   : > { %v3914_v58 = vsel %vm14782_vm6, %v12330_v40, 0.0  ;;  %vm3467_vm10 = vcmp.eq.s32.totalorder %v7914_v54, %v3013_v19  ;;  %v3027_v55 = vadd.s32 %v3026_v32, %v3024_v13  ;;  %vm14784_vm12 = vcmp.eq.s32.totalorder %v7914_v54, %v14783_v60 }
 0x50d   : > { %v4107_v11 = vsel %vm3467_vm10, %v12417_v33, 0.0  ;;  %v3051_v10 = vpop.xlane.xlu0 %3050  ;;  %v3915_v40 = vsel %vm14784_vm12, %v12333_v34, 0.0  ;;  %v12555_v2 = vadd.f32 %v4106_v14, %v3914_v58  ;;  %v3041_v32 = vadd.s32 %v3040_v63, %v3038_v1  ;;  %v14787_v14 = vld [vmem:[#allocation170_spill] sm:$0xff]  ;;  %v14789_v58 = vld [vmem:[#allocation61_spill] sm:$0xff] }
 0x50e   : > { %vm3468_vm15 = vcmp.eq.s32.totalorder %v7914_v54, %v3027_v55  ;;  %v3052_v0 = vcvt.f32.s32 %v3051_v10  ;;  %v12558_v47 = vadd.f32 %v4107_v11, %v3915_v40  ;;  %v12560_v16 = vpop.eup %7602  ;;  %v3734_v51 = vadd.f32 1.0, %v12536_v29  ;;  %v14790_v1 = vld [vmem:[#allocation77_spill] sm:$0xff]  ;;  %v14792_v10 = vld [vmem:[#allocation102_spill] sm:$0xff] }
 0x50f   : > { %14785 = vst [vmem:[#allocation3_spill] sm:$0xff] %v12555_v2  ;;  %v3735_v33 = vadd.f32 1.0, %v12543_v46  ;;  %7604 = vpow2.f32 %v3654_v52  ;;  %v12566_v19 = vmul.f32 %v12525_v48, %v12353_v44  ;;  %v4108_v34 = vsel %vm3468_vm15, %v12421_v43, 0.0  ;;  %v14791_v11 = vld [vmem:[#allocation153_spill] sm:$0xff]  ;;  %v14812_v2 = vld [vmem:[#allocation48_spill] sm:$0xff] }
 0x510   : > { %14786 = vst [vmem:[#allocation49_spill] sm:$0xff] %v12558_v47  ;;  %vm3469_vm8 = vcmp.eq.s32.totalorder %v7914_v54, %v3041_v32  ;;  %v3055_v13 = vadd.s32 %v3054_v41, %v3052_v0  ;;  %7606 = vpow2.f32 %v3656_v4  ;;  %v3546_v53 = vsub.f32 %v14788_v24, %v14787_v14  ;;  %v14793_v43 = vld [vmem:[#allocation97_spill] sm:$0xff]  ;;  %v14795_v4 = vld [vmem:[#allocation186_spill] sm:$0xff]  ;;  %v14797_v32 = vld [vmem:[#allocation172_spill] sm:$0xff] }
 0x511   : > { %v3067_v55 = vcvt.f32.s32 %v14789_v58  ;;  %v4109_v52 = vsel %vm3469_vm8, %v12429_v25, 0.0  ;;  %v3547_v44 = vsub.f32 %v14791_v11, %v14790_v1  ;;  %v2829_v60 = vcvt.f32.s32 %v14792_v10  ;;  %v14800_v24 = vld [vmem:[#allocation20_spill] sm:$0xff] }
 0x512   : > { %vm14794_vm2 = vcmp.eq.s32.totalorder %v7914_v54, %v14793_v43  ;;  %vm14796_vm3 = vcmp.eq.s32.totalorder %v7914_v54, %v14795_v4  ;;  %7608 = vrcp.f32 %v3734_v51  ;;  %v2843_v0 = vcvt.f32.s32 %v14797_v32  ;;  %v14801_v43 = vld [vmem:[#allocation32_spill] sm:$0xff]  ;;  %v14802_v4 = vld [vmem:[#allocation178_spill] sm:$0xff] }
 0x513   : > { %v3916_v41 = vsel %vm14794_vm2, %v12337_v42, 0.0  ;;  %v3917_v40 = vsel %vm14796_vm3, %v12341_v36, 0.0  ;;  %7610 = vrcp.f32 %v3735_v33  ;;  %v2857_v58 = vcvt.f32.s32 %v14800_v24  ;;  %v14803_v24 = vld [vmem:[#allocation96_spill] sm:$0xff] }
 0x514   : > { %v12588_v14 = vadd.f32 %v4108_v34, %v3916_v41  ;;  %v12590_v25 = vadd.f32 %v4109_v52, %v3917_v40  ;;  %v3065_v1 = vpop.xlane.xlu1 %3064  ;;  %v12595_v11 = vmul.f32 %v12531_v28, %v12365_v18  ;;  %v12599_v42 = vmul.f32 %v12548_v50, %v12408_v3 }
 0x515   : > { %v3068_v36 = vshll.u32 %v3067_v55, 16  ;;  %vm3470_vm7 = vcmp.eq.s32.totalorder %v7914_v54, %v3055_v13  ;;  %v3066_v51 = vcvt.f32.s32 %v3065_v1  ;;  %v12604_v52 = vmul.f32 1.442695, %v3546_v53 }
 0x516   : > { %14798 = vst [vmem:[#allocation45_spill] sm:$0xff] %v12588_v14  ;;  %14799 = vst [vmem:[#allocation231_spill] sm:$0xff] %v12590_v25  ;;  %v12606_v33 = vmul.f32 1.442695, %v3547_v44  ;;  %v2830_v10 = vshll.u32 %v2829_v60, 16  ;;  %v3081_v41 = vcvt.f32.s32 %v14801_v43  ;;  %v2844_v18 = vshll.u32 %v2843_v0, 16 }
 0x517   : > { %v2871_v40 = vcvt.f32.s32 %v14802_v4  ;;  %v2828_v3 = vcvt.f32.s32 %v12255_v45  ;;  %v3069_v32 = vadd.s32 %v3068_v36, %v3066_v51  ;;  %v2858_v55 = vshll.u32 %v2857_v58, 16  ;;  %v14804_v44 = vld [vmem:[#allocation179_spill] sm:$0xff]  ;;  %v14805_v60 = vld [vmem:[#allocation180_spill] sm:$0xff]  ;;  %v14806_v45 = vld [vmem:[#allocation98_spill] sm:$0xff] }
 0x518   : > { %v2885_v13 = vcvt.f32.s32 %v14803_v24  ;;  %v2842_v1 = vcvt.f32.s32 %v12262_v15  ;;  %v4110_v34 = vsel %vm3470_vm7, %v12433_v8, 0.0  ;;  %v2899_v63 = vcvt.f32.s32 %v14804_v44  ;;  %v14808_v8 = vld [vmem:[#allocation21_spill] sm:$0xff] }
 0x519   : > { %v12614_v53 = vpop.eup %7604  ;;  %v2913_v62 = vcvt.f32.s32 %v14805_v60  ;;  %vm3471_vm9 = vcmp.eq.s32.totalorder %v7914_v54, %v3069_v32  ;;  %vm14807_vm1 = vcmp.eq.s32.totalorder %v7914_v54, %v14806_v45  ;;  %v3082_v36 = vshll.u32 %v3081_v41, 16  ;;  %v14810_v45 = vld [vmem:[#allocation44_spill] sm:$0xff] }
 0x51a   : > { %v3079_v0 = vpop.xlane.xlu0 %3078  ;;  %v3918_v58 = vsel %vm14807_vm1, %v12379_v23, 0.0  ;;  %v4111_v51 = vsel %vm3471_vm9, %v12476_v39, 0.0  ;;  %vm14809_vm0 = vcmp.eq.s32.totalorder %v7914_v54, %v14808_v8  ;;  %v12628_v4 = vpop.eup %7606  ;;  %v2831_v24 = vadd.s32 %v2830_v10, %v2828_v3  ;;  %v14811_v8 = vld [vmem:[#allocation24_spill] sm:$0xff] }
 0x51b   : > { %v3080_v15 = vcvt.f32.s32 %v3079_v0  ;;  %v3919_v43 = vsel %vm14809_vm0, %v12423_v31, 0.0  ;;  %v2856_v32 = vcvt.f32.s32 %v12289_v61  ;;  %v12631_v44 = vadd.f32 %v4110_v34, %v3918_v58 }
 0x51c   : > { %v12633_v60 = vadd.f32 %v4111_v51, %v3919_v43  ;;  %v2927_v23 = vcvt.f32.s32 %v14810_v45  ;;  %v2845_v41 = vadd.s32 %v2844_v18, %v2842_v1  ;;  %v2870_v39 = vcvt.f32.s32 %v12294_v20  ;;  %v12637_v14 = vpop.eup %7608  ;;  %v14813_v51 = vld [vmem:[#allocation67_spill] sm:$0xff] }
 0x51d   : > { %v3083_v0 = vadd.s32 %v3082_v36, %v3080_v15  ;;  %v2872_v25 = vshll.u32 %v2871_v40, 16  ;;  %v2941_v31 = vcvt.f32.s32 %v14811_v8  ;;  %v2955_v47 = vcvt.f32.s32 %v14812_v2  ;;  %v12643_v34 = vpop.eup %7610  ;;  %v14814_v15 = vld [vmem:[#allocation40_spill] sm:$0xff] }
 0x51e   : > { %v5886_v61 = vpack.c.bf16 %v12633_v60, %v12631_v44  ;;  %v2886_v10 = vshll.u32 %v2885_v13, 16  ;;  %v2900_v3 = vshll.u32 %v2899_v63, 16  ;;  %v2914_v58 = vshll.u32 %v2913_v62, 16  ;;  %v14815_v13 = vld [vmem:[#allocation222_spill] sm:$0xff] }
 0x51f   : > { %v3095_v18 = vcvt.f32.s32 %v14813_v51  ;;  %vm3454_vm14 = vcmp.eq.s32.totalorder %v7914_v54, %v2831_v24  ;;  %v2859_v20 = vadd.s32 %v2858_v55, %v2856_v32  ;;  %v2884_v1 = vcvt.f32.s32 %v12319_v26  ;;  %v14816_v51 = vld [vmem:[#allocation192_spill] sm:$0xff] }
 0x520   : > { %v2898_v40 = vcvt.f32.s32 %v12327_v21  ;;  %v2928_v36 = vshll.u32 %v2927_v23, 16  ;;  %v3109_v2 = vcvt.f32.s32 %v14814_v15  ;;  %vm3455_vm11 = vcmp.eq.s32.totalorder %v7914_v54, %v2845_v41 }
 0x521   : > { %v2873_v43 = vadd.s32 %v2872_v25, %v2870_v39  ;;  %v2942_v45 = vshll.u32 %v2941_v31, 16  ;;  %v2956_v8 = vshll.u32 %v2955_v47, 16  ;;  %v3123_v63 = vcvt.f32.s32 %v14815_v13  ;;  %v14818_v39 = vld [vmem:[#allocation22_spill] sm:$0xff]  ;;  %v14825_v13 = vld [vmem:[#allocation83_spill] sm:$0xff] }
 0x522   : > { %vm14817_vm4 = vcmp.eq.s32.totalorder %v7914_v54, %v14816_v51  ;;  %v3096_v24 = vshll.u32 %v3095_v18, 16  ;;  %v4094_v26 = vsel %vm3454_vm14, %v12345_v49, 0.0  ;;  %vm3472_vm5 = vcmp.eq.s32.totalorder %v7914_v54, %v3083_v0 }
 0x523   : > { %v3093_v62 = vpop.xlane.xlu1 %3092  ;;  %v3920_v55 = vsel %vm14817_vm4, %v12471_v56, 0.0  ;;  %v4095_v32 = vsel %vm3455_vm11, %v12349_v38, 0.0  ;;  %vm3456_vm13 = vcmp.eq.s32.totalorder %v7914_v54, %v2859_v20  ;;  %v2887_v25 = vadd.s32 %v2886_v10, %v2884_v1 }
 0x524   : > { %v3094_v21 = vcvt.f32.s32 %v3093_v62  ;;  %v2901_v47 = vadd.s32 %v2900_v3, %v2898_v40  ;;  %v3110_v23 = vshll.u32 %v3109_v2, 16  ;;  %vm3457_vm6 = vcmp.eq.s32.totalorder %v7914_v54, %v2873_v43  ;;  %v14822_v40 = vld [vmem:[#allocation220_spill] sm:$0xff]  ;;  %v14823_v2 = vld [vmem:[#allocation33_spill] sm:$0xff]  ;;  %v14824_v43 = vld [vmem:[#allocation151_spill] sm:$0xff] }
 0x525   : > { %vm14819_vm10 = vcmp.eq.s32.totalorder %v7914_v54, %v14818_v39  ;;  %v3124_v31 = vshll.u32 %v3123_v63, 16  ;;  %v2912_v49 = vcvt.f32.s32 %v12377_v6  ;;  %v2926_v0 = vcvt.f32.s32 %v12396_v12  ;;  %v3107_v12 = vpop.xlane.xlu0 %3106  ;;  %v14830_v39 = vld [vmem:[#allocation230_spill] sm:$0xff] }
 0x526   : > { %v3097_v41 = vadd.s32 %v3096_v24, %v3094_v21  ;;  %v3921_v56 = vsel %vm14819_vm10, %v12497_v17, 0.0  ;;  %v4112_v38 = vsel %vm3472_vm5, %v12504_v59, 0.0  ;;  %v14820_v10 = vpack.c.bf16 %v12222_v35, %v12220_v22  ;;  %v14821_v59 = vld [vmem:[#allocation128_spill] sm:$0xff]  ;;  %v14827_v24 = vld [vmem:[#allocation229_spill] sm:$0xff]  ;;  %v14828_v21 = vld [vmem:[#allocation214_spill] sm:$0xff] }
 0x527   : > { %v4096_v3 = vsel %vm3456_vm13, %v12357_v30, 0.0  ;;  %v4158_v18 = vadd.f32 %v4094_v26, %v12439_v7  ;;  %v4159_v20 = vadd.f32 %v4095_v32, %v12448_v57  ;;  %v4097_v17 = vsel %vm3457_vm6, %v12361_v9, 0.0 }
 0x528   : > { %5948 = vxpose.xlu0.c.b16.start [1/8] %v14820_v10, 128  ;;  %vm3473_vm12 = vcmp.eq.s32.totalorder %v7914_v54, %v3097_v41  ;;  %vm3458_vm15 = vcmp.eq.s32.totalorder %v7914_v54, %v2887_v25  ;;  %vm3459_vm8 = vcmp.eq.s32.totalorder %v7914_v54, %v2901_v47  ;;  %v2940_v22 = vcvt.f32.s32 %v14821_v59  ;;  %v14833_v10 = vld [vmem:[#allocation34_spill] sm:$0xff] }
 0x529   : > { %v4113_v6 = vsel %vm3473_vm12, %v12514_v27, 0.0  ;;  %v3108_v35 = vcvt.f32.s32 %v3107_v12  ;;  %v12680_v1 = vadd.f32 %v4112_v38, %v3920_v55  ;;  %v3137_v7 = vcvt.f32.s32 %v14822_v40 }
 0x52a   : > { %v12682_v30 = vadd.f32 %v4113_v6, %v3921_v56  ;;  %v2915_v15 = vadd.s32 %v2914_v58, %v2912_v49  ;;  %v2929_v57 = vadd.s32 %v2928_v36, %v2926_v0  ;;  %v2954_v9 = vcvt.f32.s32 %v14823_v2  ;;  %v14829_v58 = vld [vmem:[#allocation35_spill] sm:$0xff] }
 0x52b   : > { %v14826_v63 = vpack.c.bf16 %v14824_v43, %v14825_v13  ;;  %v3111_v62 = vadd.s32 %v3110_v23, %v3108_v35  ;;  %v5878_v27 = vpack.c.bf16 %v4159_v20, %v4158_v18  ;;  %v3121_v51 = vpop.xlane.xlu1 %3120  ;;  %v4160_v26 = vadd.f32 %v4096_v3, %v14827_v24  ;;  %v14831_v49 = vld [vmem:[#allocation103_spill] sm:$0xff]  ;;  %v14835_v18 = vld [vmem:[#allocation109_spill] sm:$0xff]  ;;  %v14843_v43 = vld [vmem:[#allocation62_spill] sm:$0xff] }
 0x52c   : > { %v5887_v55 = vpack.c.bf16 %v12682_v30, %v12680_v1  ;;  %v4098_v32 = vsel %vm3458_vm15, %v14828_v21, 0.0  ;;  %v4099_v36 = vsel %vm3459_vm8, %v14829_v58, 0.0  ;;  %v3122_v41 = vcvt.f32.s32 %v3121_v51  ;;  %v14845_v24 = vld [vmem:[#allocation127_spill] sm:$0xff]  ;;  %v14846_v58 = vld [vmem:[#allocation126_spill] sm:$0xff] }
 0x52d   : > { %5949 = vxpose.xlu0.c.b16.cont [2/8] %v14826_v63, 128  ;;  %v4161_v56 = vadd.f32 %v4097_v17, %v14830_v39  ;;  %7612 = vpow2.f32 %v12604_v52  ;;  %v2943_v23 = vadd.s32 %v2942_v45, %v2940_v22  ;;  %vm3474_vm2 = vcmp.eq.s32.totalorder %v7914_v54, %v3111_v62  ;;  %v14834_v52 = vld [vmem:[#allocation131_spill] sm:$0xff] }
 0x52e   : > { %vm14832_vm3 = vcmp.eq.s32.totalorder %v7914_v54, %v14831_v49  ;;  %vm3460_vm7 = vcmp.eq.s32.totalorder %v7914_v54, %v2915_v15  ;;  %vm3461_vm9 = vcmp.eq.s32.totalorder %v7914_v54, %v2929_v57  ;;  %v2957_v25 = vadd.s32 %v2956_v8, %v2954_v9  ;;  %v14838_v8 = vld [vmem:[#allocation2_spill] sm:$0xff]  ;;  %v14840_v15 = vld [vmem:[#allocation177_spill] sm:$0xff]  ;;  %v14848_v49 = vld [vmem:[#allocation116_spill] sm:$0xff] }
 0x52f   : > { %v3922_v0 = vsel %vm14832_vm3, %v12525_v48, 0.0  ;;  %v3125_v47 = vadd.s32 %v3124_v31, %v3122_v41  ;;  %v4114_v38 = vsel %vm3474_vm2, %v12566_v19, 0.0  ;;  %v4162_v3 = vadd.f32 %v4098_v32, %v14833_v10  ;;  %v14837_v48 = vld [vmem:[#allocation75_spill] sm:$0xff]  ;;  %v14839_v31 = vld [vmem:[#allocation36_spill] sm:$0xff]  ;;  %v14841_v57 = vld [vmem:[#allocation154_spill] sm:$0xff] }
 0x530   : > { %v4163_v45 = vadd.f32 %v4099_v36, %v14834_v52  ;;  %vm14836_vm1 = vcmp.eq.s32.totalorder %v7914_v54, %v14835_v18  ;;  %v3138_v17 = vshll.u32 %v3137_v7, 16  ;;  %v3151_v6 = vcvt.f32.s32 %v14837_v48  ;;  %v14842_v9 = vld [vmem:[#allocation173_spill] sm:$0xff] }
 0x531   : > { %5950 = vxpose.xlu0.c.b16.cont [3/8] %v5878_v27, 128  ;;  %v3923_v20 = vsel %vm14836_vm1, %v12531_v28, 0.0  ;;  %vm3475_vm0 = vcmp.eq.s32.totalorder %v7914_v54, %v3125_v47  ;;  %v5879_v12 = vpack.c.bf16 %v4161_v56, %v4160_v26  ;;  %v4100_v59 = vsel %vm3460_vm7, %v14838_v8, 0.0  ;;  %v14844_v27 = vld [vmem:[#allocation215_spill] sm:$0xff]  ;;  %v14847_v36 = vld [vmem:[#allocation125_spill] sm:$0xff] }
 0x532   : > { %v4101_v22 = vsel %vm3461_vm9, %v14839_v31, 0.0  ;;  %vm3462_vm14 = vcmp.eq.s32.totalorder %v7914_v54, %v2943_v23  ;;  %v4115_v19 = vsel %vm3475_vm0, %v12595_v11, 0.0  ;;  %v3135_v35 = vpop.xlane.xlu0 %3134  ;;  %vm3463_vm11 = vcmp.eq.s32.totalorder %v7914_v54, %v2957_v25  ;;  %v14852_v10 = vld [vmem:[#allocation185_spill] sm:$0xff] }
 0x533   : > { %v3136_v40 = vcvt.f32.s32 %v3135_v35  ;;  %v12721_v28 = vadd.f32 %v4114_v38, %v3922_v0  ;;  %v12723_v7 = vadd.f32 %v4115_v19, %v3923_v20  ;;  %7614 = vpow2.f32 %v12606_v33  ;;  %v3149_v11 = vpop.xlane.xlu1 %3148  ;;  %v14849_v0 = vld [vmem:[#allocation17_spill] sm:$0xff]  ;;  %v14851_v38 = vld [vmem:[#allocation115_spill] sm:$0xff]  ;;  %v14858_v19 = vld [vmem:[#allocation68_spill] sm:$0xff] }
 0x534   : > { %v3548_v2 = vsub.f32 %v14841_v57, %v14840_v15  ;;  %v3549_v13 = vsub.f32 %v14843_v43, %v14842_v9  ;;  %v5880_v63 = vpack.c.bf16 %v4163_v45, %v4162_v3  ;;  %v4164_v51 = vadd.f32 %v4100_v59, %v14844_v27  ;;  %v14854_v45 = vld [vmem:[#allocation122_spill] sm:$0xff]  ;;  %v14859_v35 = vld [vmem:[#allocation80_spill] sm:$0xff] }
 0x535   : > { %5951 = vxpose.xlu0.c.b16.cont [4/8] %v5879_v12, 128  ;;  %v3139_v62 = vadd.s32 %v3138_v17, %v3136_v40  ;;  %v4165_v26 = vadd.f32 %v4101_v22, %v14845_v24  ;;  %v5888_v21 = vpack.c.bf16 %v12723_v7, %v12721_v28  ;;  %v3152_v32 = vshll.u32 %v3151_v6, 16  ;;  %v14855_v12 = vld [vmem:[#allocation193_spill] sm:$0xff]  ;;  %v14860_v57 = vld [vmem:[#allocation196_spill] sm:$0xff]  ;;  %v14864_v27 = vld [vmem:[#allocation6_spill] sm:$0xff] }
 0x536   : > { %v4102_v33 = vsel %vm3462_vm14, %v14846_v58, 0.0  ;;  %v4103_v41 = vsel %vm3463_vm11, %v14847_v36, 0.0  ;;  %v3150_v39 = vcvt.f32.s32 %v3149_v11  ;;  %v3736_v56 = vadd.f32 1.0, %v12614_v53  ;;  %v14857_v22 = vld [vmem:[#allocation181_spill] sm:$0xff]  ;;  %v14863_v11 = vld [vmem:[#allocation78_spill] sm:$0xff] }
 0x537   : > { %vm3476_vm4 = vcmp.eq.s32.totalorder %v7914_v54, %v3139_v62  ;;  %vm14850_vm5 = vcmp.eq.s32.totalorder %v7914_v54, %v14849_v0  ;;  %vm14853_vm13 = vcmp.eq.s32.totalorder %v7914_v54, %v14852_v10  ;;  %v12750_v3 = vpop.eup %7612  ;;  %v3662_v25 = vmul.f32 1.442695, %v3548_v2  ;;  %v14865_v10 = vld [vmem:[#allocation166_spill] sm:$0xff] }
 0x538   : > { %v3910_v47 = vsel %vm14850_vm5, %v14848_v49, 0.0  ;;  %v3911_v23 = vsel %vm14853_vm13, %v14851_v38, 0.0  ;;  %v4116_v52 = vsel %vm3476_vm4, %v12599_v42, 0.0  ;;  %v4053_v18 = vmul.f32 %v12560_v16, %v14854_v45  ;;  %v14867_v45 = vld [vmem:[#allocation183_spill] sm:$0xff] }
 0x539   : > { %5952 = vxpose.xlu0.c.b16.cont [5/8] %v5880_v63, 128  ;;  %v3153_v20 = vadd.s32 %v3152_v32, %v3150_v39  ;;  %v5881_v17 = vpack.c.bf16 %v4165_v26, %v4164_v51  ;;  %v4166_v48 = vadd.f32 %v4102_v33, %v3910_v47  ;;  %v4167_v6 = vadd.f32 %v4103_v41, %v3911_v23 }
 0x53a   : > { %vm14856_vm6 = vcmp.eq.s32.totalorder %v7914_v54, %v14855_v12  ;;  %v3664_v59 = vmul.f32 1.442695, %v3549_v13  ;;  %v3550_v42 = vsub.f32 %v14858_v19, %v14857_v22  ;;  %v3165_v40 = vcvt.f32.s32 %v14859_v35  ;;  %v14875_v19 = vld [vmem:[#allocation92_spill] sm:$0xff] }
 0x53b   : > { %v3924_v8 = vsel %vm14856_vm6, %v12548_v50, 0.0  ;;  %vm3477_vm10 = vcmp.eq.s32.totalorder %v7914_v54, %v3153_v20  ;;  %vm14861_vm12 = vcmp.eq.s32.totalorder %v7914_v54, %v14860_v57  ;;  %v3737_v9 = vadd.f32 1.0, %v12628_v4  ;;  %v14862_v50 = vld [vmem:[#allocation158_spill] sm:$0xff] }
 0x53c   : > { %v12760_v31 = vadd.f32 %v4116_v52, %v3924_v8  ;;  %v4117_v15 = vsel %vm3477_vm10, %v4053_v18, 0.0  ;;  %v3925_v2 = vsel %vm14861_vm12, %v12560_v16, 0.0  ;;  %7616 = vpow2.f32 %v3662_v25  ;;  %v3163_v24 = vpop.xlane.xlu0 %3162  ;;  %v14868_v18 = vld [vmem:[#allocation76_spill] sm:$0xff]  ;;  %v14873_v8 = vld [vmem:[#allocation90_spill] sm:$0xff] }
 0x53d   : > { %5953 = vxpose.xlu0.c.b16.cont [6/8] %v5881_v17, 128  ;;  %v3179_v43 = vcvt.f32.s32 %v14862_v50  ;;  %v12771_v13 = vadd.f32 %v4117_v15, %v3925_v2  ;;  %7618 = vrcp.f32 %v3736_v56  ;;  %v5882_v63 = vpack.c.bf16 %v4167_v6, %v4166_v48  ;;  %v12773_v62 = vpop.eup %7614  ;;  %v3177_v33 = vpop.xlane.xlu1 %3176  ;;  %v14876_v2 = vld [vmem:[#allocation130_spill] sm:$0xff] }
 0x53e   : > { %7620 = vpow2.f32 %v3664_v59  ;;  %v3551_v51 = vsub.f32 %v14864_v27, %v14863_v11  ;;  %v3666_v16 = vmul.f32 1.442695, %v3550_v42  ;;  %v3166_v32 = vshll.u32 %v3165_v40, 16  ;;  %v14874_v59 = vld [vmem:[#allocation171_spill] sm:$0xff] }
 0x53f   : > { %v5889_v26 = vpack.c.bf16 %v12771_v13, %v12760_v31  ;;  %v3164_v58 = vcvt.f32.s32 %v3163_v24  ;;  %7622 = vrcp.f32 %v3737_v9  ;;  %v3180_v36 = vshll.u32 %v3179_v43, 16  ;;  %v14877_v9 = vld [vmem:[#allocation66_spill] sm:$0xff]  ;;  %v14879_v27 = vld [vmem:[#allocation187_spill] sm:$0xff] }
 0x540   : > { %v3178_v41 = vcvt.f32.s32 %v3177_v33  ;;  %v3738_v39 = vadd.f32 1.0, %v12750_v3  ;;  %v3739_v49 = vadd.f32 1.0, %v12773_v62  ;;  %v3668_v0 = vmul.f32 1.442695, %v3551_v51  ;;  %v14880_v51 = vld [vmem:[#allocation200_spill] sm:$0xff] }
 0x541   : > { %5954 = vxpose.xlu0.c.b16.cont [7/8] %v5882_v63, 128  ;;  %v3167_v56 = vadd.s32 %v3166_v32, %v3164_v58  ;;  %v4054_v47 = vmul.f32 %v12637_v14, %v12536_v29  ;;  %7624 = vpow2.f32 %v3666_v16  ;;  %v3193_v23 = vcvt.f32.s32 %v14865_v10  ;;  %v14869_v29 = vld [vmem:[#allocation29_spill] sm:$0xff] }
 0x542   : > { %v3181_v38 = vadd.s32 %v3180_v36, %v3178_v41  ;;  %v4055_v25 = vmul.f32 %v12643_v34, %v12543_v46  ;;  %v14866_v52 = vpack.c.bf16 %v12534_v5, %v12529_v37  ;;  %v3552_v20 = vsub.f32 %v14868_v18, %v14867_v45  ;;  %v14871_v46 = vld [vmem:[#allocation30_spill] sm:$0xff]  ;;  %v14884_v10 = vld [vmem:[#allocation73_spill] sm:$0xff] }
 0x543   : > { %vm3478_vm15 = vcmp.eq.s32.totalorder %v7914_v54, %v3167_v56  ;;  %vm14870_vm2 = vcmp.eq.s32.totalorder %v7914_v54, %v14869_v29  ;;  %7626 = vrcp.f32 %v3738_v39  ;;  %vm14872_vm3 = vcmp.eq.s32.totalorder %v7914_v54, %v14871_v46  ;;  %v14887_v29 = vld [vmem:[#allocation134_spill] sm:$0xff] }
 0x544   : > { %v4118_v17 = vsel %vm3478_vm15, %v4054_v47, 0.0  ;;  %vm3479_vm8 = vcmp.eq.s32.totalorder %v7914_v54, %v3181_v38  ;;  %v3926_v48 = vsel %vm14870_vm2, %v12637_v14, 0.0  ;;  %v3927_v12 = vsel %vm14872_vm3, %v12643_v34, 0.0  ;;  %v3191_v35 = vpop.xlane.xlu0 %3190  ;;  %v14883_v38 = vld [vmem:[#allocation150_spill] sm:$0xff] }
 0x545   : > { %5955 = vxpose.xlu0.c.b16.end [8/8] %v14866_v52, 128  ;;  %v4119_v6 = vsel %vm3479_vm8, %v4055_v25, 0.0  ;;  %v12801_v37 = vadd.f32 %v4118_v17, %v3926_v48  ;;  %7628 = vpow2.f32 %v3668_v0  ;;  %v3553_v22 = vsub.f32 %v14874_v59, %v14873_v8  ;;  %v14882_v0 = vld [vmem:[#allocation201_spill] sm:$0xff] }
 0x546   : > { %v12803_v5 = vpop.eup %7616  ;;  %v3207_v42 = vcvt.f32.s32 %v14875_v19  ;;  %v12808_v40 = vadd.f32 %v4119_v6, %v3927_v12  ;;  %v3194_v15 = vshll.u32 %v3193_v23, 16  ;;  %v3192_v57 = vcvt.f32.s32 %v3191_v35  ;;  %v3205_v32 = vpop.xlane.xlu1 %3204  ;;  %v14886_v25 = vld [vmem:[#allocation93_spill] sm:$0xff]  ;;  %v14889_v6 = vld [vmem:[#allocation198_spill] sm:$0xff]  ;;  %v14891_v35 = vld [vmem:[#allocation55_spill] sm:$0xff] }
 0x547   : > { %v7619_v14 = vpop.eup %7618  ;;  %v14878_v50 = vpack.c.bf16 %v14876_v2, %v14877_v9  ;;  %7630 = vrcp.f32 %v3739_v49  ;;  %v3670_v43 = vmul.f32 1.442695, %v3552_v20  ;;  %v3740_v11 = vadd.f32 1.0, %v12803_v5  ;;  %v14881_v49 = vld [vmem:[#allocation184_spill] sm:$0xff] }
 0x548   : > { %v12813_v34 = vpop.eup %7620  ;;  %v5890_v63 = vpack.c.bf16 %v12808_v40, %v12801_v37  ;;  %v3554_v24 = vsub.f32 %v14880_v51, %v14879_v27  ;;  %v3195_v16 = vadd.s32 %v3194_v15, %v3192_v57  ;;  %v3672_v33 = vmul.f32 1.442695, %v3553_v22 }
 0x549   : > { %5932 = vxpose.xlu0.c.b16.start [1/8] %v14878_v50, 128  ;;  %v7623_v58 = vpop.eup %7622  ;;  %v3208_v36 = vshll.u32 %v3207_v42, 16  ;;  %v4056_v41 = vmul.f32 %v7619_v14, %v12614_v53  ;;  %v3206_v39 = vcvt.f32.s32 %v3205_v32  ;;  %v3741_v56 = vadd.f32 1.0, %v12813_v34  ;;  %v14890_v42 = vld [vmem:[#allocation79_spill] sm:$0xff] }
 0x54a   : > { %v3555_v47 = vsub.f32 %v14882_v0, %v14881_v49  ;;  %vm3480_vm7 = vcmp.eq.s32.totalorder %v7914_v54, %v3195_v16  ;;  %v14885_v23 = vpack.c.bf16 %v14883_v38, %v14884_v10  ;;  %7632 = vpow2.f32 %v3670_v43  ;;  %v14899_v49 = vld [vmem:[#allocation12_spill] sm:$0xff] }
 0x54b   : > { %v3221_v52 = vcvt.f32.s32 %v14886_v25  ;;  %v4120_v45 = vsel %vm3480_vm7, %v4056_v41, 0.0  ;;  %v3209_v18 = vadd.s32 %v3208_v36, %v3206_v39  ;;  %v12829_v20 = vpop.eup %7624  ;;  %7634 = vrcp.f32 %v3740_v11  ;;  %v14895_v36 = vld [vmem:[#allocation87_spill] sm:$0xff]  ;;  %v14896_v41 = vld [vmem:[#allocation69_spill] sm:$0xff] }
 0x54c   : > { %v3674_v53 = vmul.f32 1.442695, %v3554_v24  ;;  %v4057_v17 = vmul.f32 %v7623_v58, %v12628_v4  ;;  %vm14888_vm9 = vcmp.eq.s32.totalorder %v7914_v54, %v14887_v29  ;;  %7636 = vpow2.f32 %v3672_v33  ;;  %v14893_v4 = vld [vmem:[#allocation39_spill] sm:$0xff]  ;;  %v14905_v29 = vld [vmem:[#allocation100_spill] sm:$0xff] }
 0x54d   : > { %5933 = vxpose.xlu0.c.b16.cont [2/8] %v14885_v23, 128  ;;  %v3928_v48 = vsel %vm14888_vm9, %v7619_v14, 0.0  ;;  %v3235_v46 = vcvt.f32.s32 %v14889_v6  ;;  %vm3481_vm1 = vcmp.eq.s32.totalorder %v7914_v54, %v3209_v18  ;;  %v7627_v8 = vpop.eup %7626  ;;  %v3676_v59 = vmul.f32 1.442695, %v3555_v47  ;;  %v3219_v19 = vpop.xlane.xlu0 %3218  ;;  %v14900_v47 = vld [vmem:[#allocation205_spill] sm:$0xff]  ;;  %v14901_v23 = vld [vmem:[#allocation188_spill] sm:$0xff]  ;;  %v14902_v25 = vld [vmem:[#allocation207_spill] sm:$0xff] }
 0x54e   : > { %v12837_v12 = vadd.f32 %v4120_v45, %v3928_v48  ;;  %v4121_v22 = vsel %vm3481_vm1, %v4057_v17, 0.0  ;;  %v14892_v15 = vpack.c.bf16 %v14890_v42, %v14891_v35  ;;  %vm14894_vm0 = vcmp.eq.s32.totalorder %v7914_v54, %v14893_v4  ;;  %v3233_v11 = vpop.xlane.xlu1 %3232  ;;  %v14907_v42 = vld [vmem:[#allocation89_spill] sm:$0xff] }
 0x54f   : > { %v3929_v57 = vsel %vm14894_vm0, %v7623_v58, 0.0  ;;  %v12845_v14 = vpop.eup %7628  ;;  %7638 = vrcp.f32 %v3741_v56  ;;  %v3222_v2 = vshll.u32 %v3221_v52, 16  ;;  %v3220_v9 = vcvt.f32.s32 %v3219_v19  ;;  %v14898_v56 = vld [vmem:[#allocation190_spill] sm:$0xff]  ;;  %v14906_v19 = vld [vmem:[#allocation129_spill] sm:$0xff] }
 0x550   : > { %v12847_v50 = vadd.f32 %v4121_v22, %v3929_v57  ;;  %v3742_v43 = vadd.f32 1.0, %v12829_v20  ;;  %7640 = vpow2.f32 %v3674_v53  ;;  %v3236_v51 = vshll.u32 %v3235_v46, 16 }
 0x551   : > { %5934 = vxpose.xlu0.c.b16.cont [3/8] %v14892_v15, 128  ;;  %v7631_v27 = vpop.eup %7630  ;;  %v3223_v24 = vadd.s32 %v3222_v2, %v3220_v9  ;;  %v3234_v16 = vcvt.f32.s32 %v3233_v11  ;;  %v3743_v58 = vadd.f32 1.0, %v12845_v14  ;;  %7642 = vpow2.f32 %v3676_v59 }
 0x552   : > { %v5891_v32 = vpack.c.bf16 %v12847_v50, %v12837_v12  ;;  %v4058_v33 = vmul.f32 %v7627_v8, %v12750_v3  ;;  %v14897_v39 = vpack.c.bf16 %v14895_v36, %v14896_v41  ;;  %v3556_v0 = vsub.f32 %v14899_v49, %v14898_v56  ;;  %v14903_v3 = vld [vmem:[#allocation146_spill] sm:$0xff]  ;;  %v14912_v56 = vld [vmem:[#allocation209_spill] sm:$0xff] }
 0x553   : > { %v3249_v38 = vcvt.f32.s32 %v14900_v47  ;;  %vm3482_vm14 = vcmp.eq.s32.totalorder %v7914_v54, %v3223_v24  ;;  %v3237_v10 = vadd.s32 %v3236_v51, %v3234_v16  ;;  %v3557_v52 = vsub.f32 %v14902_v25, %v14901_v23  ;;  %v14913_v47 = vld [vmem:[#allocation99_spill] sm:$0xff]  ;;  %v14916_v23 = vld [vmem:[#allocation210_spill] sm:$0xff] }
 0x554   : > { %v4122_v45 = vsel %vm3482_vm14, %v4058_v33, 0.0  ;;  %v4059_v18 = vmul.f32 %v7631_v27, %v12773_v62  ;;  %vm14904_vm11 = vcmp.eq.s32.totalorder %v7914_v54, %v14903_v3  ;;  %v12867_v17 = vpop.eup %7632  ;;  %7644 = vrcp.f32 %v3742_v43  ;;  %v14909_v62 = vld [vmem:[#allocation43_spill] sm:$0xff] }
 0x555   : > { %5935 = vxpose.xlu0.c.b16.cont [4/8] %v14897_v39, 128  ;;  %v3930_v53 = vsel %vm14904_vm11, %v7627_v8, 0.0  ;;  %v3263_v48 = vcvt.f32.s32 %v14905_v29  ;;  %vm3483_vm4 = vcmp.eq.s32.totalorder %v7914_v54, %v3237_v10  ;;  %v7635_v46 = vpop.eup %7634  ;;  %7646 = vrcp.f32 %v3743_v58  ;;  %v3247_v22 = vpop.xlane.xlu0 %3246  ;;  %v14919_v29 = vld [vmem:[#allocation106_spill] sm:$0xff] }
 0x556   : > { %v4186_v6 = vadd.f32 %v4122_v45, %v3930_v53  ;;  %v4123_v59 = vsel %vm3483_vm4, %v4059_v18, 0.0  ;;  %v14908_v35 = vpack.c.bf16 %v14906_v19, %v14907_v42  ;;  %vm14910_vm5 = vcmp.eq.s32.totalorder %v7914_v54, %v14909_v62  ;;  %v12877_v15 = vpop.eup %7636  ;;  %v3261_v51 = vpop.xlane.xlu1 %3260  ;;  %v14917_v53 = vld [vmem:[#allocation50_spill] sm:$0xff] }
 0x557   : > { %v3931_v8 = vsel %vm14910_vm5, %v7631_v27, 0.0  ;;  %v3678_v4 = vmul.f32 1.442695, %v3556_v0  ;;  %v3250_v57 = vshll.u32 %v3249_v38, 16  ;;  %v3248_v2 = vcvt.f32.s32 %v3247_v22  ;;  %v14911_v27 = vld [vmem:[#allocation194_spill] sm:$0xff]  ;;  %v14914_v38 = vld [vmem:[#allocation132_spill] sm:$0xff] }
 0x558   : > { %v4187_v9 = vadd.f32 %v4123_v59, %v3931_v8  ;;  %v3744_v43 = vadd.f32 1.0, %v12867_v17  ;;  %v3680_v11 = vmul.f32 1.442695, %v3557_v52  ;;  %v3264_v16 = vshll.u32 %v3263_v48, 16  ;;  %v14920_v22 = vld [vmem:[#allocation191_spill] sm:$0xff]  ;;  %v14921_v19 = vld [vmem:[#allocation14_spill] sm:$0xff] }
 0x559   : > { %5936 = vxpose.xlu0.c.b16.cont [5/8] %v14908_v35, 128  ;;  %v7639_v24 = vpop.eup %7638  ;;  %v3251_v58 = vadd.s32 %v3250_v57, %v3248_v2  ;;  %v3262_v33 = vcvt.f32.s32 %v3261_v51  ;;  %v3745_v39 = vadd.f32 1.0, %v12877_v15  ;;  %v3558_v49 = vsub.f32 %v14912_v56, %v14911_v27  ;;  %v14922_v8 = vld [vmem:[#allocation105_spill] sm:$0xff] }
 0x55a   : > { %v5892_v36 = vpack.c.bf16 %v4187_v9, %v4186_v6  ;;  %v12880_v41 = vpop.eup %7640  ;;  %v4060_v0 = vmul.f32 %v7635_v46, %v12803_v5  ;;  %v14915_v10 = vpack.c.bf16 %v14913_v47, %v14914_v38  ;;  %7648 = vpow2.f32 %v3678_v4  ;;  %v14923_v4 = vld [vmem:[#allocation72_spill] sm:$0xff] }
 0x55b   : > { %v3277_v25 = vcvt.f32.s32 %v14916_v23  ;;  %vm3484_vm13 = vcmp.eq.s32.totalorder %v7914_v54, %v3251_v58  ;;  %v3265_v52 = vadd.s32 %v3264_v16, %v3262_v33  ;;  %v12891_v45 = vpop.eup %7642  ;;  %7650 = vrcp.f32 %v3744_v43  ;;  %v14928_v38 = vld [vmem:[#allocation176_spill] sm:$0xff]  ;;  %v14931_v23 = vld [vmem:[#allocation114_spill] sm:$0xff] }
 0x55c   : > { %5980 = vxpose.xlu1.c.b16.start [1/8] %v5892_v36, 128  ;;  %v4124_v18 = vsel %vm3484_vm13, %v4060_v0, 0.0  ;;  %v4061_v3 = vmul.f32 %v7639_v24, %v12813_v34  ;;  %vm14918_vm6 = vcmp.eq.s32.totalorder %v7914_v54, %v14917_v53  ;;  %7652 = vpow2.f32 %v3680_v11  ;;  %v14925_v34 = vld [vmem:[#allocation56_spill] sm:$0xff] }
 0x55d   : > { %5937 = vxpose.xlu0.c.b16.cont [6/8] %v14915_v10, 128  ;;  %v3932_v5 = vsel %vm14918_vm6, %v7635_v46, 0.0  ;;  %v3291_v48 = vcvt.f32.s32 %v14919_v29  ;;  %vm3485_vm10 = vcmp.eq.s32.totalorder %v7914_v54, %v3265_v52  ;;  %v3682_v59 = vmul.f32 1.442695, %v3558_v49  ;;  %v3275_v62 = vpop.xlane.xlu0 %3274  ;;  %v14930_v10 = vld [vmem:[#allocation119_spill] sm:$0xff]  ;;  %v14932_v52 = vld [vmem:[#allocation140_spill] sm:$0xff]  ;;  %v14933_v29 = vld [vmem:[#allocation161_spill] sm:$0xff] }
 0x55e   : > { %v4188_v6 = vadd.f32 %v4124_v18, %v3932_v5  ;;  %v3559_v42 = vsub.f32 %v14921_v19, %v14920_v22  ;;  %v4125_v35 = vsel %vm3485_vm10, %v4061_v3, 0.0  ;;  %v14924_v57 = vpack.c.bf16 %v14922_v8, %v14923_v4  ;;  %v7645_v2 = vpop.eup %7644  ;;  %v3289_v33 = vpop.xlane.xlu1 %3288 }
 0x55f   : > { %vm14926_vm12 = vcmp.eq.s32.totalorder %v7914_v54, %v14925_v34  ;;  %7654 = vrcp.f32 %v3745_v39  ;;  %v3278_v9 = vshll.u32 %v3277_v25, 16  ;;  %v3276_v43 = vcvt.f32.s32 %v3275_v62  ;;  %v7647_v51 = vpop.eup %7646 }
 0x560   : > { %v3933_v46 = vsel %vm14926_vm12, %v7639_v24, 0.0  ;;  %v3746_v16 = vadd.f32 1.0, %v12880_v41  ;;  %v3747_v58 = vadd.f32 1.0, %v12891_v45  ;;  %v3292_v36 = vshll.u32 %v3291_v48, 16  ;;  %v14927_v24 = vld [vmem:[#allocation138_spill] sm:$0xff] }
 0x561   : > { %5938 = vxpose.xlu0.c.b16.cont [7/8] %v14924_v57, 128  ;;  %v4189_v11 = vadd.f32 %v4125_v35, %v3933_v46  ;;  %v3279_v27 = vadd.s32 %v3278_v9, %v3276_v43  ;;  %v3290_v56 = vcvt.f32.s32 %v3289_v33  ;;  %7656 = vpow2.f32 %v3682_v59  ;;  %v14937_v35 = vld [vmem:[#allocation42_spill] sm:$0xff] }
 0x562   : > { %v3684_v0 = vmul.f32 1.442695, %v3559_v42  ;;  %v4062_v47 = vmul.f32 %v7645_v2, %v12829_v20  ;;  %v14929_v39 = vpack.c.bf16 %v14927_v24, %v14928_v38  ;;  %v3560_v25 = vsub.f32 %v14931_v23, %v14930_v10  ;;  %v14936_v42 = vld [vmem:[#allocation111_spill] sm:$0xff] }
 0x563   : > { %v5893_v49 = vpack.c.bf16 %v4189_v11, %v4188_v6  ;;  %v3305_v18 = vcvt.f32.s32 %v14932_v52  ;;  %vm3486_vm15 = vcmp.eq.s32.totalorder %v7914_v54, %v3279_v27  ;;  %v3293_v3 = vadd.s32 %v3292_v36, %v3290_v56  ;;  %v14935_v6 = vld [vmem:[#allocation112_spill] sm:$0xff] }
 0x564   : > { %7658 = vrcp.f32 %v3746_v16  ;;  %v4126_v53 = vsel %vm3486_vm15, %v4062_v47, 0.0  ;;  %v4063_v5 = vmul.f32 %v7647_v51, %v12845_v14  ;;  %vm14934_vm8 = vcmp.eq.s32.totalorder %v7914_v54, %v14933_v29  ;;  %v12921_v48 = vpop.eup %7648  ;;  %v14938_v14 = vld [vmem:[#allocation74_spill] sm:$0xff] }
 0x565   : > { %5939 = vxpose.xlu0.c.b16.end [8/8] %v14929_v39, 128  ;;  %5981 = vxpose.xlu1.c.b16.cont [2/8] %v5893_v49, 128  ;;  %v3934_v20 = vsel %vm14934_vm8, %v7645_v2, 0.0  ;;  %7660 = vrcp.f32 %v3747_v58  ;;  %v3319_v59 = vcvt.f32.s32 %v14935_v6  ;;  %vm3487_vm2 = vcmp.eq.s32.totalorder %v7914_v54, %v3293_v3  ;;  %v7651_v19 = vpop.eup %7650  ;;  %v3303_v4 = vpop.xlane.xlu0 %3302 }
 0x566   : > { %v4190_v22 = vadd.f32 %v4126_v53, %v3934_v20  ;;  %7662 = vpow2.f32 %v3684_v0  ;;  %v3561_v62 = vsub.f32 %v14937_v35, %v14936_v42  ;;  %v4127_v8 = vsel %vm3487_vm2, %v4063_v5, 0.0  ;;  %v12930_v34 = vpop.eup %7652  ;;  %v3317_v16 = vpop.xlane.xlu1 %3316  ;;  %v14944_v20 = vld [vmem:[#allocation10_spill] sm:$0xff] }
 0x567   : > { %vm14939_vm3 = vcmp.eq.s32.totalorder %v7914_v54, %v14938_v14  ;;  %v3686_v46 = vmul.f32 1.442695, %v3560_v25  ;;  %v3306_v2 = vshll.u32 %v3305_v18, 16  ;;  %v3304_v9 = vcvt.f32.s32 %v3303_v4  ;;  %v14941_v25 = vld [vmem:[#allocation82_spill] sm:$0xff]  ;;  %v14943_v18 = vld [vmem:[#allocation113_spill] sm:$0xff] }
 0x568   : > { %v3935_v57 = vsel %vm14939_vm3, %v7647_v51, 0.0  ;;  %v3748_v11 = vadd.f32 1.0, %v12921_v48  ;;  %v3320_v33 = vshll.u32 %v3319_v59, 16  ;;  %v3318_v27 = vcvt.f32.s32 %v3317_v16  ;;  %v14940_v51 = vld [vmem:[#allocation213_spill] sm:$0xff] }
 0x569   : > { %v4191_v43 = vadd.f32 %v4127_v8, %v3935_v57  ;;  %v7655_v58 = vpop.eup %7654  ;;  %v3307_v36 = vadd.s32 %v3306_v2, %v3304_v9  ;;  %v3749_v49 = vadd.f32 1.0, %v12930_v34  ;;  %v3688_v0 = vmul.f32 1.442695, %v3561_v62  ;;  %v14946_v9 = vld [vmem:[#allocation124_spill] sm:$0xff] }
 0x56a   : > { %v4064_v47 = vmul.f32 %v7651_v19, %v12867_v17  ;;  %7664 = vpow2.f32 %v3686_v46  ;;  %v3333_v24 = vcvt.f32.s32 %v14940_v51  ;;  %v3321_v38 = vadd.s32 %v3320_v33, %v3318_v27  ;;  %v14947_v33 = vld [vmem:[#allocation203_spill] sm:$0xff]  ;;  %v14950_v51 = vld [vmem:[#allocation204_spill] sm:$0xff] }
 0x56b   : > { %v5894_v56 = vpack.c.bf16 %v4191_v43, %v4190_v22  ;;  %vm3488_vm7 = vcmp.eq.s32.totalorder %v7914_v54, %v3307_v36  ;;  %v12937_v39 = vpop.eup %7656  ;;  %v4065_v23 = vmul.f32 %v7655_v58, %v12877_v15  ;;  %vm14942_vm9 = vcmp.eq.s32.totalorder %v7914_v54, %v14941_v25 }
 0x56c   : > { %v4128_v10 = vsel %vm3488_vm7, %v4064_v47, 0.0  ;;  %v3936_v52 = vsel %vm14942_vm9, %v7651_v19, 0.0  ;;  %7666 = vrcp.f32 %v3748_v11  ;;  %v3347_v3 = vcvt.f32.s32 %v14943_v18 }
 0x56d   : > { %5982 = vxpose.xlu1.c.b16.cont [3/8] %v5894_v56, 128  ;;  %vm3489_vm1 = vcmp.eq.s32.totalorder %v7914_v54, %v3321_v38  ;;  %v4192_v17 = vadd.f32 %v4128_v10, %v3936_v52  ;;  %7668 = vpow2.f32 %v3688_v0  ;;  %v3331_v29 = vpop.xlane.xlu0 %3330  ;;  %vm14945_vm0 = vcmp.eq.s32.totalorder %v7914_v54, %v14944_v20  ;;  %v14949_v56 = vld [vmem:[#allocation227_spill] sm:$0xff] }
 0x56e   : > { %v7659_v53 = vpop.eup %7658  ;;  %v4129_v5 = vsel %vm3489_vm1, %v4065_v23, 0.0  ;;  %v3937_v6 = vsel %vm14945_vm0, %v7655_v58, 0.0  ;;  %7670 = vrcp.f32 %v3749_v49  ;;  %v3334_v15 = vshll.u32 %v3333_v24, 16  ;;  %v3345_v62 = vpop.xlane.xlu1 %3344 }
 0x56f   : > { %v7661_v59 = vpop.eup %7660  ;;  %v3332_v22 = vcvt.f32.s32 %v3331_v29  ;;  %v4193_v42 = vadd.f32 %v4129_v5, %v3937_v6  ;;  %v3750_v35 = vadd.f32 1.0, %v12937_v39  ;;  %v3348_v8 = vshll.u32 %v3347_v3, 16 }
 0x570   : > { %v12948_v19 = vpop.eup %7662  ;;  %v3346_v14 = vcvt.f32.s32 %v3345_v62  ;;  %v4066_v46 = vmul.f32 %v7659_v53, %v12880_v41  ;;  %v3361_v43 = vcvt.f32.s32 %v14946_v9  ;;  %v4067_v58 = vmul.f32 %v7661_v59, %v12891_v45  ;;  %v14953_v62 = vld [vmem:[#allocation206_spill] sm:$0xff] }
 0x571   : > { %v3335_v4 = vadd.s32 %v3334_v15, %v3332_v22  ;;  %v5895_v57 = vpack.c.bf16 %v4193_v42, %v4192_v17  ;;  %v3751_v2 = vadd.f32 1.0, %v12948_v19  ;;  %vm14948_vm11 = vcmp.eq.s32.totalorder %v7914_v54, %v14947_v33 }
 0x572   : > { %v3349_v11 = vadd.s32 %v3348_v8, %v3346_v14  ;;  %v3938_v36 = vsel %vm14948_vm11, %v7659_v53, 0.0  ;;  %7672 = vrcp.f32 %v3750_v35  ;;  %v3375_v41 = vcvt.f32.s32 %v14949_v56 }
 0x573   : > { %vm3490_vm14 = vcmp.eq.s32.totalorder %v7914_v54, %v3335_v4  ;;  %5983 = vxpose.xlu1.c.b16.cont [4/8] %v5895_v57, 128  ;;  %vm14951_vm5 = vcmp.eq.s32.totalorder %v7914_v54, %v14950_v51  ;;  %7674 = vrcp.f32 %v3751_v2  ;;  %v3362_v45 = vshll.u32 %v3361_v43, 16  ;;  %v14955_v4 = vld [vmem:[#allocation197_spill] sm:$0xff]  ;;  %v14956_v2 = vld [vmem:[#allocation208_spill] sm:$0xff] }
 0x574   : > { %v4130_v16 = vsel %vm3490_vm14, %v4066_v46, 0.0  ;;  %v12959_v27 = vpop.eup %7664  ;;  %vm3491_vm4 = vcmp.eq.s32.totalorder %v7914_v54, %v3349_v11  ;;  %v3939_v24 = vsel %vm14951_vm5, %v7661_v59, 0.0  ;;  %v3376_v17 = vshll.u32 %v3375_v41, 16  ;;  %v14952_v59 = vld [vmem:[#allocation118_spill] sm:$0xff] }
 0x575   : > { %v4194_v49 = vadd.f32 %v4130_v16, %v3938_v36  ;;  %v4131_v0 = vsel %vm3491_vm4, %v4067_v58, 0.0  ;;  %v3359_v47 = vpop.xlane.xlu0 %3358  ;;  %v3752_v52 = vadd.f32 1.0, %v12959_v27  ;;  %v3389_v15 = vcvt.f32.s32 %v14952_v59 }
 0x576   : > { %v7667_v38 = vpop.eup %7666  ;;  %v3360_v10 = vcvt.f32.s32 %v3359_v47  ;;  %v4195_v23 = vadd.f32 %v4131_v0, %v3939_v24  ;;  %v3373_v18 = vpop.xlane.xlu1 %3372  ;;  %vm14954_vm6 = vcmp.eq.s32.totalorder %v7914_v54, %v14953_v62  ;;  %v3403_v14 = vcvt.f32.s32 %v14955_v4  ;;  %v14958_v47 = vld [vmem:[#allocation228_spill] sm:$0xff] }
 0x577   : > { %v12966_v25 = vpop.eup %7668  ;;  %v3374_v5 = vcvt.f32.s32 %v3373_v18  ;;  %v4068_v20 = vmul.f32 %v7667_v38, %v12921_v48  ;;  %v3940_v8 = vsel %vm14954_vm6, %v7667_v38, 0.0  ;;  %7676 = vrcp.f32 %v3752_v52  ;;  %v14961_v52 = vld [vmem:[#allocation120_spill] sm:$0xff] }
 0x578   : > { %v7671_v3 = vpop.eup %7670  ;;  %v3363_v53 = vadd.s32 %v3362_v45, %v3360_v10  ;;  %v5896_v29 = vpack.c.bf16 %v4195_v23, %v4194_v49  ;;  %v3753_v6 = vadd.f32 1.0, %v12966_v25  ;;  %vm14957_vm12 = vcmp.eq.s32.totalorder %v7914_v54, %v14956_v2  ;;  %v14959_v10 = vld [vmem:[#allocation211_spill] sm:$0xff] }
 0x579   : > { %v3377_v22 = vadd.s32 %v3376_v17, %v3374_v5  ;;  %v4069_v35 = vmul.f32 %v7671_v3, %v12930_v34  ;;  %v3941_v9 = vsel %vm14957_vm12, %v7671_v3, 0.0  ;;  %v3390_v11 = vshll.u32 %v3389_v15, 16 }
 0x57a   : > { %vm3492_vm13 = vcmp.eq.s32.totalorder %v7914_v54, %v3363_v53  ;;  %5984 = vxpose.xlu1.c.b16.cont [5/8] %v5896_v29, 128  ;;  %7678 = vrcp.f32 %v3753_v6  ;;  %v3404_v36 = vshll.u32 %v3403_v14, 16  ;;  %v3417_v51 = vcvt.f32.s32 %v14958_v47  ;;  %v14962_v53 = vld [vmem:[#allocation212_spill] sm:$0xff] }
 0x57b   : > { %v4132_v42 = vsel %vm3492_vm13, %v4068_v20, 0.0  ;;  %vm3493_vm10 = vcmp.eq.s32.totalorder %v7914_v54, %v3377_v22  ;;  %vm14960_vm8 = vcmp.eq.s32.totalorder %v7914_v54, %v14959_v10  ;;  %v3431_v18 = vcvt.f32.s32 %v14961_v52 }
 0x57c   : > { %v4196_v48 = vadd.f32 %v4132_v42, %v3940_v8  ;;  %v4133_v57 = vsel %vm3493_vm10, %v4069_v35, 0.0  ;;  %v7673_v43 = vpop.eup %7672  ;;  %vm14963_vm3 = vcmp.eq.s32.totalorder %v7914_v54, %v14962_v53  ;;  %v3418_v20 = vshll.u32 %v3417_v51, 16 }
 0x57d   : > { %v3387_v46 = vpop.xlane.xlu0 %3386  ;;  %v4197_v16 = vadd.f32 %v4133_v57, %v3941_v9  ;;  %v7675_v33 = vpop.eup %7674  ;;  %v4070_v0 = vmul.f32 %v7673_v43, %v12937_v39  ;;  %v3942_v23 = vsel %vm14960_vm8, %v7673_v43, 0.0  ;;  %v3432_v22 = vshll.u32 %v3431_v18, 16  ;;  %v14964_v57 = vld [vmem:[#allocation16_spill] sm:$0xff] }
 0x57e   : > { %v3388_v34 = vcvt.f32.s32 %v3387_v46  ;;  %v3401_v58 = vpop.xlane.xlu1 %3400  ;;  %v4071_v45 = vmul.f32 %v7675_v33, %v12948_v19  ;;  %v3943_v5 = vsel %vm14963_vm3, %v7675_v33, 0.0  ;;  %vm14965_vm9 = vcmp.eq.s32.totalorder %v7914_v54, %v14964_v57 }
 0x57f   : > { %v3402_v41 = vcvt.f32.s32 %v3401_v58  ;;  %v5897_v49 = vpack.c.bf16 %v4197_v16, %v4196_v48 }
 0x580   : > { %v3391_v56 = vadd.s32 %v3390_v11, %v3388_v34  ;;  %v14966_v11 = vld [vmem:[#allocation121_spill] sm:$0xff] }
 0x581   : > { %v3405_v24 = vadd.s32 %v3404_v36, %v3402_v41  ;;  %5985 = vxpose.xlu1.c.b16.cont [6/8] %v5897_v49, 128  ;;  %v7677_v29 = vpop.eup %7676  ;;  %vm14967_vm0 = vcmp.eq.s32.totalorder %v7914_v54, %v14966_v11  ;;  %v14969_v36 = vld [vmem:[#allocation3_spill] sm:$0xff] }
 0x582   : > { %vm3494_vm15 = vcmp.eq.s32.totalorder %v7914_v54, %v3391_v56  ;;  %v4072_v8 = vmul.f32 %v7677_v29, %v12959_v27  ;;  %v3944_v46 = vsel %vm14965_vm9, %v7677_v29, 0.0  ;;  %v14971_v49 = vld [vmem:[#allocation231_spill] sm:$0xff] }
 0x583   : > { %v4134_v38 = vsel %vm3494_vm15, %v4070_v0, 0.0  ;;  %vm3495_vm2 = vcmp.eq.s32.totalorder %v7914_v54, %v3405_v24  ;;  %v14972_v0 = vld [vmem:[#allocation45_spill] sm:$0xff] }
 0x584   : > { %v4198_v3 = vadd.f32 %v4134_v38, %v3942_v23  ;;  %v4135_v17 = vsel %vm3495_vm2, %v4071_v45, 0.0  ;;  %v7679_v15 = vpop.eup %7678  ;;  %v14973_v47 = vpack.c.bf16 %v14971_v49, %v14972_v0 }
 0x585   : > { %v3415_v39 = vpop.xlane.xlu0 %3414  ;;  %v4199_v59 = vadd.f32 %v4135_v17, %v3943_v5  ;;  %v4073_v48 = vmul.f32 %v7679_v15, %v12966_v25  ;;  %v3945_v27 = vsel %vm14967_vm0, %v7679_v15, 0.0  ;;  %v14968_v25 = vld [vmem:[#allocation49_spill] sm:$0xff] }
 0x586   : > { %v3416_v6 = vcvt.f32.s32 %v3415_v39  ;;  %v3429_v19 = vpop.xlane.xlu1 %3428  ;;  %v14970_v56 = vpack.c.bf16 %v14968_v25, %v14969_v36 }
 0x587   : > { %v3430_v35 = vcvt.f32.s32 %v3429_v19  ;;  %v5898_v62 = vpack.c.bf16 %v4199_v59, %v4198_v3 }
 0x588   : > { %v3419_v42 = vadd.s32 %v3418_v20, %v3416_v6 }
 0x589   : > { %v3433_v4 = vadd.s32 %v3432_v22, %v3430_v35  ;;  %5986 = vxpose.xlu1.c.b16.cont [7/8] %v5898_v62, 128 }
 0x58a   : > { %vm3496_vm7 = vcmp.eq.s32.totalorder %v7914_v54, %v3419_v42 }
 0x58b   : > { %v4136_v14 = vsel %vm3496_vm7, %v4072_v8, 0.0  ;;  %vm3497_vm1 = vcmp.eq.s32.totalorder %v7914_v54, %v3433_v4 }
 0x58c   : > { %v4200_v9 = vadd.f32 %v4136_v14, %v3944_v46  ;;  %v4137_v43 = vsel %vm3497_vm1, %v4073_v48, 0.0 }
 0x58d   : > { %v4201_v34 = vadd.f32 %v4137_v43, %v3945_v27 }
 0x58f   : > { %v5956_v2 = vpop.trf.xlu0  ;;  %v5899_v58 = vpack.c.bf16 %v4201_v34, %v4200_v9 }
 0x590   : > { %6028 = vmatprep.mubr.bf16.mxu0 %v5956_v2 }
 0x591   : > { %5987 = vxpose.xlu1.c.b16.end [8/8] %v5899_v58, 128 }
 0x593   : > { %v5957_v16 = vpop.trf.xlu0 }
 0x595   : > { %5964 = vxpose.xlu1.c.b16.start [1/8] %v14970_v56, 128 }
 0x597   : > { %v5958_v33 = vpop.trf.xlu0 }
 0x599   : > { %5965 = vxpose.xlu1.c.b16.cont [2/8] %v14973_v47, 128 }
 0x59b   : > { %v5959_v41 = vpop.trf.xlu0 }
 0x59d   : > { %5966 = vxpose.xlu1.c.b16.cont [3/8] %v5886_v61, 128 }
 0x59f   : > { %v5960_v51 = vpop.trf.xlu0 }
 0x5a1   : > { %5967 = vxpose.xlu1.c.b16.cont [4/8] %v5887_v55, 128 }
 0x5a3   : > { %v5961_v54 = vpop.trf.xlu0 }
 0x5a5   : > { %5968 = vxpose.xlu1.c.b16.cont [5/8] %v5888_v21, 128 }
 0x5a7   : > { %v5962_v24 = vpop.trf.xlu0 }
 0x5a9   : > { %5969 = vxpose.xlu1.c.b16.cont [6/8] %v5889_v26, 128 }
 0x5ab   : > { %v5963_v38 = vpop.trf.xlu0 }
 0x5ad   : > { %5970 = vxpose.xlu1.c.b16.cont [7/8] %v5890_v63, 128 }
 0x5af   : > { %v5940_v45 = vpop.trf.xlu0 }
 0x5b0   : > { %6029 = vmatmul.mubr.bf16.vlgmr.msra.gmra.mrb[128].mxu0 %v5940_v45 }
 0x5b1   : > { %6035 = vmatprep.mubr.bf16.mxu0 %v5957_v16  ;;  %5971 = vxpose.xlu1.c.b16.end [8/8] %v5891_v32, 128 }
 0x5b3   : > { %v5941_v44 = vpop.trf.xlu0 }
 0x5b7   : > { %v5942_v60 = vpop.trf.xlu0 }
 0x5b8   : > { %6036 = vmatmul.mubr.bf16.gmra.mrb[132].mxu0 %v5941_v44 }
 0x5b9   : > { %6041 = vmatprep.mubr.bf16.mxu0 %v5958_v33 }
 0x5bb   : > { %v5943_v61 = vpop.trf.xlu0 }
 0x5bf   : > { %v5944_v1 = vpop.trf.xlu0 }
 0x5c0   : > { %6042 = vmatmul.mubr.bf16.gmra.mrb[136].mxu0 %v5942_v60 }
 0x5c1   : > { %6047 = vmatprep.mubr.bf16.mxu0 %v5959_v41 }
 0x5c3   : > { %v5945_v30 = vpop.trf.xlu0 }
 0x5c7   : > { %v5946_v55 = vpop.trf.xlu0 }
 0x5c8   : > { %6048 = vmatmul.mubr.bf16.gmra.mrb[140].mxu0 %v5943_v61 }
 0x5c9   : > { %6053 = vmatprep.mubr.bf16.mxu0 %v5960_v51 }
 0x5cb   : > { %v5947_v21 = vpop.trf.xlu0 }
 0x5d0   : > { %6054 = vmatmul.mubr.bf16.gmra.mrb[144].mxu0 %v5944_v1 }
 0x5d1   : > { %6059 = vmatprep.mubr.bf16.mxu0 %v5961_v54  ;;  %v6160_v54 = vld [vmem:[%s7780_s29] sm:$0xff] }
 0x5d8   : > { %6060 = vmatmul.mubr.bf16.gmra.mrb[148].mxu0 %v5945_v30 }
 0x5d9   : > { %6065 = vmatprep.mubr.bf16.mxu0 %v5962_v24 }
 0x5db   : > { %v5988_v28 = vpop.trf.xlu1 }
 0x5dc   : > { %6110 = vmatprep.mubr.bf16.mxu1 %v5988_v28 }
 0x5df   : > { %v5989_v7 = vpop.trf.xlu1 }
 0x5e0   : > { %6066 = vmatmul.mubr.bf16.gmra.mrb[152].mxu0 %v5946_v55 }
 0x5e1   : > { %6071 = vmatprep.mubr.bf16.mxu0 %v5963_v38 }
 0x5e3   : > { %v5990_v31 = vpop.trf.xlu1 }
 0x5e7   : > { %v5991_v13 = vpop.trf.xlu1 }
 0x5e8   : > { %6072 = vmatmul.mubr.bf16.gmra.mrb[156].mxu0 %v5947_v21 }
 0x5eb   : > { %v5992_v26 = vpop.trf.xlu1 }
 0x5ef   : > { %v5993_v37 = vpop.trf.xlu1 }
 0x5f3   : > { %v5994_v40 = vpop.trf.xlu1 }
 0x5f7   : > { %v5995_v63 = vpop.trf.xlu1 }
 0x5fb   : > { %v5972_v12 = vpop.trf.xlu1 }
 0x5fc   : > { %6111 = vmatmul.mubr.bf16.vlgmr.msra.gmra.mrb[128].mxu1 %v5972_v12 }
 0x5fd   : > { %6117 = vmatprep.mubr.bf16.mxu1 %v5989_v7 }
 0x5ff   : > { %v5973_v50 = vpop.trf.xlu1 }
 0x603   : > { %v5974_v32 = vpop.trf.xlu1 }
 0x604   : > { %6118 = vmatmul.mubr.bf16.gmra.mrb[132].mxu1 %v5973_v50 }
 0x605   : > { %6123 = vmatprep.mubr.bf16.mxu1 %v5990_v31 }
 0x607   : > { %v5975_v10 = vpop.trf.xlu1 }
 0x60b   : > { %v5976_v23 = vpop.trf.xlu1 }
 0x60c   : > { %6124 = vmatmul.mubr.bf16.gmra.mrb[136].mxu1 %v5974_v32 }
 0x60d   : > { %6129 = vmatprep.mubr.bf16.mxu1 %v5991_v13 }
 0x60f   : > { %v5977_v52 = vpop.trf.xlu1 }
 0x613   : > { %v5978_v18 = vpop.trf.xlu1 }
 0x614   : > { %6130 = vmatmul.mubr.bf16.gmra.mrb[140].mxu1 %v5975_v10 }
 0x615   : > { %6135 = vmatprep.mubr.bf16.mxu1 %v5992_v26 }
 0x617   : > { %v5979_v3 = vpop.trf.xlu1 }
 0x61c   : > { %6136 = vmatmul.mubr.bf16.gmra.mrb[144].mxu1 %v5976_v23 }
 0x61d   : > { %6141 = vmatprep.mubr.bf16.mxu1 %v5993_v37 }
 0x624   : > { %6142 = vmatmul.mubr.bf16.gmra.mrb[148].mxu1 %v5977_v52 }
 0x625   : > { %6147 = vmatprep.mubr.bf16.mxu1 %v5994_v40 }
 0x62c   : > { %6148 = vmatmul.mubr.bf16.gmra.mrb[152].mxu1 %v5978_v18 }
 0x62d   : > { %6153 = vmatprep.mubr.bf16.mxu1 %v5995_v63 }
 0x634   : > { %6154 = vmatmul.mubr.bf16.gmra.mrb[156].mxu1 %v5979_v3 }
 0x683   : > { %v6526_v17 = vpop.f32.mrb[128].mxu0 }
 0x684   : > { %v6527_v39 = vpop.f32.mrb[129].mxu0 }
 0x685   : > { %v6528_v53 = vadd.f32 %v6527_v39, %v6526_v17  ;;  %v6529_v5 = vpop.f32.mrb[130].mxu0 }
 0x686   : > { %v6530_v29 = vpop.f32.mrb[131].mxu0 }
 0x68b   : > { %v6532_v20 = vpop.f32.mrb[132].mxu0 }
 0x68c   : > { %v6533_v6 = vpop.f32.mrb[133].mxu0 }
 0x68d   : > { %v6535_v59 = vpop.f32.mrb[134].mxu0 }
 0x68e   : > { %v6536_v19 = vpop.f32.mrb[135].mxu0 }
 0x693   : > { %v6538_v15 = vpop.f32.mrb[136].mxu0 }
 0x694   : > { %v6539_v22 = vpop.f32.mrb[137].mxu0 }
 0x695   : > { %v6541_v42 = vpop.f32.mrb[138].mxu0 }
 0x696   : > { %v6542_v35 = vpop.f32.mrb[139].mxu0 }
 0x69b   : > { %v6544_v62 = vpop.f32.mrb[140].mxu0 }
 0x69c   : > { %v6545_v8 = vpop.f32.mrb[141].mxu0 }
 0x69d   : > { %v6547_v4 = vpop.f32.mrb[142].mxu0 }
 0x69e   : > { %v6548_v14 = vpop.f32.mrb[143].mxu0 }
 0x6a3   : > { %v6550_v48 = vpop.f32.mrb[144].mxu0 }
 0x6a4   : > { %v6551_v57 = vpop.f32.mrb[145].mxu0 }
 0x6a5   : > { %v6553_v46 = vpop.f32.mrb[146].mxu0 }
 0x6a6   : > { %v6554_v2 = vpop.f32.mrb[147].mxu0 }
 0x6ab   : > { %v6556_v9 = vpop.f32.mrb[148].mxu0 }
 0x6ac   : > { %v6557_v43 = vpop.f32.mrb[149].mxu0 }
 0x6ad   : > { %v6559_v11 = vpop.f32.mrb[150].mxu0 }
 0x6ae   : > { %v6560_v27 = vpop.f32.mrb[151].mxu0 }
 0x6b3   : > { %v6562_v34 = vpop.f32.mrb[152].mxu0 }
 0x6b4   : > { %v6563_v16 = vpop.f32.mrb[153].mxu0 }
 0x6b5   : > { %v6565_v58 = vpop.f32.mrb[154].mxu0 }
 0x6b6   : > { %v6566_v33 = vpop.f32.mrb[155].mxu0 }
 0x6bb   : > { %v6568_v25 = vpop.f32.mrb[156].mxu0 }
 0x6bc   : > { %v6569_v36 = vpop.f32.mrb[157].mxu0 }
 0x6bd   : > { %v6571_v56 = vpop.f32.mrb[158].mxu0 }
 0x6be   : > { %v6572_v41 = vpop.f32.mrb[159].mxu0 }
 0x6cf   : > { %v6590_v49 = vpop.f32.mrb[128].mxu1 }
 0x6d0   : > { %v6591_v0 = vpop.f32.mrb[129].mxu1 }
 0x6d1   : > { %v6592_v47 = vadd.f32 %v6591_v0, %v6590_v49  ;;  %v6593_v51 = vpop.f32.mrb[130].mxu1 }
 0x6d2   : > { %v6594_v24 = vpop.f32.mrb[131].mxu1 }
 0x6d3   : > { %v6113_v38 = vadd.f32 %v6592_v47, %v6528_v53 }
 0x6d5   : > { %v6161_v45 = vadd.f32 %v6160_v54, %v6113_v38 }
 0x6d7   : > { %6162 = vst [vmem:[%s7780_s29] sm:$0xff] %v6161_v45  ;;  %v6596_v44 = vpop.f32.mrb[132].mxu1 }
 0x6d8   : > { %v6597_v60 = vpop.f32.mrb[133].mxu1 }
 0x6d9   : > { %v6599_v61 = vpop.f32.mrb[134].mxu1 }
 0x6da   : > { %v6600_v1 = vpop.f32.mrb[135].mxu1 }
 0x6df   : > { %v6602_v30 = vpop.f32.mrb[136].mxu1 }
 0x6e0   : > { %v6603_v55 = vpop.f32.mrb[137].mxu1 }
 0x6e1   : > { %v6605_v28 = vpop.f32.mrb[138].mxu1 }
 0x6e2   : > { %v6606_v7 = vpop.f32.mrb[139].mxu1 }
 0x6e7   : > { %v6608_v21 = vpop.f32.mrb[140].mxu1 }
 0x6e8   : > { %v6609_v31 = vpop.f32.mrb[141].mxu1 }
 0x6e9   : > { %v6611_v13 = vpop.f32.mrb[142].mxu1 }
 0x6ea   : > { %v6612_v26 = vpop.f32.mrb[143].mxu1 }
 0x6ef   : > { %v6614_v37 = vpop.f32.mrb[144].mxu1 }
 0x6f0   : > { %v6615_v40 = vpop.f32.mrb[145].mxu1 }
 0x6f1   : > { %v6617_v63 = vpop.f32.mrb[146].mxu1 }
 0x6f2   : > { %v6618_v12 = vpop.f32.mrb[147].mxu1 }
 0x6f7   : > { %v6620_v50 = vpop.f32.mrb[148].mxu1 }
 0x6f8   : > { %v6621_v32 = vpop.f32.mrb[149].mxu1 }
 0x6f9   : > { %v6623_v10 = vpop.f32.mrb[150].mxu1 }
 0x6fa   : > { %v6624_v23 = vpop.f32.mrb[151].mxu1 }
 0x6ff   : > { %v6626_v52 = vpop.f32.mrb[152].mxu1 }
 0x700   : > { %v6627_v18 = vpop.f32.mrb[153].mxu1 }
 0x701   : > { %v6629_v3 = vpop.f32.mrb[154].mxu1 }
 0x702   : > { %v6630_v17 = vpop.f32.mrb[155].mxu1 }
 0x707   : > { %v6632_v39 = vpop.f32.mrb[156].mxu1 }
 0x708   : > { %v6633_v53 = vpop.f32.mrb[157].mxu1 }
 0x709   : > { %v6635_v5 = vpop.f32.mrb[158].mxu1 }
 0x70a   : > { %v6636_v29 = vpop.f32.mrb[159].mxu1 }
 0x70b PF: > { %s14_s19 = sadd.s32 1, %s7718_s19   ;;  %s14974_s15 = smov %s7710_s17 }
 0x70c   : > { %p11_p8 = scmp.ge.s32.totalorder %s14_s19, 8   ;;  %s14975_s16 = smov %s7714_s18 }
 0x70d   : > { %s14976_s17 = smov %s14979_s20  ;;  %s14977_s18 = smov %s14983_s21 }
 0x70e   :  { %13 = sbr.rel (!%p11_p8) target bundleno = 3 (0x3), region = 70 }

</bundles_post_ra>
